<compile_context>
chip_gen: v6e
topology: v6e:2x2x1
jax: 0.10.0
libtpu: 0.0.40
codegen_flags: <defaults>
</compile_context>

<pallas_src>
import numpy as np

import jax
import jax.numpy as jnp
from jax.experimental import pallas as pl
from jax.experimental.pallas import tpu as pltpu

EPS = 1e-6
_SQRT_2_OVER_PI = 0.7978845608028654


def _gelu_tanh(x):
    # tanh-form GELU (EUP slot); tiny numeric delta vs. the exact-erf GELU of the reference.
    return 0.5 * x * (1.0 + jnp.tanh(_SQRT_2_OVER_PI * (x + 0.044715 * x * x * x)))


def _ln(x, w, b):
    mu = jnp.mean(x, axis=-1, keepdims=True)
    var = jnp.mean((x - mu) ** 2, axis=-1, keepdims=True)
    return (x - mu) * jax.lax.rsqrt(var + EPS) * w.astype(jnp.float32) + b.astype(jnp.float32)


def _patchify(x_nhwc, s):
    """Non-overlapping sxs patches -> (N, (H/s)*(W/s), s*s*C), row-major (a, b, c) order."""
    n, h, w, c = x_nhwc.shape
    ho, wo = h // s, w // s
    return (x_nhwc.reshape(n, ho, s, wo, s, c)
            .transpose(0, 1, 3, 2, 4, 5)
            .reshape(n, ho * wo, s * s * c))


# ---------------------------------------------------------------------------
# Fused ConvNeXt block kernel:
#   [proj (+stem LN)] -> dw7x7 (padded-image scratch) -> LN -> Linear(C,4C) -> GELU
#   -> Linear(4C,C) -> gamma -> +residual -> [tail LN] | [pool + norm + head]
# Grid is over batch; weights use constant index_maps (VMEM-resident).
# ---------------------------------------------------------------------------
def _make_block_kernel(H, W, C, taps, proj_mode, has_tail, has_head):
    HW = H * W
    HP, WP = H + 6, W + 6

    def kernel(*refs):
        it = iter(refs)
        x_ref = next(it)
        if proj_mode is not None:
            pw_ref, pb_ref = next(it), next(it)
            if proj_mode == "post_ln":
                plnw_ref, plnb_ref = next(it), next(it)
        dww_ref, dwb_ref = next(it), next(it)
        lnw_ref, lnb_ref = next(it), next(it)
        w1_ref, b1_ref, w2_ref, b2_ref = next(it), next(it), next(it), next(it)
        g_ref = next(it)
        if has_tail:
            tlnw_ref, tlnb_ref = next(it), next(it)
        if has_head:
            nw_ref, nb_ref, hw_ref, hb_ref = next(it), next(it), next(it), next(it)
        o_ref = next(it)
        xs_ref = next(it)            # (H+6, W+6, C) f32 zero-padded image scratch
        ys_ref = next(it)            # (H*W, C)      f32 dw-conv result, flat rows

        # ---- optional stem 4x4/s4 or downsample 2x2/s2 projection: patches @ W (bf16 MXU) --
        if proj_mode is not None:
            x = jnp.dot(x_ref[0].astype(jnp.bfloat16), pw_ref[...],
                        preferred_element_type=jnp.float32)
            x = x + pb_ref[...].astype(jnp.float32)
            if proj_mode == "post_ln":                      # stem channels_first LayerNorm
                x = _ln(x, plnw_ref[...], plnb_ref[...])
        else:
            x = x_ref[0].astype(jnp.float32)                # (HW, C)

        # ---- depthwise 7x7 (padding=3) via a zero-padded 2-D VMEM image, no masks ----
        xs_ref[0:3, :, :] = jnp.zeros((3, WP, C), jnp.float32)            # top halo
        xs_ref[3 + H:HP, :, :] = jnp.zeros((3, WP, C), jnp.float32)       # bottom halo
        xs_ref[3:3 + H, 0:3, :] = jnp.zeros((H, 3, C), jnp.float32)       # left halo
        xs_ref[3:3 + H, 3 + W:WP, :] = jnp.zeros((H, 3, C), jnp.float32)  # right halo
        for i in range(H):                                                # interior rows
            xs_ref[3 + i, 3:3 + W, :] = x[i * W:(i + 1) * W, :]

        acc0 = jnp.zeros((H, W, C), jnp.float32)
        acc1 = jnp.zeros((H, W, C), jnp.float32)
        for t, (kh, kw) in enumerate(taps):      # statically-dead taps already dropped
            term = xs_ref[kh:kh + H, kw:kw + W, :] * dww_ref[t]
            if t % 2 == 0:
                acc0 = acc0 + term
            else:
                acc1 = acc1 + term
        xdw = acc0 + acc1                                                 # (H, W, C)
        for i in range(H):                       # relayout to flat (HW, C) rows via VMEM
            ys_ref[i * W:(i + 1) * W, :] = xdw[i]
        xdw_flat = ys_ref[...] + dwb_ref[...].astype(jnp.float32)

        # ---- LN -> Linear(C,4C) -> GELU -> Linear(4C,C) -> layer scale -> residual ----
        xn = _ln(xdw_flat, lnw_ref[...], lnb_ref[...])
        h = jnp.dot(xn.astype(jnp.bfloat16), w1_ref[...],
                    preferred_element_type=jnp.float32) + b1_ref[...].astype(jnp.float32)
        h = _gelu_tanh(h)
        y = jnp.dot(h.astype(jnp.bfloat16), w2_ref[...],
                    preferred_element_type=jnp.float32) + b2_ref[...].astype(jnp.float32)
        out = x + g_ref[...].astype(jnp.float32) * y        # DropPath(0) == identity

        if has_tail:                   # channels_first LN that precedes the next downsample
            out = _ln(out, tlnw_ref[...], tlnb_ref[...])

        if has_head:                   # fused global mean pool + final LN + classifier head
            pooled = jnp.mean(out, axis=0, keepdims=True)   # == x.mean([-2, -1]) in NCHW
            pooled = _ln(pooled, nw_ref[...], nb_ref[...])
            logits = jnp.dot(pooled.astype(jnp.bfloat16), hw_ref[...],
                             preferred_element_type=jnp.float32)
            o_ref[0] = logits + hb_ref[...].astype(jnp.float32)
        else:
            o_ref[0] = out.astype(o_ref.dtype)

    return kernel


def convnext_block(x, blk, *, H, W, proj=None, post_ln=None, tail_ln=None, head=None):
    """x: (N, HW_in, Cin) bf16 rows.  Returns (N, H*W, C) bf16 rows, or (N, 1, ncls) f32."""
    N = x.shape[0]
    Cin = x.shape[-1]
    C = blk["dw_w"].shape[-1]
    HW = H * W

    # taps whose receptive field intersects the image (others contribute exactly zero)
    taps = [(kh, kw) for kh in range(7) for kw in range(7)
            if abs(kh - 3) < H and abs(kw - 3) < W]
    kh_idx = np.array([t[0] for t in taps])
    kw_idx = np.array([t[1] for t in taps])
    dww = blk["dw_w"][kh_idx, kw_idx, :][:, None, None, :]          # (T, 1, 1, C) f32

    inputs = [x]
    in_specs = [pl.BlockSpec((1, HW, Cin), lambda n: (n, 0, 0))]

    def add_full(a):   # weights: full block, constant index_map -> stays VMEM-resident
        inputs.append(a)
        in_specs.append(pl.BlockSpec(a.shape, lambda n, _nd=a.ndim: (0,) * _nd))

    proj_mode = None
    if proj is not None:
        proj_mode = "post_ln" if post_ln is not None else "plain"
        add_full(proj["w"].astype(jnp.bfloat16))                    # (Cin, C)
        add_full(proj["b"].reshape(1, C))
        if post_ln is not None:
            add_full(post_ln["w"].reshape(1, C))
            add_full(post_ln["b"].reshape(1, C))
    add_full(dww)
    add_full(blk["dw_b"].reshape(1, C))
    add_full(blk["ln_w"].reshape(1, C))
    add_full(blk["ln_b"].reshape(1, C))
    add_full(blk["w1"].astype(jnp.bfloat16))                        # (C, 4C)
    add_full(blk["b1"].reshape(1, 4 * C))
    add_full(blk["w2"].astype(jnp.bfloat16))                        # (4C, C)
    add_full(blk["b2"].reshape(1, C))
    add_full(blk["gamma"].reshape(1, C))
    has_tail = tail_ln is not None
    if has_tail:
        add_full(tail_ln["w"].reshape(1, C))
        add_full(tail_ln["b"].reshape(1, C))
    has_head = head is not None
    if has_head:
        ncls = head["head_w"].shape[1]
        add_full(head["norm_w"].reshape(1, C))
        add_full(head["norm_b"].reshape(1, C))
        add_full(head["head_w"].astype(jnp.bfloat16))               # (C, ncls)
        add_full(head["head_b"].reshape(1, ncls))
        out_shape = jax.ShapeDtypeStruct((N, 1, ncls), jnp.float32)
        out_spec = pl.BlockSpec((1, 1, ncls), lambda n: (n, 0, 0))
    else:
        out_shape = jax.ShapeDtypeStruct((N, HW, C), jnp.bfloat16)  # bf16 inter-kernel acts
        out_spec = pl.BlockSpec((1, HW, C), lambda n: (n, 0, 0))

    kernel = _make_block_kernel(H, W, C, taps, proj_mode, has_tail, has_head)
    return pl.pallas_call(
        kernel,
        out_shape=out_shape,
        grid=(N,),
        in_specs=in_specs,
        out_specs=out_spec,
        scratch_shapes=[pltpu.VMEM((H + 6, W + 6, C), jnp.float32),
                        pltpu.VMEM((HW, C), jnp.float32)],
        compiler_params=pltpu.CompilerParams(
            dimension_semantics=("parallel",),
            vmem_limit_bytes=32 * 1024 * 1024),
    )(*inputs)


# ---------------------------------------------------------------------------
# Full forward (public entry point takes NCHW like the PyTorch module).
# ---------------------------------------------------------------------------
def forward(params, x_nchw):
    x = jnp.transpose(x_nchw, (0, 2, 3, 1))                          # NCHW -> NHWC
    n = x.shape[0]
    h, w = x.shape[1] // 4, x.shape[2] // 4
    feats = _patchify(x, 4).astype(jnp.bfloat16)                     # stem 4x4/s4 patches

    # TODO(synk): the 2x2/s2 stage-boundary patch gather is plain JAX (reshape/transpose) on
    # bf16 activations instead of being fused into the producing block kernel.
    for i in range(4):
        blocks = params["stages"][i]
        cdim = blocks[0]["dw_w"].shape[-1]
        nblk = len(blocks)
        for j, blk in enumerate(blocks):
            proj = post_ln = tail_ln = head = None
            if j == 0:
                if i == 0:
                    proj = dict(w=params["stem_w"].reshape(-1, cdim), b=params["stem_b"])
                    post_ln = dict(w=params["stem_ln_w"], b=params["stem_ln_b"])
                else:
                    ds = params["downsample"][i - 1]
                    proj = dict(w=ds["w"].reshape(-1, cdim), b=ds["b"])
            if j == nblk - 1:
                if i < 3:
                    dsn = params["downsample"][i]
                    tail_ln = dict(w=dsn["ln_w"], b=dsn["ln_b"])     # LN before downsample
                else:
                    head = dict(norm_w=params["norm_w"], norm_b=params["norm_b"],
                                head_w=params["head_w"], head_b=params["head_b"])
            feats = convnext_block(feats, blk, H=h, W=w, proj=proj,
                                   post_ln=post_ln, tail_ln=tail_ln, head=head)
        if i < 3:
            feats = _patchify(feats.reshape(n, h, w, cdim), 2)       # 2x2/s2 patches
            h, w = h // 2, w // 2

    return feats.reshape(n, params["head_w"].shape[1])               # (N, num_classes) f32


# ---------------------------------------------------------------------------
# Deterministic parameter init (shapes mirror the PyTorch __init__, small config).
# ---------------------------------------------------------------------------
def init_params(key, in_chans=3, num_classes=10, depths=(1, 1, 1, 1),
                dims=(16, 32, 64, 128), layer_scale_init_value=1e-6):
    keys = iter(jax.random.split(key, 256))

    def tn(shape):  # trunc_normal_(std=0.02), truncated at +-2 std
        return 0.02 * jax.random.truncated_normal(next(keys), -2.0, 2.0, shape, jnp.float32)

    params = {
        "stem_w": tn((4, 4, in_chans, dims[0])),
        "stem_b": jnp.zeros((dims[0],), jnp.float32),
        "stem_ln_w": jnp.ones((dims[0],), jnp.float32),
        "stem_ln_b": jnp.zeros((dims[0],), jnp.float32),
        "downsample": [],
        "stages": [],
        "norm_w": jnp.ones((dims[-1],), jnp.float32),
        "norm_b": jnp.zeros((dims[-1],), jnp.float32),
        "head_w": tn((dims[-1], num_classes)),
        "head_b": jnp.zeros((num_classes,), jnp.float32),
    }
    for i in range(3):
        params["downsample"].append(dict(
            ln_w=jnp.ones((dims[i],), jnp.float32),
            ln_b=jnp.zeros((dims[i],), jnp.float32),
            w=tn((2, 2, dims[i], dims[i + 1])),
            b=jnp.zeros((dims[i + 1],), jnp.float32)))
    for i in range(4):
        d = dims[i]
        blocks = []
        for _ in range(depths[i]):
            blocks.append(dict(
                dw_w=tn((7, 7, d)),
                dw_b=jnp.zeros((d,), jnp.float32),
                ln_w=jnp.ones((d,), jnp.float32),
                ln_b=jnp.zeros((d,), jnp.float32),
                w1=tn((d, 4 * d)),
                b1=jnp.zeros((4 * d,), jnp.float32),
                w2=tn((4 * d, d)),
                b2=jnp.zeros((d,), jnp.float32),
                gamma=layer_scale_init_value * jnp.ones((d,), jnp.float32)))
        params["stages"].append(blocks)
    return params


if __name__ == "__main__":
    key = jax.random.PRNGKey(0)
    pkey, xkey = jax.random.split(key)
    params = init_params(pkey)
    # NCHW input (like the PyTorch module); spatial must be divisible by 32 (4*2*2*2).
    x = jax.random.normal(xkey, (2, 3, 32, 32), jnp.float32)

    fwd = jax.jit(forward)
    out = fwd(params, x)
    jax.block_until_ready(out)

    assert out.shape == (2, 10), out.shape
    assert bool(jnp.all(jnp.isfinite(out)))
    print("KERNEL_OK")
</pallas_src>

<mosaic_0001>
module attributes {stable_mosaic.version = 11 : i64} {
  func.func @kernel(%arg0: i32, %arg1: memref<1x64x48xbf16, #tpu.memory_space<vmem>>, %arg2: memref<48x16xbf16, #tpu.memory_space<vmem>>, %arg3: memref<1x16xf32, #tpu.memory_space<vmem>>, %arg4: memref<1x16xf32, #tpu.memory_space<vmem>>, %arg5: memref<1x16xf32, #tpu.memory_space<vmem>>, %arg6: memref<49x1x1x16xf32, #tpu.memory_space<vmem>>, %arg7: memref<1x16xf32, #tpu.memory_space<vmem>>, %arg8: memref<1x16xf32, #tpu.memory_space<vmem>>, %arg9: memref<1x16xf32, #tpu.memory_space<vmem>>, %arg10: memref<16x64xbf16, #tpu.memory_space<vmem>>, %arg11: memref<1x64xf32, #tpu.memory_space<vmem>>, %arg12: memref<64x16xbf16, #tpu.memory_space<vmem>>, %arg13: memref<1x16xf32, #tpu.memory_space<vmem>>, %arg14: memref<1x16xf32, #tpu.memory_space<vmem>>, %arg15: memref<1x16xf32, #tpu.memory_space<vmem>>, %arg16: memref<1x16xf32, #tpu.memory_space<vmem>>, %arg17: memref<1x64x16xbf16, #tpu.memory_space<vmem>>, %arg18: memref<14x14x16xf32, #tpu.memory_space<vmem>>, %arg19: memref<64x16xf32, #tpu.memory_space<vmem>>) attributes {dimension_semantics = [#tpu.dimension_semantics<parallel>], iteration_bounds = array<i64: 2>, scalar_prefetch = 0 : i64, scratch_operands = 2 : i64, tpu.core_type = #tpu.core_type<tc>, window_params = [{transform_indices = @transform_0, window_bounds = array<i64: 1, 64, 48>}, {pipeline_mode = #tpu.pipeline_mode<synchronous>, transform_indices = @transform_1, window_bounds = array<i64: 48, 16>}, {pipeline_mode = #tpu.pipeline_mode<synchronous>, transform_indices = @transform_2, window_bounds = array<i64: 1, 16>}, {pipeline_mode = #tpu.pipeline_mode<synchronous>, transform_indices = @transform_3, window_bounds = array<i64: 1, 16>}, {pipeline_mode = #tpu.pipeline_mode<synchronous>, transform_indices = @transform_4, window_bounds = array<i64: 1, 16>}, {pipeline_mode = #tpu.pipeline_mode<synchronous>, transform_indices = @transform_5, window_bounds = array<i64: 49, 1, 1, 16>}, {pipeline_mode = #tpu.pipeline_mode<synchronous>, transform_indices = @transform_6, window_bounds = array<i64: 1, 16>}, {pipeline_mode = #tpu.pipeline_mode<synchronous>, transform_indices = @transform_7, window_bounds = array<i64: 1, 16>}, {pipeline_mode = #tpu.pipeline_mode<synchronous>, transform_indices = @transform_8, window_bounds = array<i64: 1, 16>}, {pipeline_mode = #tpu.pipeline_mode<synchronous>, transform_indices = @transform_9, window_bounds = array<i64: 16, 64>}, {pipeline_mode = #tpu.pipeline_mode<synchronous>, transform_indices = @transform_10, window_bounds = array<i64: 1, 64>}, {pipeline_mode = #tpu.pipeline_mode<synchronous>, transform_indices = @transform_11, window_bounds = array<i64: 64, 16>}, {pipeline_mode = #tpu.pipeline_mode<synchronous>, transform_indices = @transform_12, window_bounds = array<i64: 1, 16>}, {pipeline_mode = #tpu.pipeline_mode<synchronous>, transform_indices = @transform_13, window_bounds = array<i64: 1, 16>}, {pipeline_mode = #tpu.pipeline_mode<synchronous>, transform_indices = @transform_14, window_bounds = array<i64: 1, 16>}, {pipeline_mode = #tpu.pipeline_mode<synchronous>, transform_indices = @transform_15, window_bounds = array<i64: 1, 16>}, {transform_indices = @transform_16, window_bounds = array<i64: 1, 64, 16>}]} {
    %c0 = arith.constant 0 : index
    %c0_0 = arith.constant 0 : index
    %c0_1 = arith.constant 0 : index
    %0 = vector.load %arg1[%c0, %c0_0, %c0_1] : memref<1x64x48xbf16, #tpu.memory_space<vmem>>, vector<1x64x48xbf16>
    %1 = vector.shape_cast %0 : vector<1x64x48xbf16> to vector<64x48xbf16>
    %c0_2 = arith.constant 0 : index
    %c0_3 = arith.constant 0 : index
    %2 = vector.load %arg2[%c0_2, %c0_3] : memref<48x16xbf16, #tpu.memory_space<vmem>>, vector<48x16xbf16>
    %cst = arith.constant dense<0.000000e+00> : vector<64x16xf32>
    %3 = tpu.matmul %1, %2, %cst {dimension_numbers = #tpu.dot_dimension_numbers<[1], [0], [0], [1], [0, 0, 1, 1], [], []>} : vector<64x48xbf16>, vector<48x16xbf16>, vector<64x16xf32> -> vector<64x16xf32>
    %c0_4 = arith.constant 0 : index
    %c0_5 = arith.constant 0 : index
    %4 = vector.load %arg3[%c0_4, %c0_5] : memref<1x16xf32, #tpu.memory_space<vmem>>, vector<1x16xf32>
    %5 = vector.broadcast %4 : vector<1x16xf32> to vector<64x16xf32>
    %6 = arith.addf %3, %5 : vector<64x16xf32>
    %c0_6 = arith.constant 0 : index
    %c0_7 = arith.constant 0 : index
    %7 = vector.load %arg4[%c0_6, %c0_7] : memref<1x16xf32, #tpu.memory_space<vmem>>, vector<1x16xf32>
    %c0_8 = arith.constant 0 : index
    %c0_9 = arith.constant 0 : index
    %8 = vector.load %arg5[%c0_8, %c0_9] : memref<1x16xf32, #tpu.memory_space<vmem>>, vector<1x16xf32>
    %cst_10 = arith.constant dense<0.000000e+00> : vector<64xf32>
    %9 = vector.multi_reduction <add>, %6, %cst_10 [1] : vector<64x16xf32> to vector<64xf32>
    %10 = vector.shape_cast %9 : vector<64xf32> to vector<64x1xf32>
    %cst_11 = arith.constant 1.600000e+01 : f32
    %11 = vector.broadcast %cst_11 : f32 to vector<64x1xf32>
    %12 = arith.divf %10, %11 : vector<64x1xf32>
    %13 = vector.broadcast %12 : vector<64x1xf32> to vector<64x16xf32>
    %14 = arith.subf %6, %13 : vector<64x16xf32>
    %15 = arith.mulf %14, %14 : vector<64x16xf32>
    %cst_12 = arith.constant dense<0.000000e+00> : vector<64xf32>
    %16 = vector.multi_reduction <add>, %15, %cst_12 [1] : vector<64x16xf32> to vector<64xf32>
    %17 = vector.shape_cast %16 : vector<64xf32> to vector<64x1xf32>
    %cst_13 = arith.constant 1.600000e+01 : f32
    %18 = vector.broadcast %cst_13 : f32 to vector<64x1xf32>
    %19 = arith.divf %17, %18 : vector<64x1xf32>
    %20 = vector.broadcast %12 : vector<64x1xf32> to vector<64x16xf32>
    %21 = arith.subf %6, %20 : vector<64x16xf32>
    %cst_14 = arith.constant 9.99999997E-7 : f32
    %22 = vector.broadcast %cst_14 : f32 to vector<64x1xf32>
    %23 = arith.addf %19, %22 : vector<64x1xf32>
    %24 = math.rsqrt %23 : vector<64x1xf32>
    %25 = vector.broadcast %24 : vector<64x1xf32> to vector<64x16xf32>
    %26 = arith.mulf %21, %25 : vector<64x16xf32>
    %27 = vector.broadcast %7 : vector<1x16xf32> to vector<64x16xf32>
    %28 = arith.mulf %26, %27 : vector<64x16xf32>
    %29 = vector.broadcast %8 : vector<1x16xf32> to vector<64x16xf32>
    %30 = arith.addf %28, %29 : vector<64x16xf32>
    %cst_15 = arith.constant 0.000000e+00 : f32
    %31 = vector.broadcast %cst_15 : f32 to vector<3x14x16xf32>
    %c0_16 = arith.constant 0 : index
    %c0_17 = arith.constant 0 : index
    %c0_18 = arith.constant 0 : index
    %32 = vector.load %arg18[%c0_16, %c0_17, %c0_18] : memref<14x14x16xf32, #tpu.memory_space<vmem>>, vector<3x14x16xf32>
    tpu.vector_store %arg18[%c0_16, %c0_17, %c0_18], %31 {strides = array<i32>} : memref<14x14x16xf32, #tpu.memory_space<vmem>>, vector<3x14x16xf32>,
    %cst_19 = arith.constant 0.000000e+00 : f32
    %33 = vector.broadcast %cst_19 : f32 to vector<3x14x16xf32>
    %c11 = arith.constant 11 : index
    %c0_20 = arith.constant 0 : index
    %c0_21 = arith.constant 0 : index
    %34 = vector.load %arg18[%c11, %c0_20, %c0_21] : memref<14x14x16xf32, #tpu.memory_space<vmem>>, vector<3x14x16xf32>
    tpu.vector_store %arg18[%c11, %c0_20, %c0_21], %33 {strides = array<i32>} : memref<14x14x16xf32, #tpu.memory_space<vmem>>, vector<3x14x16xf32>,
    %cst_22 = arith.constant 0.000000e+00 : f32
    %35 = vector.broadcast %cst_22 : f32 to vector<8x3x16xf32>
    %c3 = arith.constant 3 : index
    %c0_23 = arith.constant 0 : index
    %c0_24 = arith.constant 0 : index
    %36 = vector.load %arg18[%c3, %c0_23, %c0_24] : memref<14x14x16xf32, #tpu.memory_space<vmem>>, vector<8x3x16xf32>
    tpu.vector_store %arg18[%c3, %c0_23, %c0_24], %35 {strides = array<i32>} : memref<14x14x16xf32, #tpu.memory_space<vmem>>, vector<8x3x16xf32>,
    %cst_25 = arith.constant 0.000000e+00 : f32
    %37 = vector.broadcast %cst_25 : f32 to vector<8x3x16xf32>
    %c3_26 = arith.constant 3 : index
    %c11_27 = arith.constant 11 : index
    %c0_28 = arith.constant 0 : index
    %38 = vector.load %arg18[%c3_26, %c11_27, %c0_28] : memref<14x14x16xf32, #tpu.memory_space<vmem>>, vector<8x3x16xf32>
    tpu.vector_store %arg18[%c3_26, %c11_27, %c0_28], %37 {strides = array<i32>} : memref<14x14x16xf32, #tpu.memory_space<vmem>>, vector<8x3x16xf32>,
    %39 = vector.extract_strided_slice %30 {offsets = [0, 0], sizes = [8, 16], strides = [1, 1]} : vector<64x16xf32> to vector<8x16xf32>
    %c3_29 = arith.constant 3 : index
    %c3_30 = arith.constant 3 : index
    %c0_31 = arith.constant 0 : index
    %40 = vector.load %arg18[%c3_29, %c3_30, %c0_31] : memref<14x14x16xf32, #tpu.memory_space<vmem>>, vector<1x8x16xf32>
    %41 = vector.shape_cast %40 : vector<1x8x16xf32> to vector<8x16xf32>
    %42 = vector.shape_cast %39 : vector<8x16xf32> to vector<1x8x16xf32>
    tpu.vector_store %arg18[%c3_29, %c3_30, %c0_31], %42 {strides = array<i32>} : memref<14x14x16xf32, #tpu.memory_space<vmem>>, vector<1x8x16xf32>,
    %43 = vector.extract_strided_slice %30 {offsets = [8, 0], sizes = [8, 16], strides = [1, 1]} : vector<64x16xf32> to vector<8x16xf32>
    %c4 = arith.constant 4 : index
    %c3_32 = arith.constant 3 : index
    %c0_33 = arith.constant 0 : index
    %44 = vector.load %arg18[%c4, %c3_32, %c0_33] : memref<14x14x16xf32, #tpu.memory_space<vmem>>, vector<1x8x16xf32>
    %45 = vector.shape_cast %44 : vector<1x8x16xf32> to vector<8x16xf32>
    %46 = vector.shape_cast %43 : vector<8x16xf32> to vector<1x8x16xf32>
    tpu.vector_store %arg18[%c4, %c3_32, %c0_33], %46 {strides = array<i32>} : memref<14x14x16xf32, #tpu.memory_space<vmem>>, vector<1x8x16xf32>,
    %47 = vector.extract_strided_slice %30 {offsets = [16, 0], sizes = [8, 16], strides = [1, 1]} : vector<64x16xf32> to vector<8x16xf32>
    %c5 = arith.constant 5 : index
    %c3_34 = arith.constant 3 : index
    %c0_35 = arith.constant 0 : index
    %48 = vector.load %arg18[%c5, %c3_34, %c0_35] : memref<14x14x16xf32, #tpu.memory_space<vmem>>, vector<1x8x16xf32>
    %49 = vector.shape_cast %48 : vector<1x8x16xf32> to vector<8x16xf32>
    %50 = vector.shape_cast %47 : vector<8x16xf32> to vector<1x8x16xf32>
    tpu.vector_store %arg18[%c5, %c3_34, %c0_35], %50 {strides = array<i32>} : memref<14x14x16xf32, #tpu.memory_space<vmem>>, vector<1x8x16xf32>,
    %51 = vector.extract_strided_slice %30 {offsets = [24, 0], sizes = [8, 16], strides = [1, 1]} : vector<64x16xf32> to vector<8x16xf32>
    %c6 = arith.constant 6 : index
    %c3_36 = arith.constant 3 : index
    %c0_37 = arith.constant 0 : index
    %52 = vector.load %arg18[%c6, %c3_36, %c0_37] : memref<14x14x16xf32, #tpu.memory_space<vmem>>, vector<1x8x16xf32>
    %53 = vector.shape_cast %52 : vector<1x8x16xf32> to vector<8x16xf32>
    %54 = vector.shape_cast %51 : vector<8x16xf32> to vector<1x8x16xf32>
    tpu.vector_store %arg18[%c6, %c3_36, %c0_37], %54 {strides = array<i32>} : memref<14x14x16xf32, #tpu.memory_space<vmem>>, vector<1x8x16xf32>,
    %55 = vector.extract_strided_slice %30 {offsets = [32, 0], sizes = [8, 16], strides = [1, 1]} : vector<64x16xf32> to vector<8x16xf32>
    %c7 = arith.constant 7 : index
    %c3_38 = arith.constant 3 : index
    %c0_39 = arith.constant 0 : index
    %56 = vector.load %arg18[%c7, %c3_38, %c0_39] : memref<14x14x16xf32, #tpu.memory_space<vmem>>, vector<1x8x16xf32>
    %57 = vector.shape_cast %56 : vector<1x8x16xf32> to vector<8x16xf32>
    %58 = vector.shape_cast %55 : vector<8x16xf32> to vector<1x8x16xf32>
    tpu.vector_store %arg18[%c7, %c3_38, %c0_39], %58 {strides = array<i32>} : memref<14x14x16xf32, #tpu.memory_space<vmem>>, vector<1x8x16xf32>,
    %59 = vector.extract_strided_slice %30 {offsets = [40, 0], sizes = [8, 16], strides = [1, 1]} : vector<64x16xf32> to vector<8x16xf32>
    %c8 = arith.constant 8 : index
    %c3_40 = arith.constant 3 : index
    %c0_41 = arith.constant 0 : index
    %60 = vector.load %arg18[%c8, %c3_40, %c0_41] : memref<14x14x16xf32, #tpu.memory_space<vmem>>, vector<1x8x16xf32>
    %61 = vector.shape_cast %60 : vector<1x8x16xf32> to vector<8x16xf32>
    %62 = vector.shape_cast %59 : vector<8x16xf32> to vector<1x8x16xf32>
    tpu.vector_store %arg18[%c8, %c3_40, %c0_41], %62 {strides = array<i32>} : memref<14x14x16xf32, #tpu.memory_space<vmem>>, vector<1x8x16xf32>,
    %63 = vector.extract_strided_slice %30 {offsets = [48, 0], sizes = [8, 16], strides = [1, 1]} : vector<64x16xf32> to vector<8x16xf32>
    %c9 = arith.constant 9 : index
    %c3_42 = arith.constant 3 : index
    %c0_43 = arith.constant 0 : index
    %64 = vector.load %arg18[%c9, %c3_42, %c0_43] : memref<14x14x16xf32, #tpu.memory_space<vmem>>, vector<1x8x16xf32>
    %65 = vector.shape_cast %64 : vector<1x8x16xf32> to vector<8x16xf32>
    %66 = vector.shape_cast %63 : vector<8x16xf32> to vector<1x8x16xf32>
    tpu.vector_store %arg18[%c9, %c3_42, %c0_43], %66 {strides = array<i32>} : memref<14x14x16xf32, #tpu.memory_space<vmem>>, vector<1x8x16xf32>,
    %67 = vector.extract_strided_slice %30 {offsets = [56, 0], sizes = [8, 16], strides = [1, 1]} : vector<64x16xf32> to vector<8x16xf32>
    %c10 = arith.constant 10 : index
    %c3_44 = arith.constant 3 : index
    %c0_45 = arith.constant 0 : index
    %68 = vector.load %arg18[%c10, %c3_44, %c0_45] : memref<14x14x16xf32, #tpu.memory_space<vmem>>, vector<1x8x16xf32>
    %69 = vector.shape_cast %68 : vector<1x8x16xf32> to vector<8x16xf32>
    %70 = vector.shape_cast %67 : vector<8x16xf32> to vector<1x8x16xf32>
    tpu.vector_store %arg18[%c10, %c3_44, %c0_45], %70 {strides = array<i32>} : memref<14x14x16xf32, #tpu.memory_space<vmem>>, vector<1x8x16xf32>,
    %cst_46 = arith.constant 0.000000e+00 : f32
    %71 = vector.broadcast %cst_46 : f32 to vector<8x8x16xf32>
    %cst_47 = arith.constant 0.000000e+00 : f32
    %72 = vector.broadcast %cst_47 : f32 to vector<8x8x16xf32>
    %c0_48 = arith.constant 0 : index
    %c0_49 = arith.constant 0 : index
    %c0_50 = arith.constant 0 : index
    %73 = vector.load %arg18[%c0_48, %c0_49, %c0_50] : memref<14x14x16xf32, #tpu.memory_space<vmem>>, vector<8x8x16xf32>
    %c0_51 = arith.constant 0 : index
    %c0_52 = arith.constant 0 : index
    %c0_53 = arith.constant 0 : index
    %c0_54 = arith.constant 0 : index
    %74 = vector.load %arg6[%c0_51, %c0_52, %c0_53, %c0_54] : memref<49x1x1x16xf32, #tpu.memory_space<vmem>>, vector<1x1x1x16xf32>
    %75 = vector.shape_cast %74 : vector<1x1x1x16xf32> to vector<1x1x16xf32>
    %76 = vector.broadcast %75 : vector<1x1x16xf32> to vector<8x8x16xf32>
    %77 = arith.mulf %73, %76 : vector<8x8x16xf32>
    %78 = arith.addf %71, %77 : vector<8x8x16xf32>
    %c0_55 = arith.constant 0 : index
    %c1 = arith.constant 1 : index
    %c0_56 = arith.constant 0 : index
    %79 = vector.load %arg18[%c0_55, %c1, %c0_56] : memref<14x14x16xf32, #tpu.memory_space<vmem>>, vector<8x8x16xf32>
    %c1_57 = arith.constant 1 : index
    %c0_58 = arith.constant 0 : index
    %c0_59 = arith.constant 0 : index
    %c0_60 = arith.constant 0 : index
    %80 = vector.load %arg6[%c1_57, %c0_58, %c0_59, %c0_60] : memref<49x1x1x16xf32, #tpu.memory_space<vmem>>, vector<1x1x1x16xf32>
    %81 = vector.shape_cast %80 : vector<1x1x1x16xf32> to vector<1x1x16xf32>
    %82 = vector.broadcast %81 : vector<1x1x16xf32> to vector<8x8x16xf32>
    %83 = arith.mulf %79, %82 : vector<8x8x16xf32>
    %84 = arith.addf %72, %83 : vector<8x8x16xf32>
    %c0_61 = arith.constant 0 : index
    %c2 = arith.constant 2 : index
    %c0_62 = arith.constant 0 : index
    %85 = vector.load %arg18[%c0_61, %c2, %c0_62] : memref<14x14x16xf32, #tpu.memory_space<vmem>>, vector<8x8x16xf32>
    %c2_63 = arith.constant 2 : index
    %c0_64 = arith.constant 0 : index
    %c0_65 = arith.constant 0 : index
    %c0_66 = arith.constant 0 : index
    %86 = vector.load %arg6[%c2_63, %c0_64, %c0_65, %c0_66] : memref<49x1x1x16xf32, #tpu.memory_space<vmem>>, vector<1x1x1x16xf32>
    %87 = vector.shape_cast %86 : vector<1x1x1x16xf32> to vector<1x1x16xf32>
    %88 = vector.broadcast %87 : vector<1x1x16xf32> to vector<8x8x16xf32>
    %89 = arith.mulf %85, %88 : vector<8x8x16xf32>
    %90 = arith.addf %78, %89 : vector<8x8x16xf32>
    %c0_67 = arith.constant 0 : index
    %c3_68 = arith.constant 3 : index
    %c0_69 = arith.constant 0 : index
    %91 = vector.load %arg18[%c0_67, %c3_68, %c0_69] : memref<14x14x16xf32, #tpu.memory_space<vmem>>, vector<8x8x16xf32>
    %c3_70 = arith.constant 3 : index
    %c0_71 = arith.constant 0 : index
    %c0_72 = arith.constant 0 : index
    %c0_73 = arith.constant 0 : index
    %92 = vector.load %arg6[%c3_70, %c0_71, %c0_72, %c0_73] : memref<49x1x1x16xf32, #tpu.memory_space<vmem>>, vector<1x1x1x16xf32>
    %93 = vector.shape_cast %92 : vector<1x1x1x16xf32> to vector<1x1x16xf32>
    %94 = vector.broadcast %93 : vector<1x1x16xf32> to vector<8x8x16xf32>
    %95 = arith.mulf %91, %94 : vector<8x8x16xf32>
    %96 = arith.addf %84, %95 : vector<8x8x16xf32>
    %c0_74 = arith.constant 0 : index
    %c4_75 = arith.constant 4 : index
    %c0_76 = arith.constant 0 : index
    %97 = vector.load %arg18[%c0_74, %c4_75, %c0_76] : memref<14x14x16xf32, #tpu.memory_space<vmem>>, vector<8x8x16xf32>
    %c4_77 = arith.constant 4 : index
    %c0_78 = arith.constant 0 : index
    %c0_79 = arith.constant 0 : index
    %c0_80 = arith.constant 0 : index
    %98 = vector.load %arg6[%c4_77, %c0_78, %c0_79, %c0_80] : memref<49x1x1x16xf32, #tpu.memory_space<vmem>>, vector<1x1x1x16xf32>
    %99 = vector.shape_cast %98 : vector<1x1x1x16xf32> to vector<1x1x16xf32>
    %100 = vector.broadcast %99 : vector<1x1x16xf32> to vector<8x8x16xf32>
    %101 = arith.mulf %97, %100 : vector<8x8x16xf32>
    %102 = arith.addf %90, %101 : vector<8x8x16xf32>
    %c0_81 = arith.constant 0 : index
    %c5_82 = arith.constant 5 : index
    %c0_83 = arith.constant 0 : index
    %103 = vector.load %arg18[%c0_81, %c5_82, %c0_83] : memref<14x14x16xf32, #tpu.memory_space<vmem>>, vector<8x8x16xf32>
    %c5_84 = arith.constant 5 : index
    %c0_85 = arith.constant 0 : index
    %c0_86 = arith.constant 0 : index
    %c0_87 = arith.constant 0 : index
    %104 = vector.load %arg6[%c5_84, %c0_85, %c0_86, %c0_87] : memref<49x1x1x16xf32, #tpu.memory_space<vmem>>, vector<1x1x1x16xf32>
    %105 = vector.shape_cast %104 : vector<1x1x1x16xf32> to vector<1x1x16xf32>
    %106 = vector.broadcast %105 : vector<1x1x16xf32> to vector<8x8x16xf32>
    %107 = arith.mulf %103, %106 : vector<8x8x16xf32>
    %108 = arith.addf %96, %107 : vector<8x8x16xf32>
    %c0_88 = arith.constant 0 : index
    %c6_89 = arith.constant 6 : index
    %c0_90 = arith.constant 0 : index
    %109 = vector.load %arg18[%c0_88, %c6_89, %c0_90] : memref<14x14x16xf32, #tpu.memory_space<vmem>>, vector<8x8x16xf32>
    %c6_91 = arith.constant 6 : index
    %c0_92 = arith.constant 0 : index
    %c0_93 = arith.constant 0 : index
    %c0_94 = arith.constant 0 : index
    %110 = vector.load %arg6[%c6_91, %c0_92, %c0_93, %c0_94] : memref<49x1x1x16xf32, #tpu.memory_space<vmem>>, vector<1x1x1x16xf32>
    %111 = vector.shape_cast %110 : vector<1x1x1x16xf32> to vector<1x1x16xf32>
    %112 = vector.broadcast %111 : vector<1x1x16xf32> to vector<8x8x16xf32>
    %113 = arith.mulf %109, %112 : vector<8x8x16xf32>
    %114 = arith.addf %102, %113 : vector<8x8x16xf32>
    %c1_95 = arith.constant 1 : index
    %c0_96 = arith.constant 0 : index
    %c0_97 = arith.constant 0 : index
    %115 = vector.load %arg18[%c1_95, %c0_96, %c0_97] : memref<14x14x16xf32, #tpu.memory_space<vmem>>, vector<8x8x16xf32>
    %c7_98 = arith.constant 7 : index
    %c0_99 = arith.constant 0 : index
    %c0_100 = arith.constant 0 : index
    %c0_101 = arith.constant 0 : index
    %116 = vector.load %arg6[%c7_98, %c0_99, %c0_100, %c0_101] : memref<49x1x1x16xf32, #tpu.memory_space<vmem>>, vector<1x1x1x16xf32>
    %117 = vector.shape_cast %116 : vector<1x1x1x16xf32> to vector<1x1x16xf32>
    %118 = vector.broadcast %117 : vector<1x1x16xf32> to vector<8x8x16xf32>
    %119 = arith.mulf %115, %118 : vector<8x8x16xf32>
    %120 = arith.addf %108, %119 : vector<8x8x16xf32>
    %c1_102 = arith.constant 1 : index
    %c1_103 = arith.constant 1 : index
    %c0_104 = arith.constant 0 : index
    %121 = vector.load %arg18[%c1_102, %c1_103, %c0_104] : memref<14x14x16xf32, #tpu.memory_space<vmem>>, vector<8x8x16xf32>
    %c8_105 = arith.constant 8 : index
    %c0_106 = arith.constant 0 : index
    %c0_107 = arith.constant 0 : index
    %c0_108 = arith.constant 0 : index
    %122 = vector.load %arg6[%c8_105, %c0_106, %c0_107, %c0_108] : memref<49x1x1x16xf32, #tpu.memory_space<vmem>>, vector<1x1x1x16xf32>
    %123 = vector.shape_cast %122 : vector<1x1x1x16xf32> to vector<1x1x16xf32>
    %124 = vector.broadcast %123 : vector<1x1x16xf32> to vector<8x8x16xf32>
    %125 = arith.mulf %121, %124 : vector<8x8x16xf32>
    %126 = arith.addf %114, %125 : vector<8x8x16xf32>
    %c1_109 = arith.constant 1 : index
    %c2_110 = arith.constant 2 : index
    %c0_111 = arith.constant 0 : index
    %127 = vector.load %arg18[%c1_109, %c2_110, %c0_111] : memref<14x14x16xf32, #tpu.memory_space<vmem>>, vector<8x8x16xf32>
    %c9_112 = arith.constant 9 : index
    %c0_113 = arith.constant 0 : index
    %c0_114 = arith.constant 0 : index
    %c0_115 = arith.constant 0 : index
    %128 = vector.load %arg6[%c9_112, %c0_113, %c0_114, %c0_115] : memref<49x1x1x16xf32, #tpu.memory_space<vmem>>, vector<1x1x1x16xf32>
    %129 = vector.shape_cast %128 : vector<1x1x1x16xf32> to vector<1x1x16xf32>
    %130 = vector.broadcast %129 : vector<1x1x16xf32> to vector<8x8x16xf32>
    %131 = arith.mulf %127, %130 : vector<8x8x16xf32>
    %132 = arith.addf %120, %131 : vector<8x8x16xf32>
    %c1_116 = arith.constant 1 : index
    %c3_117 = arith.constant 3 : index
    %c0_118 = arith.constant 0 : index
    %133 = vector.load %arg18[%c1_116, %c3_117, %c0_118] : memref<14x14x16xf32, #tpu.memory_space<vmem>>, vector<8x8x16xf32>
    %c10_119 = arith.constant 10 : index
    %c0_120 = arith.constant 0 : index
    %c0_121 = arith.constant 0 : index
    %c0_122 = arith.constant 0 : index
    %134 = vector.load %arg6[%c10_119, %c0_120, %c0_121, %c0_122] : memref<49x1x1x16xf32, #tpu.memory_space<vmem>>, vector<1x1x1x16xf32>
    %135 = vector.shape_cast %134 : vector<1x1x1x16xf32> to vector<1x1x16xf32>
    %136 = vector.broadcast %135 : vector<1x1x16xf32> to vector<8x8x16xf32>
    %137 = arith.mulf %133, %136 : vector<8x8x16xf32>
    %138 = arith.addf %126, %137 : vector<8x8x16xf32>
    %c1_123 = arith.constant 1 : index
    %c4_124 = arith.constant 4 : index
    %c0_125 = arith.constant 0 : index
    %139 = vector.load %arg18[%c1_123, %c4_124, %c0_125] : memref<14x14x16xf32, #tpu.memory_space<vmem>>, vector<8x8x16xf32>
    %c11_126 = arith.constant 11 : index
    %c0_127 = arith.constant 0 : index
    %c0_128 = arith.constant 0 : index
    %c0_129 = arith.constant 0 : index
    %140 = vector.load %arg6[%c11_126, %c0_127, %c0_128, %c0_129] : memref<49x1x1x16xf32, #tpu.memory_space<vmem>>, vector<1x1x1x16xf32>
    %141 = vector.shape_cast %140 : vector<1x1x1x16xf32> to vector<1x1x16xf32>
    %142 = vector.broadcast %141 : vector<1x1x16xf32> to vector<8x8x16xf32>
    %143 = arith.mulf %139, %142 : vector<8x8x16xf32>
    %144 = arith.addf %132, %143 : vector<8x8x16xf32>
    %c1_130 = arith.constant 1 : index
    %c5_131 = arith.constant 5 : index
    %c0_132 = arith.constant 0 : index
    %145 = vector.load %arg18[%c1_130, %c5_131, %c0_132] : memref<14x14x16xf32, #tpu.memory_space<vmem>>, vector<8x8x16xf32>
    %c12 = arith.constant 12 : index
    %c0_133 = arith.constant 0 : index
    %c0_134 = arith.constant 0 : index
    %c0_135 = arith.constant 0 : index
    %146 = vector.load %arg6[%c12, %c0_133, %c0_134, %c0_135] : memref<49x1x1x16xf32, #tpu.memory_space<vmem>>, vector<1x1x1x16xf32>
    %147 = vector.shape_cast %146 : vector<1x1x1x16xf32> to vector<1x1x16xf32>
    %148 = vector.broadcast %147 : vector<1x1x16xf32> to vector<8x8x16xf32>
    %149 = arith.mulf %145, %148 : vector<8x8x16xf32>
    %150 = arith.addf %138, %149 : vector<8x8x16xf32>
    %c1_136 = arith.constant 1 : index
    %c6_137 = arith.constant 6 : index
    %c0_138 = arith.constant 0 : index
    %151 = vector.load %arg18[%c1_136, %c6_137, %c0_138] : memref<14x14x16xf32, #tpu.memory_space<vmem>>, vector<8x8x16xf32>
    %c13 = arith.constant 13 : index
    %c0_139 = arith.constant 0 : index
    %c0_140 = arith.constant 0 : index
    %c0_141 = arith.constant 0 : index
    %152 = vector.load %arg6[%c13, %c0_139, %c0_140, %c0_141] : memref<49x1x1x16xf32, #tpu.memory_space<vmem>>, vector<1x1x1x16xf32>
    %153 = vector.shape_cast %152 : vector<1x1x1x16xf32> to vector<1x1x16xf32>
    %154 = vector.broadcast %153 : vector<1x1x16xf32> to vector<8x8x16xf32>
    %155 = arith.mulf %151, %154 : vector<8x8x16xf32>
    %156 = arith.addf %144, %155 : vector<8x8x16xf32>
    %c2_142 = arith.constant 2 : index
    %c0_143 = arith.constant 0 : index
    %c0_144 = arith.constant 0 : index
    %157 = vector.load %arg18[%c2_142, %c0_143, %c0_144] : memref<14x14x16xf32, #tpu.memory_space<vmem>>, vector<8x8x16xf32>
    %c14 = arith.constant 14 : index
    %c0_145 = arith.constant 0 : index
    %c0_146 = arith.constant 0 : index
    %c0_147 = arith.constant 0 : index
    %158 = vector.load %arg6[%c14, %c0_145, %c0_146, %c0_147] : memref<49x1x1x16xf32, #tpu.memory_space<vmem>>, vector<1x1x1x16xf32>
    %159 = vector.shape_cast %158 : vector<1x1x1x16xf32> to vector<1x1x16xf32>
    %160 = vector.broadcast %159 : vector<1x1x16xf32> to vector<8x8x16xf32>
    %161 = arith.mulf %157, %160 : vector<8x8x16xf32>
    %162 = arith.addf %150, %161 : vector<8x8x16xf32>
    %c2_148 = arith.constant 2 : index
    %c1_149 = arith.constant 1 : index
    %c0_150 = arith.constant 0 : index
    %163 = vector.load %arg18[%c2_148, %c1_149, %c0_150] : memref<14x14x16xf32, #tpu.memory_space<vmem>>, vector<8x8x16xf32>
    %c15 = arith.constant 15 : index
    %c0_151 = arith.constant 0 : index
    %c0_152 = arith.constant 0 : index
    %c0_153 = arith.constant 0 : index
    %164 = vector.load %arg6[%c15, %c0_151, %c0_152, %c0_153] : memref<49x1x1x16xf32, #tpu.memory_space<vmem>>, vector<1x1x1x16xf32>
    %165 = vector.shape_cast %164 : vector<1x1x1x16xf32> to vector<1x1x16xf32>
    %166 = vector.broadcast %165 : vector<1x1x16xf32> to vector<8x8x16xf32>
    %167 = arith.mulf %163, %166 : vector<8x8x16xf32>
    %168 = arith.addf %156, %167 : vector<8x8x16xf32>
    %c2_154 = arith.constant 2 : index
    %c2_155 = arith.constant 2 : index
    %c0_156 = arith.constant 0 : index
    %169 = vector.load %arg18[%c2_154, %c2_155, %c0_156] : memref<14x14x16xf32, #tpu.memory_space<vmem>>, vector<8x8x16xf32>
    %c16 = arith.constant 16 : index
    %c0_157 = arith.constant 0 : index
    %c0_158 = arith.constant 0 : index
    %c0_159 = arith.constant 0 : index
    %170 = vector.load %arg6[%c16, %c0_157, %c0_158, %c0_159] : memref<49x1x1x16xf32, #tpu.memory_space<vmem>>, vector<1x1x1x16xf32>
    %171 = vector.shape_cast %170 : vector<1x1x1x16xf32> to vector<1x1x16xf32>
    %172 = vector.broadcast %171 : vector<1x1x16xf32> to vector<8x8x16xf32>
    %173 = arith.mulf %169, %172 : vector<8x8x16xf32>
    %174 = arith.addf %162, %173 : vector<8x8x16xf32>
    %c2_160 = arith.constant 2 : index
    %c3_161 = arith.constant 3 : index
    %c0_162 = arith.constant 0 : index
    %175 = vector.load %arg18[%c2_160, %c3_161, %c0_162] : memref<14x14x16xf32, #tpu.memory_space<vmem>>, vector<8x8x16xf32>
    %c17 = arith.constant 17 : index
    %c0_163 = arith.constant 0 : index
    %c0_164 = arith.constant 0 : index
    %c0_165 = arith.constant 0 : index
    %176 = vector.load %arg6[%c17, %c0_163, %c0_164, %c0_165] : memref<49x1x1x16xf32, #tpu.memory_space<vmem>>, vector<1x1x1x16xf32>
    %177 = vector.shape_cast %176 : vector<1x1x1x16xf32> to vector<1x1x16xf32>
    %178 = vector.broadcast %177 : vector<1x1x16xf32> to vector<8x8x16xf32>
    %179 = arith.mulf %175, %178 : vector<8x8x16xf32>
    %180 = arith.addf %168, %179 : vector<8x8x16xf32>
    %c2_166 = arith.constant 2 : index
    %c4_167 = arith.constant 4 : index
    %c0_168 = arith.constant 0 : index
    %181 = vector.load %arg18[%c2_166, %c4_167, %c0_168] : memref<14x14x16xf32, #tpu.memory_space<vmem>>, vector<8x8x16xf32>
    %c18 = arith.constant 18 : index
    %c0_169 = arith.constant 0 : index
    %c0_170 = arith.constant 0 : index
    %c0_171 = arith.constant 0 : index
    %182 = vector.load %arg6[%c18, %c0_169, %c0_170, %c0_171] : memref<49x1x1x16xf32, #tpu.memory_space<vmem>>, vector<1x1x1x16xf32>
    %183 = vector.shape_cast %182 : vector<1x1x1x16xf32> to vector<1x1x16xf32>
    %184 = vector.broadcast %183 : vector<1x1x16xf32> to vector<8x8x16xf32>
    %185 = arith.mulf %181, %184 : vector<8x8x16xf32>
    %186 = arith.addf %174, %185 : vector<8x8x16xf32>
    %c2_172 = arith.constant 2 : index
    %c5_173 = arith.constant 5 : index
    %c0_174 = arith.constant 0 : index
    %187 = vector.load %arg18[%c2_172, %c5_173, %c0_174] : memref<14x14x16xf32, #tpu.memory_space<vmem>>, vector<8x8x16xf32>
    %c19 = arith.constant 19 : index
    %c0_175 = arith.constant 0 : index
    %c0_176 = arith.constant 0 : index
    %c0_177 = arith.constant 0 : index
    %188 = vector.load %arg6[%c19, %c0_175, %c0_176, %c0_177] : memref<49x1x1x16xf32, #tpu.memory_space<vmem>>, vector<1x1x1x16xf32>
    %189 = vector.shape_cast %188 : vector<1x1x1x16xf32> to vector<1x1x16xf32>
    %190 = vector.broadcast %189 : vector<1x1x16xf32> to vector<8x8x16xf32>
    %191 = arith.mulf %187, %190 : vector<8x8x16xf32>
    %192 = arith.addf %180, %191 : vector<8x8x16xf32>
    %c2_178 = arith.constant 2 : index
    %c6_179 = arith.constant 6 : index
    %c0_180 = arith.constant 0 : index
    %193 = vector.load %arg18[%c2_178, %c6_179, %c0_180] : memref<14x14x16xf32, #tpu.memory_space<vmem>>, vector<8x8x16xf32>
    %c20 = arith.constant 20 : index
    %c0_181 = arith.constant 0 : index
    %c0_182 = arith.constant 0 : index
    %c0_183 = arith.constant 0 : index
    %194 = vector.load %arg6[%c20, %c0_181, %c0_182, %c0_183] : memref<49x1x1x16xf32, #tpu.memory_space<vmem>>, vector<1x1x1x16xf32>
    %195 = vector.shape_cast %194 : vector<1x1x1x16xf32> to vector<1x1x16xf32>
    %196 = vector.broadcast %195 : vector<1x1x16xf32> to vector<8x8x16xf32>
    %197 = arith.mulf %193, %196 : vector<8x8x16xf32>
    %198 = arith.addf %186, %197 : vector<8x8x16xf32>
    %c3_184 = arith.constant 3 : index
    %c0_185 = arith.constant 0 : index
    %c0_186 = arith.constant 0 : index
    %199 = vector.load %arg18[%c3_184, %c0_185, %c0_186] : memref<14x14x16xf32, #tpu.memory_space<vmem>>, vector<8x8x16xf32>
    %c21 = arith.constant 21 : index
    %c0_187 = arith.constant 0 : index
    %c0_188 = arith.constant 0 : index
    %c0_189 = arith.constant 0 : index
    %200 = vector.load %arg6[%c21, %c0_187, %c0_188, %c0_189] : memref<49x1x1x16xf32, #tpu.memory_space<vmem>>, vector<1x1x1x16xf32>
    %201 = vector.shape_cast %200 : vector<1x1x1x16xf32> to vector<1x1x16xf32>
    %202 = vector.broadcast %201 : vector<1x1x16xf32> to vector<8x8x16xf32>
    %203 = arith.mulf %199, %202 : vector<8x8x16xf32>
    %204 = arith.addf %192, %203 : vector<8x8x16xf32>
    %c3_190 = arith.constant 3 : index
    %c1_191 = arith.constant 1 : index
    %c0_192 = arith.constant 0 : index
    %205 = vector.load %arg18[%c3_190, %c1_191, %c0_192] : memref<14x14x16xf32, #tpu.memory_space<vmem>>, vector<8x8x16xf32>
    %c22 = arith.constant 22 : index
    %c0_193 = arith.constant 0 : index
    %c0_194 = arith.constant 0 : index
    %c0_195 = arith.constant 0 : index
    %206 = vector.load %arg6[%c22, %c0_193, %c0_194, %c0_195] : memref<49x1x1x16xf32, #tpu.memory_space<vmem>>, vector<1x1x1x16xf32>
    %207 = vector.shape_cast %206 : vector<1x1x1x16xf32> to vector<1x1x16xf32>
    %208 = vector.broadcast %207 : vector<1x1x16xf32> to vector<8x8x16xf32>
    %209 = arith.mulf %205, %208 : vector<8x8x16xf32>
    %210 = arith.addf %198, %209 : vector<8x8x16xf32>
    %c3_196 = arith.constant 3 : index
    %c2_197 = arith.constant 2 : index
    %c0_198 = arith.constant 0 : index
    %211 = vector.load %arg18[%c3_196, %c2_197, %c0_198] : memref<14x14x16xf32, #tpu.memory_space<vmem>>, vector<8x8x16xf32>
    %c23 = arith.constant 23 : index
    %c0_199 = arith.constant 0 : index
    %c0_200 = arith.constant 0 : index
    %c0_201 = arith.constant 0 : index
    %212 = vector.load %arg6[%c23, %c0_199, %c0_200, %c0_201] : memref<49x1x1x16xf32, #tpu.memory_space<vmem>>, vector<1x1x1x16xf32>
    %213 = vector.shape_cast %212 : vector<1x1x1x16xf32> to vector<1x1x16xf32>
    %214 = vector.broadcast %213 : vector<1x1x16xf32> to vector<8x8x16xf32>
    %215 = arith.mulf %211, %214 : vector<8x8x16xf32>
    %216 = arith.addf %204, %215 : vector<8x8x16xf32>
    %c3_202 = arith.constant 3 : index
    %c3_203 = arith.constant 3 : index
    %c0_204 = arith.constant 0 : index
    %217 = vector.load %arg18[%c3_202, %c3_203, %c0_204] : memref<14x14x16xf32, #tpu.memory_space<vmem>>, vector<8x8x16xf32>
    %c24 = arith.constant 24 : index
    %c0_205 = arith.constant 0 : index
    %c0_206 = arith.constant 0 : index
    %c0_207 = arith.constant 0 : index
    %218 = vector.load %arg6[%c24, %c0_205, %c0_206, %c0_207] : memref<49x1x1x16xf32, #tpu.memory_space<vmem>>, vector<1x1x1x16xf32>
    %219 = vector.shape_cast %218 : vector<1x1x1x16xf32> to vector<1x1x16xf32>
    %220 = vector.broadcast %219 : vector<1x1x16xf32> to vector<8x8x16xf32>
    %221 = arith.mulf %217, %220 : vector<8x8x16xf32>
    %222 = arith.addf %210, %221 : vector<8x8x16xf32>
    %c3_208 = arith.constant 3 : index
    %c4_209 = arith.constant 4 : index
    %c0_210 = arith.constant 0 : index
    %223 = vector.load %arg18[%c3_208, %c4_209, %c0_210] : memref<14x14x16xf32, #tpu.memory_space<vmem>>, vector<8x8x16xf32>
    %c25 = arith.constant 25 : index
    %c0_211 = arith.constant 0 : index
    %c0_212 = arith.constant 0 : index
    %c0_213 = arith.constant 0 : index
    %224 = vector.load %arg6[%c25, %c0_211, %c0_212, %c0_213] : memref<49x1x1x16xf32, #tpu.memory_space<vmem>>, vector<1x1x1x16xf32>
    %225 = vector.shape_cast %224 : vector<1x1x1x16xf32> to vector<1x1x16xf32>
    %226 = vector.broadcast %225 : vector<1x1x16xf32> to vector<8x8x16xf32>
    %227 = arith.mulf %223, %226 : vector<8x8x16xf32>
    %228 = arith.addf %216, %227 : vector<8x8x16xf32>
    %c3_214 = arith.constant 3 : index
    %c5_215 = arith.constant 5 : index
    %c0_216 = arith.constant 0 : index
    %229 = vector.load %arg18[%c3_214, %c5_215, %c0_216] : memref<14x14x16xf32, #tpu.memory_space<vmem>>, vector<8x8x16xf32>
    %c26 = arith.constant 26 : index
    %c0_217 = arith.constant 0 : index
    %c0_218 = arith.constant 0 : index
    %c0_219 = arith.constant 0 : index
    %230 = vector.load %arg6[%c26, %c0_217, %c0_218, %c0_219] : memref<49x1x1x16xf32, #tpu.memory_space<vmem>>, vector<1x1x1x16xf32>
    %231 = vector.shape_cast %230 : vector<1x1x1x16xf32> to vector<1x1x16xf32>
    %232 = vector.broadcast %231 : vector<1x1x16xf32> to vector<8x8x16xf32>
    %233 = arith.mulf %229, %232 : vector<8x8x16xf32>
    %234 = arith.addf %222, %233 : vector<8x8x16xf32>
    %c3_220 = arith.constant 3 : index
    %c6_221 = arith.constant 6 : index
    %c0_222 = arith.constant 0 : index
    %235 = vector.load %arg18[%c3_220, %c6_221, %c0_222] : memref<14x14x16xf32, #tpu.memory_space<vmem>>, vector<8x8x16xf32>
    %c27 = arith.constant 27 : index
    %c0_223 = arith.constant 0 : index
    %c0_224 = arith.constant 0 : index
    %c0_225 = arith.constant 0 : index
    %236 = vector.load %arg6[%c27, %c0_223, %c0_224, %c0_225] : memref<49x1x1x16xf32, #tpu.memory_space<vmem>>, vector<1x1x1x16xf32>
    %237 = vector.shape_cast %236 : vector<1x1x1x16xf32> to vector<1x1x16xf32>
    %238 = vector.broadcast %237 : vector<1x1x16xf32> to vector<8x8x16xf32>
    %239 = arith.mulf %235, %238 : vector<8x8x16xf32>
    %240 = arith.addf %228, %239 : vector<8x8x16xf32>
    %c4_226 = arith.constant 4 : index
    %c0_227 = arith.constant 0 : index
    %c0_228 = arith.constant 0 : index
    %241 = vector.load %arg18[%c4_226, %c0_227, %c0_228] : memref<14x14x16xf32, #tpu.memory_space<vmem>>, vector<8x8x16xf32>
    %c28 = arith.constant 28 : index
    %c0_229 = arith.constant 0 : index
    %c0_230 = arith.constant 0 : index
    %c0_231 = arith.constant 0 : index
    %242 = vector.load %arg6[%c28, %c0_229, %c0_230, %c0_231] : memref<49x1x1x16xf32, #tpu.memory_space<vmem>>, vector<1x1x1x16xf32>
    %243 = vector.shape_cast %242 : vector<1x1x1x16xf32> to vector<1x1x16xf32>
    %244 = vector.broadcast %243 : vector<1x1x16xf32> to vector<8x8x16xf32>
    %245 = arith.mulf %241, %244 : vector<8x8x16xf32>
    %246 = arith.addf %234, %245 : vector<8x8x16xf32>
    %c4_232 = arith.constant 4 : index
    %c1_233 = arith.constant 1 : index
    %c0_234 = arith.constant 0 : index
    %247 = vector.load %arg18[%c4_232, %c1_233, %c0_234] : memref<14x14x16xf32, #tpu.memory_space<vmem>>, vector<8x8x16xf32>
    %c29 = arith.constant 29 : index
    %c0_235 = arith.constant 0 : index
    %c0_236 = arith.constant 0 : index
    %c0_237 = arith.constant 0 : index
    %248 = vector.load %arg6[%c29, %c0_235, %c0_236, %c0_237] : memref<49x1x1x16xf32, #tpu.memory_space<vmem>>, vector<1x1x1x16xf32>
    %249 = vector.shape_cast %248 : vector<1x1x1x16xf32> to vector<1x1x16xf32>
    %250 = vector.broadcast %249 : vector<1x1x16xf32> to vector<8x8x16xf32>
    %251 = arith.mulf %247, %250 : vector<8x8x16xf32>
    %252 = arith.addf %240, %251 : vector<8x8x16xf32>
    %c4_238 = arith.constant 4 : index
    %c2_239 = arith.constant 2 : index
    %c0_240 = arith.constant 0 : index
    %253 = vector.load %arg18[%c4_238, %c2_239, %c0_240] : memref<14x14x16xf32, #tpu.memory_space<vmem>>, vector<8x8x16xf32>
    %c30 = arith.constant 30 : index
    %c0_241 = arith.constant 0 : index
    %c0_242 = arith.constant 0 : index
    %c0_243 = arith.constant 0 : index
    %254 = vector.load %arg6[%c30, %c0_241, %c0_242, %c0_243] : memref<49x1x1x16xf32, #tpu.memory_space<vmem>>, vector<1x1x1x16xf32>
    %255 = vector.shape_cast %254 : vector<1x1x1x16xf32> to vector<1x1x16xf32>
    %256 = vector.broadcast %255 : vector<1x1x16xf32> to vector<8x8x16xf32>
    %257 = arith.mulf %253, %256 : vector<8x8x16xf32>
    %258 = arith.addf %246, %257 : vector<8x8x16xf32>
    %c4_244 = arith.constant 4 : index
    %c3_245 = arith.constant 3 : index
    %c0_246 = arith.constant 0 : index
    %259 = vector.load %arg18[%c4_244, %c3_245, %c0_246] : memref<14x14x16xf32, #tpu.memory_space<vmem>>, vector<8x8x16xf32>
    %c31 = arith.constant 31 : index
    %c0_247 = arith.constant 0 : index
    %c0_248 = arith.constant 0 : index
    %c0_249 = arith.constant 0 : index
    %260 = vector.load %arg6[%c31, %c0_247, %c0_248, %c0_249] : memref<49x1x1x16xf32, #tpu.memory_space<vmem>>, vector<1x1x1x16xf32>
    %261 = vector.shape_cast %260 : vector<1x1x1x16xf32> to vector<1x1x16xf32>
    %262 = vector.broadcast %261 : vector<1x1x16xf32> to vector<8x8x16xf32>
    %263 = arith.mulf %259, %262 : vector<8x8x16xf32>
    %264 = arith.addf %252, %263 : vector<8x8x16xf32>
    %c4_250 = arith.constant 4 : index
    %c4_251 = arith.constant 4 : index
    %c0_252 = arith.constant 0 : index
    %265 = vector.load %arg18[%c4_250, %c4_251, %c0_252] : memref<14x14x16xf32, #tpu.memory_space<vmem>>, vector<8x8x16xf32>
    %c32 = arith.constant 32 : index
    %c0_253 = arith.constant 0 : index
    %c0_254 = arith.constant 0 : index
    %c0_255 = arith.constant 0 : index
    %266 = vector.load %arg6[%c32, %c0_253, %c0_254, %c0_255] : memref<49x1x1x16xf32, #tpu.memory_space<vmem>>, vector<1x1x1x16xf32>
    %267 = vector.shape_cast %266 : vector<1x1x1x16xf32> to vector<1x1x16xf32>
    %268 = vector.broadcast %267 : vector<1x1x16xf32> to vector<8x8x16xf32>
    %269 = arith.mulf %265, %268 : vector<8x8x16xf32>
    %270 = arith.addf %258, %269 : vector<8x8x16xf32>
    %c4_256 = arith.constant 4 : index
    %c5_257 = arith.constant 5 : index
    %c0_258 = arith.constant 0 : index
    %271 = vector.load %arg18[%c4_256, %c5_257, %c0_258] : memref<14x14x16xf32, #tpu.memory_space<vmem>>, vector<8x8x16xf32>
    %c33 = arith.constant 33 : index
    %c0_259 = arith.constant 0 : index
    %c0_260 = arith.constant 0 : index
    %c0_261 = arith.constant 0 : index
    %272 = vector.load %arg6[%c33, %c0_259, %c0_260, %c0_261] : memref<49x1x1x16xf32, #tpu.memory_space<vmem>>, vector<1x1x1x16xf32>
    %273 = vector.shape_cast %272 : vector<1x1x1x16xf32> to vector<1x1x16xf32>
    %274 = vector.broadcast %273 : vector<1x1x16xf32> to vector<8x8x16xf32>
    %275 = arith.mulf %271, %274 : vector<8x8x16xf32>
    %276 = arith.addf %264, %275 : vector<8x8x16xf32>
    %c4_262 = arith.constant 4 : index
    %c6_263 = arith.constant 6 : index
    %c0_264 = arith.constant 0 : index
    %277 = vector.load %arg18[%c4_262, %c6_263, %c0_264] : memref<14x14x16xf32, #tpu.memory_space<vmem>>, vector<8x8x16xf32>
    %c34 = arith.constant 34 : index
    %c0_265 = arith.constant 0 : index
    %c0_266 = arith.constant 0 : index
    %c0_267 = arith.constant 0 : index
    %278 = vector.load %arg6[%c34, %c0_265, %c0_266, %c0_267] : memref<49x1x1x16xf32, #tpu.memory_space<vmem>>, vector<1x1x1x16xf32>
    %279 = vector.shape_cast %278 : vector<1x1x1x16xf32> to vector<1x1x16xf32>
    %280 = vector.broadcast %279 : vector<1x1x16xf32> to vector<8x8x16xf32>
    %281 = arith.mulf %277, %280 : vector<8x8x16xf32>
    %282 = arith.addf %270, %281 : vector<8x8x16xf32>
    %c5_268 = arith.constant 5 : index
    %c0_269 = arith.constant 0 : index
    %c0_270 = arith.constant 0 : index
    %283 = vector.load %arg18[%c5_268, %c0_269, %c0_270] : memref<14x14x16xf32, #tpu.memory_space<vmem>>, vector<8x8x16xf32>
    %c35 = arith.constant 35 : index
    %c0_271 = arith.constant 0 : index
    %c0_272 = arith.constant 0 : index
    %c0_273 = arith.constant 0 : index
    %284 = vector.load %arg6[%c35, %c0_271, %c0_272, %c0_273] : memref<49x1x1x16xf32, #tpu.memory_space<vmem>>, vector<1x1x1x16xf32>
    %285 = vector.shape_cast %284 : vector<1x1x1x16xf32> to vector<1x1x16xf32>
    %286 = vector.broadcast %285 : vector<1x1x16xf32> to vector<8x8x16xf32>
    %287 = arith.mulf %283, %286 : vector<8x8x16xf32>
    %288 = arith.addf %276, %287 : vector<8x8x16xf32>
    %c5_274 = arith.constant 5 : index
    %c1_275 = arith.constant 1 : index
    %c0_276 = arith.constant 0 : index
    %289 = vector.load %arg18[%c5_274, %c1_275, %c0_276] : memref<14x14x16xf32, #tpu.memory_space<vmem>>, vector<8x8x16xf32>
    %c36 = arith.constant 36 : index
    %c0_277 = arith.constant 0 : index
    %c0_278 = arith.constant 0 : index
    %c0_279 = arith.constant 0 : index
    %290 = vector.load %arg6[%c36, %c0_277, %c0_278, %c0_279] : memref<49x1x1x16xf32, #tpu.memory_space<vmem>>, vector<1x1x1x16xf32>
    %291 = vector.shape_cast %290 : vector<1x1x1x16xf32> to vector<1x1x16xf32>
    %292 = vector.broadcast %291 : vector<1x1x16xf32> to vector<8x8x16xf32>
    %293 = arith.mulf %289, %292 : vector<8x8x16xf32>
    %294 = arith.addf %282, %293 : vector<8x8x16xf32>
    %c5_280 = arith.constant 5 : index
    %c2_281 = arith.constant 2 : index
    %c0_282 = arith.constant 0 : index
    %295 = vector.load %arg18[%c5_280, %c2_281, %c0_282] : memref<14x14x16xf32, #tpu.memory_space<vmem>>, vector<8x8x16xf32>
    %c37 = arith.constant 37 : index
    %c0_283 = arith.constant 0 : index
    %c0_284 = arith.constant 0 : index
    %c0_285 = arith.constant 0 : index
    %296 = vector.load %arg6[%c37, %c0_283, %c0_284, %c0_285] : memref<49x1x1x16xf32, #tpu.memory_space<vmem>>, vector<1x1x1x16xf32>
    %297 = vector.shape_cast %296 : vector<1x1x1x16xf32> to vector<1x1x16xf32>
    %298 = vector.broadcast %297 : vector<1x1x16xf32> to vector<8x8x16xf32>
    %299 = arith.mulf %295, %298 : vector<8x8x16xf32>
    %300 = arith.addf %288, %299 : vector<8x8x16xf32>
    %c5_286 = arith.constant 5 : index
    %c3_287 = arith.constant 3 : index
    %c0_288 = arith.constant 0 : index
    %301 = vector.load %arg18[%c5_286, %c3_287, %c0_288] : memref<14x14x16xf32, #tpu.memory_space<vmem>>, vector<8x8x16xf32>
    %c38 = arith.constant 38 : index
    %c0_289 = arith.constant 0 : index
    %c0_290 = arith.constant 0 : index
    %c0_291 = arith.constant 0 : index
    %302 = vector.load %arg6[%c38, %c0_289, %c0_290, %c0_291] : memref<49x1x1x16xf32, #tpu.memory_space<vmem>>, vector<1x1x1x16xf32>
    %303 = vector.shape_cast %302 : vector<1x1x1x16xf32> to vector<1x1x16xf32>
    %304 = vector.broadcast %303 : vector<1x1x16xf32> to vector<8x8x16xf32>
    %305 = arith.mulf %301, %304 : vector<8x8x16xf32>
    %306 = arith.addf %294, %305 : vector<8x8x16xf32>
    %c5_292 = arith.constant 5 : index
    %c4_293 = arith.constant 4 : index
    %c0_294 = arith.constant 0 : index
    %307 = vector.load %arg18[%c5_292, %c4_293, %c0_294] : memref<14x14x16xf32, #tpu.memory_space<vmem>>, vector<8x8x16xf32>
    %c39 = arith.constant 39 : index
    %c0_295 = arith.constant 0 : index
    %c0_296 = arith.constant 0 : index
    %c0_297 = arith.constant 0 : index
    %308 = vector.load %arg6[%c39, %c0_295, %c0_296, %c0_297] : memref<49x1x1x16xf32, #tpu.memory_space<vmem>>, vector<1x1x1x16xf32>
    %309 = vector.shape_cast %308 : vector<1x1x1x16xf32> to vector<1x1x16xf32>
    %310 = vector.broadcast %309 : vector<1x1x16xf32> to vector<8x8x16xf32>
    %311 = arith.mulf %307, %310 : vector<8x8x16xf32>
    %312 = arith.addf %300, %311 : vector<8x8x16xf32>
    %c5_298 = arith.constant 5 : index
    %c5_299 = arith.constant 5 : index
    %c0_300 = arith.constant 0 : index
    %313 = vector.load %arg18[%c5_298, %c5_299, %c0_300] : memref<14x14x16xf32, #tpu.memory_space<vmem>>, vector<8x8x16xf32>
    %c40 = arith.constant 40 : index
    %c0_301 = arith.constant 0 : index
    %c0_302 = arith.constant 0 : index
    %c0_303 = arith.constant 0 : index
    %314 = vector.load %arg6[%c40, %c0_301, %c0_302, %c0_303] : memref<49x1x1x16xf32, #tpu.memory_space<vmem>>, vector<1x1x1x16xf32>
    %315 = vector.shape_cast %314 : vector<1x1x1x16xf32> to vector<1x1x16xf32>
    %316 = vector.broadcast %315 : vector<1x1x16xf32> to vector<8x8x16xf32>
    %317 = arith.mulf %313, %316 : vector<8x8x16xf32>
    %318 = arith.addf %306, %317 : vector<8x8x16xf32>
    %c5_304 = arith.constant 5 : index
    %c6_305 = arith.constant 6 : index
    %c0_306 = arith.constant 0 : index
    %319 = vector.load %arg18[%c5_304, %c6_305, %c0_306] : memref<14x14x16xf32, #tpu.memory_space<vmem>>, vector<8x8x16xf32>
    %c41 = arith.constant 41 : index
    %c0_307 = arith.constant 0 : index
    %c0_308 = arith.constant 0 : index
    %c0_309 = arith.constant 0 : index
    %320 = vector.load %arg6[%c41, %c0_307, %c0_308, %c0_309] : memref<49x1x1x16xf32, #tpu.memory_space<vmem>>, vector<1x1x1x16xf32>
    %321 = vector.shape_cast %320 : vector<1x1x1x16xf32> to vector<1x1x16xf32>
    %322 = vector.broadcast %321 : vector<1x1x16xf32> to vector<8x8x16xf32>
    %323 = arith.mulf %319, %322 : vector<8x8x16xf32>
    %324 = arith.addf %312, %323 : vector<8x8x16xf32>
    %c6_310 = arith.constant 6 : index
    %c0_311 = arith.constant 0 : index
    %c0_312 = arith.constant 0 : index
    %325 = vector.load %arg18[%c6_310, %c0_311, %c0_312] : memref<14x14x16xf32, #tpu.memory_space<vmem>>, vector<8x8x16xf32>
    %c42 = arith.constant 42 : index
    %c0_313 = arith.constant 0 : index
    %c0_314 = arith.constant 0 : index
    %c0_315 = arith.constant 0 : index
    %326 = vector.load %arg6[%c42, %c0_313, %c0_314, %c0_315] : memref<49x1x1x16xf32, #tpu.memory_space<vmem>>, vector<1x1x1x16xf32>
    %327 = vector.shape_cast %326 : vector<1x1x1x16xf32> to vector<1x1x16xf32>
    %328 = vector.broadcast %327 : vector<1x1x16xf32> to vector<8x8x16xf32>
    %329 = arith.mulf %325, %328 : vector<8x8x16xf32>
    %330 = arith.addf %318, %329 : vector<8x8x16xf32>
    %c6_316 = arith.constant 6 : index
    %c1_317 = arith.constant 1 : index
    %c0_318 = arith.constant 0 : index
    %331 = vector.load %arg18[%c6_316, %c1_317, %c0_318] : memref<14x14x16xf32, #tpu.memory_space<vmem>>, vector<8x8x16xf32>
    %c43 = arith.constant 43 : index
    %c0_319 = arith.constant 0 : index
    %c0_320 = arith.constant 0 : index
    %c0_321 = arith.constant 0 : index
    %332 = vector.load %arg6[%c43, %c0_319, %c0_320, %c0_321] : memref<49x1x1x16xf32, #tpu.memory_space<vmem>>, vector<1x1x1x16xf32>
    %333 = vector.shape_cast %332 : vector<1x1x1x16xf32> to vector<1x1x16xf32>
    %334 = vector.broadcast %333 : vector<1x1x16xf32> to vector<8x8x16xf32>
    %335 = arith.mulf %331, %334 : vector<8x8x16xf32>
    %336 = arith.addf %324, %335 : vector<8x8x16xf32>
    %c6_322 = arith.constant 6 : index
    %c2_323 = arith.constant 2 : index
    %c0_324 = arith.constant 0 : index
    %337 = vector.load %arg18[%c6_322, %c2_323, %c0_324] : memref<14x14x16xf32, #tpu.memory_space<vmem>>, vector<8x8x16xf32>
    %c44 = arith.constant 44 : index
    %c0_325 = arith.constant 0 : index
    %c0_326 = arith.constant 0 : index
    %c0_327 = arith.constant 0 : index
    %338 = vector.load %arg6[%c44, %c0_325, %c0_326, %c0_327] : memref<49x1x1x16xf32, #tpu.memory_space<vmem>>, vector<1x1x1x16xf32>
    %339 = vector.shape_cast %338 : vector<1x1x1x16xf32> to vector<1x1x16xf32>
    %340 = vector.broadcast %339 : vector<1x1x16xf32> to vector<8x8x16xf32>
    %341 = arith.mulf %337, %340 : vector<8x8x16xf32>
    %342 = arith.addf %330, %341 : vector<8x8x16xf32>
    %c6_328 = arith.constant 6 : index
    %c3_329 = arith.constant 3 : index
    %c0_330 = arith.constant 0 : index
    %343 = vector.load %arg18[%c6_328, %c3_329, %c0_330] : memref<14x14x16xf32, #tpu.memory_space<vmem>>, vector<8x8x16xf32>
    %c45 = arith.constant 45 : index
    %c0_331 = arith.constant 0 : index
    %c0_332 = arith.constant 0 : index
    %c0_333 = arith.constant 0 : index
    %344 = vector.load %arg6[%c45, %c0_331, %c0_332, %c0_333] : memref<49x1x1x16xf32, #tpu.memory_space<vmem>>, vector<1x1x1x16xf32>
    %345 = vector.shape_cast %344 : vector<1x1x1x16xf32> to vector<1x1x16xf32>
    %346 = vector.broadcast %345 : vector<1x1x16xf32> to vector<8x8x16xf32>
    %347 = arith.mulf %343, %346 : vector<8x8x16xf32>
    %348 = arith.addf %336, %347 : vector<8x8x16xf32>
    %c6_334 = arith.constant 6 : index
    %c4_335 = arith.constant 4 : index
    %c0_336 = arith.constant 0 : index
    %349 = vector.load %arg18[%c6_334, %c4_335, %c0_336] : memref<14x14x16xf32, #tpu.memory_space<vmem>>, vector<8x8x16xf32>
    %c46 = arith.constant 46 : index
    %c0_337 = arith.constant 0 : index
    %c0_338 = arith.constant 0 : index
    %c0_339 = arith.constant 0 : index
    %350 = vector.load %arg6[%c46, %c0_337, %c0_338, %c0_339] : memref<49x1x1x16xf32, #tpu.memory_space<vmem>>, vector<1x1x1x16xf32>
    %351 = vector.shape_cast %350 : vector<1x1x1x16xf32> to vector<1x1x16xf32>
    %352 = vector.broadcast %351 : vector<1x1x16xf32> to vector<8x8x16xf32>
    %353 = arith.mulf %349, %352 : vector<8x8x16xf32>
    %354 = arith.addf %342, %353 : vector<8x8x16xf32>
    %c6_340 = arith.constant 6 : index
    %c5_341 = arith.constant 5 : index
    %c0_342 = arith.constant 0 : index
    %355 = vector.load %arg18[%c6_340, %c5_341, %c0_342] : memref<14x14x16xf32, #tpu.memory_space<vmem>>, vector<8x8x16xf32>
    %c47 = arith.constant 47 : index
    %c0_343 = arith.constant 0 : index
    %c0_344 = arith.constant 0 : index
    %c0_345 = arith.constant 0 : index
    %356 = vector.load %arg6[%c47, %c0_343, %c0_344, %c0_345] : memref<49x1x1x16xf32, #tpu.memory_space<vmem>>, vector<1x1x1x16xf32>
    %357 = vector.shape_cast %356 : vector<1x1x1x16xf32> to vector<1x1x16xf32>
    %358 = vector.broadcast %357 : vector<1x1x16xf32> to vector<8x8x16xf32>
    %359 = arith.mulf %355, %358 : vector<8x8x16xf32>
    %360 = arith.addf %348, %359 : vector<8x8x16xf32>
    %c6_346 = arith.constant 6 : index
    %c6_347 = arith.constant 6 : index
    %c0_348 = arith.constant 0 : index
    %361 = vector.load %arg18[%c6_346, %c6_347, %c0_348] : memref<14x14x16xf32, #tpu.memory_space<vmem>>, vector<8x8x16xf32>
    %c48 = arith.constant 48 : index
    %c0_349 = arith.constant 0 : index
    %c0_350 = arith.constant 0 : index
    %c0_351 = arith.constant 0 : index
    %362 = vector.load %arg6[%c48, %c0_349, %c0_350, %c0_351] : memref<49x1x1x16xf32, #tpu.memory_space<vmem>>, vector<1x1x1x16xf32>
    %363 = vector.shape_cast %362 : vector<1x1x1x16xf32> to vector<1x1x16xf32>
    %364 = vector.broadcast %363 : vector<1x1x16xf32> to vector<8x8x16xf32>
    %365 = arith.mulf %361, %364 : vector<8x8x16xf32>
    %366 = arith.addf %354, %365 : vector<8x8x16xf32>
    %367 = arith.addf %366, %360 : vector<8x8x16xf32>
    %368 = vector.extract_strided_slice %367 {offsets = [0, 0, 0], sizes = [1, 8, 16], strides = [1, 1, 1]} : vector<8x8x16xf32> to vector<1x8x16xf32>
    %369 = vector.shape_cast %368 : vector<1x8x16xf32> to vector<8x16xf32>
    %c0_352 = arith.constant 0 : index
    %c0_353 = arith.constant 0 : index
    %370 = vector.load %arg19[%c0_352, %c0_353] : memref<64x16xf32, #tpu.memory_space<vmem>>, vector<8x16xf32>
    tpu.vector_store %arg19[%c0_352, %c0_353], %369 {strides = array<i32>} : memref<64x16xf32, #tpu.memory_space<vmem>>, vector<8x16xf32>,
    %371 = vector.extract_strided_slice %367 {offsets = [1, 0, 0], sizes = [1, 8, 16], strides = [1, 1, 1]} : vector<8x8x16xf32> to vector<1x8x16xf32>
    %372 = vector.shape_cast %371 : vector<1x8x16xf32> to vector<8x16xf32>
    %c8_354 = arith.constant 8 : index
    %c0_355 = arith.constant 0 : index
    %373 = vector.load %arg19[%c8_354, %c0_355] : memref<64x16xf32, #tpu.memory_space<vmem>>, vector<8x16xf32>
    tpu.vector_store %arg19[%c8_354, %c0_355], %372 {strides = array<i32>} : memref<64x16xf32, #tpu.memory_space<vmem>>, vector<8x16xf32>,
    %374 = vector.extract_strided_slice %367 {offsets = [2, 0, 0], sizes = [1, 8, 16], strides = [1, 1, 1]} : vector<8x8x16xf32> to vector<1x8x16xf32>
    %375 = vector.shape_cast %374 : vector<1x8x16xf32> to vector<8x16xf32>
    %c16_356 = arith.constant 16 : index
    %c0_357 = arith.constant 0 : index
    %376 = vector.load %arg19[%c16_356, %c0_357] : memref<64x16xf32, #tpu.memory_space<vmem>>, vector<8x16xf32>
    tpu.vector_store %arg19[%c16_356, %c0_357], %375 {strides = array<i32>} : memref<64x16xf32, #tpu.memory_space<vmem>>, vector<8x16xf32>,
    %377 = vector.extract_strided_slice %367 {offsets = [3, 0, 0], sizes = [1, 8, 16], strides = [1, 1, 1]} : vector<8x8x16xf32> to vector<1x8x16xf32>
    %378 = vector.shape_cast %377 : vector<1x8x16xf32> to vector<8x16xf32>
    %c24_358 = arith.constant 24 : index
    %c0_359 = arith.constant 0 : index
    %379 = vector.load %arg19[%c24_358, %c0_359] : memref<64x16xf32, #tpu.memory_space<vmem>>, vector<8x16xf32>
    tpu.vector_store %arg19[%c24_358, %c0_359], %378 {strides = array<i32>} : memref<64x16xf32, #tpu.memory_space<vmem>>, vector<8x16xf32>,
    %380 = vector.extract_strided_slice %367 {offsets = [4, 0, 0], sizes = [1, 8, 16], strides = [1, 1, 1]} : vector<8x8x16xf32> to vector<1x8x16xf32>
    %381 = vector.shape_cast %380 : vector<1x8x16xf32> to vector<8x16xf32>
    %c32_360 = arith.constant 32 : index
    %c0_361 = arith.constant 0 : index
    %382 = vector.load %arg19[%c32_360, %c0_361] : memref<64x16xf32, #tpu.memory_space<vmem>>, vector<8x16xf32>
    tpu.vector_store %arg19[%c32_360, %c0_361], %381 {strides = array<i32>} : memref<64x16xf32, #tpu.memory_space<vmem>>, vector<8x16xf32>,
    %383 = vector.extract_strided_slice %367 {offsets = [5, 0, 0], sizes = [1, 8, 16], strides = [1, 1, 1]} : vector<8x8x16xf32> to vector<1x8x16xf32>
    %384 = vector.shape_cast %383 : vector<1x8x16xf32> to vector<8x16xf32>
    %c40_362 = arith.constant 40 : index
    %c0_363 = arith.constant 0 : index
    %385 = vector.load %arg19[%c40_362, %c0_363] : memref<64x16xf32, #tpu.memory_space<vmem>>, vector<8x16xf32>
    tpu.vector_store %arg19[%c40_362, %c0_363], %384 {strides = array<i32>} : memref<64x16xf32, #tpu.memory_space<vmem>>, vector<8x16xf32>,
    %386 = vector.extract_strided_slice %367 {offsets = [6, 0, 0], sizes = [1, 8, 16], strides = [1, 1, 1]} : vector<8x8x16xf32> to vector<1x8x16xf32>
    %387 = vector.shape_cast %386 : vector<1x8x16xf32> to vector<8x16xf32>
    %c48_364 = arith.constant 48 : index
    %c0_365 = arith.constant 0 : index
    %388 = vector.load %arg19[%c48_364, %c0_365] : memref<64x16xf32, #tpu.memory_space<vmem>>, vector<8x16xf32>
    tpu.vector_store %arg19[%c48_364, %c0_365], %387 {strides = array<i32>} : memref<64x16xf32, #tpu.memory_space<vmem>>, vector<8x16xf32>,
    %389 = vector.extract_strided_slice %367 {offsets = [7, 0, 0], sizes = [1, 8, 16], strides = [1, 1, 1]} : vector<8x8x16xf32> to vector<1x8x16xf32>
    %390 = vector.shape_cast %389 : vector<1x8x16xf32> to vector<8x16xf32>
    %c56 = arith.constant 56 : index
    %c0_366 = arith.constant 0 : index
    %391 = vector.load %arg19[%c56, %c0_366] : memref<64x16xf32, #tpu.memory_space<vmem>>, vector<8x16xf32>
    tpu.vector_store %arg19[%c56, %c0_366], %390 {strides = array<i32>} : memref<64x16xf32, #tpu.memory_space<vmem>>, vector<8x16xf32>,
    %c0_367 = arith.constant 0 : index
    %c0_368 = arith.constant 0 : index
    %392 = vector.load %arg19[%c0_367, %c0_368] : memref<64x16xf32, #tpu.memory_space<vmem>>, vector<64x16xf32>
    %c0_369 = arith.constant 0 : index
    %c0_370 = arith.constant 0 : index
    %393 = vector.load %arg7[%c0_369, %c0_370] : memref<1x16xf32, #tpu.memory_space<vmem>>, vector<1x16xf32>
    %394 = vector.broadcast %393 : vector<1x16xf32> to vector<64x16xf32>
    %395 = arith.addf %392, %394 : vector<64x16xf32>
    %c0_371 = arith.constant 0 : index
    %c0_372 = arith.constant 0 : index
    %396 = vector.load %arg8[%c0_371, %c0_372] : memref<1x16xf32, #tpu.memory_space<vmem>>, vector<1x16xf32>
    %c0_373 = arith.constant 0 : index
    %c0_374 = arith.constant 0 : index
    %397 = vector.load %arg9[%c0_373, %c0_374] : memref<1x16xf32, #tpu.memory_space<vmem>>, vector<1x16xf32>
    %cst_375 = arith.constant dense<0.000000e+00> : vector<64xf32>
    %398 = vector.multi_reduction <add>, %395, %cst_375 [1] : vector<64x16xf32> to vector<64xf32>
    %399 = vector.shape_cast %398 : vector<64xf32> to vector<64x1xf32>
    %cst_376 = arith.constant 1.600000e+01 : f32
    %400 = vector.broadcast %cst_376 : f32 to vector<64x1xf32>
    %401 = arith.divf %399, %400 : vector<64x1xf32>
    %402 = vector.broadcast %401 : vector<64x1xf32> to vector<64x16xf32>
    %403 = arith.subf %395, %402 : vector<64x16xf32>
    %404 = arith.mulf %403, %403 : vector<64x16xf32>
    %cst_377 = arith.constant dense<0.000000e+00> : vector<64xf32>
    %405 = vector.multi_reduction <add>, %404, %cst_377 [1] : vector<64x16xf32> to vector<64xf32>
    %406 = vector.shape_cast %405 : vector<64xf32> to vector<64x1xf32>
    %cst_378 = arith.constant 1.600000e+01 : f32
    %407 = vector.broadcast %cst_378 : f32 to vector<64x1xf32>
    %408 = arith.divf %406, %407 : vector<64x1xf32>
    %409 = vector.broadcast %401 : vector<64x1xf32> to vector<64x16xf32>
    %410 = arith.subf %395, %409 : vector<64x16xf32>
    %cst_379 = arith.constant 9.99999997E-7 : f32
    %411 = vector.broadcast %cst_379 : f32 to vector<64x1xf32>
    %412 = arith.addf %408, %411 : vector<64x1xf32>
    %413 = math.rsqrt %412 : vector<64x1xf32>
    %414 = vector.broadcast %413 : vector<64x1xf32> to vector<64x16xf32>
    %415 = arith.mulf %410, %414 : vector<64x16xf32>
    %416 = vector.broadcast %396 : vector<1x16xf32> to vector<64x16xf32>
    %417 = arith.mulf %415, %416 : vector<64x16xf32>
    %418 = vector.broadcast %397 : vector<1x16xf32> to vector<64x16xf32>
    %419 = arith.addf %417, %418 : vector<64x16xf32>
    %420 = arith.truncf %419 : vector<64x16xf32> to vector<64x16xbf16>
    %c0_380 = arith.constant 0 : index
    %c0_381 = arith.constant 0 : index
    %421 = vector.load %arg10[%c0_380, %c0_381] : memref<16x64xbf16, #tpu.memory_space<vmem>>, vector<16x64xbf16>
    %cst_382 = arith.constant dense<0.000000e+00> : vector<64x64xf32>
    %422 = tpu.matmul %420, %421, %cst_382 {dimension_numbers = #tpu.dot_dimension_numbers<[1], [0], [0], [1], [0, 0, 1, 1], [], []>} : vector<64x16xbf16>, vector<16x64xbf16>, vector<64x64xf32> -> vector<64x64xf32>
    %c0_383 = arith.constant 0 : index
    %c0_384 = arith.constant 0 : index
    %423 = vector.load %arg11[%c0_383, %c0_384] : memref<1x64xf32, #tpu.memory_space<vmem>>, vector<1x64xf32>
    %424 = vector.broadcast %423 : vector<1x64xf32> to vector<64x64xf32>
    %425 = arith.addf %422, %424 : vector<64x64xf32>
    %cst_385 = arith.constant 5.000000e-01 : f32
    %426 = vector.broadcast %cst_385 : f32 to vector<64x64xf32>
    %427 = arith.mulf %426, %425 : vector<64x64xf32>
    %cst_386 = arith.constant 4.471500e-02 : f32
    %428 = vector.broadcast %cst_386 : f32 to vector<64x64xf32>
    %429 = arith.mulf %428, %425 : vector<64x64xf32>
    %430 = arith.mulf %429, %425 : vector<64x64xf32>
    %431 = arith.mulf %430, %425 : vector<64x64xf32>
    %432 = arith.addf %425, %431 : vector<64x64xf32>
    %cst_387 = arith.constant 0.797884583 : f32
    %433 = vector.broadcast %cst_387 : f32 to vector<64x64xf32>
    %434 = arith.mulf %433, %432 : vector<64x64xf32>
    %435 = math.tanh %434 : vector<64x64xf32>
    %cst_388 = arith.constant 1.000000e+00 : f32
    %436 = vector.broadcast %cst_388 : f32 to vector<64x64xf32>
    %437 = arith.addf %436, %435 : vector<64x64xf32>
    %438 = arith.mulf %427, %437 : vector<64x64xf32>
    %439 = arith.truncf %438 : vector<64x64xf32> to vector<64x64xbf16>
    %c0_389 = arith.constant 0 : index
    %c0_390 = arith.constant 0 : index
    %440 = vector.load %arg12[%c0_389, %c0_390] : memref<64x16xbf16, #tpu.memory_space<vmem>>, vector<64x16xbf16>
    %cst_391 = arith.constant dense<0.000000e+00> : vector<64x16xf32>
    %441 = tpu.matmul %439, %440, %cst_391 {dimension_numbers = #tpu.dot_dimension_numbers<[1], [0], [0], [1], [0, 0, 1, 1], [], []>} : vector<64x64xbf16>, vector<64x16xbf16>, vector<64x16xf32> -> vector<64x16xf32>
    %c0_392 = arith.constant 0 : index
    %c0_393 = arith.constant 0 : index
    %442 = vector.load %arg13[%c0_392, %c0_393] : memref<1x16xf32, #tpu.memory_space<vmem>>, vector<1x16xf32>
    %443 = vector.broadcast %442 : vector<1x16xf32> to vector<64x16xf32>
    %444 = arith.addf %441, %443 : vector<64x16xf32>
    %c0_394 = arith.constant 0 : index
    %c0_395 = arith.constant 0 : index
    %445 = vector.load %arg14[%c0_394, %c0_395] : memref<1x16xf32, #tpu.memory_space<vmem>>, vector<1x16xf32>
    %446 = vector.broadcast %445 : vector<1x16xf32> to vector<64x16xf32>
    %447 = arith.mulf %446, %444 : vector<64x16xf32>
    %448 = arith.addf %30, %447 : vector<64x16xf32>
    %c0_396 = arith.constant 0 : index
    %c0_397 = arith.constant 0 : index
    %449 = vector.load %arg15[%c0_396, %c0_397] : memref<1x16xf32, #tpu.memory_space<vmem>>, vector<1x16xf32>
    %c0_398 = arith.constant 0 : index
    %c0_399 = arith.constant 0 : index
    %450 = vector.load %arg16[%c0_398, %c0_399] : memref<1x16xf32, #tpu.memory_space<vmem>>, vector<1x16xf32>
    %cst_400 = arith.constant dense<0.000000e+00> : vector<64xf32>
    %451 = vector.multi_reduction <add>, %448, %cst_400 [1] : vector<64x16xf32> to vector<64xf32>
    %452 = vector.shape_cast %451 : vector<64xf32> to vector<64x1xf32>
    %cst_401 = arith.constant 1.600000e+01 : f32
    %453 = vector.broadcast %cst_401 : f32 to vector<64x1xf32>
    %454 = arith.divf %452, %453 : vector<64x1xf32>
    %455 = vector.broadcast %454 : vector<64x1xf32> to vector<64x16xf32>
    %456 = arith.subf %448, %455 : vector<64x16xf32>
    %457 = arith.mulf %456, %456 : vector<64x16xf32>
    %cst_402 = arith.constant dense<0.000000e+00> : vector<64xf32>
    %458 = vector.multi_reduction <add>, %457, %cst_402 [1] : vector<64x16xf32> to vector<64xf32>
    %459 = vector.shape_cast %458 : vector<64xf32> to vector<64x1xf32>
    %cst_403 = arith.constant 1.600000e+01 : f32
    %460 = vector.broadcast %cst_403 : f32 to vector<64x1xf32>
    %461 = arith.divf %459, %460 : vector<64x1xf32>
    %462 = vector.broadcast %454 : vector<64x1xf32> to vector<64x16xf32>
    %463 = arith.subf %448, %462 : vector<64x16xf32>
    %cst_404 = arith.constant 9.99999997E-7 : f32
    %464 = vector.broadcast %cst_404 : f32 to vector<64x1xf32>
    %465 = arith.addf %461, %464 : vector<64x1xf32>
    %466 = math.rsqrt %465 : vector<64x1xf32>
    %467 = vector.broadcast %466 : vector<64x1xf32> to vector<64x16xf32>
    %468 = arith.mulf %463, %467 : vector<64x16xf32>
    %469 = vector.broadcast %449 : vector<1x16xf32> to vector<64x16xf32>
    %470 = arith.mulf %468, %469 : vector<64x16xf32>
    %471 = vector.broadcast %450 : vector<1x16xf32> to vector<64x16xf32>
    %472 = arith.addf %470, %471 : vector<64x16xf32>
    %473 = arith.truncf %472 : vector<64x16xf32> to vector<64x16xbf16>
    %c0_405 = arith.constant 0 : index
    %c0_406 = arith.constant 0 : index
    %c0_407 = arith.constant 0 : index
    %474 = vector.load %arg17[%c0_405, %c0_406, %c0_407] : memref<1x64x16xbf16, #tpu.memory_space<vmem>>, vector<1x64x16xbf16>
    %475 = vector.shape_cast %474 : vector<1x64x16xbf16> to vector<64x16xbf16>
    %476 = vector.shape_cast %473 : vector<64x16xbf16> to vector<1x64x16xbf16>
    tpu.vector_store %arg17[%c0_405, %c0_406, %c0_407], %476 {strides = array<i32>} : memref<1x64x16xbf16, #tpu.memory_space<vmem>>, vector<1x64x16xbf16>,
    return
  }
  func.func @transform_0(%arg0: i32) -> (i32, i32, i32) {
    %c0_i32 = arith.constant 0 : i32
    %c0_i32_0 = arith.constant 0 : i32
    %c0_i32_1 = arith.constant 0 : i32
    return %arg0, %c0_i32, %c0_i32_0 : i32, i32, i32
  }
  func.func @transform_1(%arg0: i32) -> (i32, i32) {
    %c0_i32 = arith.constant 0 : i32
    %c0_i32_0 = arith.constant 0 : i32
    %c0_i32_1 = arith.constant 0 : i32
    return %c0_i32, %c0_i32_0 : i32, i32
  }
  func.func @transform_2(%arg0: i32) -> (i32, i32) {
    %c0_i32 = arith.constant 0 : i32
    %c0_i32_0 = arith.constant 0 : i32
    %c0_i32_1 = arith.constant 0 : i32
    return %c0_i32, %c0_i32_0 : i32, i32
  }
  func.func @transform_3(%arg0: i32) -> (i32, i32) {
    %c0_i32 = arith.constant 0 : i32
    %c0_i32_0 = arith.constant 0 : i32
    %c0_i32_1 = arith.constant 0 : i32
    return %c0_i32, %c0_i32_0 : i32, i32
  }
  func.func @transform_4(%arg0: i32) -> (i32, i32) {
    %c0_i32 = arith.constant 0 : i32
    %c0_i32_0 = arith.constant 0 : i32
    %c0_i32_1 = arith.constant 0 : i32
    return %c0_i32, %c0_i32_0 : i32, i32
  }
  func.func @transform_5(%arg0: i32) -> (i32, i32, i32, i32) {
    %c0_i32 = arith.constant 0 : i32
    %c0_i32_0 = arith.constant 0 : i32
    %c0_i32_1 = arith.constant 0 : i32
    %c0_i32_2 = arith.constant 0 : i32
    %c0_i32_3 = arith.constant 0 : i32
    return %c0_i32, %c0_i32_0, %c0_i32_1, %c0_i32_2 : i32, i32, i32, i32
  }
  func.func @transform_6(%arg0: i32) -> (i32, i32) {
    %c0_i32 = arith.constant 0 : i32
    %c0_i32_0 = arith.constant 0 : i32
    %c0_i32_1 = arith.constant 0 : i32
    return %c0_i32, %c0_i32_0 : i32, i32
  }
  func.func @transform_7(%arg0: i32) -> (i32, i32) {
    %c0_i32 = arith.constant 0 : i32
    %c0_i32_0 = arith.constant 0 : i32
    %c0_i32_1 = arith.constant 0 : i32
    return %c0_i32, %c0_i32_0 : i32, i32
  }
  func.func @transform_8(%arg0: i32) -> (i32, i32) {
    %c0_i32 = arith.constant 0 : i32
    %c0_i32_0 = arith.constant 0 : i32
    %c0_i32_1 = arith.constant 0 : i32
    return %c0_i32, %c0_i32_0 : i32, i32
  }
  func.func @transform_9(%arg0: i32) -> (i32, i32) {
    %c0_i32 = arith.constant 0 : i32
    %c0_i32_0 = arith.constant 0 : i32
    %c0_i32_1 = arith.constant 0 : i32
    return %c0_i32, %c0_i32_0 : i32, i32
  }
  func.func @transform_10(%arg0: i32) -> (i32, i32) {
    %c0_i32 = arith.constant 0 : i32
    %c0_i32_0 = arith.constant 0 : i32
    %c0_i32_1 = arith.constant 0 : i32
    return %c0_i32, %c0_i32_0 : i32, i32
  }
  func.func @transform_11(%arg0: i32) -> (i32, i32) {
    %c0_i32 = arith.constant 0 : i32
    %c0_i32_0 = arith.constant 0 : i32
    %c0_i32_1 = arith.constant 0 : i32
    return %c0_i32, %c0_i32_0 : i32, i32
  }
  func.func @transform_12(%arg0: i32) -> (i32, i32) {
    %c0_i32 = arith.constant 0 : i32
    %c0_i32_0 = arith.constant 0 : i32
    %c0_i32_1 = arith.constant 0 : i32
    return %c0_i32, %c0_i32_0 : i32, i32
  }
  func.func @transform_13(%arg0: i32) -> (i32, i32) {
    %c0_i32 = arith.constant 0 : i32
    %c0_i32_0 = arith.constant 0 : i32
    %c0_i32_1 = arith.constant 0 : i32
    return %c0_i32, %c0_i32_0 : i32, i32
  }
  func.func @transform_14(%arg0: i32) -> (i32, i32) {
    %c0_i32 = arith.constant 0 : i32
    %c0_i32_0 = arith.constant 0 : i32
    %c0_i32_1 = arith.constant 0 : i32
    return %c0_i32, %c0_i32_0 : i32, i32
  }
  func.func @transform_15(%arg0: i32) -> (i32, i32) {
    %c0_i32 = arith.constant 0 : i32
    %c0_i32_0 = arith.constant 0 : i32
    %c0_i32_1 = arith.constant 0 : i32
    return %c0_i32, %c0_i32_0 : i32, i32
  }
  func.func @transform_16(%arg0: i32) -> (i32, i32, i32) {
    %c0_i32 = arith.constant 0 : i32
    %c0_i32_0 = arith.constant 0 : i32
    %c0_i32_1 = arith.constant 0 : i32
    return %arg0, %c0_i32, %c0_i32_0 : i32, i32, i32
  }
}

module attributes {stable_mosaic.version = 11 : i64} {
  func.func @kernel(%arg0: i32, %arg1: memref<1x16x64xbf16, #tpu.memory_space<vmem>>, %arg2: memref<64x32xbf16, #tpu.memory_space<vmem>>, %arg3: memref<1x32xf32, #tpu.memory_space<vmem>>, %arg4: memref<49x1x1x32xf32, #tpu.memory_space<vmem>>, %arg5: memref<1x32xf32, #tpu.memory_space<vmem>>, %arg6: memref<1x32xf32, #tpu.memory_space<vmem>>, %arg7: memref<1x32xf32, #tpu.memory_space<vmem>>, %arg8: memref<32x128xbf16, #tpu.memory_space<vmem>>, %arg9: memref<1x128xf32, #tpu.memory_space<vmem>>, %arg10: memref<128x32xbf16, #tpu.memory_space<vmem>>, %arg11: memref<1x32xf32, #tpu.memory_space<vmem>>, %arg12: memref<1x32xf32, #tpu.memory_space<vmem>>, %arg13: memref<1x32xf32, #tpu.memory_space<vmem>>, %arg14: memref<1x32xf32, #tpu.memory_space<vmem>>, %arg15: memref<1x16x32xbf16, #tpu.memory_space<vmem>>, %arg16: memref<10x10x32xf32, #tpu.memory_space<vmem>>, %arg17: memref<16x32xf32, #tpu.memory_space<vmem>>) attributes {dimension_semantics = [#tpu.dimension_semantics<parallel>], iteration_bounds = array<i64: 2>, scalar_prefetch = 0 : i64, scratch_operands = 2 : i64, tpu.core_type = #tpu.core_type<tc>, window_params = [{transform_indices = @transform_0, window_bounds = array<i64: 1, 16, 64>}, {pipeline_mode = #tpu.pipeline_mode<synchronous>, transform_indices = @transform_1, window_bounds = array<i64: 64, 32>}, {pipeline_mode = #tpu.pipeline_mode<synchronous>, transform_indices = @transform_2, window_bounds = array<i64: 1, 32>}, {pipeline_mode = #tpu.pipeline_mode<synchronous>, transform_indices = @transform_3, window_bounds = array<i64: 49, 1, 1, 32>}, {pipeline_mode = #tpu.pipeline_mode<synchronous>, transform_indices = @transform_4, window_bounds = array<i64: 1, 32>}, {pipeline_mode = #tpu.pipeline_mode<synchronous>, transform_indices = @transform_5, window_bounds = array<i64: 1, 32>}, {pipeline_mode = #tpu.pipeline_mode<synchronous>, transform_indices = @transform_6, window_bounds = array<i64: 1, 32>}, {pipeline_mode = #tpu.pipeline_mode<synchronous>, transform_indices = @transform_7, window_bounds = array<i64: 32, 128>}, {pipeline_mode = #tpu.pipeline_mode<synchronous>, transform_indices = @transform_8, window_bounds = array<i64: 1, 128>}, {pipeline_mode = #tpu.pipeline_mode<synchronous>, transform_indices = @transform_9, window_bounds = array<i64: 128, 32>}, {pipeline_mode = #tpu.pipeline_mode<synchronous>, transform_indices = @transform_10, window_bounds = array<i64: 1, 32>}, {pipeline_mode = #tpu.pipeline_mode<synchronous>, transform_indices = @transform_11, window_bounds = array<i64: 1, 32>}, {pipeline_mode = #tpu.pipeline_mode<synchronous>, transform_indices = @transform_12, window_bounds = array<i64: 1, 32>}, {pipeline_mode = #tpu.pipeline_mode<synchronous>, transform_indices = @transform_13, window_bounds = array<i64: 1, 32>}, {transform_indices = @transform_14, window_bounds = array<i64: 1, 16, 32>}]} {
    %c0 = arith.constant 0 : index
    %c0_0 = arith.constant 0 : index
    %c0_1 = arith.constant 0 : index
    %0 = vector.load %arg1[%c0, %c0_0, %c0_1] : memref<1x16x64xbf16, #tpu.memory_space<vmem>>, vector<1x16x64xbf16>
    %1 = vector.shape_cast %0 : vector<1x16x64xbf16> to vector<16x64xbf16>
    %c0_2 = arith.constant 0 : index
    %c0_3 = arith.constant 0 : index
    %2 = vector.load %arg2[%c0_2, %c0_3] : memref<64x32xbf16, #tpu.memory_space<vmem>>, vector<64x32xbf16>
    %cst = arith.constant dense<0.000000e+00> : vector<16x32xf32>
    %3 = tpu.matmul %1, %2, %cst {dimension_numbers = #tpu.dot_dimension_numbers<[1], [0], [0], [1], [0, 0, 1, 1], [], []>} : vector<16x64xbf16>, vector<64x32xbf16>, vector<16x32xf32> -> vector<16x32xf32>
    %c0_4 = arith.constant 0 : index
    %c0_5 = arith.constant 0 : index
    %4 = vector.load %arg3[%c0_4, %c0_5] : memref<1x32xf32, #tpu.memory_space<vmem>>, vector<1x32xf32>
    %5 = vector.broadcast %4 : vector<1x32xf32> to vector<16x32xf32>
    %6 = arith.addf %3, %5 : vector<16x32xf32>
    %cst_6 = arith.constant 0.000000e+00 : f32
    %7 = vector.broadcast %cst_6 : f32 to vector<3x10x32xf32>
    %c0_7 = arith.constant 0 : index
    %c0_8 = arith.constant 0 : index
    %c0_9 = arith.constant 0 : index
    %8 = vector.load %arg16[%c0_7, %c0_8, %c0_9] : memref<10x10x32xf32, #tpu.memory_space<vmem>>, vector<3x10x32xf32>
    tpu.vector_store %arg16[%c0_7, %c0_8, %c0_9], %7 {strides = array<i32>} : memref<10x10x32xf32, #tpu.memory_space<vmem>>, vector<3x10x32xf32>,
    %cst_10 = arith.constant 0.000000e+00 : f32
    %9 = vector.broadcast %cst_10 : f32 to vector<3x10x32xf32>
    %c7 = arith.constant 7 : index
    %c0_11 = arith.constant 0 : index
    %c0_12 = arith.constant 0 : index
    %10 = vector.load %arg16[%c7, %c0_11, %c0_12] : memref<10x10x32xf32, #tpu.memory_space<vmem>>, vector<3x10x32xf32>
    tpu.vector_store %arg16[%c7, %c0_11, %c0_12], %9 {strides = array<i32>} : memref<10x10x32xf32, #tpu.memory_space<vmem>>, vector<3x10x32xf32>,
    %cst_13 = arith.constant 0.000000e+00 : f32
    %11 = vector.broadcast %cst_13 : f32 to vector<4x3x32xf32>
    %c3 = arith.constant 3 : index
    %c0_14 = arith.constant 0 : index
    %c0_15 = arith.constant 0 : index
    %12 = vector.load %arg16[%c3, %c0_14, %c0_15] : memref<10x10x32xf32, #tpu.memory_space<vmem>>, vector<4x3x32xf32>
    tpu.vector_store %arg16[%c3, %c0_14, %c0_15], %11 {strides = array<i32>} : memref<10x10x32xf32, #tpu.memory_space<vmem>>, vector<4x3x32xf32>,
    %cst_16 = arith.constant 0.000000e+00 : f32
    %13 = vector.broadcast %cst_16 : f32 to vector<4x3x32xf32>
    %c3_17 = arith.constant 3 : index
    %c7_18 = arith.constant 7 : index
    %c0_19 = arith.constant 0 : index
    %14 = vector.load %arg16[%c3_17, %c7_18, %c0_19] : memref<10x10x32xf32, #tpu.memory_space<vmem>>, vector<4x3x32xf32>
    tpu.vector_store %arg16[%c3_17, %c7_18, %c0_19], %13 {strides = array<i32>} : memref<10x10x32xf32, #tpu.memory_space<vmem>>, vector<4x3x32xf32>,
    %15 = vector.extract_strided_slice %6 {offsets = [0, 0], sizes = [4, 32], strides = [1, 1]} : vector<16x32xf32> to vector<4x32xf32>
    %c3_20 = arith.constant 3 : index
    %c3_21 = arith.constant 3 : index
    %c0_22 = arith.constant 0 : index
    %16 = vector.load %arg16[%c3_20, %c3_21, %c0_22] : memref<10x10x32xf32, #tpu.memory_space<vmem>>, vector<1x4x32xf32>
    %17 = vector.shape_cast %16 : vector<1x4x32xf32> to vector<4x32xf32>
    %18 = vector.shape_cast %15 : vector<4x32xf32> to vector<1x4x32xf32>
    tpu.vector_store %arg16[%c3_20, %c3_21, %c0_22], %18 {strides = array<i32>} : memref<10x10x32xf32, #tpu.memory_space<vmem>>, vector<1x4x32xf32>,
    %19 = vector.extract_strided_slice %6 {offsets = [4, 0], sizes = [4, 32], strides = [1, 1]} : vector<16x32xf32> to vector<4x32xf32>
    %c4 = arith.constant 4 : index
    %c3_23 = arith.constant 3 : index
    %c0_24 = arith.constant 0 : index
    %20 = vector.load %arg16[%c4, %c3_23, %c0_24] : memref<10x10x32xf32, #tpu.memory_space<vmem>>, vector<1x4x32xf32>
    %21 = vector.shape_cast %20 : vector<1x4x32xf32> to vector<4x32xf32>
    %22 = vector.shape_cast %19 : vector<4x32xf32> to vector<1x4x32xf32>
    tpu.vector_store %arg16[%c4, %c3_23, %c0_24], %22 {strides = array<i32>} : memref<10x10x32xf32, #tpu.memory_space<vmem>>, vector<1x4x32xf32>,
    %23 = vector.extract_strided_slice %6 {offsets = [8, 0], sizes = [4, 32], strides = [1, 1]} : vector<16x32xf32> to vector<4x32xf32>
    %c5 = arith.constant 5 : index
    %c3_25 = arith.constant 3 : index
    %c0_26 = arith.constant 0 : index
    %24 = vector.load %arg16[%c5, %c3_25, %c0_26] : memref<10x10x32xf32, #tpu.memory_space<vmem>>, vector<1x4x32xf32>
    %25 = vector.shape_cast %24 : vector<1x4x32xf32> to vector<4x32xf32>
    %26 = vector.shape_cast %23 : vector<4x32xf32> to vector<1x4x32xf32>
    tpu.vector_store %arg16[%c5, %c3_25, %c0_26], %26 {strides = array<i32>} : memref<10x10x32xf32, #tpu.memory_space<vmem>>, vector<1x4x32xf32>,
    %27 = vector.extract_strided_slice %6 {offsets = [12, 0], sizes = [4, 32], strides = [1, 1]} : vector<16x32xf32> to vector<4x32xf32>
    %c6 = arith.constant 6 : index
    %c3_27 = arith.constant 3 : index
    %c0_28 = arith.constant 0 : index
    %28 = vector.load %arg16[%c6, %c3_27, %c0_28] : memref<10x10x32xf32, #tpu.memory_space<vmem>>, vector<1x4x32xf32>
    %29 = vector.shape_cast %28 : vector<1x4x32xf32> to vector<4x32xf32>
    %30 = vector.shape_cast %27 : vector<4x32xf32> to vector<1x4x32xf32>
    tpu.vector_store %arg16[%c6, %c3_27, %c0_28], %30 {strides = array<i32>} : memref<10x10x32xf32, #tpu.memory_space<vmem>>, vector<1x4x32xf32>,
    %cst_29 = arith.constant 0.000000e+00 : f32
    %31 = vector.broadcast %cst_29 : f32 to vector<4x4x32xf32>
    %cst_30 = arith.constant 0.000000e+00 : f32
    %32 = vector.broadcast %cst_30 : f32 to vector<4x4x32xf32>
    %c0_31 = arith.constant 0 : index
    %c0_32 = arith.constant 0 : index
    %c0_33 = arith.constant 0 : index
    %33 = vector.load %arg16[%c0_31, %c0_32, %c0_33] : memref<10x10x32xf32, #tpu.memory_space<vmem>>, vector<4x4x32xf32>
    %c0_34 = arith.constant 0 : index
    %c0_35 = arith.constant 0 : index
    %c0_36 = arith.constant 0 : index
    %c0_37 = arith.constant 0 : index
    %34 = vector.load %arg4[%c0_34, %c0_35, %c0_36, %c0_37] : memref<49x1x1x32xf32, #tpu.memory_space<vmem>>, vector<1x1x1x32xf32>
    %35 = vector.shape_cast %34 : vector<1x1x1x32xf32> to vector<1x1x32xf32>
    %36 = vector.broadcast %35 : vector<1x1x32xf32> to vector<4x4x32xf32>
    %37 = arith.mulf %33, %36 : vector<4x4x32xf32>
    %38 = arith.addf %31, %37 : vector<4x4x32xf32>
    %c0_38 = arith.constant 0 : index
    %c1 = arith.constant 1 : index
    %c0_39 = arith.constant 0 : index
    %39 = vector.load %arg16[%c0_38, %c1, %c0_39] : memref<10x10x32xf32, #tpu.memory_space<vmem>>, vector<4x4x32xf32>
    %c1_40 = arith.constant 1 : index
    %c0_41 = arith.constant 0 : index
    %c0_42 = arith.constant 0 : index
    %c0_43 = arith.constant 0 : index
    %40 = vector.load %arg4[%c1_40, %c0_41, %c0_42, %c0_43] : memref<49x1x1x32xf32, #tpu.memory_space<vmem>>, vector<1x1x1x32xf32>
    %41 = vector.shape_cast %40 : vector<1x1x1x32xf32> to vector<1x1x32xf32>
    %42 = vector.broadcast %41 : vector<1x1x32xf32> to vector<4x4x32xf32>
    %43 = arith.mulf %39, %42 : vector<4x4x32xf32>
    %44 = arith.addf %32, %43 : vector<4x4x32xf32>
    %c0_44 = arith.constant 0 : index
    %c2 = arith.constant 2 : index
    %c0_45 = arith.constant 0 : index
    %45 = vector.load %arg16[%c0_44, %c2, %c0_45] : memref<10x10x32xf32, #tpu.memory_space<vmem>>, vector<4x4x32xf32>
    %c2_46 = arith.constant 2 : index
    %c0_47 = arith.constant 0 : index
    %c0_48 = arith.constant 0 : index
    %c0_49 = arith.constant 0 : index
    %46 = vector.load %arg4[%c2_46, %c0_47, %c0_48, %c0_49] : memref<49x1x1x32xf32, #tpu.memory_space<vmem>>, vector<1x1x1x32xf32>
    %47 = vector.shape_cast %46 : vector<1x1x1x32xf32> to vector<1x1x32xf32>
    %48 = vector.broadcast %47 : vector<1x1x32xf32> to vector<4x4x32xf32>
    %49 = arith.mulf %45, %48 : vector<4x4x32xf32>
    %50 = arith.addf %38, %49 : vector<4x4x32xf32>
    %c0_50 = arith.constant 0 : index
    %c3_51 = arith.constant 3 : index
    %c0_52 = arith.constant 0 : index
    %51 = vector.load %arg16[%c0_50, %c3_51, %c0_52] : memref<10x10x32xf32, #tpu.memory_space<vmem>>, vector<4x4x32xf32>
    %c3_53 = arith.constant 3 : index
    %c0_54 = arith.constant 0 : index
    %c0_55 = arith.constant 0 : index
    %c0_56 = arith.constant 0 : index
    %52 = vector.load %arg4[%c3_53, %c0_54, %c0_55, %c0_56] : memref<49x1x1x32xf32, #tpu.memory_space<vmem>>, vector<1x1x1x32xf32>
    %53 = vector.shape_cast %52 : vector<1x1x1x32xf32> to vector<1x1x32xf32>
    %54 = vector.broadcast %53 : vector<1x1x32xf32> to vector<4x4x32xf32>
    %55 = arith.mulf %51, %54 : vector<4x4x32xf32>
    %56 = arith.addf %44, %55 : vector<4x4x32xf32>
    %c0_57 = arith.constant 0 : index
    %c4_58 = arith.constant 4 : index
    %c0_59 = arith.constant 0 : index
    %57 = vector.load %arg16[%c0_57, %c4_58, %c0_59] : memref<10x10x32xf32, #tpu.memory_space<vmem>>, vector<4x4x32xf32>
    %c4_60 = arith.constant 4 : index
    %c0_61 = arith.constant 0 : index
    %c0_62 = arith.constant 0 : index
    %c0_63 = arith.constant 0 : index
    %58 = vector.load %arg4[%c4_60, %c0_61, %c0_62, %c0_63] : memref<49x1x1x32xf32, #tpu.memory_space<vmem>>, vector<1x1x1x32xf32>
    %59 = vector.shape_cast %58 : vector<1x1x1x32xf32> to vector<1x1x32xf32>
    %60 = vector.broadcast %59 : vector<1x1x32xf32> to vector<4x4x32xf32>
    %61 = arith.mulf %57, %60 : vector<4x4x32xf32>
    %62 = arith.addf %50, %61 : vector<4x4x32xf32>
    %c0_64 = arith.constant 0 : index
    %c5_65 = arith.constant 5 : index
    %c0_66 = arith.constant 0 : index
    %63 = vector.load %arg16[%c0_64, %c5_65, %c0_66] : memref<10x10x32xf32, #tpu.memory_space<vmem>>, vector<4x4x32xf32>
    %c5_67 = arith.constant 5 : index
    %c0_68 = arith.constant 0 : index
    %c0_69 = arith.constant 0 : index
    %c0_70 = arith.constant 0 : index
    %64 = vector.load %arg4[%c5_67, %c0_68, %c0_69, %c0_70] : memref<49x1x1x32xf32, #tpu.memory_space<vmem>>, vector<1x1x1x32xf32>
    %65 = vector.shape_cast %64 : vector<1x1x1x32xf32> to vector<1x1x32xf32>
    %66 = vector.broadcast %65 : vector<1x1x32xf32> to vector<4x4x32xf32>
    %67 = arith.mulf %63, %66 : vector<4x4x32xf32>
    %68 = arith.addf %56, %67 : vector<4x4x32xf32>
    %c0_71 = arith.constant 0 : index
    %c6_72 = arith.constant 6 : index
    %c0_73 = arith.constant 0 : index
    %69 = vector.load %arg16[%c0_71, %c6_72, %c0_73] : memref<10x10x32xf32, #tpu.memory_space<vmem>>, vector<4x4x32xf32>
    %c6_74 = arith.constant 6 : index
    %c0_75 = arith.constant 0 : index
    %c0_76 = arith.constant 0 : index
    %c0_77 = arith.constant 0 : index
    %70 = vector.load %arg4[%c6_74, %c0_75, %c0_76, %c0_77] : memref<49x1x1x32xf32, #tpu.memory_space<vmem>>, vector<1x1x1x32xf32>
    %71 = vector.shape_cast %70 : vector<1x1x1x32xf32> to vector<1x1x32xf32>
    %72 = vector.broadcast %71 : vector<1x1x32xf32> to vector<4x4x32xf32>
    %73 = arith.mulf %69, %72 : vector<4x4x32xf32>
    %74 = arith.addf %62, %73 : vector<4x4x32xf32>
    %c1_78 = arith.constant 1 : index
    %c0_79 = arith.constant 0 : index
    %c0_80 = arith.constant 0 : index
    %75 = vector.load %arg16[%c1_78, %c0_79, %c0_80] : memref<10x10x32xf32, #tpu.memory_space<vmem>>, vector<4x4x32xf32>
    %c7_81 = arith.constant 7 : index
    %c0_82 = arith.constant 0 : index
    %c0_83 = arith.constant 0 : index
    %c0_84 = arith.constant 0 : index
    %76 = vector.load %arg4[%c7_81, %c0_82, %c0_83, %c0_84] : memref<49x1x1x32xf32, #tpu.memory_space<vmem>>, vector<1x1x1x32xf32>
    %77 = vector.shape_cast %76 : vector<1x1x1x32xf32> to vector<1x1x32xf32>
    %78 = vector.broadcast %77 : vector<1x1x32xf32> to vector<4x4x32xf32>
    %79 = arith.mulf %75, %78 : vector<4x4x32xf32>
    %80 = arith.addf %68, %79 : vector<4x4x32xf32>
    %c1_85 = arith.constant 1 : index
    %c1_86 = arith.constant 1 : index
    %c0_87 = arith.constant 0 : index
    %81 = vector.load %arg16[%c1_85, %c1_86, %c0_87] : memref<10x10x32xf32, #tpu.memory_space<vmem>>, vector<4x4x32xf32>
    %c8 = arith.constant 8 : index
    %c0_88 = arith.constant 0 : index
    %c0_89 = arith.constant 0 : index
    %c0_90 = arith.constant 0 : index
    %82 = vector.load %arg4[%c8, %c0_88, %c0_89, %c0_90] : memref<49x1x1x32xf32, #tpu.memory_space<vmem>>, vector<1x1x1x32xf32>
    %83 = vector.shape_cast %82 : vector<1x1x1x32xf32> to vector<1x1x32xf32>
    %84 = vector.broadcast %83 : vector<1x1x32xf32> to vector<4x4x32xf32>
    %85 = arith.mulf %81, %84 : vector<4x4x32xf32>
    %86 = arith.addf %74, %85 : vector<4x4x32xf32>
    %c1_91 = arith.constant 1 : index
    %c2_92 = arith.constant 2 : index
    %c0_93 = arith.constant 0 : index
    %87 = vector.load %arg16[%c1_91, %c2_92, %c0_93] : memref<10x10x32xf32, #tpu.memory_space<vmem>>, vector<4x4x32xf32>
    %c9 = arith.constant 9 : index
    %c0_94 = arith.constant 0 : index
    %c0_95 = arith.constant 0 : index
    %c0_96 = arith.constant 0 : index
    %88 = vector.load %arg4[%c9, %c0_94, %c0_95, %c0_96] : memref<49x1x1x32xf32, #tpu.memory_space<vmem>>, vector<1x1x1x32xf32>
    %89 = vector.shape_cast %88 : vector<1x1x1x32xf32> to vector<1x1x32xf32>
    %90 = vector.broadcast %89 : vector<1x1x32xf32> to vector<4x4x32xf32>
    %91 = arith.mulf %87, %90 : vector<4x4x32xf32>
    %92 = arith.addf %80, %91 : vector<4x4x32xf32>
    %c1_97 = arith.constant 1 : index
    %c3_98 = arith.constant 3 : index
    %c0_99 = arith.constant 0 : index
    %93 = vector.load %arg16[%c1_97, %c3_98, %c0_99] : memref<10x10x32xf32, #tpu.memory_space<vmem>>, vector<4x4x32xf32>
    %c10 = arith.constant 10 : index
    %c0_100 = arith.constant 0 : index
    %c0_101 = arith.constant 0 : index
    %c0_102 = arith.constant 0 : index
    %94 = vector.load %arg4[%c10, %c0_100, %c0_101, %c0_102] : memref<49x1x1x32xf32, #tpu.memory_space<vmem>>, vector<1x1x1x32xf32>
    %95 = vector.shape_cast %94 : vector<1x1x1x32xf32> to vector<1x1x32xf32>
    %96 = vector.broadcast %95 : vector<1x1x32xf32> to vector<4x4x32xf32>
    %97 = arith.mulf %93, %96 : vector<4x4x32xf32>
    %98 = arith.addf %86, %97 : vector<4x4x32xf32>
    %c1_103 = arith.constant 1 : index
    %c4_104 = arith.constant 4 : index
    %c0_105 = arith.constant 0 : index
    %99 = vector.load %arg16[%c1_103, %c4_104, %c0_105] : memref<10x10x32xf32, #tpu.memory_space<vmem>>, vector<4x4x32xf32>
    %c11 = arith.constant 11 : index
    %c0_106 = arith.constant 0 : index
    %c0_107 = arith.constant 0 : index
    %c0_108 = arith.constant 0 : index
    %100 = vector.load %arg4[%c11, %c0_106, %c0_107, %c0_108] : memref<49x1x1x32xf32, #tpu.memory_space<vmem>>, vector<1x1x1x32xf32>
    %101 = vector.shape_cast %100 : vector<1x1x1x32xf32> to vector<1x1x32xf32>
    %102 = vector.broadcast %101 : vector<1x1x32xf32> to vector<4x4x32xf32>
    %103 = arith.mulf %99, %102 : vector<4x4x32xf32>
    %104 = arith.addf %92, %103 : vector<4x4x32xf32>
    %c1_109 = arith.constant 1 : index
    %c5_110 = arith.constant 5 : index
    %c0_111 = arith.constant 0 : index
    %105 = vector.load %arg16[%c1_109, %c5_110, %c0_111] : memref<10x10x32xf32, #tpu.memory_space<vmem>>, vector<4x4x32xf32>
    %c12 = arith.constant 12 : index
    %c0_112 = arith.constant 0 : index
    %c0_113 = arith.constant 0 : index
    %c0_114 = arith.constant 0 : index
    %106 = vector.load %arg4[%c12, %c0_112, %c0_113, %c0_114] : memref<49x1x1x32xf32, #tpu.memory_space<vmem>>, vector<1x1x1x32xf32>
    %107 = vector.shape_cast %106 : vector<1x1x1x32xf32> to vector<1x1x32xf32>
    %108 = vector.broadcast %107 : vector<1x1x32xf32> to vector<4x4x32xf32>
    %109 = arith.mulf %105, %108 : vector<4x4x32xf32>
    %110 = arith.addf %98, %109 : vector<4x4x32xf32>
    %c1_115 = arith.constant 1 : index
    %c6_116 = arith.constant 6 : index
    %c0_117 = arith.constant 0 : index
    %111 = vector.load %arg16[%c1_115, %c6_116, %c0_117] : memref<10x10x32xf32, #tpu.memory_space<vmem>>, vector<4x4x32xf32>
    %c13 = arith.constant 13 : index
    %c0_118 = arith.constant 0 : index
    %c0_119 = arith.constant 0 : index
    %c0_120 = arith.constant 0 : index
    %112 = vector.load %arg4[%c13, %c0_118, %c0_119, %c0_120] : memref<49x1x1x32xf32, #tpu.memory_space<vmem>>, vector<1x1x1x32xf32>
    %113 = vector.shape_cast %112 : vector<1x1x1x32xf32> to vector<1x1x32xf32>
    %114 = vector.broadcast %113 : vector<1x1x32xf32> to vector<4x4x32xf32>
    %115 = arith.mulf %111, %114 : vector<4x4x32xf32>
    %116 = arith.addf %104, %115 : vector<4x4x32xf32>
    %c2_121 = arith.constant 2 : index
    %c0_122 = arith.constant 0 : index
    %c0_123 = arith.constant 0 : index
    %117 = vector.load %arg16[%c2_121, %c0_122, %c0_123] : memref<10x10x32xf32, #tpu.memory_space<vmem>>, vector<4x4x32xf32>
    %c14 = arith.constant 14 : index
    %c0_124 = arith.constant 0 : index
    %c0_125 = arith.constant 0 : index
    %c0_126 = arith.constant 0 : index
    %118 = vector.load %arg4[%c14, %c0_124, %c0_125, %c0_126] : memref<49x1x1x32xf32, #tpu.memory_space<vmem>>, vector<1x1x1x32xf32>
    %119 = vector.shape_cast %118 : vector<1x1x1x32xf32> to vector<1x1x32xf32>
    %120 = vector.broadcast %119 : vector<1x1x32xf32> to vector<4x4x32xf32>
    %121 = arith.mulf %117, %120 : vector<4x4x32xf32>
    %122 = arith.addf %110, %121 : vector<4x4x32xf32>
    %c2_127 = arith.constant 2 : index
    %c1_128 = arith.constant 1 : index
    %c0_129 = arith.constant 0 : index
    %123 = vector.load %arg16[%c2_127, %c1_128, %c0_129] : memref<10x10x32xf32, #tpu.memory_space<vmem>>, vector<4x4x32xf32>
    %c15 = arith.constant 15 : index
    %c0_130 = arith.constant 0 : index
    %c0_131 = arith.constant 0 : index
    %c0_132 = arith.constant 0 : index
    %124 = vector.load %arg4[%c15, %c0_130, %c0_131, %c0_132] : memref<49x1x1x32xf32, #tpu.memory_space<vmem>>, vector<1x1x1x32xf32>
    %125 = vector.shape_cast %124 : vector<1x1x1x32xf32> to vector<1x1x32xf32>
    %126 = vector.broadcast %125 : vector<1x1x32xf32> to vector<4x4x32xf32>
    %127 = arith.mulf %123, %126 : vector<4x4x32xf32>
    %128 = arith.addf %116, %127 : vector<4x4x32xf32>
    %c2_133 = arith.constant 2 : index
    %c2_134 = arith.constant 2 : index
    %c0_135 = arith.constant 0 : index
    %129 = vector.load %arg16[%c2_133, %c2_134, %c0_135] : memref<10x10x32xf32, #tpu.memory_space<vmem>>, vector<4x4x32xf32>
    %c16 = arith.constant 16 : index
    %c0_136 = arith.constant 0 : index
    %c0_137 = arith.constant 0 : index
    %c0_138 = arith.constant 0 : index
    %130 = vector.load %arg4[%c16, %c0_136, %c0_137, %c0_138] : memref<49x1x1x32xf32, #tpu.memory_space<vmem>>, vector<1x1x1x32xf32>
    %131 = vector.shape_cast %130 : vector<1x1x1x32xf32> to vector<1x1x32xf32>
    %132 = vector.broadcast %131 : vector<1x1x32xf32> to vector<4x4x32xf32>
    %133 = arith.mulf %129, %132 : vector<4x4x32xf32>
    %134 = arith.addf %122, %133 : vector<4x4x32xf32>
    %c2_139 = arith.constant 2 : index
    %c3_140 = arith.constant 3 : index
    %c0_141 = arith.constant 0 : index
    %135 = vector.load %arg16[%c2_139, %c3_140, %c0_141] : memref<10x10x32xf32, #tpu.memory_space<vmem>>, vector<4x4x32xf32>
    %c17 = arith.constant 17 : index
    %c0_142 = arith.constant 0 : index
    %c0_143 = arith.constant 0 : index
    %c0_144 = arith.constant 0 : index
    %136 = vector.load %arg4[%c17, %c0_142, %c0_143, %c0_144] : memref<49x1x1x32xf32, #tpu.memory_space<vmem>>, vector<1x1x1x32xf32>
    %137 = vector.shape_cast %136 : vector<1x1x1x32xf32> to vector<1x1x32xf32>
    %138 = vector.broadcast %137 : vector<1x1x32xf32> to vector<4x4x32xf32>
    %139 = arith.mulf %135, %138 : vector<4x4x32xf32>
    %140 = arith.addf %128, %139 : vector<4x4x32xf32>
    %c2_145 = arith.constant 2 : index
    %c4_146 = arith.constant 4 : index
    %c0_147 = arith.constant 0 : index
    %141 = vector.load %arg16[%c2_145, %c4_146, %c0_147] : memref<10x10x32xf32, #tpu.memory_space<vmem>>, vector<4x4x32xf32>
    %c18 = arith.constant 18 : index
    %c0_148 = arith.constant 0 : index
    %c0_149 = arith.constant 0 : index
    %c0_150 = arith.constant 0 : index
    %142 = vector.load %arg4[%c18, %c0_148, %c0_149, %c0_150] : memref<49x1x1x32xf32, #tpu.memory_space<vmem>>, vector<1x1x1x32xf32>
    %143 = vector.shape_cast %142 : vector<1x1x1x32xf32> to vector<1x1x32xf32>
    %144 = vector.broadcast %143 : vector<1x1x32xf32> to vector<4x4x32xf32>
    %145 = arith.mulf %141, %144 : vector<4x4x32xf32>
    %146 = arith.addf %134, %145 : vector<4x4x32xf32>
    %c2_151 = arith.constant 2 : index
    %c5_152 = arith.constant 5 : index
    %c0_153 = arith.constant 0 : index
    %147 = vector.load %arg16[%c2_151, %c5_152, %c0_153] : memref<10x10x32xf32, #tpu.memory_space<vmem>>, vector<4x4x32xf32>
    %c19 = arith.constant 19 : index
    %c0_154 = arith.constant 0 : index
    %c0_155 = arith.constant 0 : index
    %c0_156 = arith.constant 0 : index
    %148 = vector.load %arg4[%c19, %c0_154, %c0_155, %c0_156] : memref<49x1x1x32xf32, #tpu.memory_space<vmem>>, vector<1x1x1x32xf32>
    %149 = vector.shape_cast %148 : vector<1x1x1x32xf32> to vector<1x1x32xf32>
    %150 = vector.broadcast %149 : vector<1x1x32xf32> to vector<4x4x32xf32>
    %151 = arith.mulf %147, %150 : vector<4x4x32xf32>
    %152 = arith.addf %140, %151 : vector<4x4x32xf32>
    %c2_157 = arith.constant 2 : index
    %c6_158 = arith.constant 6 : index
    %c0_159 = arith.constant 0 : index
    %153 = vector.load %arg16[%c2_157, %c6_158, %c0_159] : memref<10x10x32xf32, #tpu.memory_space<vmem>>, vector<4x4x32xf32>
    %c20 = arith.constant 20 : index
    %c0_160 = arith.constant 0 : index
    %c0_161 = arith.constant 0 : index
    %c0_162 = arith.constant 0 : index
    %154 = vector.load %arg4[%c20, %c0_160, %c0_161, %c0_162] : memref<49x1x1x32xf32, #tpu.memory_space<vmem>>, vector<1x1x1x32xf32>
    %155 = vector.shape_cast %154 : vector<1x1x1x32xf32> to vector<1x1x32xf32>
    %156 = vector.broadcast %155 : vector<1x1x32xf32> to vector<4x4x32xf32>
    %157 = arith.mulf %153, %156 : vector<4x4x32xf32>
    %158 = arith.addf %146, %157 : vector<4x4x32xf32>
    %c3_163 = arith.constant 3 : index
    %c0_164 = arith.constant 0 : index
    %c0_165 = arith.constant 0 : index
    %159 = vector.load %arg16[%c3_163, %c0_164, %c0_165] : memref<10x10x32xf32, #tpu.memory_space<vmem>>, vector<4x4x32xf32>
    %c21 = arith.constant 21 : index
    %c0_166 = arith.constant 0 : index
    %c0_167 = arith.constant 0 : index
    %c0_168 = arith.constant 0 : index
    %160 = vector.load %arg4[%c21, %c0_166, %c0_167, %c0_168] : memref<49x1x1x32xf32, #tpu.memory_space<vmem>>, vector<1x1x1x32xf32>
    %161 = vector.shape_cast %160 : vector<1x1x1x32xf32> to vector<1x1x32xf32>
    %162 = vector.broadcast %161 : vector<1x1x32xf32> to vector<4x4x32xf32>
    %163 = arith.mulf %159, %162 : vector<4x4x32xf32>
    %164 = arith.addf %152, %163 : vector<4x4x32xf32>
    %c3_169 = arith.constant 3 : index
    %c1_170 = arith.constant 1 : index
    %c0_171 = arith.constant 0 : index
    %165 = vector.load %arg16[%c3_169, %c1_170, %c0_171] : memref<10x10x32xf32, #tpu.memory_space<vmem>>, vector<4x4x32xf32>
    %c22 = arith.constant 22 : index
    %c0_172 = arith.constant 0 : index
    %c0_173 = arith.constant 0 : index
    %c0_174 = arith.constant 0 : index
    %166 = vector.load %arg4[%c22, %c0_172, %c0_173, %c0_174] : memref<49x1x1x32xf32, #tpu.memory_space<vmem>>, vector<1x1x1x32xf32>
    %167 = vector.shape_cast %166 : vector<1x1x1x32xf32> to vector<1x1x32xf32>
    %168 = vector.broadcast %167 : vector<1x1x32xf32> to vector<4x4x32xf32>
    %169 = arith.mulf %165, %168 : vector<4x4x32xf32>
    %170 = arith.addf %158, %169 : vector<4x4x32xf32>
    %c3_175 = arith.constant 3 : index
    %c2_176 = arith.constant 2 : index
    %c0_177 = arith.constant 0 : index
    %171 = vector.load %arg16[%c3_175, %c2_176, %c0_177] : memref<10x10x32xf32, #tpu.memory_space<vmem>>, vector<4x4x32xf32>
    %c23 = arith.constant 23 : index
    %c0_178 = arith.constant 0 : index
    %c0_179 = arith.constant 0 : index
    %c0_180 = arith.constant 0 : index
    %172 = vector.load %arg4[%c23, %c0_178, %c0_179, %c0_180] : memref<49x1x1x32xf32, #tpu.memory_space<vmem>>, vector<1x1x1x32xf32>
    %173 = vector.shape_cast %172 : vector<1x1x1x32xf32> to vector<1x1x32xf32>
    %174 = vector.broadcast %173 : vector<1x1x32xf32> to vector<4x4x32xf32>
    %175 = arith.mulf %171, %174 : vector<4x4x32xf32>
    %176 = arith.addf %164, %175 : vector<4x4x32xf32>
    %c3_181 = arith.constant 3 : index
    %c3_182 = arith.constant 3 : index
    %c0_183 = arith.constant 0 : index
    %177 = vector.load %arg16[%c3_181, %c3_182, %c0_183] : memref<10x10x32xf32, #tpu.memory_space<vmem>>, vector<4x4x32xf32>
    %c24 = arith.constant 24 : index
    %c0_184 = arith.constant 0 : index
    %c0_185 = arith.constant 0 : index
    %c0_186 = arith.constant 0 : index
    %178 = vector.load %arg4[%c24, %c0_184, %c0_185, %c0_186] : memref<49x1x1x32xf32, #tpu.memory_space<vmem>>, vector<1x1x1x32xf32>
    %179 = vector.shape_cast %178 : vector<1x1x1x32xf32> to vector<1x1x32xf32>
    %180 = vector.broadcast %179 : vector<1x1x32xf32> to vector<4x4x32xf32>
    %181 = arith.mulf %177, %180 : vector<4x4x32xf32>
    %182 = arith.addf %170, %181 : vector<4x4x32xf32>
    %c3_187 = arith.constant 3 : index
    %c4_188 = arith.constant 4 : index
    %c0_189 = arith.constant 0 : index
    %183 = vector.load %arg16[%c3_187, %c4_188, %c0_189] : memref<10x10x32xf32, #tpu.memory_space<vmem>>, vector<4x4x32xf32>
    %c25 = arith.constant 25 : index
    %c0_190 = arith.constant 0 : index
    %c0_191 = arith.constant 0 : index
    %c0_192 = arith.constant 0 : index
    %184 = vector.load %arg4[%c25, %c0_190, %c0_191, %c0_192] : memref<49x1x1x32xf32, #tpu.memory_space<vmem>>, vector<1x1x1x32xf32>
    %185 = vector.shape_cast %184 : vector<1x1x1x32xf32> to vector<1x1x32xf32>
    %186 = vector.broadcast %185 : vector<1x1x32xf32> to vector<4x4x32xf32>
    %187 = arith.mulf %183, %186 : vector<4x4x32xf32>
    %188 = arith.addf %176, %187 : vector<4x4x32xf32>
    %c3_193 = arith.constant 3 : index
    %c5_194 = arith.constant 5 : index
    %c0_195 = arith.constant 0 : index
    %189 = vector.load %arg16[%c3_193, %c5_194, %c0_195] : memref<10x10x32xf32, #tpu.memory_space<vmem>>, vector<4x4x32xf32>
    %c26 = arith.constant 26 : index
    %c0_196 = arith.constant 0 : index
    %c0_197 = arith.constant 0 : index
    %c0_198 = arith.constant 0 : index
    %190 = vector.load %arg4[%c26, %c0_196, %c0_197, %c0_198] : memref<49x1x1x32xf32, #tpu.memory_space<vmem>>, vector<1x1x1x32xf32>
    %191 = vector.shape_cast %190 : vector<1x1x1x32xf32> to vector<1x1x32xf32>
    %192 = vector.broadcast %191 : vector<1x1x32xf32> to vector<4x4x32xf32>
    %193 = arith.mulf %189, %192 : vector<4x4x32xf32>
    %194 = arith.addf %182, %193 : vector<4x4x32xf32>
    %c3_199 = arith.constant 3 : index
    %c6_200 = arith.constant 6 : index
    %c0_201 = arith.constant 0 : index
    %195 = vector.load %arg16[%c3_199, %c6_200, %c0_201] : memref<10x10x32xf32, #tpu.memory_space<vmem>>, vector<4x4x32xf32>
    %c27 = arith.constant 27 : index
    %c0_202 = arith.constant 0 : index
    %c0_203 = arith.constant 0 : index
    %c0_204 = arith.constant 0 : index
    %196 = vector.load %arg4[%c27, %c0_202, %c0_203, %c0_204] : memref<49x1x1x32xf32, #tpu.memory_space<vmem>>, vector<1x1x1x32xf32>
    %197 = vector.shape_cast %196 : vector<1x1x1x32xf32> to vector<1x1x32xf32>
    %198 = vector.broadcast %197 : vector<1x1x32xf32> to vector<4x4x32xf32>
    %199 = arith.mulf %195, %198 : vector<4x4x32xf32>
    %200 = arith.addf %188, %199 : vector<4x4x32xf32>
    %c4_205 = arith.constant 4 : index
    %c0_206 = arith.constant 0 : index
    %c0_207 = arith.constant 0 : index
    %201 = vector.load %arg16[%c4_205, %c0_206, %c0_207] : memref<10x10x32xf32, #tpu.memory_space<vmem>>, vector<4x4x32xf32>
    %c28 = arith.constant 28 : index
    %c0_208 = arith.constant 0 : index
    %c0_209 = arith.constant 0 : index
    %c0_210 = arith.constant 0 : index
    %202 = vector.load %arg4[%c28, %c0_208, %c0_209, %c0_210] : memref<49x1x1x32xf32, #tpu.memory_space<vmem>>, vector<1x1x1x32xf32>
    %203 = vector.shape_cast %202 : vector<1x1x1x32xf32> to vector<1x1x32xf32>
    %204 = vector.broadcast %203 : vector<1x1x32xf32> to vector<4x4x32xf32>
    %205 = arith.mulf %201, %204 : vector<4x4x32xf32>
    %206 = arith.addf %194, %205 : vector<4x4x32xf32>
    %c4_211 = arith.constant 4 : index
    %c1_212 = arith.constant 1 : index
    %c0_213 = arith.constant 0 : index
    %207 = vector.load %arg16[%c4_211, %c1_212, %c0_213] : memref<10x10x32xf32, #tpu.memory_space<vmem>>, vector<4x4x32xf32>
    %c29 = arith.constant 29 : index
    %c0_214 = arith.constant 0 : index
    %c0_215 = arith.constant 0 : index
    %c0_216 = arith.constant 0 : index
    %208 = vector.load %arg4[%c29, %c0_214, %c0_215, %c0_216] : memref<49x1x1x32xf32, #tpu.memory_space<vmem>>, vector<1x1x1x32xf32>
    %209 = vector.shape_cast %208 : vector<1x1x1x32xf32> to vector<1x1x32xf32>
    %210 = vector.broadcast %209 : vector<1x1x32xf32> to vector<4x4x32xf32>
    %211 = arith.mulf %207, %210 : vector<4x4x32xf32>
    %212 = arith.addf %200, %211 : vector<4x4x32xf32>
    %c4_217 = arith.constant 4 : index
    %c2_218 = arith.constant 2 : index
    %c0_219 = arith.constant 0 : index
    %213 = vector.load %arg16[%c4_217, %c2_218, %c0_219] : memref<10x10x32xf32, #tpu.memory_space<vmem>>, vector<4x4x32xf32>
    %c30 = arith.constant 30 : index
    %c0_220 = arith.constant 0 : index
    %c0_221 = arith.constant 0 : index
    %c0_222 = arith.constant 0 : index
    %214 = vector.load %arg4[%c30, %c0_220, %c0_221, %c0_222] : memref<49x1x1x32xf32, #tpu.memory_space<vmem>>, vector<1x1x1x32xf32>
    %215 = vector.shape_cast %214 : vector<1x1x1x32xf32> to vector<1x1x32xf32>
    %216 = vector.broadcast %215 : vector<1x1x32xf32> to vector<4x4x32xf32>
    %217 = arith.mulf %213, %216 : vector<4x4x32xf32>
    %218 = arith.addf %206, %217 : vector<4x4x32xf32>
    %c4_223 = arith.constant 4 : index
    %c3_224 = arith.constant 3 : index
    %c0_225 = arith.constant 0 : index
    %219 = vector.load %arg16[%c4_223, %c3_224, %c0_225] : memref<10x10x32xf32, #tpu.memory_space<vmem>>, vector<4x4x32xf32>
    %c31 = arith.constant 31 : index
    %c0_226 = arith.constant 0 : index
    %c0_227 = arith.constant 0 : index
    %c0_228 = arith.constant 0 : index
    %220 = vector.load %arg4[%c31, %c0_226, %c0_227, %c0_228] : memref<49x1x1x32xf32, #tpu.memory_space<vmem>>, vector<1x1x1x32xf32>
    %221 = vector.shape_cast %220 : vector<1x1x1x32xf32> to vector<1x1x32xf32>
    %222 = vector.broadcast %221 : vector<1x1x32xf32> to vector<4x4x32xf32>
    %223 = arith.mulf %219, %222 : vector<4x4x32xf32>
    %224 = arith.addf %212, %223 : vector<4x4x32xf32>
    %c4_229 = arith.constant 4 : index
    %c4_230 = arith.constant 4 : index
    %c0_231 = arith.constant 0 : index
    %225 = vector.load %arg16[%c4_229, %c4_230, %c0_231] : memref<10x10x32xf32, #tpu.memory_space<vmem>>, vector<4x4x32xf32>
    %c32 = arith.constant 32 : index
    %c0_232 = arith.constant 0 : index
    %c0_233 = arith.constant 0 : index
    %c0_234 = arith.constant 0 : index
    %226 = vector.load %arg4[%c32, %c0_232, %c0_233, %c0_234] : memref<49x1x1x32xf32, #tpu.memory_space<vmem>>, vector<1x1x1x32xf32>
    %227 = vector.shape_cast %226 : vector<1x1x1x32xf32> to vector<1x1x32xf32>
    %228 = vector.broadcast %227 : vector<1x1x32xf32> to vector<4x4x32xf32>
    %229 = arith.mulf %225, %228 : vector<4x4x32xf32>
    %230 = arith.addf %218, %229 : vector<4x4x32xf32>
    %c4_235 = arith.constant 4 : index
    %c5_236 = arith.constant 5 : index
    %c0_237 = arith.constant 0 : index
    %231 = vector.load %arg16[%c4_235, %c5_236, %c0_237] : memref<10x10x32xf32, #tpu.memory_space<vmem>>, vector<4x4x32xf32>
    %c33 = arith.constant 33 : index
    %c0_238 = arith.constant 0 : index
    %c0_239 = arith.constant 0 : index
    %c0_240 = arith.constant 0 : index
    %232 = vector.load %arg4[%c33, %c0_238, %c0_239, %c0_240] : memref<49x1x1x32xf32, #tpu.memory_space<vmem>>, vector<1x1x1x32xf32>
    %233 = vector.shape_cast %232 : vector<1x1x1x32xf32> to vector<1x1x32xf32>
    %234 = vector.broadcast %233 : vector<1x1x32xf32> to vector<4x4x32xf32>
    %235 = arith.mulf %231, %234 : vector<4x4x32xf32>
    %236 = arith.addf %224, %235 : vector<4x4x32xf32>
    %c4_241 = arith.constant 4 : index
    %c6_242 = arith.constant 6 : index
    %c0_243 = arith.constant 0 : index
    %237 = vector.load %arg16[%c4_241, %c6_242, %c0_243] : memref<10x10x32xf32, #tpu.memory_space<vmem>>, vector<4x4x32xf32>
    %c34 = arith.constant 34 : index
    %c0_244 = arith.constant 0 : index
    %c0_245 = arith.constant 0 : index
    %c0_246 = arith.constant 0 : index
    %238 = vector.load %arg4[%c34, %c0_244, %c0_245, %c0_246] : memref<49x1x1x32xf32, #tpu.memory_space<vmem>>, vector<1x1x1x32xf32>
    %239 = vector.shape_cast %238 : vector<1x1x1x32xf32> to vector<1x1x32xf32>
    %240 = vector.broadcast %239 : vector<1x1x32xf32> to vector<4x4x32xf32>
    %241 = arith.mulf %237, %240 : vector<4x4x32xf32>
    %242 = arith.addf %230, %241 : vector<4x4x32xf32>
    %c5_247 = arith.constant 5 : index
    %c0_248 = arith.constant 0 : index
    %c0_249 = arith.constant 0 : index
    %243 = vector.load %arg16[%c5_247, %c0_248, %c0_249] : memref<10x10x32xf32, #tpu.memory_space<vmem>>, vector<4x4x32xf32>
    %c35 = arith.constant 35 : index
    %c0_250 = arith.constant 0 : index
    %c0_251 = arith.constant 0 : index
    %c0_252 = arith.constant 0 : index
    %244 = vector.load %arg4[%c35, %c0_250, %c0_251, %c0_252] : memref<49x1x1x32xf32, #tpu.memory_space<vmem>>, vector<1x1x1x32xf32>
    %245 = vector.shape_cast %244 : vector<1x1x1x32xf32> to vector<1x1x32xf32>
    %246 = vector.broadcast %245 : vector<1x1x32xf32> to vector<4x4x32xf32>
    %247 = arith.mulf %243, %246 : vector<4x4x32xf32>
    %248 = arith.addf %236, %247 : vector<4x4x32xf32>
    %c5_253 = arith.constant 5 : index
    %c1_254 = arith.constant 1 : index
    %c0_255 = arith.constant 0 : index
    %249 = vector.load %arg16[%c5_253, %c1_254, %c0_255] : memref<10x10x32xf32, #tpu.memory_space<vmem>>, vector<4x4x32xf32>
    %c36 = arith.constant 36 : index
    %c0_256 = arith.constant 0 : index
    %c0_257 = arith.constant 0 : index
    %c0_258 = arith.constant 0 : index
    %250 = vector.load %arg4[%c36, %c0_256, %c0_257, %c0_258] : memref<49x1x1x32xf32, #tpu.memory_space<vmem>>, vector<1x1x1x32xf32>
    %251 = vector.shape_cast %250 : vector<1x1x1x32xf32> to vector<1x1x32xf32>
    %252 = vector.broadcast %251 : vector<1x1x32xf32> to vector<4x4x32xf32>
    %253 = arith.mulf %249, %252 : vector<4x4x32xf32>
    %254 = arith.addf %242, %253 : vector<4x4x32xf32>
    %c5_259 = arith.constant 5 : index
    %c2_260 = arith.constant 2 : index
    %c0_261 = arith.constant 0 : index
    %255 = vector.load %arg16[%c5_259, %c2_260, %c0_261] : memref<10x10x32xf32, #tpu.memory_space<vmem>>, vector<4x4x32xf32>
    %c37 = arith.constant 37 : index
    %c0_262 = arith.constant 0 : index
    %c0_263 = arith.constant 0 : index
    %c0_264 = arith.constant 0 : index
    %256 = vector.load %arg4[%c37, %c0_262, %c0_263, %c0_264] : memref<49x1x1x32xf32, #tpu.memory_space<vmem>>, vector<1x1x1x32xf32>
    %257 = vector.shape_cast %256 : vector<1x1x1x32xf32> to vector<1x1x32xf32>
    %258 = vector.broadcast %257 : vector<1x1x32xf32> to vector<4x4x32xf32>
    %259 = arith.mulf %255, %258 : vector<4x4x32xf32>
    %260 = arith.addf %248, %259 : vector<4x4x32xf32>
    %c5_265 = arith.constant 5 : index
    %c3_266 = arith.constant 3 : index
    %c0_267 = arith.constant 0 : index
    %261 = vector.load %arg16[%c5_265, %c3_266, %c0_267] : memref<10x10x32xf32, #tpu.memory_space<vmem>>, vector<4x4x32xf32>
    %c38 = arith.constant 38 : index
    %c0_268 = arith.constant 0 : index
    %c0_269 = arith.constant 0 : index
    %c0_270 = arith.constant 0 : index
    %262 = vector.load %arg4[%c38, %c0_268, %c0_269, %c0_270] : memref<49x1x1x32xf32, #tpu.memory_space<vmem>>, vector<1x1x1x32xf32>
    %263 = vector.shape_cast %262 : vector<1x1x1x32xf32> to vector<1x1x32xf32>
    %264 = vector.broadcast %263 : vector<1x1x32xf32> to vector<4x4x32xf32>
    %265 = arith.mulf %261, %264 : vector<4x4x32xf32>
    %266 = arith.addf %254, %265 : vector<4x4x32xf32>
    %c5_271 = arith.constant 5 : index
    %c4_272 = arith.constant 4 : index
    %c0_273 = arith.constant 0 : index
    %267 = vector.load %arg16[%c5_271, %c4_272, %c0_273] : memref<10x10x32xf32, #tpu.memory_space<vmem>>, vector<4x4x32xf32>
    %c39 = arith.constant 39 : index
    %c0_274 = arith.constant 0 : index
    %c0_275 = arith.constant 0 : index
    %c0_276 = arith.constant 0 : index
    %268 = vector.load %arg4[%c39, %c0_274, %c0_275, %c0_276] : memref<49x1x1x32xf32, #tpu.memory_space<vmem>>, vector<1x1x1x32xf32>
    %269 = vector.shape_cast %268 : vector<1x1x1x32xf32> to vector<1x1x32xf32>
    %270 = vector.broadcast %269 : vector<1x1x32xf32> to vector<4x4x32xf32>
    %271 = arith.mulf %267, %270 : vector<4x4x32xf32>
    %272 = arith.addf %260, %271 : vector<4x4x32xf32>
    %c5_277 = arith.constant 5 : index
    %c5_278 = arith.constant 5 : index
    %c0_279 = arith.constant 0 : index
    %273 = vector.load %arg16[%c5_277, %c5_278, %c0_279] : memref<10x10x32xf32, #tpu.memory_space<vmem>>, vector<4x4x32xf32>
    %c40 = arith.constant 40 : index
    %c0_280 = arith.constant 0 : index
    %c0_281 = arith.constant 0 : index
    %c0_282 = arith.constant 0 : index
    %274 = vector.load %arg4[%c40, %c0_280, %c0_281, %c0_282] : memref<49x1x1x32xf32, #tpu.memory_space<vmem>>, vector<1x1x1x32xf32>
    %275 = vector.shape_cast %274 : vector<1x1x1x32xf32> to vector<1x1x32xf32>
    %276 = vector.broadcast %275 : vector<1x1x32xf32> to vector<4x4x32xf32>
    %277 = arith.mulf %273, %276 : vector<4x4x32xf32>
    %278 = arith.addf %266, %277 : vector<4x4x32xf32>
    %c5_283 = arith.constant 5 : index
    %c6_284 = arith.constant 6 : index
    %c0_285 = arith.constant 0 : index
    %279 = vector.load %arg16[%c5_283, %c6_284, %c0_285] : memref<10x10x32xf32, #tpu.memory_space<vmem>>, vector<4x4x32xf32>
    %c41 = arith.constant 41 : index
    %c0_286 = arith.constant 0 : index
    %c0_287 = arith.constant 0 : index
    %c0_288 = arith.constant 0 : index
    %280 = vector.load %arg4[%c41, %c0_286, %c0_287, %c0_288] : memref<49x1x1x32xf32, #tpu.memory_space<vmem>>, vector<1x1x1x32xf32>
    %281 = vector.shape_cast %280 : vector<1x1x1x32xf32> to vector<1x1x32xf32>
    %282 = vector.broadcast %281 : vector<1x1x32xf32> to vector<4x4x32xf32>
    %283 = arith.mulf %279, %282 : vector<4x4x32xf32>
    %284 = arith.addf %272, %283 : vector<4x4x32xf32>
    %c6_289 = arith.constant 6 : index
    %c0_290 = arith.constant 0 : index
    %c0_291 = arith.constant 0 : index
    %285 = vector.load %arg16[%c6_289, %c0_290, %c0_291] : memref<10x10x32xf32, #tpu.memory_space<vmem>>, vector<4x4x32xf32>
    %c42 = arith.constant 42 : index
    %c0_292 = arith.constant 0 : index
    %c0_293 = arith.constant 0 : index
    %c0_294 = arith.constant 0 : index
    %286 = vector.load %arg4[%c42, %c0_292, %c0_293, %c0_294] : memref<49x1x1x32xf32, #tpu.memory_space<vmem>>, vector<1x1x1x32xf32>
    %287 = vector.shape_cast %286 : vector<1x1x1x32xf32> to vector<1x1x32xf32>
    %288 = vector.broadcast %287 : vector<1x1x32xf32> to vector<4x4x32xf32>
    %289 = arith.mulf %285, %288 : vector<4x4x32xf32>
    %290 = arith.addf %278, %289 : vector<4x4x32xf32>
    %c6_295 = arith.constant 6 : index
    %c1_296 = arith.constant 1 : index
    %c0_297 = arith.constant 0 : index
    %291 = vector.load %arg16[%c6_295, %c1_296, %c0_297] : memref<10x10x32xf32, #tpu.memory_space<vmem>>, vector<4x4x32xf32>
    %c43 = arith.constant 43 : index
    %c0_298 = arith.constant 0 : index
    %c0_299 = arith.constant 0 : index
    %c0_300 = arith.constant 0 : index
    %292 = vector.load %arg4[%c43, %c0_298, %c0_299, %c0_300] : memref<49x1x1x32xf32, #tpu.memory_space<vmem>>, vector<1x1x1x32xf32>
    %293 = vector.shape_cast %292 : vector<1x1x1x32xf32> to vector<1x1x32xf32>
    %294 = vector.broadcast %293 : vector<1x1x32xf32> to vector<4x4x32xf32>
    %295 = arith.mulf %291, %294 : vector<4x4x32xf32>
    %296 = arith.addf %284, %295 : vector<4x4x32xf32>
    %c6_301 = arith.constant 6 : index
    %c2_302 = arith.constant 2 : index
    %c0_303 = arith.constant 0 : index
    %297 = vector.load %arg16[%c6_301, %c2_302, %c0_303] : memref<10x10x32xf32, #tpu.memory_space<vmem>>, vector<4x4x32xf32>
    %c44 = arith.constant 44 : index
    %c0_304 = arith.constant 0 : index
    %c0_305 = arith.constant 0 : index
    %c0_306 = arith.constant 0 : index
    %298 = vector.load %arg4[%c44, %c0_304, %c0_305, %c0_306] : memref<49x1x1x32xf32, #tpu.memory_space<vmem>>, vector<1x1x1x32xf32>
    %299 = vector.shape_cast %298 : vector<1x1x1x32xf32> to vector<1x1x32xf32>
    %300 = vector.broadcast %299 : vector<1x1x32xf32> to vector<4x4x32xf32>
    %301 = arith.mulf %297, %300 : vector<4x4x32xf32>
    %302 = arith.addf %290, %301 : vector<4x4x32xf32>
    %c6_307 = arith.constant 6 : index
    %c3_308 = arith.constant 3 : index
    %c0_309 = arith.constant 0 : index
    %303 = vector.load %arg16[%c6_307, %c3_308, %c0_309] : memref<10x10x32xf32, #tpu.memory_space<vmem>>, vector<4x4x32xf32>
    %c45 = arith.constant 45 : index
    %c0_310 = arith.constant 0 : index
    %c0_311 = arith.constant 0 : index
    %c0_312 = arith.constant 0 : index
    %304 = vector.load %arg4[%c45, %c0_310, %c0_311, %c0_312] : memref<49x1x1x32xf32, #tpu.memory_space<vmem>>, vector<1x1x1x32xf32>
    %305 = vector.shape_cast %304 : vector<1x1x1x32xf32> to vector<1x1x32xf32>
    %306 = vector.broadcast %305 : vector<1x1x32xf32> to vector<4x4x32xf32>
    %307 = arith.mulf %303, %306 : vector<4x4x32xf32>
    %308 = arith.addf %296, %307 : vector<4x4x32xf32>
    %c6_313 = arith.constant 6 : index
    %c4_314 = arith.constant 4 : index
    %c0_315 = arith.constant 0 : index
    %309 = vector.load %arg16[%c6_313, %c4_314, %c0_315] : memref<10x10x32xf32, #tpu.memory_space<vmem>>, vector<4x4x32xf32>
    %c46 = arith.constant 46 : index
    %c0_316 = arith.constant 0 : index
    %c0_317 = arith.constant 0 : index
    %c0_318 = arith.constant 0 : index
    %310 = vector.load %arg4[%c46, %c0_316, %c0_317, %c0_318] : memref<49x1x1x32xf32, #tpu.memory_space<vmem>>, vector<1x1x1x32xf32>
    %311 = vector.shape_cast %310 : vector<1x1x1x32xf32> to vector<1x1x32xf32>
    %312 = vector.broadcast %311 : vector<1x1x32xf32> to vector<4x4x32xf32>
    %313 = arith.mulf %309, %312 : vector<4x4x32xf32>
    %314 = arith.addf %302, %313 : vector<4x4x32xf32>
    %c6_319 = arith.constant 6 : index
    %c5_320 = arith.constant 5 : index
    %c0_321 = arith.constant 0 : index
    %315 = vector.load %arg16[%c6_319, %c5_320, %c0_321] : memref<10x10x32xf32, #tpu.memory_space<vmem>>, vector<4x4x32xf32>
    %c47 = arith.constant 47 : index
    %c0_322 = arith.constant 0 : index
    %c0_323 = arith.constant 0 : index
    %c0_324 = arith.constant 0 : index
    %316 = vector.load %arg4[%c47, %c0_322, %c0_323, %c0_324] : memref<49x1x1x32xf32, #tpu.memory_space<vmem>>, vector<1x1x1x32xf32>
    %317 = vector.shape_cast %316 : vector<1x1x1x32xf32> to vector<1x1x32xf32>
    %318 = vector.broadcast %317 : vector<1x1x32xf32> to vector<4x4x32xf32>
    %319 = arith.mulf %315, %318 : vector<4x4x32xf32>
    %320 = arith.addf %308, %319 : vector<4x4x32xf32>
    %c6_325 = arith.constant 6 : index
    %c6_326 = arith.constant 6 : index
    %c0_327 = arith.constant 0 : index
    %321 = vector.load %arg16[%c6_325, %c6_326, %c0_327] : memref<10x10x32xf32, #tpu.memory_space<vmem>>, vector<4x4x32xf32>
    %c48 = arith.constant 48 : index
    %c0_328 = arith.constant 0 : index
    %c0_329 = arith.constant 0 : index
    %c0_330 = arith.constant 0 : index
    %322 = vector.load %arg4[%c48, %c0_328, %c0_329, %c0_330] : memref<49x1x1x32xf32, #tpu.memory_space<vmem>>, vector<1x1x1x32xf32>
    %323 = vector.shape_cast %322 : vector<1x1x1x32xf32> to vector<1x1x32xf32>
    %324 = vector.broadcast %323 : vector<1x1x32xf32> to vector<4x4x32xf32>
    %325 = arith.mulf %321, %324 : vector<4x4x32xf32>
    %326 = arith.addf %314, %325 : vector<4x4x32xf32>
    %327 = arith.addf %326, %320 : vector<4x4x32xf32>
    %328 = vector.extract_strided_slice %327 {offsets = [0, 0, 0], sizes = [1, 4, 32], strides = [1, 1, 1]} : vector<4x4x32xf32> to vector<1x4x32xf32>
    %329 = vector.shape_cast %328 : vector<1x4x32xf32> to vector<4x32xf32>
    %c0_331 = arith.constant 0 : index
    %c0_332 = arith.constant 0 : index
    %330 = vector.load %arg17[%c0_331, %c0_332] : memref<16x32xf32, #tpu.memory_space<vmem>>, vector<4x32xf32>
    tpu.vector_store %arg17[%c0_331, %c0_332], %329 {strides = array<i32>} : memref<16x32xf32, #tpu.memory_space<vmem>>, vector<4x32xf32>,
    %331 = vector.extract_strided_slice %327 {offsets = [1, 0, 0], sizes = [1, 4, 32], strides = [1, 1, 1]} : vector<4x4x32xf32> to vector<1x4x32xf32>
    %332 = vector.shape_cast %331 : vector<1x4x32xf32> to vector<4x32xf32>
    %c4_333 = arith.constant 4 : index
    %c0_334 = arith.constant 0 : index
    %333 = vector.load %arg17[%c4_333, %c0_334] : memref<16x32xf32, #tpu.memory_space<vmem>>, vector<4x32xf32>
    tpu.vector_store %arg17[%c4_333, %c0_334], %332 {strides = array<i32>} : memref<16x32xf32, #tpu.memory_space<vmem>>, vector<4x32xf32>,
    %334 = vector.extract_strided_slice %327 {offsets = [2, 0, 0], sizes = [1, 4, 32], strides = [1, 1, 1]} : vector<4x4x32xf32> to vector<1x4x32xf32>
    %335 = vector.shape_cast %334 : vector<1x4x32xf32> to vector<4x32xf32>
    %c8_335 = arith.constant 8 : index
    %c0_336 = arith.constant 0 : index
    %336 = vector.load %arg17[%c8_335, %c0_336] : memref<16x32xf32, #tpu.memory_space<vmem>>, vector<4x32xf32>
    tpu.vector_store %arg17[%c8_335, %c0_336], %335 {strides = array<i32>} : memref<16x32xf32, #tpu.memory_space<vmem>>, vector<4x32xf32>,
    %337 = vector.extract_strided_slice %327 {offsets = [3, 0, 0], sizes = [1, 4, 32], strides = [1, 1, 1]} : vector<4x4x32xf32> to vector<1x4x32xf32>
    %338 = vector.shape_cast %337 : vector<1x4x32xf32> to vector<4x32xf32>
    %c12_337 = arith.constant 12 : index
    %c0_338 = arith.constant 0 : index
    %339 = vector.load %arg17[%c12_337, %c0_338] : memref<16x32xf32, #tpu.memory_space<vmem>>, vector<4x32xf32>
    tpu.vector_store %arg17[%c12_337, %c0_338], %338 {strides = array<i32>} : memref<16x32xf32, #tpu.memory_space<vmem>>, vector<4x32xf32>,
    %c0_339 = arith.constant 0 : index
    %c0_340 = arith.constant 0 : index
    %340 = vector.load %arg17[%c0_339, %c0_340] : memref<16x32xf32, #tpu.memory_space<vmem>>, vector<16x32xf32>
    %c0_341 = arith.constant 0 : index
    %c0_342 = arith.constant 0 : index
    %341 = vector.load %arg5[%c0_341, %c0_342] : memref<1x32xf32, #tpu.memory_space<vmem>>, vector<1x32xf32>
    %342 = vector.broadcast %341 : vector<1x32xf32> to vector<16x32xf32>
    %343 = arith.addf %340, %342 : vector<16x32xf32>
    %c0_343 = arith.constant 0 : index
    %c0_344 = arith.constant 0 : index
    %344 = vector.load %arg6[%c0_343, %c0_344] : memref<1x32xf32, #tpu.memory_space<vmem>>, vector<1x32xf32>
    %c0_345 = arith.constant 0 : index
    %c0_346 = arith.constant 0 : index
    %345 = vector.load %arg7[%c0_345, %c0_346] : memref<1x32xf32, #tpu.memory_space<vmem>>, vector<1x32xf32>
    %cst_347 = arith.constant dense<0.000000e+00> : vector<16xf32>
    %346 = vector.multi_reduction <add>, %343, %cst_347 [1] : vector<16x32xf32> to vector<16xf32>
    %347 = vector.shape_cast %346 : vector<16xf32> to vector<16x1xf32>
    %cst_348 = arith.constant 3.200000e+01 : f32
    %348 = vector.broadcast %cst_348 : f32 to vector<16x1xf32>
    %349 = arith.divf %347, %348 : vector<16x1xf32>
    %350 = vector.broadcast %349 : vector<16x1xf32> to vector<16x32xf32>
    %351 = arith.subf %343, %350 : vector<16x32xf32>
    %352 = arith.mulf %351, %351 : vector<16x32xf32>
    %cst_349 = arith.constant dense<0.000000e+00> : vector<16xf32>
    %353 = vector.multi_reduction <add>, %352, %cst_349 [1] : vector<16x32xf32> to vector<16xf32>
    %354 = vector.shape_cast %353 : vector<16xf32> to vector<16x1xf32>
    %cst_350 = arith.constant 3.200000e+01 : f32
    %355 = vector.broadcast %cst_350 : f32 to vector<16x1xf32>
    %356 = arith.divf %354, %355 : vector<16x1xf32>
    %357 = vector.broadcast %349 : vector<16x1xf32> to vector<16x32xf32>
    %358 = arith.subf %343, %357 : vector<16x32xf32>
    %cst_351 = arith.constant 9.99999997E-7 : f32
    %359 = vector.broadcast %cst_351 : f32 to vector<16x1xf32>
    %360 = arith.addf %356, %359 : vector<16x1xf32>
    %361 = math.rsqrt %360 : vector<16x1xf32>
    %362 = vector.broadcast %361 : vector<16x1xf32> to vector<16x32xf32>
    %363 = arith.mulf %358, %362 : vector<16x32xf32>
    %364 = vector.broadcast %344 : vector<1x32xf32> to vector<16x32xf32>
    %365 = arith.mulf %363, %364 : vector<16x32xf32>
    %366 = vector.broadcast %345 : vector<1x32xf32> to vector<16x32xf32>
    %367 = arith.addf %365, %366 : vector<16x32xf32>
    %368 = arith.truncf %367 : vector<16x32xf32> to vector<16x32xbf16>
    %c0_352 = arith.constant 0 : index
    %c0_353 = arith.constant 0 : index
    %369 = vector.load %arg8[%c0_352, %c0_353] : memref<32x128xbf16, #tpu.memory_space<vmem>>, vector<32x128xbf16>
    %cst_354 = arith.constant dense<0.000000e+00> : vector<16x128xf32>
    %370 = tpu.matmul %368, %369, %cst_354 {dimension_numbers = #tpu.dot_dimension_numbers<[1], [0], [0], [1], [0, 0, 1, 1], [], []>} : vector<16x32xbf16>, vector<32x128xbf16>, vector<16x128xf32> -> vector<16x128xf32>
    %c0_355 = arith.constant 0 : index
    %c0_356 = arith.constant 0 : index
    %371 = vector.load %arg9[%c0_355, %c0_356] : memref<1x128xf32, #tpu.memory_space<vmem>>, vector<1x128xf32>
    %372 = vector.broadcast %371 : vector<1x128xf32> to vector<16x128xf32>
    %373 = arith.addf %370, %372 : vector<16x128xf32>
    %cst_357 = arith.constant 5.000000e-01 : f32
    %374 = vector.broadcast %cst_357 : f32 to vector<16x128xf32>
    %375 = arith.mulf %374, %373 : vector<16x128xf32>
    %cst_358 = arith.constant 4.471500e-02 : f32
    %376 = vector.broadcast %cst_358 : f32 to vector<16x128xf32>
    %377 = arith.mulf %376, %373 : vector<16x128xf32>
    %378 = arith.mulf %377, %373 : vector<16x128xf32>
    %379 = arith.mulf %378, %373 : vector<16x128xf32>
    %380 = arith.addf %373, %379 : vector<16x128xf32>
    %cst_359 = arith.constant 0.797884583 : f32
    %381 = vector.broadcast %cst_359 : f32 to vector<16x128xf32>
    %382 = arith.mulf %381, %380 : vector<16x128xf32>
    %383 = math.tanh %382 : vector<16x128xf32>
    %cst_360 = arith.constant 1.000000e+00 : f32
    %384 = vector.broadcast %cst_360 : f32 to vector<16x128xf32>
    %385 = arith.addf %384, %383 : vector<16x128xf32>
    %386 = arith.mulf %375, %385 : vector<16x128xf32>
    %387 = arith.truncf %386 : vector<16x128xf32> to vector<16x128xbf16>
    %c0_361 = arith.constant 0 : index
    %c0_362 = arith.constant 0 : index
    %388 = vector.load %arg10[%c0_361, %c0_362] : memref<128x32xbf16, #tpu.memory_space<vmem>>, vector<128x32xbf16>
    %cst_363 = arith.constant dense<0.000000e+00> : vector<16x32xf32>
    %389 = tpu.matmul %387, %388, %cst_363 {dimension_numbers = #tpu.dot_dimension_numbers<[1], [0], [0], [1], [0, 0, 1, 1], [], []>} : vector<16x128xbf16>, vector<128x32xbf16>, vector<16x32xf32> -> vector<16x32xf32>
    %c0_364 = arith.constant 0 : index
    %c0_365 = arith.constant 0 : index
    %390 = vector.load %arg11[%c0_364, %c0_365] : memref<1x32xf32, #tpu.memory_space<vmem>>, vector<1x32xf32>
    %391 = vector.broadcast %390 : vector<1x32xf32> to vector<16x32xf32>
    %392 = arith.addf %389, %391 : vector<16x32xf32>
    %c0_366 = arith.constant 0 : index
    %c0_367 = arith.constant 0 : index
    %393 = vector.load %arg12[%c0_366, %c0_367] : memref<1x32xf32, #tpu.memory_space<vmem>>, vector<1x32xf32>
    %394 = vector.broadcast %393 : vector<1x32xf32> to vector<16x32xf32>
    %395 = arith.mulf %394, %392 : vector<16x32xf32>
    %396 = arith.addf %6, %395 : vector<16x32xf32>
    %c0_368 = arith.constant 0 : index
    %c0_369 = arith.constant 0 : index
    %397 = vector.load %arg13[%c0_368, %c0_369] : memref<1x32xf32, #tpu.memory_space<vmem>>, vector<1x32xf32>
    %c0_370 = arith.constant 0 : index
    %c0_371 = arith.constant 0 : index
    %398 = vector.load %arg14[%c0_370, %c0_371] : memref<1x32xf32, #tpu.memory_space<vmem>>, vector<1x32xf32>
    %cst_372 = arith.constant dense<0.000000e+00> : vector<16xf32>
    %399 = vector.multi_reduction <add>, %396, %cst_372 [1] : vector<16x32xf32> to vector<16xf32>
    %400 = vector.shape_cast %399 : vector<16xf32> to vector<16x1xf32>
    %cst_373 = arith.constant 3.200000e+01 : f32
    %401 = vector.broadcast %cst_373 : f32 to vector<16x1xf32>
    %402 = arith.divf %400, %401 : vector<16x1xf32>
    %403 = vector.broadcast %402 : vector<16x1xf32> to vector<16x32xf32>
    %404 = arith.subf %396, %403 : vector<16x32xf32>
    %405 = arith.mulf %404, %404 : vector<16x32xf32>
    %cst_374 = arith.constant dense<0.000000e+00> : vector<16xf32>
    %406 = vector.multi_reduction <add>, %405, %cst_374 [1] : vector<16x32xf32> to vector<16xf32>
    %407 = vector.shape_cast %406 : vector<16xf32> to vector<16x1xf32>
    %cst_375 = arith.constant 3.200000e+01 : f32
    %408 = vector.broadcast %cst_375 : f32 to vector<16x1xf32>
    %409 = arith.divf %407, %408 : vector<16x1xf32>
    %410 = vector.broadcast %402 : vector<16x1xf32> to vector<16x32xf32>
    %411 = arith.subf %396, %410 : vector<16x32xf32>
    %cst_376 = arith.constant 9.99999997E-7 : f32
    %412 = vector.broadcast %cst_376 : f32 to vector<16x1xf32>
    %413 = arith.addf %409, %412 : vector<16x1xf32>
    %414 = math.rsqrt %413 : vector<16x1xf32>
    %415 = vector.broadcast %414 : vector<16x1xf32> to vector<16x32xf32>
    %416 = arith.mulf %411, %415 : vector<16x32xf32>
    %417 = vector.broadcast %397 : vector<1x32xf32> to vector<16x32xf32>
    %418 = arith.mulf %416, %417 : vector<16x32xf32>
    %419 = vector.broadcast %398 : vector<1x32xf32> to vector<16x32xf32>
    %420 = arith.addf %418, %419 : vector<16x32xf32>
    %421 = arith.truncf %420 : vector<16x32xf32> to vector<16x32xbf16>
    %c0_377 = arith.constant 0 : index
    %c0_378 = arith.constant 0 : index
    %c0_379 = arith.constant 0 : index
    %422 = vector.load %arg15[%c0_377, %c0_378, %c0_379] : memref<1x16x32xbf16, #tpu.memory_space<vmem>>, vector<1x16x32xbf16>
    %423 = vector.shape_cast %422 : vector<1x16x32xbf16> to vector<16x32xbf16>
    %424 = vector.shape_cast %421 : vector<16x32xbf16> to vector<1x16x32xbf16>
    tpu.vector_store %arg15[%c0_377, %c0_378, %c0_379], %424 {strides = array<i32>} : memref<1x16x32xbf16, #tpu.memory_space<vmem>>, vector<1x16x32xbf16>,
    return
  }
  func.func @transform_0(%arg0: i32) -> (i32, i32, i32) {
    %c0_i32 = arith.constant 0 : i32
    %c0_i32_0 = arith.constant 0 : i32
    %c0_i32_1 = arith.constant 0 : i32
    return %arg0, %c0_i32, %c0_i32_0 : i32, i32, i32
  }
  func.func @transform_1(%arg0: i32) -> (i32, i32) {
    %c0_i32 = arith.constant 0 : i32
    %c0_i32_0 = arith.constant 0 : i32
    %c0_i32_1 = arith.constant 0 : i32
    return %c0_i32, %c0_i32_0 : i32, i32
  }
  func.func @transform_2(%arg0: i32) -> (i32, i32) {
    %c0_i32 = arith.constant 0 : i32
    %c0_i32_0 = arith.constant 0 : i32
    %c0_i32_1 = arith.constant 0 : i32
    return %c0_i32, %c0_i32_0 : i32, i32
  }
  func.func @transform_3(%arg0: i32) -> (i32, i32, i32, i32) {
    %c0_i32 = arith.constant 0 : i32
    %c0_i32_0 = arith.constant 0 : i32
    %c0_i32_1 = arith.constant 0 : i32
    %c0_i32_2 = arith.constant 0 : i32
    %c0_i32_3 = arith.constant 0 : i32
    return %c0_i32, %c0_i32_0, %c0_i32_1, %c0_i32_2 : i32, i32, i32, i32
  }
  func.func @transform_4(%arg0: i32) -> (i32, i32) {
    %c0_i32 = arith.constant 0 : i32
    %c0_i32_0 = arith.constant 0 : i32
    %c0_i32_1 = arith.constant 0 : i32
    return %c0_i32, %c0_i32_0 : i32, i32
  }
  func.func @transform_5(%arg0: i32) -> (i32, i32) {
    %c0_i32 = arith.constant 0 : i32
    %c0_i32_0 = arith.constant 0 : i32
    %c0_i32_1 = arith.constant 0 : i32
    return %c0_i32, %c0_i32_0 : i32, i32
  }
  func.func @transform_6(%arg0: i32) -> (i32, i32) {
    %c0_i32 = arith.constant 0 : i32
    %c0_i32_0 = arith.constant 0 : i32
    %c0_i32_1 = arith.constant 0 : i32
    return %c0_i32, %c0_i32_0 : i32, i32
  }
  func.func @transform_7(%arg0: i32) -> (i32, i32) {
    %c0_i32 = arith.constant 0 : i32
    %c0_i32_0 = arith.constant 0 : i32
    %c0_i32_1 = arith.constant 0 : i32
    return %c0_i32, %c0_i32_0 : i32, i32
  }
  func.func @transform_8(%arg0: i32) -> (i32, i32) {
    %c0_i32 = arith.constant 0 : i32
    %c0_i32_0 = arith.constant 0 : i32
    %c0_i32_1 = arith.constant 0 : i32
    return %c0_i32, %c0_i32_0 : i32, i32
  }
  func.func @transform_9(%arg0: i32) -> (i32, i32) {
    %c0_i32 = arith.constant 0 : i32
    %c0_i32_0 = arith.constant 0 : i32
    %c0_i32_1 = arith.constant 0 : i32
    return %c0_i32, %c0_i32_0 : i32, i32
  }
  func.func @transform_10(%arg0: i32) -> (i32, i32) {
    %c0_i32 = arith.constant 0 : i32
    %c0_i32_0 = arith.constant 0 : i32
    %c0_i32_1 = arith.constant 0 : i32
    return %c0_i32, %c0_i32_0 : i32, i32
  }
  func.func @transform_11(%arg0: i32) -> (i32, i32) {
    %c0_i32 = arith.constant 0 : i32
    %c0_i32_0 = arith.constant 0 : i32
    %c0_i32_1 = arith.constant 0 : i32
    return %c0_i32, %c0_i32_0 : i32, i32
  }
  func.func @transform_12(%arg0: i32) -> (i32, i32) {
    %c0_i32 = arith.constant 0 : i32
    %c0_i32_0 = arith.constant 0 : i32
    %c0_i32_1 = arith.constant 0 : i32
    return %c0_i32, %c0_i32_0 : i32, i32
  }
  func.func @transform_13(%arg0: i32) -> (i32, i32) {
    %c0_i32 = arith.constant 0 : i32
    %c0_i32_0 = arith.constant 0 : i32
    %c0_i32_1 = arith.constant 0 : i32
    return %c0_i32, %c0_i32_0 : i32, i32
  }
  func.func @transform_14(%arg0: i32) -> (i32, i32, i32) {
    %c0_i32 = arith.constant 0 : i32
    %c0_i32_0 = arith.constant 0 : i32
    %c0_i32_1 = arith.constant 0 : i32
    return %arg0, %c0_i32, %c0_i32_0 : i32, i32, i32
  }
}

module attributes {stable_mosaic.version = 11 : i64} {
  func.func @kernel(%arg0: i32, %arg1: memref<1x4x128xbf16, #tpu.memory_space<vmem>>, %arg2: memref<128x64xbf16, #tpu.memory_space<vmem>>, %arg3: memref<1x64xf32, #tpu.memory_space<vmem>>, %arg4: memref<9x1x1x64xf32, #tpu.memory_space<vmem>>, %arg5: memref<1x64xf32, #tpu.memory_space<vmem>>, %arg6: memref<1x64xf32, #tpu.memory_space<vmem>>, %arg7: memref<1x64xf32, #tpu.memory_space<vmem>>, %arg8: memref<64x256xbf16, #tpu.memory_space<vmem>>, %arg9: memref<1x256xf32, #tpu.memory_space<vmem>>, %arg10: memref<256x64xbf16, #tpu.memory_space<vmem>>, %arg11: memref<1x64xf32, #tpu.memory_space<vmem>>, %arg12: memref<1x64xf32, #tpu.memory_space<vmem>>, %arg13: memref<1x64xf32, #tpu.memory_space<vmem>>, %arg14: memref<1x64xf32, #tpu.memory_space<vmem>>, %arg15: memref<1x4x64xbf16, #tpu.memory_space<vmem>>, %arg16: memref<8x8x64xf32, #tpu.memory_space<vmem>>, %arg17: memref<4x64xf32, #tpu.memory_space<vmem>>) attributes {dimension_semantics = [#tpu.dimension_semantics<parallel>], iteration_bounds = array<i64: 2>, scalar_prefetch = 0 : i64, scratch_operands = 2 : i64, tpu.core_type = #tpu.core_type<tc>, window_params = [{transform_indices = @transform_0, window_bounds = array<i64: 1, 4, 128>}, {pipeline_mode = #tpu.pipeline_mode<synchronous>, transform_indices = @transform_1, window_bounds = array<i64: 128, 64>}, {pipeline_mode = #tpu.pipeline_mode<synchronous>, transform_indices = @transform_2, window_bounds = array<i64: 1, 64>}, {pipeline_mode = #tpu.pipeline_mode<synchronous>, transform_indices = @transform_3, window_bounds = array<i64: 9, 1, 1, 64>}, {pipeline_mode = #tpu.pipeline_mode<synchronous>, transform_indices = @transform_4, window_bounds = array<i64: 1, 64>}, {pipeline_mode = #tpu.pipeline_mode<synchronous>, transform_indices = @transform_5, window_bounds = array<i64: 1, 64>}, {pipeline_mode = #tpu.pipeline_mode<synchronous>, transform_indices = @transform_6, window_bounds = array<i64: 1, 64>}, {pipeline_mode = #tpu.pipeline_mode<synchronous>, transform_indices = @transform_7, window_bounds = array<i64: 64, 256>}, {pipeline_mode = #tpu.pipeline_mode<synchronous>, transform_indices = @transform_8, window_bounds = array<i64: 1, 256>}, {pipeline_mode = #tpu.pipeline_mode<synchronous>, transform_indices = @transform_9, window_bounds = array<i64: 256, 64>}, {pipeline_mode = #tpu.pipeline_mode<synchronous>, transform_indices = @transform_10, window_bounds = array<i64: 1, 64>}, {pipeline_mode = #tpu.pipeline_mode<synchronous>, transform_indices = @transform_11, window_bounds = array<i64: 1, 64>}, {pipeline_mode = #tpu.pipeline_mode<synchronous>, transform_indices = @transform_12, window_bounds = array<i64: 1, 64>}, {pipeline_mode = #tpu.pipeline_mode<synchronous>, transform_indices = @transform_13, window_bounds = array<i64: 1, 64>}, {transform_indices = @transform_14, window_bounds = array<i64: 1, 4, 64>}]} {
    %c0 = arith.constant 0 : index
    %c0_0 = arith.constant 0 : index
    %c0_1 = arith.constant 0 : index
    %0 = vector.load %arg1[%c0, %c0_0, %c0_1] : memref<1x4x128xbf16, #tpu.memory_space<vmem>>, vector<1x4x128xbf16>
    %1 = vector.shape_cast %0 : vector<1x4x128xbf16> to vector<4x128xbf16>
    %c0_2 = arith.constant 0 : index
    %c0_3 = arith.constant 0 : index
    %2 = vector.load %arg2[%c0_2, %c0_3] : memref<128x64xbf16, #tpu.memory_space<vmem>>, vector<128x64xbf16>
    %cst = arith.constant dense<0.000000e+00> : vector<4x64xf32>
    %3 = tpu.matmul %1, %2, %cst {dimension_numbers = #tpu.dot_dimension_numbers<[1], [0], [0], [1], [0, 0, 1, 1], [], []>} : vector<4x128xbf16>, vector<128x64xbf16>, vector<4x64xf32> -> vector<4x64xf32>
    %c0_4 = arith.constant 0 : index
    %c0_5 = arith.constant 0 : index
    %4 = vector.load %arg3[%c0_4, %c0_5] : memref<1x64xf32, #tpu.memory_space<vmem>>, vector<1x64xf32>
    %5 = vector.broadcast %4 : vector<1x64xf32> to vector<4x64xf32>
    %6 = arith.addf %3, %5 : vector<4x64xf32>
    %cst_6 = arith.constant 0.000000e+00 : f32
    %7 = vector.broadcast %cst_6 : f32 to vector<3x8x64xf32>
    %c0_7 = arith.constant 0 : index
    %c0_8 = arith.constant 0 : index
    %c0_9 = arith.constant 0 : index
    %8 = vector.load %arg16[%c0_7, %c0_8, %c0_9] : memref<8x8x64xf32, #tpu.memory_space<vmem>>, vector<3x8x64xf32>
    tpu.vector_store %arg16[%c0_7, %c0_8, %c0_9], %7 {strides = array<i32>} : memref<8x8x64xf32, #tpu.memory_space<vmem>>, vector<3x8x64xf32>,
    %cst_10 = arith.constant 0.000000e+00 : f32
    %9 = vector.broadcast %cst_10 : f32 to vector<3x8x64xf32>
    %c5 = arith.constant 5 : index
    %c0_11 = arith.constant 0 : index
    %c0_12 = arith.constant 0 : index
    %10 = vector.load %arg16[%c5, %c0_11, %c0_12] : memref<8x8x64xf32, #tpu.memory_space<vmem>>, vector<3x8x64xf32>
    tpu.vector_store %arg16[%c5, %c0_11, %c0_12], %9 {strides = array<i32>} : memref<8x8x64xf32, #tpu.memory_space<vmem>>, vector<3x8x64xf32>,
    %cst_13 = arith.constant 0.000000e+00 : f32
    %11 = vector.broadcast %cst_13 : f32 to vector<2x3x64xf32>
    %c3 = arith.constant 3 : index
    %c0_14 = arith.constant 0 : index
    %c0_15 = arith.constant 0 : index
    %12 = vector.load %arg16[%c3, %c0_14, %c0_15] : memref<8x8x64xf32, #tpu.memory_space<vmem>>, vector<2x3x64xf32>
    tpu.vector_store %arg16[%c3, %c0_14, %c0_15], %11 {strides = array<i32>} : memref<8x8x64xf32, #tpu.memory_space<vmem>>, vector<2x3x64xf32>,
    %cst_16 = arith.constant 0.000000e+00 : f32
    %13 = vector.broadcast %cst_16 : f32 to vector<2x3x64xf32>
    %c3_17 = arith.constant 3 : index
    %c5_18 = arith.constant 5 : index
    %c0_19 = arith.constant 0 : index
    %14 = vector.load %arg16[%c3_17, %c5_18, %c0_19] : memref<8x8x64xf32, #tpu.memory_space<vmem>>, vector<2x3x64xf32>
    tpu.vector_store %arg16[%c3_17, %c5_18, %c0_19], %13 {strides = array<i32>} : memref<8x8x64xf32, #tpu.memory_space<vmem>>, vector<2x3x64xf32>,
    %15 = vector.extract_strided_slice %6 {offsets = [0, 0], sizes = [2, 64], strides = [1, 1]} : vector<4x64xf32> to vector<2x64xf32>
    %c3_20 = arith.constant 3 : index
    %c3_21 = arith.constant 3 : index
    %c0_22 = arith.constant 0 : index
    %16 = vector.load %arg16[%c3_20, %c3_21, %c0_22] : memref<8x8x64xf32, #tpu.memory_space<vmem>>, vector<1x2x64xf32>
    %17 = vector.shape_cast %16 : vector<1x2x64xf32> to vector<2x64xf32>
    %18 = vector.shape_cast %15 : vector<2x64xf32> to vector<1x2x64xf32>
    tpu.vector_store %arg16[%c3_20, %c3_21, %c0_22], %18 {strides = array<i32>} : memref<8x8x64xf32, #tpu.memory_space<vmem>>, vector<1x2x64xf32>,
    %19 = vector.extract_strided_slice %6 {offsets = [2, 0], sizes = [2, 64], strides = [1, 1]} : vector<4x64xf32> to vector<2x64xf32>
    %c4 = arith.constant 4 : index
    %c3_23 = arith.constant 3 : index
    %c0_24 = arith.constant 0 : index
    %20 = vector.load %arg16[%c4, %c3_23, %c0_24] : memref<8x8x64xf32, #tpu.memory_space<vmem>>, vector<1x2x64xf32>
    %21 = vector.shape_cast %20 : vector<1x2x64xf32> to vector<2x64xf32>
    %22 = vector.shape_cast %19 : vector<2x64xf32> to vector<1x2x64xf32>
    tpu.vector_store %arg16[%c4, %c3_23, %c0_24], %22 {strides = array<i32>} : memref<8x8x64xf32, #tpu.memory_space<vmem>>, vector<1x2x64xf32>,
    %cst_25 = arith.constant 0.000000e+00 : f32
    %23 = vector.broadcast %cst_25 : f32 to vector<2x2x64xf32>
    %cst_26 = arith.constant 0.000000e+00 : f32
    %24 = vector.broadcast %cst_26 : f32 to vector<2x2x64xf32>
    %c2 = arith.constant 2 : index
    %c2_27 = arith.constant 2 : index
    %c0_28 = arith.constant 0 : index
    %25 = vector.load %arg16[%c2, %c2_27, %c0_28] : memref<8x8x64xf32, #tpu.memory_space<vmem>>, vector<2x2x64xf32>
    %c0_29 = arith.constant 0 : index
    %c0_30 = arith.constant 0 : index
    %c0_31 = arith.constant 0 : index
    %c0_32 = arith.constant 0 : index
    %26 = vector.load %arg4[%c0_29, %c0_30, %c0_31, %c0_32] : memref<9x1x1x64xf32, #tpu.memory_space<vmem>>, vector<1x1x1x64xf32>
    %27 = vector.shape_cast %26 : vector<1x1x1x64xf32> to vector<1x1x64xf32>
    %28 = vector.broadcast %27 : vector<1x1x64xf32> to vector<2x2x64xf32>
    %29 = arith.mulf %25, %28 : vector<2x2x64xf32>
    %30 = arith.addf %23, %29 : vector<2x2x64xf32>
    %c2_33 = arith.constant 2 : index
    %c3_34 = arith.constant 3 : index
    %c0_35 = arith.constant 0 : index
    %31 = vector.load %arg16[%c2_33, %c3_34, %c0_35] : memref<8x8x64xf32, #tpu.memory_space<vmem>>, vector<2x2x64xf32>
    %c1 = arith.constant 1 : index
    %c0_36 = arith.constant 0 : index
    %c0_37 = arith.constant 0 : index
    %c0_38 = arith.constant 0 : index
    %32 = vector.load %arg4[%c1, %c0_36, %c0_37, %c0_38] : memref<9x1x1x64xf32, #tpu.memory_space<vmem>>, vector<1x1x1x64xf32>
    %33 = vector.shape_cast %32 : vector<1x1x1x64xf32> to vector<1x1x64xf32>
    %34 = vector.broadcast %33 : vector<1x1x64xf32> to vector<2x2x64xf32>
    %35 = arith.mulf %31, %34 : vector<2x2x64xf32>
    %36 = arith.addf %24, %35 : vector<2x2x64xf32>
    %c2_39 = arith.constant 2 : index
    %c4_40 = arith.constant 4 : index
    %c0_41 = arith.constant 0 : index
    %37 = vector.load %arg16[%c2_39, %c4_40, %c0_41] : memref<8x8x64xf32, #tpu.memory_space<vmem>>, vector<2x2x64xf32>
    %c2_42 = arith.constant 2 : index
    %c0_43 = arith.constant 0 : index
    %c0_44 = arith.constant 0 : index
    %c0_45 = arith.constant 0 : index
    %38 = vector.load %arg4[%c2_42, %c0_43, %c0_44, %c0_45] : memref<9x1x1x64xf32, #tpu.memory_space<vmem>>, vector<1x1x1x64xf32>
    %39 = vector.shape_cast %38 : vector<1x1x1x64xf32> to vector<1x1x64xf32>
    %40 = vector.broadcast %39 : vector<1x1x64xf32> to vector<2x2x64xf32>
    %41 = arith.mulf %37, %40 : vector<2x2x64xf32>
    %42 = arith.addf %30, %41 : vector<2x2x64xf32>
    %c3_46 = arith.constant 3 : index
    %c2_47 = arith.constant 2 : index
    %c0_48 = arith.constant 0 : index
    %43 = vector.load %arg16[%c3_46, %c2_47, %c0_48] : memref<8x8x64xf32, #tpu.memory_space<vmem>>, vector<2x2x64xf32>
    %c3_49 = arith.constant 3 : index
    %c0_50 = arith.constant 0 : index
    %c0_51 = arith.constant 0 : index
    %c0_52 = arith.constant 0 : index
    %44 = vector.load %arg4[%c3_49, %c0_50, %c0_51, %c0_52] : memref<9x1x1x64xf32, #tpu.memory_space<vmem>>, vector<1x1x1x64xf32>
    %45 = vector.shape_cast %44 : vector<1x1x1x64xf32> to vector<1x1x64xf32>
    %46 = vector.broadcast %45 : vector<1x1x64xf32> to vector<2x2x64xf32>
    %47 = arith.mulf %43, %46 : vector<2x2x64xf32>
    %48 = arith.addf %36, %47 : vector<2x2x64xf32>
    %c3_53 = arith.constant 3 : index
    %c3_54 = arith.constant 3 : index
    %c0_55 = arith.constant 0 : index
    %49 = vector.load %arg16[%c3_53, %c3_54, %c0_55] : memref<8x8x64xf32, #tpu.memory_space<vmem>>, vector<2x2x64xf32>
    %c4_56 = arith.constant 4 : index
    %c0_57 = arith.constant 0 : index
    %c0_58 = arith.constant 0 : index
    %c0_59 = arith.constant 0 : index
    %50 = vector.load %arg4[%c4_56, %c0_57, %c0_58, %c0_59] : memref<9x1x1x64xf32, #tpu.memory_space<vmem>>, vector<1x1x1x64xf32>
    %51 = vector.shape_cast %50 : vector<1x1x1x64xf32> to vector<1x1x64xf32>
    %52 = vector.broadcast %51 : vector<1x1x64xf32> to vector<2x2x64xf32>
    %53 = arith.mulf %49, %52 : vector<2x2x64xf32>
    %54 = arith.addf %42, %53 : vector<2x2x64xf32>
    %c3_60 = arith.constant 3 : index
    %c4_61 = arith.constant 4 : index
    %c0_62 = arith.constant 0 : index
    %55 = vector.load %arg16[%c3_60, %c4_61, %c0_62] : memref<8x8x64xf32, #tpu.memory_space<vmem>>, vector<2x2x64xf32>
    %c5_63 = arith.constant 5 : index
    %c0_64 = arith.constant 0 : index
    %c0_65 = arith.constant 0 : index
    %c0_66 = arith.constant 0 : index
    %56 = vector.load %arg4[%c5_63, %c0_64, %c0_65, %c0_66] : memref<9x1x1x64xf32, #tpu.memory_space<vmem>>, vector<1x1x1x64xf32>
    %57 = vector.shape_cast %56 : vector<1x1x1x64xf32> to vector<1x1x64xf32>
    %58 = vector.broadcast %57 : vector<1x1x64xf32> to vector<2x2x64xf32>
    %59 = arith.mulf %55, %58 : vector<2x2x64xf32>
    %60 = arith.addf %48, %59 : vector<2x2x64xf32>
    %c4_67 = arith.constant 4 : index
    %c2_68 = arith.constant 2 : index
    %c0_69 = arith.constant 0 : index
    %61 = vector.load %arg16[%c4_67, %c2_68, %c0_69] : memref<8x8x64xf32, #tpu.memory_space<vmem>>, vector<2x2x64xf32>
    %c6 = arith.constant 6 : index
    %c0_70 = arith.constant 0 : index
    %c0_71 = arith.constant 0 : index
    %c0_72 = arith.constant 0 : index
    %62 = vector.load %arg4[%c6, %c0_70, %c0_71, %c0_72] : memref<9x1x1x64xf32, #tpu.memory_space<vmem>>, vector<1x1x1x64xf32>
    %63 = vector.shape_cast %62 : vector<1x1x1x64xf32> to vector<1x1x64xf32>
    %64 = vector.broadcast %63 : vector<1x1x64xf32> to vector<2x2x64xf32>
    %65 = arith.mulf %61, %64 : vector<2x2x64xf32>
    %66 = arith.addf %54, %65 : vector<2x2x64xf32>
    %c4_73 = arith.constant 4 : index
    %c3_74 = arith.constant 3 : index
    %c0_75 = arith.constant 0 : index
    %67 = vector.load %arg16[%c4_73, %c3_74, %c0_75] : memref<8x8x64xf32, #tpu.memory_space<vmem>>, vector<2x2x64xf32>
    %c7 = arith.constant 7 : index
    %c0_76 = arith.constant 0 : index
    %c0_77 = arith.constant 0 : index
    %c0_78 = arith.constant 0 : index
    %68 = vector.load %arg4[%c7, %c0_76, %c0_77, %c0_78] : memref<9x1x1x64xf32, #tpu.memory_space<vmem>>, vector<1x1x1x64xf32>
    %69 = vector.shape_cast %68 : vector<1x1x1x64xf32> to vector<1x1x64xf32>
    %70 = vector.broadcast %69 : vector<1x1x64xf32> to vector<2x2x64xf32>
    %71 = arith.mulf %67, %70 : vector<2x2x64xf32>
    %72 = arith.addf %60, %71 : vector<2x2x64xf32>
    %c4_79 = arith.constant 4 : index
    %c4_80 = arith.constant 4 : index
    %c0_81 = arith.constant 0 : index
    %73 = vector.load %arg16[%c4_79, %c4_80, %c0_81] : memref<8x8x64xf32, #tpu.memory_space<vmem>>, vector<2x2x64xf32>
    %c8 = arith.constant 8 : index
    %c0_82 = arith.constant 0 : index
    %c0_83 = arith.constant 0 : index
    %c0_84 = arith.constant 0 : index
    %74 = vector.load %arg4[%c8, %c0_82, %c0_83, %c0_84] : memref<9x1x1x64xf32, #tpu.memory_space<vmem>>, vector<1x1x1x64xf32>
    %75 = vector.shape_cast %74 : vector<1x1x1x64xf32> to vector<1x1x64xf32>
    %76 = vector.broadcast %75 : vector<1x1x64xf32> to vector<2x2x64xf32>
    %77 = arith.mulf %73, %76 : vector<2x2x64xf32>
    %78 = arith.addf %66, %77 : vector<2x2x64xf32>
    %79 = arith.addf %78, %72 : vector<2x2x64xf32>
    %80 = vector.extract_strided_slice %79 {offsets = [0, 0, 0], sizes = [1, 2, 64], strides = [1, 1, 1]} : vector<2x2x64xf32> to vector<1x2x64xf32>
    %81 = vector.shape_cast %80 : vector<1x2x64xf32> to vector<2x64xf32>
    %c0_85 = arith.constant 0 : index
    %c0_86 = arith.constant 0 : index
    %82 = vector.load %arg17[%c0_85, %c0_86] : memref<4x64xf32, #tpu.memory_space<vmem>>, vector<2x64xf32>
    tpu.vector_store %arg17[%c0_85, %c0_86], %81 {strides = array<i32>} : memref<4x64xf32, #tpu.memory_space<vmem>>, vector<2x64xf32>,
    %83 = vector.extract_strided_slice %79 {offsets = [1, 0, 0], sizes = [1, 2, 64], strides = [1, 1, 1]} : vector<2x2x64xf32> to vector<1x2x64xf32>
    %84 = vector.shape_cast %83 : vector<1x2x64xf32> to vector<2x64xf32>
    %c2_87 = arith.constant 2 : index
    %c0_88 = arith.constant 0 : index
    %85 = vector.load %arg17[%c2_87, %c0_88] : memref<4x64xf32, #tpu.memory_space<vmem>>, vector<2x64xf32>
    tpu.vector_store %arg17[%c2_87, %c0_88], %84 {strides = array<i32>} : memref<4x64xf32, #tpu.memory_space<vmem>>, vector<2x64xf32>,
    %c0_89 = arith.constant 0 : index
    %c0_90 = arith.constant 0 : index
    %86 = vector.load %arg17[%c0_89, %c0_90] : memref<4x64xf32, #tpu.memory_space<vmem>>, vector<4x64xf32>
    %c0_91 = arith.constant 0 : index
    %c0_92 = arith.constant 0 : index
    %87 = vector.load %arg5[%c0_91, %c0_92] : memref<1x64xf32, #tpu.memory_space<vmem>>, vector<1x64xf32>
    %88 = vector.broadcast %87 : vector<1x64xf32> to vector<4x64xf32>
    %89 = arith.addf %86, %88 : vector<4x64xf32>
    %c0_93 = arith.constant 0 : index
    %c0_94 = arith.constant 0 : index
    %90 = vector.load %arg6[%c0_93, %c0_94] : memref<1x64xf32, #tpu.memory_space<vmem>>, vector<1x64xf32>
    %c0_95 = arith.constant 0 : index
    %c0_96 = arith.constant 0 : index
    %91 = vector.load %arg7[%c0_95, %c0_96] : memref<1x64xf32, #tpu.memory_space<vmem>>, vector<1x64xf32>
    %cst_97 = arith.constant dense<0.000000e+00> : vector<4xf32>
    %92 = vector.multi_reduction <add>, %89, %cst_97 [1] : vector<4x64xf32> to vector<4xf32>
    %93 = vector.shape_cast %92 : vector<4xf32> to vector<4x1xf32>
    %cst_98 = arith.constant 6.400000e+01 : f32
    %94 = vector.broadcast %cst_98 : f32 to vector<4x1xf32>
    %95 = arith.divf %93, %94 : vector<4x1xf32>
    %96 = vector.broadcast %95 : vector<4x1xf32> to vector<4x64xf32>
    %97 = arith.subf %89, %96 : vector<4x64xf32>
    %98 = arith.mulf %97, %97 : vector<4x64xf32>
    %cst_99 = arith.constant dense<0.000000e+00> : vector<4xf32>
    %99 = vector.multi_reduction <add>, %98, %cst_99 [1] : vector<4x64xf32> to vector<4xf32>
    %100 = vector.shape_cast %99 : vector<4xf32> to vector<4x1xf32>
    %cst_100 = arith.constant 6.400000e+01 : f32
    %101 = vector.broadcast %cst_100 : f32 to vector<4x1xf32>
    %102 = arith.divf %100, %101 : vector<4x1xf32>
    %103 = vector.broadcast %95 : vector<4x1xf32> to vector<4x64xf32>
    %104 = arith.subf %89, %103 : vector<4x64xf32>
    %cst_101 = arith.constant 9.99999997E-7 : f32
    %105 = vector.broadcast %cst_101 : f32 to vector<4x1xf32>
    %106 = arith.addf %102, %105 : vector<4x1xf32>
    %107 = math.rsqrt %106 : vector<4x1xf32>
    %108 = vector.broadcast %107 : vector<4x1xf32> to vector<4x64xf32>
    %109 = arith.mulf %104, %108 : vector<4x64xf32>
    %110 = vector.broadcast %90 : vector<1x64xf32> to vector<4x64xf32>
    %111 = arith.mulf %109, %110 : vector<4x64xf32>
    %112 = vector.broadcast %91 : vector<1x64xf32> to vector<4x64xf32>
    %113 = arith.addf %111, %112 : vector<4x64xf32>
    %114 = arith.truncf %113 : vector<4x64xf32> to vector<4x64xbf16>
    %c0_102 = arith.constant 0 : index
    %c0_103 = arith.constant 0 : index
    %115 = vector.load %arg8[%c0_102, %c0_103] : memref<64x256xbf16, #tpu.memory_space<vmem>>, vector<64x256xbf16>
    %cst_104 = arith.constant dense<0.000000e+00> : vector<4x256xf32>
    %116 = tpu.matmul %114, %115, %cst_104 {dimension_numbers = #tpu.dot_dimension_numbers<[1], [0], [0], [1], [0, 0, 1, 1], [], []>} : vector<4x64xbf16>, vector<64x256xbf16>, vector<4x256xf32> -> vector<4x256xf32>
    %c0_105 = arith.constant 0 : index
    %c0_106 = arith.constant 0 : index
    %117 = vector.load %arg9[%c0_105, %c0_106] : memref<1x256xf32, #tpu.memory_space<vmem>>, vector<1x256xf32>
    %118 = vector.broadcast %117 : vector<1x256xf32> to vector<4x256xf32>
    %119 = arith.addf %116, %118 : vector<4x256xf32>
    %cst_107 = arith.constant 5.000000e-01 : f32
    %120 = vector.broadcast %cst_107 : f32 to vector<4x256xf32>
    %121 = arith.mulf %120, %119 : vector<4x256xf32>
    %cst_108 = arith.constant 4.471500e-02 : f32
    %122 = vector.broadcast %cst_108 : f32 to vector<4x256xf32>
    %123 = arith.mulf %122, %119 : vector<4x256xf32>
    %124 = arith.mulf %123, %119 : vector<4x256xf32>
    %125 = arith.mulf %124, %119 : vector<4x256xf32>
    %126 = arith.addf %119, %125 : vector<4x256xf32>
    %cst_109 = arith.constant 0.797884583 : f32
    %127 = vector.broadcast %cst_109 : f32 to vector<4x256xf32>
    %128 = arith.mulf %127, %126 : vector<4x256xf32>
    %129 = math.tanh %128 : vector<4x256xf32>
    %cst_110 = arith.constant 1.000000e+00 : f32
    %130 = vector.broadcast %cst_110 : f32 to vector<4x256xf32>
    %131 = arith.addf %130, %129 : vector<4x256xf32>
    %132 = arith.mulf %121, %131 : vector<4x256xf32>
    %133 = arith.truncf %132 : vector<4x256xf32> to vector<4x256xbf16>
    %c0_111 = arith.constant 0 : index
    %c0_112 = arith.constant 0 : index
    %134 = vector.load %arg10[%c0_111, %c0_112] : memref<256x64xbf16, #tpu.memory_space<vmem>>, vector<256x64xbf16>
    %cst_113 = arith.constant dense<0.000000e+00> : vector<4x64xf32>
    %135 = tpu.matmul %133, %134, %cst_113 {dimension_numbers = #tpu.dot_dimension_numbers<[1], [0], [0], [1], [0, 0, 1, 1], [], []>} : vector<4x256xbf16>, vector<256x64xbf16>, vector<4x64xf32> -> vector<4x64xf32>
    %c0_114 = arith.constant 0 : index
    %c0_115 = arith.constant 0 : index
    %136 = vector.load %arg11[%c0_114, %c0_115] : memref<1x64xf32, #tpu.memory_space<vmem>>, vector<1x64xf32>
    %137 = vector.broadcast %136 : vector<1x64xf32> to vector<4x64xf32>
    %138 = arith.addf %135, %137 : vector<4x64xf32>
    %c0_116 = arith.constant 0 : index
    %c0_117 = arith.constant 0 : index
    %139 = vector.load %arg12[%c0_116, %c0_117] : memref<1x64xf32, #tpu.memory_space<vmem>>, vector<1x64xf32>
    %140 = vector.broadcast %139 : vector<1x64xf32> to vector<4x64xf32>
    %141 = arith.mulf %140, %138 : vector<4x64xf32>
    %142 = arith.addf %6, %141 : vector<4x64xf32>
    %c0_118 = arith.constant 0 : index
    %c0_119 = arith.constant 0 : index
    %143 = vector.load %arg13[%c0_118, %c0_119] : memref<1x64xf32, #tpu.memory_space<vmem>>, vector<1x64xf32>
    %c0_120 = arith.constant 0 : index
    %c0_121 = arith.constant 0 : index
    %144 = vector.load %arg14[%c0_120, %c0_121] : memref<1x64xf32, #tpu.memory_space<vmem>>, vector<1x64xf32>
    %cst_122 = arith.constant dense<0.000000e+00> : vector<4xf32>
    %145 = vector.multi_reduction <add>, %142, %cst_122 [1] : vector<4x64xf32> to vector<4xf32>
    %146 = vector.shape_cast %145 : vector<4xf32> to vector<4x1xf32>
    %cst_123 = arith.constant 6.400000e+01 : f32
    %147 = vector.broadcast %cst_123 : f32 to vector<4x1xf32>
    %148 = arith.divf %146, %147 : vector<4x1xf32>
    %149 = vector.broadcast %148 : vector<4x1xf32> to vector<4x64xf32>
    %150 = arith.subf %142, %149 : vector<4x64xf32>
    %151 = arith.mulf %150, %150 : vector<4x64xf32>
    %cst_124 = arith.constant dense<0.000000e+00> : vector<4xf32>
    %152 = vector.multi_reduction <add>, %151, %cst_124 [1] : vector<4x64xf32> to vector<4xf32>
    %153 = vector.shape_cast %152 : vector<4xf32> to vector<4x1xf32>
    %cst_125 = arith.constant 6.400000e+01 : f32
    %154 = vector.broadcast %cst_125 : f32 to vector<4x1xf32>
    %155 = arith.divf %153, %154 : vector<4x1xf32>
    %156 = vector.broadcast %148 : vector<4x1xf32> to vector<4x64xf32>
    %157 = arith.subf %142, %156 : vector<4x64xf32>
    %cst_126 = arith.constant 9.99999997E-7 : f32
    %158 = vector.broadcast %cst_126 : f32 to vector<4x1xf32>
    %159 = arith.addf %155, %158 : vector<4x1xf32>
    %160 = math.rsqrt %159 : vector<4x1xf32>
    %161 = vector.broadcast %160 : vector<4x1xf32> to vector<4x64xf32>
    %162 = arith.mulf %157, %161 : vector<4x64xf32>
    %163 = vector.broadcast %143 : vector<1x64xf32> to vector<4x64xf32>
    %164 = arith.mulf %162, %163 : vector<4x64xf32>
    %165 = vector.broadcast %144 : vector<1x64xf32> to vector<4x64xf32>
    %166 = arith.addf %164, %165 : vector<4x64xf32>
    %167 = arith.truncf %166 : vector<4x64xf32> to vector<4x64xbf16>
    %c0_127 = arith.constant 0 : index
    %c0_128 = arith.constant 0 : index
    %c0_129 = arith.constant 0 : index
    %168 = vector.load %arg15[%c0_127, %c0_128, %c0_129] : memref<1x4x64xbf16, #tpu.memory_space<vmem>>, vector<1x4x64xbf16>
    %169 = vector.shape_cast %168 : vector<1x4x64xbf16> to vector<4x64xbf16>
    %170 = vector.shape_cast %167 : vector<4x64xbf16> to vector<1x4x64xbf16>
    tpu.vector_store %arg15[%c0_127, %c0_128, %c0_129], %170 {strides = array<i32>} : memref<1x4x64xbf16, #tpu.memory_space<vmem>>, vector<1x4x64xbf16>,
    return
  }
  func.func @transform_0(%arg0: i32) -> (i32, i32, i32) {
    %c0_i32 = arith.constant 0 : i32
    %c0_i32_0 = arith.constant 0 : i32
    %c0_i32_1 = arith.constant 0 : i32
    return %arg0, %c0_i32, %c0_i32_0 : i32, i32, i32
  }
  func.func @transform_1(%arg0: i32) -> (i32, i32) {
    %c0_i32 = arith.constant 0 : i32
    %c0_i32_0 = arith.constant 0 : i32
    %c0_i32_1 = arith.constant 0 : i32
    return %c0_i32, %c0_i32_0 : i32, i32
  }
  func.func @transform_2(%arg0: i32) -> (i32, i32) {
    %c0_i32 = arith.constant 0 : i32
    %c0_i32_0 = arith.constant 0 : i32
    %c0_i32_1 = arith.constant 0 : i32
    return %c0_i32, %c0_i32_0 : i32, i32
  }
  func.func @transform_3(%arg0: i32) -> (i32, i32, i32, i32) {
    %c0_i32 = arith.constant 0 : i32
    %c0_i32_0 = arith.constant 0 : i32
    %c0_i32_1 = arith.constant 0 : i32
    %c0_i32_2 = arith.constant 0 : i32
    %c0_i32_3 = arith.constant 0 : i32
    return %c0_i32, %c0_i32_0, %c0_i32_1, %c0_i32_2 : i32, i32, i32, i32
  }
  func.func @transform_4(%arg0: i32) -> (i32, i32) {
    %c0_i32 = arith.constant 0 : i32
    %c0_i32_0 = arith.constant 0 : i32
    %c0_i32_1 = arith.constant 0 : i32
    return %c0_i32, %c0_i32_0 : i32, i32
  }
  func.func @transform_5(%arg0: i32) -> (i32, i32) {
    %c0_i32 = arith.constant 0 : i32
    %c0_i32_0 = arith.constant 0 : i32
    %c0_i32_1 = arith.constant 0 : i32
    return %c0_i32, %c0_i32_0 : i32, i32
  }
  func.func @transform_6(%arg0: i32) -> (i32, i32) {
    %c0_i32 = arith.constant 0 : i32
    %c0_i32_0 = arith.constant 0 : i32
    %c0_i32_1 = arith.constant 0 : i32
    return %c0_i32, %c0_i32_0 : i32, i32
  }
  func.func @transform_7(%arg0: i32) -> (i32, i32) {
    %c0_i32 = arith.constant 0 : i32
    %c0_i32_0 = arith.constant 0 : i32
    %c0_i32_1 = arith.constant 0 : i32
    return %c0_i32, %c0_i32_0 : i32, i32
  }
  func.func @transform_8(%arg0: i32) -> (i32, i32) {
    %c0_i32 = arith.constant 0 : i32
    %c0_i32_0 = arith.constant 0 : i32
    %c0_i32_1 = arith.constant 0 : i32
    return %c0_i32, %c0_i32_0 : i32, i32
  }
  func.func @transform_9(%arg0: i32) -> (i32, i32) {
    %c0_i32 = arith.constant 0 : i32
    %c0_i32_0 = arith.constant 0 : i32
    %c0_i32_1 = arith.constant 0 : i32
    return %c0_i32, %c0_i32_0 : i32, i32
  }
  func.func @transform_10(%arg0: i32) -> (i32, i32) {
    %c0_i32 = arith.constant 0 : i32
    %c0_i32_0 = arith.constant 0 : i32
    %c0_i32_1 = arith.constant 0 : i32
    return %c0_i32, %c0_i32_0 : i32, i32
  }
  func.func @transform_11(%arg0: i32) -> (i32, i32) {
    %c0_i32 = arith.constant 0 : i32
    %c0_i32_0 = arith.constant 0 : i32
    %c0_i32_1 = arith.constant 0 : i32
    return %c0_i32, %c0_i32_0 : i32, i32
  }
  func.func @transform_12(%arg0: i32) -> (i32, i32) {
    %c0_i32 = arith.constant 0 : i32
    %c0_i32_0 = arith.constant 0 : i32
    %c0_i32_1 = arith.constant 0 : i32
    return %c0_i32, %c0_i32_0 : i32, i32
  }
  func.func @transform_13(%arg0: i32) -> (i32, i32) {
    %c0_i32 = arith.constant 0 : i32
    %c0_i32_0 = arith.constant 0 : i32
    %c0_i32_1 = arith.constant 0 : i32
    return %c0_i32, %c0_i32_0 : i32, i32
  }
  func.func @transform_14(%arg0: i32) -> (i32, i32, i32) {
    %c0_i32 = arith.constant 0 : i32
    %c0_i32_0 = arith.constant 0 : i32
    %c0_i32_1 = arith.constant 0 : i32
    return %arg0, %c0_i32, %c0_i32_0 : i32, i32, i32
  }
}

module attributes {stable_mosaic.version = 11 : i64} {
  func.func @kernel(%arg0: i32, %arg1: memref<1x1x256xbf16, #tpu.memory_space<vmem>>, %arg2: memref<256x128xbf16, #tpu.memory_space<vmem>>, %arg3: memref<1x128xf32, #tpu.memory_space<vmem>>, %arg4: memref<1x1x1x128xf32, #tpu.memory_space<vmem>>, %arg5: memref<1x128xf32, #tpu.memory_space<vmem>>, %arg6: memref<1x128xf32, #tpu.memory_space<vmem>>, %arg7: memref<1x128xf32, #tpu.memory_space<vmem>>, %arg8: memref<128x512xbf16, #tpu.memory_space<vmem>>, %arg9: memref<1x512xf32, #tpu.memory_space<vmem>>, %arg10: memref<512x128xbf16, #tpu.memory_space<vmem>>, %arg11: memref<1x128xf32, #tpu.memory_space<vmem>>, %arg12: memref<1x128xf32, #tpu.memory_space<vmem>>, %arg13: memref<1x128xf32, #tpu.memory_space<vmem>>, %arg14: memref<1x128xf32, #tpu.memory_space<vmem>>, %arg15: memref<128x10xbf16, #tpu.memory_space<vmem>>, %arg16: memref<1x10xf32, #tpu.memory_space<vmem>>, %arg17: memref<1x1x10xf32, #tpu.memory_space<vmem>>, %arg18: memref<7x7x128xf32, #tpu.memory_space<vmem>>, %arg19: memref<1x128xf32, #tpu.memory_space<vmem>>) attributes {dimension_semantics = [#tpu.dimension_semantics<parallel>], iteration_bounds = array<i64: 2>, scalar_prefetch = 0 : i64, scratch_operands = 2 : i64, tpu.core_type = #tpu.core_type<tc>, window_params = [{transform_indices = @transform_0, window_bounds = array<i64: 1, 1, 256>}, {pipeline_mode = #tpu.pipeline_mode<synchronous>, transform_indices = @transform_1, window_bounds = array<i64: 256, 128>}, {pipeline_mode = #tpu.pipeline_mode<synchronous>, transform_indices = @transform_2, window_bounds = array<i64: 1, 128>}, {pipeline_mode = #tpu.pipeline_mode<synchronous>, transform_indices = @transform_3, window_bounds = array<i64: 1, 1, 1, 128>}, {pipeline_mode = #tpu.pipeline_mode<synchronous>, transform_indices = @transform_4, window_bounds = array<i64: 1, 128>}, {pipeline_mode = #tpu.pipeline_mode<synchronous>, transform_indices = @transform_5, window_bounds = array<i64: 1, 128>}, {pipeline_mode = #tpu.pipeline_mode<synchronous>, transform_indices = @transform_6, window_bounds = array<i64: 1, 128>}, {pipeline_mode = #tpu.pipeline_mode<synchronous>, transform_indices = @transform_7, window_bounds = array<i64: 128, 512>}, {pipeline_mode = #tpu.pipeline_mode<synchronous>, transform_indices = @transform_8, window_bounds = array<i64: 1, 512>}, {pipeline_mode = #tpu.pipeline_mode<synchronous>, transform_indices = @transform_9, window_bounds = array<i64: 512, 128>}, {pipeline_mode = #tpu.pipeline_mode<synchronous>, transform_indices = @transform_10, window_bounds = array<i64: 1, 128>}, {pipeline_mode = #tpu.pipeline_mode<synchronous>, transform_indices = @transform_11, window_bounds = array<i64: 1, 128>}, {pipeline_mode = #tpu.pipeline_mode<synchronous>, transform_indices = @transform_12, window_bounds = array<i64: 1, 128>}, {pipeline_mode = #tpu.pipeline_mode<synchronous>, transform_indices = @transform_13, window_bounds = array<i64: 1, 128>}, {pipeline_mode = #tpu.pipeline_mode<synchronous>, transform_indices = @transform_14, window_bounds = array<i64: 128, 10>}, {pipeline_mode = #tpu.pipeline_mode<synchronous>, transform_indices = @transform_15, window_bounds = array<i64: 1, 10>}, {transform_indices = @transform_16, window_bounds = array<i64: 1, 1, 10>}]} {
    %c0 = arith.constant 0 : index
    %c0_0 = arith.constant 0 : index
    %c0_1 = arith.constant 0 : index
    %0 = vector.load %arg1[%c0, %c0_0, %c0_1] : memref<1x1x256xbf16, #tpu.memory_space<vmem>>, vector<1x1x256xbf16>
    %1 = vector.shape_cast %0 : vector<1x1x256xbf16> to vector<1x256xbf16>
    %c0_2 = arith.constant 0 : index
    %c0_3 = arith.constant 0 : index
    %2 = vector.load %arg2[%c0_2, %c0_3] : memref<256x128xbf16, #tpu.memory_space<vmem>>, vector<256x128xbf16>
    %cst = arith.constant dense<0.000000e+00> : vector<1x128xf32>
    %3 = tpu.matmul %1, %2, %cst {dimension_numbers = #tpu.dot_dimension_numbers<[1], [0], [0], [1], [0, 0, 1, 1], [], []>} : vector<1x256xbf16>, vector<256x128xbf16>, vector<1x128xf32> -> vector<1x128xf32>
    %c0_4 = arith.constant 0 : index
    %c0_5 = arith.constant 0 : index
    %4 = vector.load %arg3[%c0_4, %c0_5] : memref<1x128xf32, #tpu.memory_space<vmem>>, vector<1x128xf32>
    %5 = arith.addf %3, %4 : vector<1x128xf32>
    %cst_6 = arith.constant 0.000000e+00 : f32
    %6 = vector.broadcast %cst_6 : f32 to vector<3x7x128xf32>
    %c0_7 = arith.constant 0 : index
    %c0_8 = arith.constant 0 : index
    %c0_9 = arith.constant 0 : index
    %7 = vector.load %arg18[%c0_7, %c0_8, %c0_9] : memref<7x7x128xf32, #tpu.memory_space<vmem>>, vector<3x7x128xf32>
    tpu.vector_store %arg18[%c0_7, %c0_8, %c0_9], %6 {strides = array<i32>} : memref<7x7x128xf32, #tpu.memory_space<vmem>>, vector<3x7x128xf32>,
    %cst_10 = arith.constant 0.000000e+00 : f32
    %8 = vector.broadcast %cst_10 : f32 to vector<3x7x128xf32>
    %c4 = arith.constant 4 : index
    %c0_11 = arith.constant 0 : index
    %c0_12 = arith.constant 0 : index
    %9 = vector.load %arg18[%c4, %c0_11, %c0_12] : memref<7x7x128xf32, #tpu.memory_space<vmem>>, vector<3x7x128xf32>
    tpu.vector_store %arg18[%c4, %c0_11, %c0_12], %8 {strides = array<i32>} : memref<7x7x128xf32, #tpu.memory_space<vmem>>, vector<3x7x128xf32>,
    %cst_13 = arith.constant 0.000000e+00 : f32
    %10 = vector.broadcast %cst_13 : f32 to vector<1x3x128xf32>
    %c3 = arith.constant 3 : index
    %c0_14 = arith.constant 0 : index
    %c0_15 = arith.constant 0 : index
    %11 = vector.load %arg18[%c3, %c0_14, %c0_15] : memref<7x7x128xf32, #tpu.memory_space<vmem>>, vector<1x3x128xf32>
    tpu.vector_store %arg18[%c3, %c0_14, %c0_15], %10 {strides = array<i32>} : memref<7x7x128xf32, #tpu.memory_space<vmem>>, vector<1x3x128xf32>,
    %cst_16 = arith.constant 0.000000e+00 : f32
    %12 = vector.broadcast %cst_16 : f32 to vector<1x3x128xf32>
    %c3_17 = arith.constant 3 : index
    %c4_18 = arith.constant 4 : index
    %c0_19 = arith.constant 0 : index
    %13 = vector.load %arg18[%c3_17, %c4_18, %c0_19] : memref<7x7x128xf32, #tpu.memory_space<vmem>>, vector<1x3x128xf32>
    tpu.vector_store %arg18[%c3_17, %c4_18, %c0_19], %12 {strides = array<i32>} : memref<7x7x128xf32, #tpu.memory_space<vmem>>, vector<1x3x128xf32>,
    %c3_20 = arith.constant 3 : index
    %c3_21 = arith.constant 3 : index
    %c0_22 = arith.constant 0 : index
    %14 = vector.load %arg18[%c3_20, %c3_21, %c0_22] : memref<7x7x128xf32, #tpu.memory_space<vmem>>, vector<1x1x128xf32>
    %15 = vector.shape_cast %14 : vector<1x1x128xf32> to vector<1x128xf32>
    %16 = vector.shape_cast %5 : vector<1x128xf32> to vector<1x1x128xf32>
    tpu.vector_store %arg18[%c3_20, %c3_21, %c0_22], %16 {strides = array<i32>} : memref<7x7x128xf32, #tpu.memory_space<vmem>>, vector<1x1x128xf32>,
    %cst_23 = arith.constant 0.000000e+00 : f32
    %17 = vector.broadcast %cst_23 : f32 to vector<1x1x128xf32>
    %cst_24 = arith.constant 0.000000e+00 : f32
    %18 = vector.broadcast %cst_24 : f32 to vector<1x1x128xf32>
    %c3_25 = arith.constant 3 : index
    %c3_26 = arith.constant 3 : index
    %c0_27 = arith.constant 0 : index
    %19 = vector.load %arg18[%c3_25, %c3_26, %c0_27] : memref<7x7x128xf32, #tpu.memory_space<vmem>>, vector<1x1x128xf32>
    %c0_28 = arith.constant 0 : index
    %c0_29 = arith.constant 0 : index
    %c0_30 = arith.constant 0 : index
    %c0_31 = arith.constant 0 : index
    %20 = vector.load %arg4[%c0_28, %c0_29, %c0_30, %c0_31] : memref<1x1x1x128xf32, #tpu.memory_space<vmem>>, vector<1x1x1x128xf32>
    %21 = vector.shape_cast %20 : vector<1x1x1x128xf32> to vector<1x1x128xf32>
    %22 = arith.mulf %19, %21 : vector<1x1x128xf32>
    %23 = arith.addf %17, %22 : vector<1x1x128xf32>
    %24 = arith.addf %23, %18 : vector<1x1x128xf32>
    %25 = vector.shape_cast %24 : vector<1x1x128xf32> to vector<1x128xf32>
    %c0_32 = arith.constant 0 : index
    %c0_33 = arith.constant 0 : index
    %26 = vector.load %arg19[%c0_32, %c0_33] : memref<1x128xf32, #tpu.memory_space<vmem>>, vector<1x128xf32>
    tpu.vector_store %arg19[%c0_32, %c0_33], %25 {strides = array<i32>} : memref<1x128xf32, #tpu.memory_space<vmem>>, vector<1x128xf32>,
    %c0_34 = arith.constant 0 : index
    %c0_35 = arith.constant 0 : index
    %27 = vector.load %arg19[%c0_34, %c0_35] : memref<1x128xf32, #tpu.memory_space<vmem>>, vector<1x128xf32>
    %c0_36 = arith.constant 0 : index
    %c0_37 = arith.constant 0 : index
    %28 = vector.load %arg5[%c0_36, %c0_37] : memref<1x128xf32, #tpu.memory_space<vmem>>, vector<1x128xf32>
    %29 = arith.addf %27, %28 : vector<1x128xf32>
    %c0_38 = arith.constant 0 : index
    %c0_39 = arith.constant 0 : index
    %30 = vector.load %arg6[%c0_38, %c0_39] : memref<1x128xf32, #tpu.memory_space<vmem>>, vector<1x128xf32>
    %c0_40 = arith.constant 0 : index
    %c0_41 = arith.constant 0 : index
    %31 = vector.load %arg7[%c0_40, %c0_41] : memref<1x128xf32, #tpu.memory_space<vmem>>, vector<1x128xf32>
    %cst_42 = arith.constant dense<0.000000e+00> : vector<1xf32>
    %32 = vector.multi_reduction <add>, %29, %cst_42 [1] : vector<1x128xf32> to vector<1xf32>
    %33 = vector.shape_cast %32 : vector<1xf32> to vector<1x1xf32>
    %cst_43 = arith.constant 1.280000e+02 : f32
    %34 = vector.broadcast %cst_43 : f32 to vector<1x1xf32>
    %35 = arith.divf %33, %34 : vector<1x1xf32>
    %36 = vector.broadcast %35 : vector<1x1xf32> to vector<1x128xf32>
    %37 = arith.subf %29, %36 : vector<1x128xf32>
    %38 = arith.mulf %37, %37 : vector<1x128xf32>
    %cst_44 = arith.constant dense<0.000000e+00> : vector<1xf32>
    %39 = vector.multi_reduction <add>, %38, %cst_44 [1] : vector<1x128xf32> to vector<1xf32>
    %40 = vector.shape_cast %39 : vector<1xf32> to vector<1x1xf32>
    %cst_45 = arith.constant 1.280000e+02 : f32
    %41 = vector.broadcast %cst_45 : f32 to vector<1x1xf32>
    %42 = arith.divf %40, %41 : vector<1x1xf32>
    %43 = vector.broadcast %35 : vector<1x1xf32> to vector<1x128xf32>
    %44 = arith.subf %29, %43 : vector<1x128xf32>
    %cst_46 = arith.constant 9.99999997E-7 : f32
    %45 = vector.broadcast %cst_46 : f32 to vector<1x1xf32>
    %46 = arith.addf %42, %45 : vector<1x1xf32>
    %47 = math.rsqrt %46 : vector<1x1xf32>
    %48 = vector.broadcast %47 : vector<1x1xf32> to vector<1x128xf32>
    %49 = arith.mulf %44, %48 : vector<1x128xf32>
    %50 = arith.mulf %49, %30 : vector<1x128xf32>
    %51 = arith.addf %50, %31 : vector<1x128xf32>
    %52 = arith.truncf %51 : vector<1x128xf32> to vector<1x128xbf16>
    %c0_47 = arith.constant 0 : index
    %c0_48 = arith.constant 0 : index
    %53 = vector.load %arg8[%c0_47, %c0_48] : memref<128x512xbf16, #tpu.memory_space<vmem>>, vector<128x512xbf16>
    %cst_49 = arith.constant dense<0.000000e+00> : vector<1x512xf32>
    %54 = tpu.matmul %52, %53, %cst_49 {dimension_numbers = #tpu.dot_dimension_numbers<[1], [0], [0], [1], [0, 0, 1, 1], [], []>} : vector<1x128xbf16>, vector<128x512xbf16>, vector<1x512xf32> -> vector<1x512xf32>
    %c0_50 = arith.constant 0 : index
    %c0_51 = arith.constant 0 : index
    %55 = vector.load %arg9[%c0_50, %c0_51] : memref<1x512xf32, #tpu.memory_space<vmem>>, vector<1x512xf32>
    %56 = arith.addf %54, %55 : vector<1x512xf32>
    %cst_52 = arith.constant 5.000000e-01 : f32
    %57 = vector.broadcast %cst_52 : f32 to vector<1x512xf32>
    %58 = arith.mulf %57, %56 : vector<1x512xf32>
    %cst_53 = arith.constant 4.471500e-02 : f32
    %59 = vector.broadcast %cst_53 : f32 to vector<1x512xf32>
    %60 = arith.mulf %59, %56 : vector<1x512xf32>
    %61 = arith.mulf %60, %56 : vector<1x512xf32>
    %62 = arith.mulf %61, %56 : vector<1x512xf32>
    %63 = arith.addf %56, %62 : vector<1x512xf32>
    %cst_54 = arith.constant 0.797884583 : f32
    %64 = vector.broadcast %cst_54 : f32 to vector<1x512xf32>
    %65 = arith.mulf %64, %63 : vector<1x512xf32>
    %66 = math.tanh %65 : vector<1x512xf32>
    %cst_55 = arith.constant 1.000000e+00 : f32
    %67 = vector.broadcast %cst_55 : f32 to vector<1x512xf32>
    %68 = arith.addf %67, %66 : vector<1x512xf32>
    %69 = arith.mulf %58, %68 : vector<1x512xf32>
    %70 = arith.truncf %69 : vector<1x512xf32> to vector<1x512xbf16>
    %c0_56 = arith.constant 0 : index
    %c0_57 = arith.constant 0 : index
    %71 = vector.load %arg10[%c0_56, %c0_57] : memref<512x128xbf16, #tpu.memory_space<vmem>>, vector<512x128xbf16>
    %cst_58 = arith.constant dense<0.000000e+00> : vector<1x128xf32>
    %72 = tpu.matmul %70, %71, %cst_58 {dimension_numbers = #tpu.dot_dimension_numbers<[1], [0], [0], [1], [0, 0, 1, 1], [], []>} : vector<1x512xbf16>, vector<512x128xbf16>, vector<1x128xf32> -> vector<1x128xf32>
    %c0_59 = arith.constant 0 : index
    %c0_60 = arith.constant 0 : index
    %73 = vector.load %arg11[%c0_59, %c0_60] : memref<1x128xf32, #tpu.memory_space<vmem>>, vector<1x128xf32>
    %74 = arith.addf %72, %73 : vector<1x128xf32>
    %c0_61 = arith.constant 0 : index
    %c0_62 = arith.constant 0 : index
    %75 = vector.load %arg12[%c0_61, %c0_62] : memref<1x128xf32, #tpu.memory_space<vmem>>, vector<1x128xf32>
    %76 = arith.mulf %75, %74 : vector<1x128xf32>
    %77 = arith.addf %5, %76 : vector<1x128xf32>
    %cst_63 = arith.constant dense<0.000000e+00> : vector<128xf32>
    %78 = vector.multi_reduction <add>, %77, %cst_63 [0] : vector<1x128xf32> to vector<128xf32>
    %79 = vector.shape_cast %78 : vector<128xf32> to vector<1x128xf32>
    %cst_64 = arith.constant 1.000000e+00 : f32
    %80 = vector.broadcast %cst_64 : f32 to vector<1x128xf32>
    %81 = arith.divf %79, %80 : vector<1x128xf32>
    %c0_65 = arith.constant 0 : index
    %c0_66 = arith.constant 0 : index
    %82 = vector.load %arg13[%c0_65, %c0_66] : memref<1x128xf32, #tpu.memory_space<vmem>>, vector<1x128xf32>
    %c0_67 = arith.constant 0 : index
    %c0_68 = arith.constant 0 : index
    %83 = vector.load %arg14[%c0_67, %c0_68] : memref<1x128xf32, #tpu.memory_space<vmem>>, vector<1x128xf32>
    %cst_69 = arith.constant dense<0.000000e+00> : vector<1xf32>
    %84 = vector.multi_reduction <add>, %81, %cst_69 [1] : vector<1x128xf32> to vector<1xf32>
    %85 = vector.shape_cast %84 : vector<1xf32> to vector<1x1xf32>
    %cst_70 = arith.constant 1.280000e+02 : f32
    %86 = vector.broadcast %cst_70 : f32 to vector<1x1xf32>
    %87 = arith.divf %85, %86 : vector<1x1xf32>
    %88 = vector.broadcast %87 : vector<1x1xf32> to vector<1x128xf32>
    %89 = arith.subf %81, %88 : vector<1x128xf32>
    %90 = arith.mulf %89, %89 : vector<1x128xf32>
    %cst_71 = arith.constant dense<0.000000e+00> : vector<1xf32>
    %91 = vector.multi_reduction <add>, %90, %cst_71 [1] : vector<1x128xf32> to vector<1xf32>
    %92 = vector.shape_cast %91 : vector<1xf32> to vector<1x1xf32>
    %cst_72 = arith.constant 1.280000e+02 : f32
    %93 = vector.broadcast %cst_72 : f32 to vector<1x1xf32>
    %94 = arith.divf %92, %93 : vector<1x1xf32>
    %95 = vector.broadcast %87 : vector<1x1xf32> to vector<1x128xf32>
    %96 = arith.subf %81, %95 : vector<1x128xf32>
    %cst_73 = arith.constant 9.99999997E-7 : f32
    %97 = vector.broadcast %cst_73 : f32 to vector<1x1xf32>
    %98 = arith.addf %94, %97 : vector<1x1xf32>
    %99 = math.rsqrt %98 : vector<1x1xf32>
    %100 = vector.broadcast %99 : vector<1x1xf32> to vector<1x128xf32>
    %101 = arith.mulf %96, %100 : vector<1x128xf32>
    %102 = arith.mulf %101, %82 : vector<1x128xf32>
    %103 = arith.addf %102, %83 : vector<1x128xf32>
    %104 = arith.truncf %103 : vector<1x128xf32> to vector<1x128xbf16>
    %c0_74 = arith.constant 0 : index
    %c0_75 = arith.constant 0 : index
    %105 = vector.load %arg15[%c0_74, %c0_75] : memref<128x10xbf16, #tpu.memory_space<vmem>>, vector<128x10xbf16>
    %cst_76 = arith.constant dense<0.000000e+00> : vector<1x10xf32>
    %106 = tpu.matmul %104, %105, %cst_76 {dimension_numbers = #tpu.dot_dimension_numbers<[1], [0], [0], [1], [0, 0, 1, 1], [], []>} : vector<1x128xbf16>, vector<128x10xbf16>, vector<1x10xf32> -> vector<1x10xf32>
    %c0_77 = arith.constant 0 : index
    %c0_78 = arith.constant 0 : index
    %107 = vector.load %arg16[%c0_77, %c0_78] : memref<1x10xf32, #tpu.memory_space<vmem>>, vector<1x10xf32>
    %108 = arith.addf %106, %107 : vector<1x10xf32>
    %c0_79 = arith.constant 0 : index
    %c0_80 = arith.constant 0 : index
    %c0_81 = arith.constant 0 : index
    %109 = vector.load %arg17[%c0_79, %c0_80, %c0_81] : memref<1x1x10xf32, #tpu.memory_space<vmem>>, vector<1x1x10xf32>
    %110 = vector.shape_cast %109 : vector<1x1x10xf32> to vector<1x10xf32>
    %111 = vector.shape_cast %108 : vector<1x10xf32> to vector<1x1x10xf32>
    tpu.vector_store %arg17[%c0_79, %c0_80, %c0_81], %111 {strides = array<i32>} : memref<1x1x10xf32, #tpu.memory_space<vmem>>, vector<1x1x10xf32>,
    return
  }
  func.func @transform_0(%arg0: i32) -> (i32, i32, i32) {
    %c0_i32 = arith.constant 0 : i32
    %c0_i32_0 = arith.constant 0 : i32
    %c0_i32_1 = arith.constant 0 : i32
    return %arg0, %c0_i32, %c0_i32_0 : i32, i32, i32
  }
  func.func @transform_1(%arg0: i32) -> (i32, i32) {
    %c0_i32 = arith.constant 0 : i32
    %c0_i32_0 = arith.constant 0 : i32
    %c0_i32_1 = arith.constant 0 : i32
    return %c0_i32, %c0_i32_0 : i32, i32
  }
  func.func @transform_2(%arg0: i32) -> (i32, i32) {
    %c0_i32 = arith.constant 0 : i32
    %c0_i32_0 = arith.constant 0 : i32
    %c0_i32_1 = arith.constant 0 : i32
    return %c0_i32, %c0_i32_0 : i32, i32
  }
  func.func @transform_3(%arg0: i32) -> (i32, i32, i32, i32) {
    %c0_i32 = arith.constant 0 : i32
    %c0_i32_0 = arith.constant 0 : i32
    %c0_i32_1 = arith.constant 0 : i32
    %c0_i32_2 = arith.constant 0 : i32
    %c0_i32_3 = arith.constant 0 : i32
    return %c0_i32, %c0_i32_0, %c0_i32_1, %c0_i32_2 : i32, i32, i32, i32
  }
  func.func @transform_4(%arg0: i32) -> (i32, i32) {
    %c0_i32 = arith.constant 0 : i32
    %c0_i32_0 = arith.constant 0 : i32
    %c0_i32_1 = arith.constant 0 : i32
    return %c0_i32, %c0_i32_0 : i32, i32
  }
  func.func @transform_5(%arg0: i32) -> (i32, i32) {
    %c0_i32 = arith.constant 0 : i32
    %c0_i32_0 = arith.constant 0 : i32
    %c0_i32_1 = arith.constant 0 : i32
    return %c0_i32, %c0_i32_0 : i32, i32
  }
  func.func @transform_6(%arg0: i32) -> (i32, i32) {
    %c0_i32 = arith.constant 0 : i32
    %c0_i32_0 = arith.constant 0 : i32
    %c0_i32_1 = arith.constant 0 : i32
    return %c0_i32, %c0_i32_0 : i32, i32
  }
  func.func @transform_7(%arg0: i32) -> (i32, i32) {
    %c0_i32 = arith.constant 0 : i32
    %c0_i32_0 = arith.constant 0 : i32
    %c0_i32_1 = arith.constant 0 : i32
    return %c0_i32, %c0_i32_0 : i32, i32
  }
  func.func @transform_8(%arg0: i32) -> (i32, i32) {
    %c0_i32 = arith.constant 0 : i32
    %c0_i32_0 = arith.constant 0 : i32
    %c0_i32_1 = arith.constant 0 : i32
    return %c0_i32, %c0_i32_0 : i32, i32
  }
  func.func @transform_9(%arg0: i32) -> (i32, i32) {
    %c0_i32 = arith.constant 0 : i32
    %c0_i32_0 = arith.constant 0 : i32
    %c0_i32_1 = arith.constant 0 : i32
    return %c0_i32, %c0_i32_0 : i32, i32
  }
  func.func @transform_10(%arg0: i32) -> (i32, i32) {
    %c0_i32 = arith.constant 0 : i32
    %c0_i32_0 = arith.constant 0 : i32
    %c0_i32_1 = arith.constant 0 : i32
    return %c0_i32, %c0_i32_0 : i32, i32
  }
  func.func @transform_11(%arg0: i32) -> (i32, i32) {
    %c0_i32 = arith.constant 0 : i32
    %c0_i32_0 = arith.constant 0 : i32
    %c0_i32_1 = arith.constant 0 : i32
    return %c0_i32, %c0_i32_0 : i32, i32
  }
  func.func @transform_12(%arg0: i32) -> (i32, i32) {
    %c0_i32 = arith.constant 0 : i32
    %c0_i32_0 = arith.constant 0 : i32
    %c0_i32_1 = arith.constant 0 : i32
    return %c0_i32, %c0_i32_0 : i32, i32
  }
  func.func @transform_13(%arg0: i32) -> (i32, i32) {
    %c0_i32 = arith.constant 0 : i32
    %c0_i32_0 = arith.constant 0 : i32
    %c0_i32_1 = arith.constant 0 : i32
    return %c0_i32, %c0_i32_0 : i32, i32
  }
  func.func @transform_14(%arg0: i32) -> (i32, i32) {
    %c0_i32 = arith.constant 0 : i32
    %c0_i32_0 = arith.constant 0 : i32
    %c0_i32_1 = arith.constant 0 : i32
    return %c0_i32, %c0_i32_0 : i32, i32
  }
  func.func @transform_15(%arg0: i32) -> (i32, i32) {
    %c0_i32 = arith.constant 0 : i32
    %c0_i32_0 = arith.constant 0 : i32
    %c0_i32_1 = arith.constant 0 : i32
    return %c0_i32, %c0_i32_0 : i32, i32
  }
  func.func @transform_16(%arg0: i32) -> (i32, i32, i32) {
    %c0_i32 = arith.constant 0 : i32
    %c0_i32_0 = arith.constant 0 : i32
    %c0_i32_1 = arith.constant 0 : i32
    return %arg0, %c0_i32, %c0_i32_0 : i32, i32, i32
  }
}

</mosaic_0001>

<bundles_post_ra>
// kernel: forward.6
= control target key start
LH: loop header
LB: loop body
LE: loop exit
PB: predicated region body
PF: predicated region fallthrough
CT: control target
= control target key end

     0   :  { %s1417_s29 = smov 0   ;;  %s1607_s0 = inlined_call_operand.vmem [shape: bf16[2,4,128], index: 0, kind: input, shape index: {}]   ;;  %s1608_s1 = inlined_call_operand.vmem [shape: bf16[128,64], index: 1, kind: input, shape index: {}]   ;;  %s1609_s2 = inlined_call_operand.vmem [shape: f32[1,64], index: 2, kind: input, shape index: {}]   ;;  %s1610_s3 = inlined_call_operand.vmem [shape: f32[9,1,1,64], index: 3, kind: input, shape index: {}]   ;;  %s1611_s4 = inlined_call_operand.vmem [shape: f32[1,64], index: 4, kind: input, shape index: {}]   ;;  %s1612_s5 = inlined_call_operand.vmem [shape: f32[1,64], index: 5, kind: input, shape index: {}]   ;;  %s1613_s6 = inlined_call_operand.vmem [shape: f32[1,64], index: 6, kind: input, shape index: {}]   ;;  %s1614_s7 = inlined_call_operand.vmem [shape: bf16[64,256], index: 7, kind: input, shape index: {}]   ;;  %s1615_s8 = inlined_call_operand.vmem [shape: f32[1,256], index: 8, kind: input, shape index: {}]   ;;  %s1616_s9 = inlined_call_operand.vmem [shape: bf16[256,64], index: 9, kind: input, shape index: {}]   ;;  %s1617_s10 = inlined_call_operand.vmem [shape: f32[1,64], index: 10, kind: input, shape index: {}]   ;;  %s1618_s11 = inlined_call_operand.vmem [shape: f32[1,64], index: 11, kind: input, shape index: {}]   ;;  %s1619_s12 = inlined_call_operand.vmem [shape: f32[1,64], index: 12, kind: input, shape index: {}]   ;;  %s1620_s13 = inlined_call_operand.vmem [shape: f32[1,64], index: 13, kind: input, shape index: {}]   ;;  %s1621_s14 = inlined_call_operand.vmem [shape: bf16[2,4,64], index: 14, kind: output, shape index: {}]  }
   0x1 LB: > { %s1158_s30 = sadd.s32 4294967295, %s1337_s29   ;;  %p1162_p0 = scmp.ge.s32.totalorder %s1337_s29, 1  ;;  %s1337_s29 = sphi %s1417_s29, %s24_s29  }
   0x2   : > { %p411_p1 = scmp.lt.s32.totalorder %s1337_s29, 3 }
   0x4   : > { %p412_p2 = pnand %p1162_p0, %p411_p1 }
   0x5   : > { %p455_p3 = scmp.lt.s32.totalorder (!%p412_p2), %s1158_s30, 1 }
   0x6   : > { %415 = sbr.rel (%p412_p2) target bundleno = 1322 (0x52a), region = 76 }
   0xb   : > { %v1287_v0 = vld [vmem:[%s1608_s1 + $0x38] sm:$0xff]   ;;  %v1339_v1 = vmov 0.0   ;;  %v1288_v2 = vld [vmem:[%s1608_s1 + $0x30] sm:$0xff]   ;;  %vm1340_vm0 = vmmov 0   ;;  %v1289_v3 = vld [vmem:[%s1608_s1 + $0x28] sm:$0xff]   ;;  %s1623_s30 = smov (!%p455_p3, %s1158_s30), 1 }
   0xc   : > { %1256 = vmatprep.subr.bf16.mxu0 %v1339_v1  ;;  %1272 = vmatprep.mubr.msk.bf16.mxu0 %vm1340_vm0, %v1339_v1  ;;  %v1290_v4 = vld [vmem:[%s1608_s1 + $0x20] sm:$0xff]   ;;  %v1291_v5 = vld [vmem:[%s1608_s1 + $0x18] sm:$0xff]   ;;  %v1292_v6 = vld [vmem:[%s1608_s1 + $0x10] sm:$0xff]   ;;  %s1163_s15 = sshll.u32 %s1623_s30, 1  ;;  %vm576_vm1 = vcmask 523264   ;;  %vm585_vm2 = vcmask 518144  }
   0xd   : > { %1257 = vmatpush3.bf16.msra.mxu0 %v1287_v0  ;;  %v1293_v7 = vld [vmem:[%s1608_s1 + $0x8] sm:$0xff]   ;;  %v1294_v8 = vld [vmem:[%s1608_s1] sm:$0xff]   ;;  %s458_s20 = scalar_lea.vmem %s1607_s0, %s1163_s15  ;;  %579 = vst.msk [vmem:[#allocation2 + $0x10] sm:$0xff] %vm576_vm1, %v1339_v1  ;;  %581 = vst.msk [vmem:[#allocation2 + $0x28] sm:$0xff] %vm576_vm1, %v1339_v1  ;;  %vm590_vm3 = vcmask 517120   ;;  %vm593_vm4 = vcmask 519170   ;;  %s462_s16 = scalar_lea.vmem %s1621_s14, %s1163_s15 }
   0xe   : > { %1258 = vmatprep.subr.bf16.mxu0 %v1339_v1  ;;  %v464_v9 = vld [vmem:[%s458_s20] sm:$0x3]  ;;  %586 = vst.msk [vmem:[#allocation2 + $0x18] sm:$0x7] %vm585_vm2, %v1339_v1  ;;  %587 = vst.msk [vmem:[#allocation2 + $0x20] sm:$0x7] %vm585_vm2, %v1339_v1 }
   0xf   : > { %588 = vst.msk [vmem:[#allocation2 + $0x1d] sm:$0x7] %vm585_vm2, %v1339_v1  ;;  %589 = vst.msk [vmem:[#allocation2 + $0x25] sm:$0x7] %vm585_vm2, %v1339_v1  ;;  %v1165_v10 = vld [vmem:[%s1609_s2] ss:$0 sm:$0xff] }
  0x10   : > { %v1174_v15 = vld [vmem:[%s1610_s3] ss:$0 sm:$0xff]  ;;  %v1178_v17 = vld [vmem:[%s1610_s3 + $0x2] ss:$0 sm:$0xff]  ;;  %v1176_v23 = vld [vmem:[%s1610_s3 + $0x1] ss:$0 sm:$0xff] }
  0x11   : > { %1259 = vmatpush3.bf16.msra.mxu0 %v1288_v2  ;;  %v1180_v24 = vld [vmem:[%s1610_s3 + $0x3] ss:$0 sm:$0xff]  ;;  %v1182_v25 = vld [vmem:[%s1610_s3 + $0x4] ss:$0 sm:$0xff]  ;;  %v1184_v26 = vld [vmem:[%s1610_s3 + $0x5] ss:$0 sm:$0xff] }
  0x12   : > { %1260 = vmatprep.subr.bf16.mxu0 %v1339_v1  ;;  %v1186_v28 = vld [vmem:[%s1610_s3 + $0x6] ss:$0 sm:$0xff]  ;;  %v1188_v35 = vld [vmem:[%s1610_s3 + $0x7] ss:$0 sm:$0xff]  ;;  %v1190_v43 = vld [vmem:[%s1610_s3 + $0x8] ss:$0 sm:$0xff] }
  0x13   : > { %vm736_vm5 = vcmask 519168  }
  0x14   : > { %v596_v13 = vld [vmem:[#allocation2 + $0x12] sm:$0x3]  ;;  %v623_v16 = vld [vmem:[#allocation2 + $0x14] sm:$0x3]  ;;  %v680_v27 = vld [vmem:[#allocation2 + $0x2a] sm:$0x3] }
  0x15   : > { %1261 = vmatpush3.bf16.msra.mxu0 %v1289_v3  ;;  %v605_v19 = vmul.f32 %v1174_v15, %v596_v13  ;;  %v633_v20 = vmul.f32 %v1178_v17, %v623_v16  ;;  %v609_v22 = vld [vmem:[#allocation2 + $0x13] sm:$0x3]  ;;  %v694_v34 = vld [vmem:[#allocation2 + $0x2b] sm:$0x3]  ;;  %v690_v50 = vmul.f32 %v1186_v28, %v680_v27  ;;  %v1341_v27 = vmov 0  }
  0x16   : > { %1262 = vmatprep.subr.bf16.mxu0 %v1339_v1  ;;  %v619_v31 = vmul.f32 %v1176_v23, %v609_v22  ;;  %v708_v36 = vld [vmem:[#allocation2 + $0x2c] sm:$0x3]  ;;  %v704_v0 = vmul.f32 %v1188_v35, %v694_v34  ;;  %861 = vmatprep.mubr.bf16.mxu1 %v1341_v27 }
  0x17   : > { %v635_v33 = vadd.f32 %v633_v20, %v605_v19 }
  0x19   : > { %1263 = vmatpush3.bf16.msra.mxu0 %v1290_v4 }
  0x1a   : > { %1264 = vmatprep.subr.bf16.mxu0 %v1339_v1 }
  0x1d   : > { %1265 = vmatpush3.bf16.msra.mxu0 %v1291_v5 }
  0x1e   : > { %1266 = vmatprep.subr.bf16.mxu0 %v1339_v1 }
  0x21   : > { %1267 = vmatpush3.bf16.msra.mxu0 %v1292_v6 }
  0x22   : > { %1268 = vmatprep.subr.bf16.mxu0 %v1339_v1 }
  0x25   : > { %1269 = vmatpush3.bf16.msra.mxu0 %v1293_v7 }
  0x26   : > { %1270 = vmatprep.subr.bf16.mxu0 %v1339_v1  ;;  %v718_v1 = vmul.f32 %v1190_v43, %v708_v36  ;;  %v1192_v36 = vld [vmem:[%s1612_s5] ss:$0 sm:$0xff] }
  0x29   : > { %1271 = vmatpush3.bf16.msra.mxu0 %v1294_v8 }
  0x2c   : > { %1273 = vmatmul.mubr.bf16.vlgmr.msra.gmra.mxu0 %v464_v9 }
  0xec   : > { %v570_v11 = vpop.f32.mrf.mxu0 }
  0xed   : > { %v1462_v12 = vadd.f32 %v1165_v10, %v570_v11 }
  0xee   : > { %v1274_v14 = vpop.f32.mrf.mxu0 }
  0xef   : > { %591 = vst.msk [vmem:[#allocation2 + $0x1b] sm:$0x3] %vm590_vm3, %v1462_v12  ;;  %v1191_v14 = vld [vmem:[%s1611_s4] ss:$0 sm:$0xff] }
  0xf0   : > { %594 = vst.msk [vmem:[#allocation2 + $0x21] sm:$0xc] %vm593_vm4, %v1462_v12  ;;  %v573_v18 = vpop.f32.mrf.mxu0 }
  0xf2   : > { %v1275_v21 = vpop.f32.mrf.mxu0 }
  0xf6   : > { %v597_v29 = vld [vmem:[#allocation2 + $0x1a] sm:$0x3]  ;;  %v624_v32 = vld [vmem:[#allocation2 + $0x1c] sm:$0x3] }
  0xf7   : > { %v610_v30 = vld [vmem:[#allocation2 + $0x1b] sm:$0x3]  ;;  %v606_v37 = vmul.f32 %v1174_v15, %v597_v29  ;;  %v634_v39 = vmul.f32 %v1178_v17, %v624_v32  ;;  %v638_v41 = vld [vmem:[#allocation2 + $0x22] sm:$0x3]  ;;  %v666_v49 = vld [vmem:[#allocation2 + $0x24] sm:$0x3] }
  0xf8   : > { %v620_v38 = vmul.f32 %v1176_v23, %v610_v30  ;;  %v637_v40 = vld [vmem:[#allocation2 + $0x1a] sm:$0x3]  ;;  %v648_v45 = vmul.f32 %v1180_v24, %v638_v41  ;;  %v652_v46 = vld [vmem:[#allocation2 + $0x23] sm:$0x3]  ;;  %v665_v48 = vld [vmem:[#allocation2 + $0x1c] sm:$0x3]  ;;  %v676_v54 = vmul.f32 %v1184_v26, %v666_v49 }
  0xf9   : > { %v651_v42 = vld [vmem:[#allocation2 + $0x1b] sm:$0x3]  ;;  %v647_v44 = vmul.f32 %v1180_v24, %v637_v40  ;;  %v636_v51 = vadd.f32 %v634_v39, %v606_v37  ;;  %v662_v52 = vmul.f32 %v1182_v25, %v652_v46  ;;  %v675_v53 = vmul.f32 %v1184_v26, %v665_v48  ;;  %v679_v55 = vld [vmem:[#allocation2 + $0x22] sm:$0x3]  ;;  %v707_v57 = vld [vmem:[#allocation2 + $0x24] sm:$0x3] }
  0xfa   : > { %v661_v47 = vmul.f32 %v1182_v25, %v651_v42  ;;  %v693_v56 = vld [vmem:[#allocation2 + $0x23] sm:$0x3]  ;;  %v650_v59 = vadd.f32 %v648_v45, %v620_v38  ;;  %v689_v61 = vmul.f32 %v1186_v28, %v679_v55  ;;  %v717_v5 = vmul.f32 %v1190_v43, %v707_v57  ;;  %v1295_v23 = vld [vmem:[%s1614_s7 + $0x34] ss:$8 sps:$4 sm:$0xff]   ;;  %v1297_v24 = vld [vmem:[%s1614_s7 + $0x30] ss:$8 sps:$4 sm:$0xff]  }
  0xfb   : > { %v649_v58 = vadd.f32 %v647_v44, %v619_v31  ;;  %v664_v62 = vadd.f32 %v662_v52, %v636_v51  ;;  %v703_v63 = vmul.f32 %v1188_v35, %v693_v56  ;;  %v1298_v25 = vld [vmem:[%s1614_s7 + $0x24] ss:$8 sps:$4 sm:$0xff]   ;;  %837 = vmatprep.subr.bf16.mxu1 %v1295_v23  ;;  %v1300_v26 = vld [vmem:[%s1614_s7 + $0x20] ss:$8 sps:$4 sm:$0xff]   ;;  %v1301_v28 = vld [vmem:[%s1614_s7 + $0x14] ss:$8 sps:$4 sm:$0xff]  }
  0xfc   : > { %v663_v60 = vadd.f32 %v661_v47, %v635_v33  ;;  %v678_v3 = vadd.f32 %v676_v54, %v650_v59  ;;  %838 = vmatpush1.bf16.msra.mxu1 %v1297_v24  ;;  %v1303_v29 = vld [vmem:[%s1614_s7 + $0x10] ss:$8 sps:$4 sm:$0xff]   ;;  %v1304_v30 = vld [vmem:[%s1614_s7 + $0x4] ss:$8 sps:$4 sm:$0xff]   ;;  %v1306_v31 = vld [vmem:[%s1614_s7] ss:$8 sps:$4 sm:$0xff]  }
  0xfd   : > { %v677_v2 = vadd.f32 %v675_v53, %v649_v58  ;;  %v692_v6 = vadd.f32 %v690_v50, %v664_v62  ;;  %839 = vmatprep.subr.bf16.mxu1 %v1298_v25  ;;  %v1193_v38 = vld [vmem:[%s1613_s6] ss:$0 sm:$0xff]  ;;  %v1307_v42 = vld [vmem:[%s1616_s9 + $0x78] sm:$0xff]   ;;  %v1309_v44 = vld [vmem:[%s1616_s9 + $0x70] sm:$0xff]   ;;  %v776_v58 = vlaneseq }
  0xfe   : > { %v691_v4 = vadd.f32 %v689_v61, %v663_v60  ;;  %v706_v9 = vadd.f32 %v704_v0, %v678_v3  ;;  %v1308_v43 = vld [vmem:[%s1616_s9 + $0x38] sm:$0xff]   ;;  %v1310_v45 = vld [vmem:[%s1616_s9 + $0x30] sm:$0xff]   ;;  %v1311_v46 = vld [vmem:[%s1616_s9 + $0x68] sm:$0xff]  }
  0xff   : > { %v705_v7 = vadd.f32 %v703_v63, %v677_v2  ;;  %v720_v10 = vadd.f32 %v718_v1, %v692_v6  ;;  %v1312_v47 = vld [vmem:[%s1616_s9 + $0x28] sm:$0xff]   ;;  %v1313_v48 = vld [vmem:[%s1616_s9 + $0x60] sm:$0xff]   ;;  %v1315_v50 = vld [vmem:[%s1616_s9 + $0x58] sm:$0xff]   ;;  %v777_v59 = vshrl.u32 %v776_v58, 7 }
 0x100   : > { %v719_v8 = vadd.f32 %v717_v5, %v691_v4  ;;  %840 = vmatpush1.bf16.msra.mxu1 %v1300_v26  ;;  %v1314_v49 = vld [vmem:[%s1616_s9 + $0x20] sm:$0xff]   ;;  %v1316_v51 = vld [vmem:[%s1616_s9 + $0x18] sm:$0xff]   ;;  %v1317_v52 = vld [vmem:[%s1616_s9 + $0x50] sm:$0xff]  }
 0x101   : > { %v722_v13 = vadd.f32 %v720_v10, %v706_v9  ;;  %841 = vmatprep.subr.bf16.mxu1 %v1301_v28  ;;  %v1318_v53 = vld [vmem:[%s1616_s9 + $0x10] sm:$0xff]   ;;  %v1319_v54 = vld [vmem:[%s1616_s9 + $0x48] sm:$0xff]   ;;  %v1321_v56 = vld [vmem:[%s1616_s9 + $0x40] sm:$0xff]   ;;  %v778_v60 = vsub.s32 0, %v777_v59  ;;  %v782_v62 = vsub.s32 1, %v777_v59 }
 0x102   : > { %v721_v11 = vadd.f32 %v719_v8, %v705_v7  ;;  %v1320_v55 = vld [vmem:[%s1616_s9 + $0x8] sm:$0xff]   ;;  %v1322_v57 = vld [vmem:[%s1616_s9] sm:$0xff]  }
 0x103   : > { %724 = vst.msk [vmem:[#allocation3 + $0x2] sm:$0x3] %vm590_vm3, %v722_v13  ;;  %v774_v61 = vld [vmem:[%s1615_s8] sm:$0x3] }
 0x104   : > { %723 = vst.msk [vmem:[#allocation3] sm:$0x3] %vm590_vm3, %v721_v11  ;;  %842 = vmatpush1.bf16.msra.mxu1 %v1303_v29  ;;  %v779_v63 = vrot.slane %v774_v61, %v778_v60  ;;  %v783_v0 = vrot.slane %v774_v61, %v782_v62  ;;  %v1203_v29 = vld [vmem:[%s1617_s10] ss:$0 sm:$0xff] }
 0x105   : > { %843 = vmatprep.subr.bf16.mxu1 %v1304_v30 }
 0x108   : > { %844 = vmatpush1.bf16.msra.mxu1 %v1306_v31 }
 0x109   : > { %1234 = vmatprep.subr.bf16.mxu1 %v1307_v42 }
 0x10b   : > { %v725_v15 = vld [vmem:[#allocation3] sm:$0xf] }
 0x10c   : > { %v733_v16 = vadd.f32 %v1191_v14, %v725_v15 }
 0x10e   : > { %v737_v17 = vsel %vm736_vm5, %v733_v16, 0.0 }
 0x10f   : > { %738 = vadd.xlane.f32.xlu0 %v737_v17 }
 0x198   : > { %v739_v18 = vpop.xlane.xlu0 %738 }
 0x199   : > { %v741_v19 = vmul.f32 0.015625, %v739_v18 }
 0x19b   : > { %v742_v20 = vsub.f32 %v733_v16, %v741_v19 }
 0x19d   : > { %v743_v21 = vmul.f32 %v742_v20, %v742_v20 }
 0x19f   : > { %v744_v22 = vsel %vm736_vm5, %v743_v21, 0.0 }
 0x1a0   : > { %745 = vadd.xlane.f32.xlu0 %v744_v22 }
 0x229   : > { %v746_v32 = vpop.xlane.xlu0 %745 }
 0x22a   : > { %v747_v33 = vmul.f32 0.015625, %v746_v32 }
 0x22c   : > { %v748_v34 = vadd.f32 1e-06, %v747_v33  ;;  %v1220_v33 = vld [vmem:[%s1618_s11] ss:$0 sm:$0xff] }
 0x22e   : > { %1323 = vrsqrt.f32 %v748_v34 }
 0x23b   : > { %v1324_v35 = vpop.eup %1323 }
 0x23c   : > { %v750_v37 = vmul.f32 %v1324_v35, %v742_v20 }
 0x23e   : > { %v757_v39 = vmul.f32 %v1192_v36, %v750_v37 }
 0x240   : > { %v764_v40 = vadd.f32 %v1193_v38, %v757_v39 }
 0x242   : > { %v765_v41 = vpack.c.bf16 %v764_v40, %v764_v40 }
 0x244   : > { %1202 = vmatmul.mubr.msk.bf16.vlgmr.msra.gmra.mxu1 %vm576_vm1, %v765_v41 }
 0x245   : > { %1235 = vmatpush3.bf16.msra.mxu1 %v1308_v43 }
 0x246   : > { %1236 = vmatprep.subr.bf16.mxu1 %v1309_v44 }
 0x249   : > { %1237 = vmatpush3.bf16.msra.mxu1 %v1310_v45 }
 0x24a   : > { %1238 = vmatprep.subr.bf16.mxu1 %v1311_v46 }
 0x24d   : > { %1239 = vmatpush3.bf16.msra.mxu1 %v1312_v47 }
 0x24e   : > { %1240 = vmatprep.subr.bf16.mxu1 %v1313_v48 }
 0x251   : > { %1241 = vmatpush3.bf16.msra.mxu1 %v1314_v49  ;;  %v1222_v49 = vld [vmem:[%s1620_s13] ss:$0 sm:$0xff] }
 0x252   : > { %1242 = vmatprep.subr.bf16.mxu1 %v1315_v50 }
 0x255   : > { %1243 = vmatpush3.bf16.msra.mxu1 %v1316_v51 }
 0x256   : > { %1244 = vmatprep.subr.bf16.mxu1 %v1317_v52 }
 0x259   : > { %1245 = vmatpush3.bf16.msra.mxu1 %v1318_v53 }
 0x25a   : > { %1246 = vmatprep.subr.bf16.mxu1 %v1319_v54 }
 0x25d   : > { %1247 = vmatpush3.bf16.msra.mxu1 %v1320_v55 }
 0x25e   : > { %1248 = vmatprep.subr.bf16.mxu1 %v1321_v56 }
 0x261   : > { %1249 = vmatpush3.bf16.msra.mxu1 %v1322_v57 }
 0x304   : > { %v863_v1 = vpop.f32.mrf.mxu1 }
 0x305   : > { %v864_v2 = vadd.f32 %v863_v1, %v779_v63 }
 0x306   : > { %v865_v3 = vpop.f32.mrf.mxu1 }
 0x307   : > { %v872_v4 = vmul.f32 0.044715, %v864_v2  ;;  %v866_v5 = vadd.f32 %v865_v3, %v783_v0  ;;  %v870_v21 = vmul.f32 0.5, %v864_v2 }
 0x308   : > { %v867_v6 = vpop.f32.mrf.mxu1 }
 0x309   : > { %v874_v7 = vmul.f32 %v872_v4, %v864_v2  ;;  %v873_v8 = vmul.f32 0.044715, %v866_v5  ;;  %v871_v22 = vmul.f32 0.5, %v866_v5 }
 0x30a   : > { %v868_v9 = vpop.f32.mrf.mxu1 }
 0x30b   : > { %v876_v10 = vmul.f32 %v874_v7, %v864_v2  ;;  %v875_v11 = vmul.f32 %v873_v8, %v866_v5 }
 0x30d   : > { %v878_v13 = vadd.f32 %v876_v10, %v864_v2  ;;  %v877_v14 = vmul.f32 %v875_v11, %v866_v5 }
 0x30f   : > { %v880_v15 = vmul.f32 0.7978846, %v878_v13  ;;  %v879_v16 = vadd.f32 %v877_v14, %v866_v5 }
 0x311   : > { %v881_v17 = vmul.f32 0.7978846, %v879_v16  ;;  %1325 = vtanh.f32 %v880_v15 }
 0x313   : > { %1327 = vtanh.f32 %v881_v17 }
 0x31e   : > { %v1326_v18 = vpop.eup %1325 }
 0x31f   : > { %v884_v19 = vadd.f32 1.0, %v1326_v18 }
 0x320   : > { %v1328_v20 = vpop.eup %1327 }
 0x321   : > { %v885_v23 = vadd.f32 1.0, %v1328_v20  ;;  %v886_v24 = vmul.f32 %v884_v19, %v870_v21 }
 0x323   : > { %v887_v25 = vmul.f32 %v885_v23, %v871_v22  ;;  %v888_v27 = vpack.c.bf16 %v886_v24, %v886_v24 }
 0x325   : > { %v889_v26 = vpack.c.bf16 %v887_v25, %v887_v25 }
 0x327   : > { %1057 = vmatprep.mubr.bf16.mxu1 %v889_v26 }
 0x328   : > { %1058 = vmatmul.mubr.bf16.vlgmr.msra.gmra.mxu1 %v888_v27 }
 0x3e8   : > { %v1250_v28 = vpop.f32.mrf.mxu1 }
 0x3ea   : > { %v1251_v30 = vpop.f32.mrf.mxu1 }
 0x3eb   : > { %v1252_v31 = vadd.f32 %v1251_v30, %v1250_v28 }
 0x3ec   : > { %v1253_v32 = vpop.f32.mrf.mxu1 }
 0x3ed   : > { %v1060_v34 = vadd.f32 %v1252_v31, %v1203_v29 }
 0x3ee   : > { %v1254_v35 = vpop.f32.mrf.mxu1 }
 0x3ef   : > { %v1072_v36 = vmul.f32 %v1220_v33, %v1060_v34 }
 0x3f1   : > { %v1073_v37 = vadd.f32 %v1072_v36, %v1462_v12  ;;  %v1221_v12 = vld [vmem:[%s1619_s12] ss:$0 sm:$0xff] }
 0x3f3   : > { %v1076_v38 = vsel %vm736_vm5, %v1073_v37, 0.0 }
 0x3f4   : > { %1077 = vadd.xlane.f32.xlu1 %v1076_v38 }
 0x47d   : > { %v1078_v39 = vpop.xlane.xlu1 %1077 }
 0x47e   : > { %v1079_v40 = vmul.f32 0.015625, %v1078_v39 }
 0x480   : > { %v1080_v41 = vsub.f32 %v1073_v37, %v1079_v40 }
 0x482   : > { %v1081_v42 = vmul.f32 %v1080_v41, %v1080_v41 }
 0x484   : > { %v1082_v43 = vsel %vm736_vm5, %v1081_v42, 0.0 }
 0x485   : > { %1083 = vadd.xlane.f32.xlu1 %v1082_v43 }
 0x50e   : > { %v1084_v44 = vpop.xlane.xlu1 %1083 }
 0x50f   : > { %v1085_v45 = vmul.f32 0.015625, %v1084_v44 }
 0x511   : > { %v1086_v46 = vadd.f32 1e-06, %v1085_v45 }
 0x513   : > { %1329 = vrsqrt.f32 %v1086_v46 }
 0x520   : > { %v1330_v47 = vpop.eup %1329 }
 0x521   : > { %v1088_v48 = vmul.f32 %v1330_v47, %v1080_v41 }
 0x523   : > { %v1095_v50 = vmul.f32 %v1221_v12, %v1088_v48 }
 0x525   : > { %v1102_v51 = vadd.f32 %v1222_v49, %v1095_v50 }
 0x527   : > { %v1103_v52 = vpack.c.bf16 %v1102_v51, %v1102_v51 }
 0x529   : > { %1104 = vst.msk [vmem:[%s462_s16] sm:$0x3] %vm590_vm3, %v1103_v52 }
 0x52a PF: > { %s24_s29 = sadd.s32 1, %s1337_s29  }
 0x52b   : > { %p21_p4 = scmp.ge.s32.totalorder %s24_s29, 4  }
 0x52d   :  { %23 = sbr.rel (!%p21_p4) target bundleno = 1 (0x1), region = 118 }

// kernel: forward.5
= control target key start
LH: loop header
LB: loop body
LE: loop exit
PB: predicated region body
PF: predicated region fallthrough
CT: control target
= control target key end

     0   :  { %s2277_s29 = smov 0   ;;  %s3058_s0 = inlined_call_operand.vmem [shape: bf16[2,16,64], index: 0, kind: input, shape index: {}]   ;;  %s3059_s1 = inlined_call_operand.vmem [shape: bf16[64,32], index: 1, kind: input, shape index: {}]   ;;  %s3060_s2 = inlined_call_operand.vmem [shape: f32[1,32], index: 2, kind: input, shape index: {}]   ;;  %s3061_s3 = inlined_call_operand.vmem [shape: f32[49,1,1,32], index: 3, kind: input, shape index: {}]   ;;  %s3062_s4 = inlined_call_operand.vmem [shape: f32[1,32], index: 4, kind: input, shape index: {}]   ;;  %s3063_s5 = inlined_call_operand.vmem [shape: f32[1,32], index: 5, kind: input, shape index: {}]   ;;  %s3064_s6 = inlined_call_operand.vmem [shape: f32[1,32], index: 6, kind: input, shape index: {}]   ;;  %s3065_s7 = inlined_call_operand.vmem [shape: bf16[32,128], index: 7, kind: input, shape index: {}]   ;;  %s3066_s8 = inlined_call_operand.vmem [shape: f32[1,128], index: 8, kind: input, shape index: {}]   ;;  %s3067_s9 = inlined_call_operand.vmem [shape: bf16[128,32], index: 9, kind: input, shape index: {}]   ;;  %s3068_s10 = inlined_call_operand.vmem [shape: f32[1,32], index: 10, kind: input, shape index: {}]   ;;  %s3069_s11 = inlined_call_operand.vmem [shape: f32[1,32], index: 11, kind: input, shape index: {}]   ;;  %s3070_s12 = inlined_call_operand.vmem [shape: f32[1,32], index: 12, kind: input, shape index: {}]   ;;  %s3071_s13 = inlined_call_operand.vmem [shape: f32[1,32], index: 13, kind: input, shape index: {}]   ;;  %s3072_s14 = inlined_call_operand.vmem [shape: bf16[2,16,32], index: 14, kind: output, shape index: {}]  }
   0x1 LB: > { %s1958_s30 = sadd.s32 4294967295, %s2198_s29   ;;  %p1962_p0 = scmp.ge.s32.totalorder %s2198_s29, 1  ;;  %s2198_s29 = sphi %s2277_s29, %s24_s29  }
   0x2   : > { %p412_p1 = scmp.lt.s32.totalorder %s2198_s29, 3 }
   0x4   : > { %p413_p2 = pnand %p1962_p0, %p412_p1 }
   0x6   : > { %416 = sbr.rel (%p413_p2) target bundleno = 1369 (0x559), region = 76 }
   0xb   : > { %v2165_v0 = vld [vmem:[%s3059_s1 + $0x18] sm:$0xff]   ;;  %v3073_v1 = vmov 0.0   ;;  %v2166_v2 = vld [vmem:[%s3059_s1 + $0x10] sm:$0xff]   ;;  %vm2201_vm0 = vmmov 0   ;;  %p458_p3 = scmp.lt.s32.totalorder %s1958_s30, 1  ;;  %v2167_v3 = vld [vmem:[%s3059_s1 + $0x8] sm:$0xff]  }
   0xc   : > { %2115 = vmatprep.subr.bf16.mxu0 %v3073_v1  ;;  %2135 = vmatprep.subr.bf16.mxu1 %v3073_v1  ;;  %v2168_v4 = vld [vmem:[%s3059_s1] sm:$0xff]   ;;  %vm515_vm1 = vcmask 523264   ;;  %vm560_vm2 = vcmask 261120   ;;  %vm562_vm3 = vcmask 254976   ;;  %vm576_vm4 = vcmask 256000  }
   0xd   : > { %2116 = vmatpush3.bf16.msra.mxu0 %v2165_v0  ;;  %2123 = vmatprep.mubr.msk.bf16.mxu0 %vm2201_vm0, %v3073_v1  ;;  %s3193_s30 = smov (!%p458_p3, %s1958_s30), 1  ;;  %561 = vst.msk [vmem:[#allocation2] sm:$0xff] %vm560_vm2, %v3073_v1  ;;  %564 = vst.msk [vmem:[#allocation2 + $0x10] sm:$0xff] %vm560_vm2, %v3073_v1  ;;  %v2346_v7 = vld [vmem:[%s3061_s3] ss:$0 sm:$0xff]  ;;  %vm585_vm5 = vcmask 257024  }
   0xe   : > { %2117 = vmatprep.subr.bf16.mxu0 %v3073_v1  ;;  %2151 = vmatprep.mubr.msk.bf16.mxu1 %vm2201_vm0, %v3073_v1  ;;  %s2094_s21 = sshll.u32 %s3193_s30, 3  ;;  %566 = vst.msk [vmem:[#allocation2 + $0x20] sm:$0xff] %vm560_vm2, %v3073_v1  ;;  %569 = vst.msk [vmem:[#allocation2 + $0x70] sm:$0xff] %vm560_vm2, %v3073_v1  ;;  %v2351_v9 = vld [vmem:[%s3061_s3 + $0x2] ss:$0 sm:$0xff]  ;;  %vm588_vm6 = vcmask 261124  }
   0xf   : > { %s462_s24 = scalar_lea.vmem %s3058_s0, %s2094_s21  ;;  %571 = vst.msk [vmem:[#allocation2 + $0x80] sm:$0xff] %vm560_vm2, %v3073_v1  ;;  %573 = vst.msk [vmem:[#allocation2 + $0x90] sm:$0xff] %vm560_vm2, %v3073_v1  ;;  %v2357_v12 = vld [vmem:[%s3061_s3 + $0x1] ss:$0 sm:$0xff]  ;;  %v2363_v15 = vld [vmem:[%s3061_s3 + $0x3] ss:$0 sm:$0xff]  ;;  %s467_s22 = scalar_lea.vmem %s3072_s14, %s2094_s21 }
  0x10   : > { %v2169_v5 = vld [vmem:[%s462_s24] sm:$0xff]   ;;  %563 = vst.msk [vmem:[#allocation2 + $0x8] sm:$0x3] %vm562_vm3, %v3073_v1  ;;  %565 = vst.msk [vmem:[#allocation2 + $0x18] sm:$0x3] %vm562_vm3, %v3073_v1 }
  0x11   : > { %2118 = vmatpush3.bf16.msra.mxu0 %v2166_v2  ;;  %567 = vst.msk [vmem:[#allocation2 + $0x28] sm:$0x3] %vm562_vm3, %v3073_v1  ;;  %570 = vst.msk [vmem:[#allocation2 + $0x78] sm:$0x3] %vm562_vm3, %v3073_v1  ;;  %v2368_v17 = vld [vmem:[%s3061_s3 + $0x4] ss:$0 sm:$0xff] }
  0x12   : > { %2119 = vmatprep.subr.bf16.mxu0 %v3073_v1  ;;  %572 = vst.msk [vmem:[#allocation2 + $0x88] sm:$0x3] %vm562_vm3, %v3073_v1  ;;  %574 = vst.msk [vmem:[#allocation2 + $0x98] sm:$0x3] %vm562_vm3, %v3073_v1  ;;  %v2376_v23 = vld [vmem:[%s3061_s3 + $0x5] ss:$0 sm:$0xff] }
  0x13   : > { %577 = vst.msk [vmem:[#allocation2 + $0x30] sm:$0x7] %vm576_vm4, %v3073_v1  ;;  %578 = vst.msk [vmem:[#allocation2 + $0x40] sm:$0x7] %vm576_vm4, %v3073_v1  ;;  %v2381_v25 = vld [vmem:[%s3061_s3 + $0x6] ss:$0 sm:$0xff] }
  0x14   : > { %581 = vst.msk [vmem:[#allocation2 + $0x37] sm:$0x7] %vm576_vm4, %v3073_v1  ;;  %582 = vst.msk [vmem:[#allocation2 + $0x47] sm:$0x7] %vm576_vm4, %v3073_v1  ;;  %v594_v6 = vld [vmem:[#allocation2] sm:$0xf] }
  0x15   : > { %2120 = vmatpush3.bf16.msra.mxu0 %v2167_v3  ;;  %579 = vst.msk [vmem:[#allocation2 + $0x50] sm:$0x7] %vm576_vm4, %v3073_v1  ;;  %580 = vst.msk [vmem:[#allocation2 + $0x60] sm:$0x7] %vm576_vm4, %v3073_v1  ;;  %v633_v8 = vld [vmem:[#allocation2 + $0x2] sm:$0xf]  ;;  %v605_v10 = vmul.f32 %v2346_v7, %v594_v6 }
  0x16   : > { %2121 = vmatprep.subr.bf16.mxu0 %v3073_v1  ;;  %583 = vst.msk [vmem:[#allocation2 + $0x57] sm:$0x7] %vm576_vm4, %v3073_v1  ;;  %584 = vst.msk [vmem:[#allocation2 + $0x67] sm:$0x7] %vm576_vm4, %v3073_v1  ;;  %v613_v11 = vld [vmem:[#allocation2 + $0x1] sm:$0xf]  ;;  %v645_v13 = vmul.f32 %v2351_v9, %v633_v8 }
  0x17   : > { %v653_v14 = vld [vmem:[#allocation2 + $0x3] sm:$0xf]  ;;  %v625_v18 = vmul.f32 %v2357_v12, %v613_v11  ;;  %v734_v30 = vld [vmem:[#allocation2 + $0x10] sm:$0xf]  ;;  %v2388_v31 = vld [vmem:[%s3061_s3 + $0x7] ss:$0 sm:$0xff] }
  0x18   : > { %v673_v16 = vld [vmem:[#allocation2 + $0x4] sm:$0xf]  ;;  %v649_v19 = vadd.f32 %v645_v13, %v605_v10  ;;  %v665_v20 = vmul.f32 %v2363_v15, %v653_v14  ;;  %v754_v32 = vld [vmem:[#allocation2 + $0x11] sm:$0xf]  ;;  %v2393_v33 = vld [vmem:[%s3061_s3 + $0x8] ss:$0 sm:$0xff]  ;;  %v746_v40 = vmul.f32 %v2388_v31, %v734_v30 }
  0x19   : > { %2122 = vmatpush3.bf16.msra.mxu0 %v2168_v4  ;;  %v685_v21 = vmul.f32 %v2368_v17, %v673_v16  ;;  %v693_v22 = vld [vmem:[#allocation2 + $0x5] sm:$0xf]  ;;  %v595_v34 = vld [vmem:[#allocation2 + $0x10] sm:$0xf]  ;;  %v766_v41 = vmul.f32 %v2393_v33, %v754_v32  ;;  %v2400_v43 = vld [vmem:[%s3061_s3 + $0x9] ss:$0 sm:$0xff] }
  0x1a   : > { %2127 = vmatprep.subr.bf16.mxu0 %v3073_v1  ;;  %v713_v24 = vld [vmem:[#allocation2 + $0x6] sm:$0xf]  ;;  %v669_v26 = vadd.f32 %v665_v20, %v625_v18  ;;  %v705_v28 = vmul.f32 %v2376_v23, %v693_v22  ;;  %v614_v35 = vld [vmem:[#allocation2 + $0x11] sm:$0xf]  ;;  %v2405_v45 = vld [vmem:[%s3061_s3 + $0xa] ss:$0 sm:$0xff]  ;;  %v606_v46 = vmul.f32 %v2346_v7, %v595_v34 }
  0x1b   : > { %v689_v27 = vadd.f32 %v685_v21, %v649_v19  ;;  %v725_v29 = vmul.f32 %v2381_v25, %v713_v24  ;;  %v634_v36 = vld [vmem:[#allocation2 + $0x12] sm:$0xf]  ;;  %v626_v47 = vmul.f32 %v2357_v12, %v614_v35  ;;  %v2416_v57 = vld [vmem:[%s3061_s3 + $0xb] ss:$0 sm:$0xff]  ;;  %v2421_v59 = vld [vmem:[%s3061_s3 + $0xc] ss:$0 sm:$0xff] }
  0x1c   : > { %2124 = vmatmul.mubr.msk.bf16.vlgmr.msra.gmra.mxu0 %vm515_vm1, %v2169_v5  ;;  %v654_v37 = vld [vmem:[#allocation2 + $0x13] sm:$0xf]  ;;  %v709_v38 = vadd.f32 %v705_v28, %v669_v26  ;;  %v646_v48 = vmul.f32 %v2351_v9, %v634_v36  ;;  %v735_v2 = vld [vmem:[#allocation2 + $0x20] sm:$0xf]  ;;  %v2430_v10 = vld [vmem:[%s3061_s3 + $0xd] ss:$0 sm:$0xff] }
  0x1d   : > { %2131 = vmatprep.mubr.msk.bf16.mxu0 %vm2201_vm0, %v3073_v1  ;;  %v729_v39 = vadd.f32 %v725_v29, %v689_v27  ;;  %v774_v42 = vld [vmem:[#allocation2 + $0x12] sm:$0xf]  ;;  %v666_v49 = vmul.f32 %v2363_v15, %v654_v37  ;;  %v714_v0 = vld [vmem:[#allocation2 + $0x16] sm:$0xf]  ;;  %v875_v11 = vld [vmem:[#allocation2 + $0x20] sm:$0xf]  ;;  %v747_v21 = vmul.f32 %v2388_v31, %v735_v2 }
  0x1e   : > { %v794_v44 = vld [vmem:[#allocation2 + $0x13] sm:$0xf]  ;;  %v750_v52 = vadd.f32 %v746_v40, %v709_v38  ;;  %v786_v54 = vmul.f32 %v2400_v43, %v774_v42  ;;  %v650_v60 = vadd.f32 %v646_v48, %v606_v46  ;;  %v2435_v13 = vld [vmem:[%s3061_s3 + $0xe] ss:$0 sm:$0xff]  ;;  %v596_v14 = vld [vmem:[#allocation2 + $0x20] sm:$0xf]  ;;  %v726_v20 = vmul.f32 %v2381_v25, %v714_v0 }
  0x1f   : > { %v674_v50 = vld [vmem:[#allocation2 + $0x14] sm:$0xf]  ;;  %v770_v53 = vadd.f32 %v766_v41, %v729_v39  ;;  %v806_v55 = vmul.f32 %v2405_v45, %v794_v44  ;;  %v670_v61 = vadd.f32 %v666_v49, %v626_v47  ;;  %v635_v16 = vld [vmem:[#allocation2 + $0x22] sm:$0xf]  ;;  %v887_v29 = vmul.f32 %v2435_v13, %v875_v11  ;;  %v2444_v32 = vld [vmem:[%s3061_s3 + $0xf] ss:$0 sm:$0xff] }
  0x20   : > { %v694_v51 = vld [vmem:[#allocation2 + $0x15] sm:$0xf]  ;;  %v686_v62 = vmul.f32 %v2368_v17, %v674_v50  ;;  %v790_v3 = vadd.f32 %v786_v54, %v750_v52  ;;  %v755_v22 = vld [vmem:[#allocation2 + $0x21] sm:$0xf]  ;;  %v2449_v35 = vld [vmem:[%s3061_s3 + $0x10] ss:$0 sm:$0xff]  ;;  %v607_v36 = vmul.f32 %v2346_v7, %v596_v14  ;;  %v647_v37 = vmul.f32 %v2351_v9, %v635_v16 }
  0x21   : > { %v814_v56 = vld [vmem:[#allocation2 + $0x14] sm:$0xf]  ;;  %v706_v63 = vmul.f32 %v2376_v23, %v694_v51  ;;  %v810_v4 = vadd.f32 %v806_v55, %v770_v53  ;;  %v775_v24 = vld [vmem:[#allocation2 + $0x22] sm:$0xf]  ;;  %v767_v44 = vmul.f32 %v2393_v33, %v755_v22  ;;  %v2460_v54 = vld [vmem:[%s3061_s3 + $0x11] ss:$0 sm:$0xff] }
  0x22   : > { %v834_v58 = vld [vmem:[#allocation2 + $0x15] sm:$0xf]  ;;  %v826_v5 = vmul.f32 %v2416_v57, %v814_v56  ;;  %v690_v18 = vadd.f32 %v686_v62, %v650_v60  ;;  %v895_v30 = vld [vmem:[#allocation2 + $0x21] sm:$0xf]  ;;  %v787_v46 = vmul.f32 %v2400_v43, %v775_v24  ;;  %v2465_v56 = vld [vmem:[%s3061_s3 + $0x12] ss:$0 sm:$0xff]  ;;  %v651_v60 = vadd.f32 %v647_v37, %v607_v36 }
  0x23   : > { %v846_v6 = vmul.f32 %v2421_v59, %v834_v58  ;;  %v854_v8 = vld [vmem:[#allocation2 + $0x16] sm:$0xf]  ;;  %v710_v19 = vadd.f32 %v706_v63, %v670_v61  ;;  %v915_v34 = vld [vmem:[#allocation2 + $0x22] sm:$0xf]  ;;  %v907_v51 = vmul.f32 %v2444_v32, %v895_v30  ;;  %v715_v0 = vld [vmem:[#allocation2 + $0x26] sm:$0xf] }
  0x24   : > { %v830_v26 = vadd.f32 %v826_v5, %v790_v3  ;;  %v866_v28 = vmul.f32 %v2430_v10, %v854_v8  ;;  %v615_v38 = vld [vmem:[#allocation2 + $0x21] sm:$0xf]  ;;  %v730_v41 = vadd.f32 %v726_v20, %v690_v18  ;;  %v927_v52 = vmul.f32 %v2449_v35, %v915_v34  ;;  %v695_v63 = vld [vmem:[#allocation2 + $0x25] sm:$0xf]  ;;  %v2477_v20 = vld [vmem:[%s3061_s3 + $0x13] ss:$0 sm:$0xff] }
  0x25   : > { %v850_v27 = vadd.f32 %v846_v6, %v810_v4  ;;  %v655_v39 = vld [vmem:[#allocation2 + $0x23] sm:$0xf]  ;;  %v751_v42 = vadd.f32 %v747_v21, %v710_v19  ;;  %v627_v58 = vmul.f32 %v2357_v12, %v615_v38  ;;  %v2482_v22 = vld [vmem:[%s3061_s3 + $0x14] ss:$0 sm:$0xff]  ;;  %v1258_v38 = vld [vmem:[#allocation2 + $0x75] sm:$0xf] }
  0x26   : > { %v675_v40 = vld [vmem:[#allocation2 + $0x24] sm:$0xf]  ;;  %v870_v49 = vadd.f32 %v866_v28, %v830_v26  ;;  %v667_v61 = vmul.f32 %v2363_v15, %v655_v39  ;;  %v771_v2 = vadd.f32 %v767_v44, %v730_v41  ;;  %v727_v28 = vmul.f32 %v2381_v25, %v715_v0  ;;  %v1238_v37 = vld [vmem:[#allocation2 + $0x74] sm:$0xf]  ;;  %v2491_v39 = vld [vmem:[%s3060_s2] ss:$0 sm:$0xff] }
  0x27   : > { %v795_v47 = vld [vmem:[#allocation2 + $0x23] sm:$0xf]  ;;  %v891_v50 = vadd.f32 %v887_v29, %v850_v27  ;;  %v687_v62 = vmul.f32 %v2368_v17, %v675_v40  ;;  %v791_v3 = vadd.f32 %v787_v46, %v751_v42  ;;  %v707_v27 = vmul.f32 %v2376_v23, %v695_v63  ;;  %v1278_v46 = vld [vmem:[#allocation2 + $0x76] sm:$0xf]  ;;  %v1337_v0 = vld [vmem:[#allocation2 + $0x72] sm:$0xf] }
  0x28   : > { %v815_v48 = vld [vmem:[#allocation2 + $0x24] sm:$0xf]  ;;  %v807_v4 = vmul.f32 %v2405_v45, %v795_v47  ;;  %v911_v11 = vadd.f32 %v907_v51, %v870_v49  ;;  %v671_v24 = vadd.f32 %v667_v61, %v627_v58  ;;  %v1158_v47 = vld [vmem:[#allocation2 + $0x70] sm:$0xf]  ;;  %v2498_v49 = vld [vmem:[%s3061_s3 + $0x20] ss:$0 sm:$0xff] }
  0x29   : > { %v935_v53 = vld [vmem:[#allocation2 + $0x23] sm:$0xf]  ;;  %v827_v5 = vmul.f32 %v2416_v57, %v815_v48  ;;  %v931_v14 = vadd.f32 %v927_v52, %v891_v50  ;;  %v691_v26 = vadd.f32 %v687_v62, %v651_v60  ;;  %v1178_v48 = vld [vmem:[#allocation2 + $0x71] sm:$0xf]  ;;  %v2503_v50 = vld [vmem:[%s3061_s3 + $0x21] ss:$0 sm:$0xff] }
  0x2a   : > { %v955_v55 = vld [vmem:[#allocation2 + $0x24] sm:$0xf]  ;;  %v947_v16 = vmul.f32 %v2460_v54, %v935_v53  ;;  %v811_v29 = vadd.f32 %v807_v4, %v771_v2  ;;  %3091 = vst [vmem:[#allocation4_spill] sm:$0xff] %v2503_v50  ;;  %v1198_v51 = vld [vmem:[#allocation2 + $0x72] sm:$0xf] }
  0x2b   : > { %v835_v6 = vld [vmem:[#allocation2 + $0x25] sm:$0xf]  ;;  %v967_v18 = vmul.f32 %v2465_v56, %v955_v55  ;;  %v831_v30 = vadd.f32 %v827_v5, %v791_v3  ;;  %v1218_v52 = vld [vmem:[#allocation2 + $0x73] sm:$0xf]  ;;  %v1298_v55 = vld [vmem:[#allocation2 + $0x80] sm:$0xf]  ;;  %v2520_v3 = vadd.f32 %v707_v27, %v671_v24  ;;  %v2522_v4 = vadd.f32 %v727_v28, %v691_v26 }
  0x2c   : > { %v855_v8 = vld [vmem:[#allocation2 + $0x26] sm:$0xf]  ;;  %v847_v34 = vmul.f32 %v2421_v59, %v835_v6  ;;  %v951_v40 = vadd.f32 %v947_v16, %v911_v11  ;;  %v1297_v53 = vld [vmem:[#allocation2 + $0x70] sm:$0xf]  ;;  %v2508_v58 = vld [vmem:[%s3061_s3 + $0x1c] ss:$0 sm:$0xff]  ;;  %v2548_v27 = vmul.f32 %v2498_v49, %v1238_v37  ;;  %v2551_v28 = vmul.f32 %v2503_v50, %v1258_v38 }
  0x2d   : > { %v975_v19 = vld [vmem:[#allocation2 + $0x25] sm:$0xf]  ;;  %v867_v36 = vmul.f32 %v2430_v10, %v855_v8  ;;  %v971_v41 = vadd.f32 %v967_v18, %v931_v14  ;;  %v2513_v60 = vld [vmem:[%s3061_s3 + $0x1d] ss:$0 sm:$0xff]  ;;  %v2518_v61 = vld [vmem:[%s3061_s3 + $0x22] ss:$0 sm:$0xff]  ;;  %v2570_v38 = vmul.f32 %v2508_v58, %v1158_v47 }
  0x2e   : > { %v995_v21 = vld [vmem:[#allocation2 + $0x26] sm:$0xf]  ;;  %v987_v42 = vmul.f32 %v2477_v20, %v975_v19  ;;  %3092 = vst [vmem:[#allocation5_spill] sm:$0xff] %v2518_v61  ;;  %v1317_v62 = vld [vmem:[#allocation2 + $0x71] sm:$0xf]  ;;  %v2524_v5 = vadd.f32 %v847_v34, %v811_v29  ;;  %3094 = vst [vmem:[#allocation7_spill] sm:$0xff] %v2548_v27  ;;  %v2567_v37 = vmul.f32 %v2518_v61, %v1278_v46 }
  0x2f   : > { %v1007_v44 = vmul.f32 %v2482_v22, %v995_v21  ;;  %v1318_v63 = vld [vmem:[#allocation2 + $0x81] sm:$0xf]  ;;  %v2526_v6 = vadd.f32 %v867_v36, %v831_v30  ;;  %v2531_v8 = vld [vmem:[%s3061_s3 + $0x1e] ss:$0 sm:$0xff]  ;;  %v2536_v11 = vld [vmem:[%s3061_s3 + $0x1f] ss:$0 sm:$0xff] }
  0x30   : > { %v1338_v2 = vld [vmem:[#allocation2 + $0x82] sm:$0xf]  ;;  %v1357_v16 = vld [vmem:[#allocation2 + $0x73] sm:$0xf]  ;;  %v2543_v24 = vadd.f32 %v987_v42, %v951_v40  ;;  %3095 = vst [vmem:[#allocation8_spill] sm:$0xff] %v2551_v28  ;;  %3098 = vst [vmem:[#allocation11_spill] sm:$0xff] %v2567_v37  ;;  %v2573_v42 = vmul.f32 %v2513_v60, %v1178_v48  ;;  %v2586_v47 = vmul.f32 %v2531_v8, %v1198_v51 }
  0x31   : > { %v2541_v14 = vld [vmem:[%s3061_s3 + $0x23] ss:$0 sm:$0xff]  ;;  %v1377_v19 = vld [vmem:[#allocation2 + $0x74] sm:$0xf]  ;;  %v2545_v26 = vadd.f32 %v1007_v44, %v971_v41  ;;  %v2556_v29 = vld [vmem:[%s3061_s3 + $0x24] ss:$0 sm:$0xff]  ;;  %v2589_v48 = vmul.f32 %v2536_v11, %v1218_v52 }
  0x32   : > { %3093 = vst [vmem:[#allocation6_spill] sm:$0xff] %v2541_v14  ;;  %v1358_v18 = vld [vmem:[#allocation2 + $0x83] sm:$0xf]  ;;  %v1397_v36 = vld [vmem:[#allocation2 + $0x75] sm:$0xf]  ;;  %3099 = vst [vmem:[#allocation12_spill] sm:$0xff] %v2570_v38  ;;  %v2592_v27 = vmul.f32 %v2541_v14, %v1297_v53  ;;  %v2612_v53 = vmul.f32 %v2556_v29, %v1317_v62 }
  0x33   : > { %v2561_v30 = vld [vmem:[%s3061_s3 + $0x25] ss:$0 sm:$0xff]  ;;  %3100 = vst [vmem:[#allocation13_spill] sm:$0xff] %v2573_v42  ;;  %v2578_v44 = vld [vmem:[%s3061_s3 + $0x26] ss:$0 sm:$0xff]  ;;  %3103 = vst [vmem:[#allocation16_spill] sm:$0xff] %v2586_v47  ;;  %v2595_v42 = vmul.f32 %v2541_v14, %v1298_v55  ;;  %v2615_v55 = vmul.f32 %v2556_v29, %v1318_v63 }
  0x34   : > { %3096 = vst [vmem:[#allocation9_spill] sm:$0xff] %v2561_v30  ;;  %v1378_v34 = vld [vmem:[#allocation2 + $0x84] sm:$0xf]  ;;  %3101 = vst [vmem:[#allocation14_spill] sm:$0xff] %v2578_v44  ;;  %v1436_v46 = vld [vmem:[#allocation2 + $0x70] sm:$0xf]  ;;  %v2629_v62 = vmul.f32 %v2578_v44, %v1357_v16  ;;  %v2632_v63 = vmul.f32 %v2578_v44, %v1358_v18 }
  0x35   : > { %v1398_v40 = vld [vmem:[#allocation2 + $0x85] sm:$0xf]  ;;  %3104 = vst [vmem:[#allocation17_spill] sm:$0xff] %v2589_v48  ;;  %3105 = vst [vmem:[#allocation18_spill] sm:$0xff] %v2592_v27  ;;  %v1437_v51 = vld [vmem:[#allocation2 + $0x80] sm:$0xf]  ;;  %v2621_v27 = vmul.f32 %v2561_v30, %v1338_v2 }
  0x36   : > { %v2583_v1 = vld [vmem:[%s3061_s3 + $0x27] ss:$0 sm:$0xff]  ;;  %3106 = vst [vmem:[#allocation19_spill] sm:$0xff] %v2595_v42  ;;  %v2600_v38 = vld [vmem:[%s3061_s3 + $0x28] ss:$0 sm:$0xff]  ;;  %3108 = vst [vmem:[#allocation21_spill] sm:$0xff] %v2612_v53  ;;  %v2618_v42 = vmul.f32 %v2561_v30, %v1337_v0 }
  0x37   : > { %3102 = vst [vmem:[#allocation15_spill] sm:$0xff] %v2583_v1  ;;  %v1418_v28 = vld [vmem:[#allocation2 + $0x86] sm:$0xf]  ;;  %3107 = vst [vmem:[#allocation20_spill] sm:$0xff] %v2600_v38  ;;  %v1438_v47 = vld [vmem:[#allocation2 + $0x90] sm:$0xf]  ;;  %v2635_v0 = vmul.f32 %v2583_v1, %v1377_v19  ;;  %v2638_v2 = vmul.f32 %v2583_v1, %v1378_v34  ;;  %v2664_v1 = vmul.f32 %v2600_v38, %v1397_v36 }
  0x38   : > { %v1456_v52 = vld [vmem:[#allocation2 + $0x71] sm:$0xf]  ;;  %3109 = vst [vmem:[#allocation22_spill] sm:$0xff] %v2615_v55  ;;  %3110 = vst [vmem:[#allocation23_spill] sm:$0xff] %v2618_v42  ;;  %v2626_v14 = vld [vmem:[%s3061_s3 + $0x2a] ss:$0 sm:$0xff] }
  0x39   : > { %3111 = vst [vmem:[#allocation24_spill] sm:$0xff] %v2621_v27  ;;  %v1476_v48 = vld [vmem:[#allocation2 + $0x72] sm:$0xf]  ;;  %3112 = vst [vmem:[#allocation25_spill] sm:$0xff] %v2629_v62  ;;  %v2643_v27 = vld [vmem:[%s3061_s3 + $0x2b] ss:$0 sm:$0xff] }
  0x3a   : > { %v1496_v61 = vld [vmem:[#allocation2 + $0x73] sm:$0xf]  ;;  %3113 = vst [vmem:[#allocation26_spill] sm:$0xff] %v2632_v63  ;;  %3114 = vst [vmem:[#allocation27_spill] sm:$0xff] %v2635_v0  ;;  %v2648_v42 = vld [vmem:[%s3061_s3 + $0x2c] ss:$0 sm:$0xff]  ;;  %v2667_v63 = vmul.f32 %v2600_v38, %v1398_v40  ;;  %v2686_v40 = vmul.f32 %v2626_v14, %v1436_v46 }
  0x3b   : > { %3115 = vst [vmem:[#allocation28_spill] sm:$0xff] %v2638_v2  ;;  %v2653_v16 = vld [vmem:[%s3061_s3 + $0x2d] ss:$0 sm:$0xff]  ;;  %v2658_v18 = vld [vmem:[%s3061_s3 + $0x2e] ss:$0 sm:$0xff]  ;;  %3117 = vst [vmem:[#allocation30_spill] sm:$0xff] %v2664_v1  ;;  %v2702_v46 = vmul.f32 %v2648_v42, %v1476_v48 }
  0x3c   : > { %v1536_v19 = vld [vmem:[#allocation2 + $0x75] sm:$0xf]  ;;  %v1457_v2 = vld [vmem:[#allocation2 + $0x81] sm:$0xf]  ;;  %3118 = vst [vmem:[#allocation31_spill] sm:$0xff] %v2667_v63 }
  0x3d   : > { %v1556_v34 = vld [vmem:[#allocation2 + $0x76] sm:$0xf]  ;;  %v2675_v44 = vld [vmem:[%s3061_s3 + $0x2f] ss:$0 sm:$0xff]  ;;  %v2680_v55 = vld [vmem:[%s3061_s3 + $0x30] ss:$0 sm:$0xff] }
  0x3e   : > { %v1478_v36 = vld [vmem:[#allocation2 + $0x92] sm:$0xf]  ;;  %v1497_v38 = vld [vmem:[#allocation2 + $0x83] sm:$0xf]  ;;  %3124 = vst [vmem:[#allocation37_spill] sm:$0xff] %v2702_v46 }
  0x3f   : > { %v1498_v30 = vld [vmem:[#allocation2 + $0x93] sm:$0xf]  ;;  %v1517_v53 = vld [vmem:[#allocation2 + $0x84] sm:$0xf] }
  0xdc   : > { %v553_v21 = vpop.f32.mrf.mxu0 }
  0xdd   : > { %v2564_v41 = vadd.f32 %v2491_v39, %v553_v21  ;;  %v1417_v21 = vld [vmem:[#allocation2 + $0x76] sm:$0xf] }
  0xde   : > { %v2125_v37 = vpop.f32.mrf.mxu0 }
  0xdf   : > { %3097 = vst [vmem:[#allocation10_spill] sm:$0xff] %v2564_v41  ;;  %v2605_v37 = vld [vmem:[%s3061_s3 + $0x29] ss:$0 sm:$0xff]  ;;  %586 = vst.msk [vmem:[#allocation2 + $0x33] sm:$0xf] %vm585_vm5, %v2564_v41 }
  0xe0   : > { %589 = vst.msk [vmem:[#allocation2 + $0x3f] sm:$0xf0] %vm588_vm6, %v2564_v41  ;;  %v1516_v41 = vld [vmem:[#allocation2 + $0x74] sm:$0xf]  ;;  %v556_v50 = vpop.f32.mrf.mxu0  ;;  %v2670_v62 = vmul.f32 %v2605_v37, %v1417_v21  ;;  %v2683_v1 = vmul.f32 %v2605_v37, %v1418_v28  ;;  %v2689_v21 = vmul.f32 %v2626_v14, %v1437_v51  ;;  %v2699_v28 = vmul.f32 %v2643_v27, %v1456_v52 }
  0xe1   : > { %v2661_v0 = vadd.f32 %v2491_v39, %v556_v50  ;;  %v1458_v39 = vld [vmem:[#allocation2 + $0x91] sm:$0xf]  ;;  %v1477_v50 = vld [vmem:[#allocation2 + $0x82] sm:$0xf]  ;;  %v2705_v51 = vmul.f32 %v2653_v16, %v1496_v61  ;;  %v2717_v52 = vmul.f32 %v2643_v27, %v1457_v2  ;;  %v1557_v61 = vld [vmem:[#allocation2 + $0x86] sm:$0xf] }
  0xe2   : > { %3119 = vst [vmem:[#allocation32_spill] sm:$0xff] %v2670_v62  ;;  %3120 = vst [vmem:[#allocation33_spill] sm:$0xff] %v2683_v1  ;;  %v2692_v62 = vmul.f32 %v2626_v14, %v1438_v47  ;;  %v2126_v63 = vpop.f32.mrf.mxu0  ;;  %v2708_v47 = vmul.f32 %v2658_v18, %v1516_v41  ;;  %v1538_v1 = vld [vmem:[#allocation2 + $0x95] sm:$0xf]  ;;  %v2720_v48 = vmul.f32 %v2643_v27, %v1458_v39 }
  0xe3   : > { %3116 = vst [vmem:[#allocation29_spill] sm:$0xff] %v2661_v0  ;;  %3121 = vst [vmem:[#allocation34_spill] sm:$0xff] %v2689_v21  ;;  %v1518_v63 = vld [vmem:[#allocation2 + $0x94] sm:$0xf]  ;;  %v2711_v21 = vmul.f32 %v2675_v44, %v1536_v19  ;;  %v2726_v41 = vmul.f32 %v2648_v42, %v1478_v36  ;;  %v2732_v19 = vmul.f32 %v2653_v16, %v1498_v30 }
  0xe4   : > { %3122 = vst [vmem:[#allocation35_spill] sm:$0xff] %v2692_v62  ;;  %591 = vst.msk [vmem:[#allocation2 + $0x53] sm:$0xf] %vm585_vm5, %v2661_v0  ;;  %v1537_v62 = vld [vmem:[#allocation2 + $0x85] sm:$0xf]  ;;  %v2735_v39 = vmul.f32 %v2658_v18, %v1517_v53  ;;  %v2744_v36 = vmul.f32 %v2675_v44, %v1538_v1  ;;  %v2750_v53 = vmul.f32 %v2680_v55, %v1557_v61 }
  0xe5   : > { %593 = vst.msk [vmem:[#allocation2 + $0x5f] sm:$0xf0] %vm588_vm6, %v2661_v0  ;;  %3123 = vst [vmem:[#allocation36_spill] sm:$0xff] %v2699_v28  ;;  %v2714_v0 = vmul.f32 %v2680_v55, %v1556_v34  ;;  %v1558_v34 = vld [vmem:[#allocation2 + $0x96] sm:$0xf] }
  0xe6   : > { %3125 = vst [vmem:[#allocation38_spill] sm:$0xff] %v2705_v51  ;;  %3126 = vst [vmem:[#allocation39_spill] sm:$0xff] %v2708_v47  ;;  %v2723_v51 = vmul.f32 %v2648_v42, %v1477_v50  ;;  %v2729_v47 = vmul.f32 %v2653_v16, %v1497_v38  ;;  %v616_v2 = vld [vmem:[#allocation2 + $0x31] sm:$0xf]  ;;  %v2741_v50 = vmul.f32 %v2675_v44, %v1537_v62  ;;  %v716_v1 = vld [vmem:[#allocation2 + $0x36] sm:$0xf] }
  0xe7   : > { %3127 = vst [vmem:[#allocation40_spill] sm:$0xff] %v2711_v21  ;;  %3128 = vst [vmem:[#allocation41_spill] sm:$0xff] %v2714_v0  ;;  %v597_v0 = vld [vmem:[#allocation2 + $0x30] sm:$0xf]  ;;  %v628_v30 = vmul.f32 %v2357_v12, %v616_v2  ;;  %v757_v2 = vld [vmem:[#allocation2 + $0x41] sm:$0xf] }
  0xe8   : > { %3129 = vst [vmem:[#allocation42_spill] sm:$0xff] %v2717_v52  ;;  %3130 = vst [vmem:[#allocation43_spill] sm:$0xff] %v2720_v48  ;;  %v636_v21 = vld [vmem:[#allocation2 + $0x32] sm:$0xf]  ;;  %v2738_v48 = vmul.f32 %v2658_v18, %v1518_v63  ;;  %v608_v38 = vmul.f32 %v2346_v7, %v597_v0  ;;  %v2756_v7 = vmul.f32 %v2680_v55, %v1558_v34 }
  0xe9   : > { %3131 = vst [vmem:[#allocation44_spill] sm:$0xff] %v2723_v51  ;;  %3132 = vst [vmem:[#allocation45_spill] sm:$0xff] %v2726_v41  ;;  %v676_v41 = vld [vmem:[#allocation2 + $0x34] sm:$0xf] }
  0xea   : > { %3133 = vst [vmem:[#allocation46_spill] sm:$0xff] %v2729_v47  ;;  %3134 = vst [vmem:[#allocation47_spill] sm:$0xff] %v2732_v19  ;;  %v648_v19 = vmul.f32 %v2351_v9, %v636_v21  ;;  %v656_v47 = vld [vmem:[#allocation2 + $0x33] sm:$0xf]  ;;  %v688_v62 = vmul.f32 %v2368_v17, %v676_v41  ;;  %v728_v9 = vmul.f32 %v2381_v25, %v716_v1 }
  0xeb   : > { %3135 = vst [vmem:[#allocation48_spill] sm:$0xff] %v2735_v39  ;;  %3136 = vst [vmem:[#allocation49_spill] sm:$0xff] %v2738_v48  ;;  %v696_v51 = vld [vmem:[#allocation2 + $0x35] sm:$0xf]  ;;  %v668_v63 = vmul.f32 %v2363_v15, %v656_v47  ;;  %v737_v48 = vld [vmem:[#allocation2 + $0x40] sm:$0xf] }
  0xec   : > { %3137 = vst [vmem:[#allocation50_spill] sm:$0xff] %v2741_v50  ;;  %3138 = vst [vmem:[#allocation51_spill] sm:$0xff] %v2744_v36  ;;  %v708_v50 = vmul.f32 %v2376_v23, %v696_v51  ;;  %v736_v36 = vld [vmem:[#allocation2 + $0x30] sm:$0xf]  ;;  %v652_v12 = vadd.f32 %v648_v19, %v608_v38  ;;  %v749_v21 = vmul.f32 %v2388_v31, %v737_v48  ;;  %v777_v51 = vld [vmem:[#allocation2 + $0x42] sm:$0xf] }
  0xed   : > { %3139 = vst [vmem:[#allocation52_spill] sm:$0xff] %v2750_v53  ;;  %3140 = vst [vmem:[#allocation53_spill] sm:$0xff] %v2756_v7  ;;  %v748_v0 = vmul.f32 %v2388_v31, %v736_v36  ;;  %v756_v61 = vld [vmem:[#allocation2 + $0x31] sm:$0xf]  ;;  %v672_v47 = vadd.f32 %v668_v63, %v628_v30  ;;  %v769_v23 = vmul.f32 %v2393_v33, %v757_v2  ;;  %v797_v7 = vld [vmem:[#allocation2 + $0x43] sm:$0xf] }
  0xee   : > { %v776_v15 = vld [vmem:[#allocation2 + $0x32] sm:$0xf]  ;;  %v768_v17 = vmul.f32 %v2393_v33, %v756_v61  ;;  %v692_v19 = vadd.f32 %v688_v62, %v652_v12  ;;  %v789_v36 = vmul.f32 %v2400_v43, %v777_v51  ;;  %v817_v38 = vld [vmem:[#allocation2 + $0x44] sm:$0xf]  ;;  %v809_v33 = vmul.f32 %v2405_v45, %v797_v7  ;;  %v877_v51 = vld [vmem:[#allocation2 + $0x40] sm:$0xf] }
  0xef   : > { %v788_v41 = vmul.f32 %v2400_v43, %v776_v15  ;;  %v796_v34 = vld [vmem:[#allocation2 + $0x33] sm:$0xf]  ;;  %v752_v25 = vadd.f32 %v748_v0, %v2520_v3  ;;  %v712_v30 = vadd.f32 %v708_v50, %v672_v47  ;;  %v837_v2 = vld [vmem:[#allocation2 + $0x45] sm:$0xf]  ;;  %v829_v3 = vmul.f32 %v2416_v57, %v817_v38  ;;  %v897_v7 = vld [vmem:[#allocation2 + $0x41] sm:$0xf] }
  0xf0   : > { %v808_v31 = vmul.f32 %v2405_v45, %v796_v34  ;;  %v816_v48 = vld [vmem:[#allocation2 + $0x34] sm:$0xf]  ;;  %v772_v63 = vadd.f32 %v768_v17, %v2522_v4  ;;  %v857_v53 = vld [vmem:[#allocation2 + $0x46] sm:$0xf]  ;;  %v732_v62 = vadd.f32 %v728_v9, %v692_v19  ;;  %v876_v0 = vld [vmem:[#allocation2 + $0x30] sm:$0xf]  ;;  %v849_v4 = vmul.f32 %v2421_v59, %v837_v2 }
  0xf1   : > { %v836_v1 = vld [vmem:[#allocation2 + $0x35] sm:$0xf]  ;;  %v828_v61 = vmul.f32 %v2416_v57, %v816_v48  ;;  %v792_v12 = vadd.f32 %v788_v41, %v752_v25  ;;  %v896_v34 = vld [vmem:[#allocation2 + $0x31] sm:$0xf]  ;;  %v753_v39 = vadd.f32 %v749_v21, %v712_v30  ;;  %v869_v48 = vmul.f32 %v2430_v10, %v857_v53  ;;  %v917_v21 = vld [vmem:[#allocation2 + $0x42] sm:$0xf] }
  0xf2   : > { %v856_v15 = vld [vmem:[#allocation2 + $0x36] sm:$0xf]  ;;  %v848_v43 = vmul.f32 %v2421_v59, %v836_v1  ;;  %v812_v50 = vadd.f32 %v808_v31, %v772_v63  ;;  %v773_v47 = vadd.f32 %v769_v23, %v732_v62  ;;  %v888_v9 = vmul.f32 %v2435_v13, %v876_v0  ;;  %v916_v41 = vld [vmem:[#allocation2 + $0x32] sm:$0xf]  ;;  %v937_v63 = vld [vmem:[#allocation2 + $0x43] sm:$0xf] }
  0xf3   : > { %v868_v45 = vmul.f32 %v2430_v10, %v856_v15  ;;  %v832_v17 = vadd.f32 %v828_v61, %v792_v12  ;;  %v793_v57 = vadd.f32 %v789_v36, %v753_v39  ;;  %v889_v25 = vmul.f32 %v2435_v13, %v877_v51  ;;  %v936_v31 = vld [vmem:[#allocation2 + $0x33] sm:$0xf]  ;;  %v957_v36 = vld [vmem:[#allocation2 + $0x44] sm:$0xf] }
  0xf4   : > { %v852_v19 = vadd.f32 %v848_v43, %v812_v50  ;;  %v908_v38 = vmul.f32 %v2444_v32, %v896_v34  ;;  %v813_v1 = vadd.f32 %v809_v33, %v773_v47  ;;  %v892_v30 = vadd.f32 %v888_v9, %v2524_v5  ;;  %v956_v61 = vld [vmem:[#allocation2 + $0x34] sm:$0xf]  ;;  %v977_v5 = vld [vmem:[#allocation2 + $0x45] sm:$0xf]  ;;  %v1017_v46 = vld [vmem:[#allocation2 + $0x50] sm:$0xf] }
  0xf5   : > { %v872_v59 = vadd.f32 %v868_v45, %v832_v17  ;;  %v909_v23 = vmul.f32 %v2444_v32, %v897_v7  ;;  %v833_v10 = vadd.f32 %v829_v3, %v793_v57  ;;  %v928_v39 = vmul.f32 %v2449_v35, %v916_v41  ;;  %v976_v15 = vld [vmem:[#allocation2 + $0x35] sm:$0xf]  ;;  %v997_v50 = vld [vmem:[#allocation2 + $0x46] sm:$0xf]  ;;  %v1015_v45 = vld [vmem:[#allocation2 + $0x30] sm:$0xf] }
  0xf6   : > { %v893_v53 = vadd.f32 %v889_v25, %v852_v19  ;;  %v912_v2 = vadd.f32 %v908_v38, %v2526_v6  ;;  %v2782_v62 = vadd.f32 %v849_v4, %v813_v1  ;;  %v929_v33 = vmul.f32 %v2449_v35, %v917_v21  ;;  %v996_v0 = vld [vmem:[#allocation2 + $0x36] sm:$0xf]  ;;  %v2793_v4 = vld [vmem:[%s3061_s3 + $0x15] ss:$0 sm:$0xff]  ;;  %v1035_v41 = vld [vmem:[#allocation2 + $0x31] sm:$0xf] }
  0xf7   : > { %v913_v12 = vadd.f32 %v909_v23, %v872_v59  ;;  %v948_v43 = vmul.f32 %v2460_v54, %v936_v31  ;;  %v2786_v51 = vadd.f32 %v869_v48, %v833_v10  ;;  %v932_v34 = vadd.f32 %v928_v39, %v892_v30  ;;  %v1016_v48 = vld [vmem:[#allocation2 + $0x40] sm:$0xf]  ;;  %v2800_v57 = vld [vmem:[%s3061_s3 + $0x16] ss:$0 sm:$0xff]  ;;  %v1055_v1 = vld [vmem:[#allocation2 + $0x32] sm:$0xf] }
  0xf8   : > { %v949_v3 = vmul.f32 %v2460_v54, %v937_v63  ;;  %v968_v6 = vmul.f32 %v2465_v56, %v956_v61  ;;  %v933_v7 = vadd.f32 %v929_v33, %v893_v53  ;;  %v969_v17 = vmul.f32 %v2465_v56, %v957_v36  ;;  %v1036_v31 = vld [vmem:[#allocation2 + $0x41] sm:$0xf]  ;;  %v2807_v59 = vld [vmem:[%s3061_s3 + $0x17] ss:$0 sm:$0xff]  ;;  %v1075_v53 = vld [vmem:[#allocation2 + $0x33] sm:$0xf] }
  0xf9   : > { %v952_v47 = vadd.f32 %v948_v43, %v912_v2  ;;  %v988_v9 = vmul.f32 %v2477_v20, %v976_v15  ;;  %v989_v38 = vmul.f32 %v2477_v20, %v977_v5  ;;  %v1008_v21 = vmul.f32 %v2482_v22, %v996_v0  ;;  %v1056_v10 = vld [vmem:[#allocation2 + $0x42] sm:$0xf]  ;;  %v2814_v2 = vld [vmem:[%s3061_s3 + $0x18] ss:$0 sm:$0xff]  ;;  %v1095_v43 = vld [vmem:[#allocation2 + $0x34] sm:$0xf] }
  0xfa   : > { %v953_v19 = vadd.f32 %v949_v3, %v913_v12  ;;  %v972_v25 = vadd.f32 %v968_v6, %v932_v34  ;;  %v973_v30 = vadd.f32 %v969_v17, %v933_v7  ;;  %v1009_v63 = vmul.f32 %v2482_v22, %v997_v50  ;;  %v1076_v33 = vld [vmem:[#allocation2 + $0x43] sm:$0xf]  ;;  %v2823_v5 = vld [vmem:[%s3061_s3 + $0x19] ss:$0 sm:$0xff]  ;;  %v2833_v7 = vld [vmem:[%s3061_s3 + $0x1a] ss:$0 sm:$0xff] }
  0xfb   : > { %v992_v23 = vadd.f32 %v988_v9, %v952_v47  ;;  %v1027_v61 = vmul.f32 %v2793_v4, %v1015_v45  ;;  %v1028_v15 = vmul.f32 %v2793_v4, %v1016_v48  ;;  %v1047_v12 = vmul.f32 %v2800_v57, %v1035_v41  ;;  %v1096_v50 = vld [vmem:[#allocation2 + $0x44] sm:$0xf]  ;;  %v1115_v45 = vld [vmem:[#allocation2 + $0x35] sm:$0xf] }
  0xfc   : > { %v2816_v39 = vadd.f32 %v989_v38, %v953_v19  ;;  %v1012_v36 = vadd.f32 %v1008_v21, %v972_v25  ;;  %v2825_v0 = vadd.f32 %v1009_v63, %v973_v30  ;;  %v1048_v3 = vmul.f32 %v2800_v57, %v1036_v31  ;;  %v1116_v41 = vld [vmem:[#allocation2 + $0x45] sm:$0xf]  ;;  %v2841_v19 = vld [vmem:[%s3061_s3 + $0x1b] ss:$0 sm:$0xff]  ;;  %v1155_v30 = vld [vmem:[#allocation2 + $0x40] sm:$0xf] }
  0xfd   : > { %v1031_v34 = vadd.f32 %v1027_v61, %v2543_v24  ;;  %v1067_v6 = vmul.f32 %v2807_v59, %v1055_v1  ;;  %v1032_v47 = vadd.f32 %v1028_v15, %v992_v23  ;;  %v1051_v17 = vadd.f32 %v1047_v12, %v2545_v26  ;;  %v1135_v24 = vld [vmem:[#allocation2 + $0x36] sm:$0xf]  ;;  %v1136_v1 = vld [vmem:[#allocation2 + $0x46] sm:$0xf] }
  0xfe   : > { %v1068_v9 = vmul.f32 %v2807_v59, %v1056_v10  ;;  %v1087_v48 = vmul.f32 %v2814_v2, %v1075_v53  ;;  %v1052_v25 = vadd.f32 %v1048_v3, %v1012_v36  ;;  %v1088_v21 = vmul.f32 %v2814_v2, %v1076_v33  ;;  %v1175_v10 = vld [vmem:[#allocation2 + $0x41] sm:$0xf] }
  0xff   : > { %v1071_v38 = vadd.f32 %v1067_v6, %v1031_v34  ;;  %v1107_v31 = vmul.f32 %v2823_v5, %v1095_v43  ;;  %v1108_v63 = vmul.f32 %v2823_v5, %v1096_v50  ;;  %v1127_v61 = vmul.f32 %v2833_v7, %v1115_v45  ;;  %v1195_v53 = vld [vmem:[#allocation2 + $0x42] sm:$0xf]  ;;  %v1275_v50 = vld [vmem:[#allocation2 + $0x46] sm:$0xf] }
 0x100   : > { %v1072_v26 = vadd.f32 %v1068_v9, %v1032_v47  ;;  %v1091_v23 = vadd.f32 %v1087_v48, %v1051_v17  ;;  %v1092_v15 = vadd.f32 %v1088_v21, %v1052_v25  ;;  %v1128_v52 = vmul.f32 %v2833_v7, %v1116_v41  ;;  %v1215_v34 = vld [vmem:[#allocation2 + $0x43] sm:$0xf]  ;;  %v878_v9 = vld [vmem:[#allocation2 + $0x50] sm:$0xf] }
 0x101   : > { %v1111_v12 = vadd.f32 %v1107_v31, %v1071_v38  ;;  %v1147_v36 = vmul.f32 %v2841_v19, %v1135_v24  ;;  %v1235_v33 = vld [vmem:[#allocation2 + $0x44] sm:$0xf]  ;;  %v1148_v6 = vmul.f32 %v2841_v19, %v1136_v1  ;;  %v1167_v47 = vmul.f32 %v2508_v58, %v1155_v30  ;;  %v898_v38 = vld [vmem:[#allocation2 + $0x51] sm:$0xf] }
 0x102   : > { %v1112_v3 = vadd.f32 %v1108_v63, %v1072_v26  ;;  %v1131_v43 = vadd.f32 %v1127_v61, %v1091_v23  ;;  %v1255_v17 = vld [vmem:[#allocation2 + $0x45] sm:$0xf]  ;;  %v2851_v45 = vadd.f32 %v1128_v52, %v1092_v15  ;;  %v1187_v25 = vmul.f32 %v2513_v60, %v1175_v10  ;;  %v918_v24 = vld [vmem:[#allocation2 + $0x52] sm:$0xf] }
 0x103   : > { %v1151_v48 = vadd.f32 %v1147_v36, %v1111_v12  ;;  %v1207_v41 = vmul.f32 %v2531_v8, %v1195_v53  ;;  %v938_v21 = vld [vmem:[#allocation2 + $0x53] sm:$0xf]  ;;  %v1227_v1 = vmul.f32 %v2536_v11, %v1215_v34  ;;  %v1247_v30 = vmul.f32 %v2498_v49, %v1235_v33  ;;  %v3142_v12 = vld [vmem:[#allocation5_spill] sm:$0xff] }
 0x104   : > { %v2855_v31 = vadd.f32 %v1148_v6, %v1112_v3  ;;  %v1171_v26 = vadd.f32 %v1167_v47, %v1131_v43  ;;  %v958_v23 = vld [vmem:[#allocation2 + $0x54] sm:$0xf]  ;;  %v1287_v36 = vmul.f32 %v3142_v12, %v1275_v50  ;;  %v890_v10 = vmul.f32 %v2435_v13, %v878_v9  ;;  %v1018_v6 = vld [vmem:[#allocation2 + $0x60] sm:$0xf] }
 0x105   : > { %v978_v63 = vld [vmem:[#allocation2 + $0x55] sm:$0xf]  ;;  %v1191_v61 = vadd.f32 %v1187_v25, %v1151_v48  ;;  %v910_v3 = vmul.f32 %v2444_v32, %v898_v38  ;;  %v930_v43 = vmul.f32 %v2449_v35, %v918_v24  ;;  %v950_v34 = vmul.f32 %v2460_v54, %v938_v21  ;;  %v1037_v33 = vld [vmem:[#allocation2 + $0x51] sm:$0xf]  ;;  %v1038_v25 = vld [vmem:[#allocation2 + $0x61] sm:$0xf] }
 0x106   : > { %v3141_v52 = vld [vmem:[#allocation4_spill] sm:$0xff]  ;;  %v1211_v28 = vadd.f32 %v1207_v41, %v1171_v26  ;;  %v894_v48 = vadd.f32 %v890_v10, %v2782_v62  ;;  %v990_v50 = vmul.f32 %v2477_v20, %v978_v63  ;;  %v1029_v32 = vmul.f32 %v2793_v4, %v1017_v46  ;;  %v1058_v38 = vld [vmem:[#allocation2 + $0x62] sm:$0xf] }
 0x107   : > { %v1267_v15 = vmul.f32 %v3141_v52, %v1255_v17  ;;  %v998_v53 = vld [vmem:[#allocation2 + $0x56] sm:$0xf]  ;;  %v1231_v47 = vadd.f32 %v1227_v1, %v1191_v61  ;;  %v970_v17 = vmul.f32 %v2465_v56, %v958_v23  ;;  %v914_v9 = vadd.f32 %v910_v3, %v2786_v51  ;;  %v1057_v35 = vld [vmem:[#allocation2 + $0x52] sm:$0xf]  ;;  %v1078_v26 = vld [vmem:[#allocation2 + $0x63] sm:$0xf] }
 0x108   : > { %v1251_v13 = vadd.f32 %v1247_v30, %v1211_v28  ;;  %v1010_v41 = vmul.f32 %v2482_v22, %v998_v53  ;;  %v934_v24 = vadd.f32 %v930_v43, %v894_v48  ;;  %v1030_v21 = vmul.f32 %v2793_v4, %v1018_v6  ;;  %v1077_v56 = vld [vmem:[#allocation2 + $0x53] sm:$0xf]  ;;  %v1098_v46 = vld [vmem:[#allocation2 + $0x64] sm:$0xf] }
 0x109   : > { %v2871_v54 = vadd.f32 %v1267_v15, %v1231_v47  ;;  %v1049_v62 = vmul.f32 %v2800_v57, %v1037_v33  ;;  %v1097_v20 = vld [vmem:[#allocation2 + $0x54] sm:$0xf]  ;;  %v954_v28 = vadd.f32 %v950_v34, %v914_v9  ;;  %v1033_v51 = vadd.f32 %v1029_v32, %v2816_v39  ;;  %v1118_v15 = vld [vmem:[#allocation2 + $0x65] sm:$0xf]  ;;  %v1157_v47 = vld [vmem:[#allocation2 + $0x60] sm:$0xf] }
 0x10a   : > { %v2875_v1 = vadd.f32 %v1287_v36, %v1251_v13  ;;  %v1050_v22 = vmul.f32 %v2800_v57, %v1038_v25  ;;  %v1117_v30 = vld [vmem:[#allocation2 + $0x55] sm:$0xf]  ;;  %v974_v23 = vadd.f32 %v970_v17, %v934_v24  ;;  %v1069_v61 = vmul.f32 %v2807_v59, %v1057_v35  ;;  %v1138_v43 = vld [vmem:[#allocation2 + $0x66] sm:$0xf]  ;;  %v1156_v57 = vld [vmem:[#allocation2 + $0x50] sm:$0xf] }
 0x10b   : > { %v1053_v63 = vadd.f32 %v1049_v62, %v2825_v0  ;;  %v1070_v4 = vmul.f32 %v2807_v59, %v1058_v38  ;;  %v1137_v10 = vld [vmem:[#allocation2 + $0x56] sm:$0xf]  ;;  %v994_v53 = vadd.f32 %v990_v50, %v954_v28  ;;  %v1089_v36 = vmul.f32 %v2814_v2, %v1077_v56  ;;  %v1176_v48 = vld [vmem:[#allocation2 + $0x51] sm:$0xf]  ;;  %v1177_v13 = vld [vmem:[#allocation2 + $0x61] sm:$0xf] }
 0x10c   : > { %v1090_v3 = vmul.f32 %v2814_v2, %v1078_v26  ;;  %v1109_v39 = vmul.f32 %v2823_v5, %v1097_v20  ;;  %v1014_v34 = vadd.f32 %v1010_v41, %v974_v23  ;;  %v1073_v6 = vadd.f32 %v1069_v61, %v1033_v51  ;;  %v1196_v35 = vld [vmem:[#allocation2 + $0x52] sm:$0xf]  ;;  %v1217_v51 = vld [vmem:[#allocation2 + $0x63] sm:$0xf] }
 0x10d   : > { %v1110_v33 = vmul.f32 %v2823_v5, %v1098_v46  ;;  %v1129_v0 = vmul.f32 %v2833_v7, %v1117_v30  ;;  %v1034_v59 = vadd.f32 %v1030_v21, %v994_v53  ;;  %v1093_v17 = vadd.f32 %v1089_v36, %v1053_v63  ;;  %v1197_v21 = vld [vmem:[#allocation2 + $0x62] sm:$0xf]  ;;  %v1216_v56 = vld [vmem:[#allocation2 + $0x53] sm:$0xf] }
 0x10e   : > { %v1130_v50 = vmul.f32 %v2833_v7, %v1118_v15  ;;  %v1149_v25 = vmul.f32 %v2841_v19, %v1137_v10  ;;  %v1054_v2 = vadd.f32 %v1050_v22, %v1014_v34  ;;  %v1113_v9 = vadd.f32 %v1109_v39, %v1073_v6  ;;  %v1236_v22 = vld [vmem:[#allocation2 + $0x54] sm:$0xf]  ;;  %v1237_v63 = vld [vmem:[#allocation2 + $0x64] sm:$0xf] }
 0x10f   : > { %v1150_v32 = vmul.f32 %v2841_v19, %v1138_v43  ;;  %v1168_v41 = vmul.f32 %v2508_v58, %v1156_v57  ;;  %v1074_v38 = vadd.f32 %v1070_v4, %v1034_v59  ;;  %v1133_v5 = vadd.f32 %v1129_v0, %v1093_v17  ;;  %v1256_v10 = vld [vmem:[#allocation2 + $0x55] sm:$0xf]  ;;  %v1295_v0 = vld [vmem:[#allocation2 + $0x50] sm:$0xf] }
 0x110   : > { %v1169_v24 = vmul.f32 %v2508_v58, %v1157_v47  ;;  %v1188_v62 = vmul.f32 %v2513_v60, %v1176_v48  ;;  %v1094_v26 = vadd.f32 %v1090_v3, %v1054_v2  ;;  %v1153_v7 = vadd.f32 %v1149_v25, %v1113_v9  ;;  %v1257_v3 = vld [vmem:[#allocation2 + $0x65] sm:$0xf]  ;;  %v1276_v39 = vld [vmem:[#allocation2 + $0x56] sm:$0xf] }
 0x111   : > { %v1172_v20 = vadd.f32 %v1168_v41, %v2851_v45  ;;  %v1189_v28 = vmul.f32 %v2513_v60, %v1177_v13  ;;  %v1114_v19 = vadd.f32 %v1110_v33, %v1074_v38  ;;  %v1208_v23 = vmul.f32 %v2531_v8, %v1196_v35  ;;  %v3143_v43 = vld [vmem:[#allocation12_spill] sm:$0xff]  ;;  %v1277_v33 = vld [vmem:[#allocation2 + $0x66] sm:$0xf]  ;;  %v3146_v41 = vld [vmem:[#allocation17_spill] sm:$0xff] }
 0x112   : > { %v1173_v46 = vadd.f32 %v1169_v24, %v1133_v5  ;;  %v1192_v30 = vadd.f32 %v1188_v62, %v2855_v31  ;;  %v1134_v58 = vadd.f32 %v1130_v50, %v1094_v26  ;;  %v1209_v4 = vmul.f32 %v2531_v8, %v1197_v21  ;;  %v3144_v8 = vld [vmem:[#allocation13_spill] sm:$0xff]  ;;  %v1296_v50 = vld [vmem:[#allocation2 + $0x60] sm:$0xf]  ;;  %v3148_v21 = vld [vmem:[#allocation7_spill] sm:$0xff] }
 0x113   : > { %v1193_v61 = vadd.f32 %v1189_v28, %v1153_v7  ;;  %v1228_v15 = vmul.f32 %v2536_v11, %v1216_v56  ;;  %v1154_v53 = vadd.f32 %v1150_v32, %v1114_v19  ;;  %v1212_v45 = vadd.f32 %v1208_v23, %v1172_v20  ;;  %v1315_v32 = vld [vmem:[#allocation2 + $0x51] sm:$0xf]  ;;  %v3147_v5 = vld [vmem:[#allocation6_spill] sm:$0xff]  ;;  %v3150_v23 = vld [vmem:[#allocation11_spill] sm:$0xff] }
 0x114   : > { %v1229_v60 = vmul.f32 %v2536_v11, %v1217_v51  ;;  %v1248_v36 = vmul.f32 %v2498_v49, %v1236_v22  ;;  %v1174_v31 = vadd.f32 %v3143_v43, %v1134_v58  ;;  %v1213_v57 = vadd.f32 %v1209_v4, %v1173_v46  ;;  %v3145_v11 = vld [vmem:[#allocation16_spill] sm:$0xff]  ;;  %v1316_v62 = vld [vmem:[#allocation2 + $0x61] sm:$0xf] }
 0x115   : > { %v1232_v34 = vadd.f32 %v1228_v15, %v1192_v30  ;;  %v1249_v6 = vmul.f32 %v2498_v49, %v1237_v63  ;;  %v1194_v47 = vadd.f32 %v3144_v8, %v1154_v53  ;;  %v1268_v17 = vmul.f32 %v3141_v52, %v1256_v10  ;;  %v1335_v28 = vld [vmem:[#allocation2 + $0x52] sm:$0xf]  ;;  %v1336_v30 = vld [vmem:[#allocation2 + $0x62] sm:$0xf]  ;;  %v3152_v53 = vld [vmem:[#allocation19_spill] sm:$0xff] }
 0x116   : > { %v1233_v48 = vadd.f32 %v1229_v60, %v1193_v61  ;;  %v1252_v59 = vadd.f32 %v1248_v36, %v1212_v45  ;;  %v1214_v25 = vadd.f32 %v3145_v11, %v1174_v31  ;;  %v1269_v2 = vmul.f32 %v3141_v52, %v1257_v3  ;;  %v3149_v51 = vld [vmem:[#allocation8_spill] sm:$0xff]  ;;  %v3151_v58 = vld [vmem:[#allocation18_spill] sm:$0xff]  ;;  %v3153_v36 = vld [vmem:[#allocation21_spill] sm:$0xff] }
 0x117   : > { %v1253_v13 = vadd.f32 %v1249_v6, %v1213_v57  ;;  %v1288_v9 = vmul.f32 %v3142_v12, %v1276_v39  ;;  %v1234_v35 = vadd.f32 %v3146_v41, %v1194_v47  ;;  %v1272_v49 = vadd.f32 %v1268_v17, %v1232_v34  ;;  %v1355_v15 = vld [vmem:[#allocation2 + $0x53] sm:$0xf]  ;;  %v1356_v10 = vld [vmem:[#allocation2 + $0x63] sm:$0xf]  ;;  %v3154_v39 = vld [vmem:[#allocation9_spill] sm:$0xff] }
 0x118   : > { %v1289_v38 = vmul.f32 %v3142_v12, %v1277_v33  ;;  %v1307_v24 = vmul.f32 %v3147_v5, %v1295_v0  ;;  %v1254_v56 = vadd.f32 %v3148_v21, %v1214_v25  ;;  %v1273_v26 = vadd.f32 %v1269_v2, %v1233_v48  ;;  %v1375_v43 = vld [vmem:[#allocation2 + $0x54] sm:$0xf]  ;;  %v3155_v57 = vld [vmem:[#allocation22_spill] sm:$0xff]  ;;  %v3156_v33 = vld [vmem:[#allocation23_spill] sm:$0xff] }
 0x119   : > { %v1292_v7 = vadd.f32 %v1288_v9, %v1252_v59  ;;  %v1308_v20 = vmul.f32 %v3147_v5, %v1296_v50  ;;  %v1274_v52 = vadd.f32 %v3149_v51, %v1234_v35  ;;  %v1327_v46 = vmul.f32 %v2556_v29, %v1315_v32  ;;  %v1376_v8 = vld [vmem:[#allocation2 + $0x64] sm:$0xf]  ;;  %v3157_v47 = vld [vmem:[#allocation24_spill] sm:$0xff]  ;;  %v3161_v41 = vld [vmem:[#allocation15_spill] sm:$0xff] }
 0x11a   : > { %v1293_v22 = vadd.f32 %v1289_v38, %v1253_v13  ;;  %v1311_v19 = vadd.f32 %v1307_v24, %v2871_v54  ;;  %v1294_v12 = vadd.f32 %v3150_v23, %v1254_v56  ;;  %v1313_v61 = vadd.f32 %v3151_v58, %v1273_v26  ;;  %v3158_v59 = vld [vmem:[#allocation14_spill] sm:$0xff]  ;;  %v1395_v50 = vld [vmem:[#allocation2 + $0x55] sm:$0xf]  ;;  %v3162_v56 = vld [vmem:[#allocation27_spill] sm:$0xff] }
 0x11b   : > { %v1312_v63 = vadd.f32 %v1308_v20, %v1272_v49  ;;  %v1328_v4 = vmul.f32 %v2556_v29, %v1316_v62  ;;  %v1314_v45 = vadd.f32 %v3152_v53, %v1274_v52  ;;  %v1331_v60 = vadd.f32 %v1327_v46, %v2875_v1  ;;  %v1396_v11 = vld [vmem:[#allocation2 + $0x65] sm:$0xf]  ;;  %v3159_v13 = vld [vmem:[#allocation25_spill] sm:$0xff]  ;;  %v1435_v5 = vld [vmem:[#allocation2 + $0x60] sm:$0xf] }
 0x11c   : > { %v1333_v3 = vadd.f32 %v3153_v36, %v1293_v22  ;;  %v1347_v54 = vmul.f32 %v3154_v39, %v1335_v28  ;;  %v1334_v34 = vadd.f32 %v3155_v57, %v1294_v12  ;;  %v1348_v6 = vmul.f32 %v3154_v39, %v1336_v30  ;;  %v3160_v9 = vld [vmem:[#allocation26_spill] sm:$0xff]  ;;  %v1415_v49 = vld [vmem:[#allocation2 + $0x56] sm:$0xf] }
 0x11d   : > { %v1332_v31 = vadd.f32 %v1328_v4, %v1292_v7  ;;  %v1353_v0 = vadd.f32 %v3156_v33, %v1313_v61  ;;  %v1354_v48 = vadd.f32 %v3157_v47, %v1314_v45  ;;  %v1367_v17 = vmul.f32 %v3158_v59, %v1355_v15  ;;  %v1416_v38 = vld [vmem:[#allocation2 + $0x66] sm:$0xf]  ;;  %v1455_v7 = vld [vmem:[#allocation2 + $0x61] sm:$0xf]  ;;  %v3163_v51 = vld [vmem:[#allocation20_spill] sm:$0xff] }
 0x11e   : > { %v1351_v29 = vadd.f32 %v1347_v54, %v1311_v19  ;;  %v1368_v1 = vmul.f32 %v3158_v59, %v1356_v10  ;;  %v1352_v25 = vadd.f32 %v1348_v6, %v1312_v63  ;;  %v1373_v2 = vadd.f32 %v3159_v13, %v1333_v3  ;;  %v1475_v20 = vld [vmem:[#allocation2 + $0x62] sm:$0xf]  ;;  %v1555_v15 = vld [vmem:[#allocation2 + $0x66] sm:$0xf]  ;;  %v3166_v33 = vld [vmem:[#allocation28_spill] sm:$0xff] }
 0x11f   : > { %v1374_v32 = vadd.f32 %v3160_v9, %v1334_v34  ;;  %v1387_v35 = vmul.f32 %v3161_v41, %v1375_v43  ;;  %v1371_v24 = vadd.f32 %v1367_v17, %v1331_v60  ;;  %v1388_v21 = vmul.f32 %v3161_v41, %v1376_v8  ;;  %v3164_v19 = vld [vmem:[#allocation30_spill] sm:$0xff]  ;;  %v3165_v34 = vld [vmem:[#allocation36_spill] sm:$0xff] }
 0x120   : > { %v1372_v62 = vadd.f32 %v1368_v1, %v1332_v31  ;;  %v1393_v26 = vadd.f32 %v3162_v56, %v1353_v0  ;;  %v1407_v52 = vmul.f32 %v3163_v51, %v1395_v50  ;;  %v1408_v22 = vmul.f32 %v3163_v51, %v1396_v11  ;;  %v1495_v30 = vld [vmem:[#allocation2 + $0x63] sm:$0xf]  ;;  %v3167_v0 = vld [vmem:[#allocation31_spill] sm:$0xff] }
 0x121   : > { %v1391_v28 = vadd.f32 %v1387_v35, %v1351_v29  ;;  %v1413_v46 = vadd.f32 %v3164_v19, %v1373_v2  ;;  %v1515_v23 = vld [vmem:[#allocation2 + $0x64] sm:$0xf]  ;;  %v1392_v12 = vadd.f32 %v1388_v21, %v1352_v25  ;;  %v1427_v63 = vmul.f32 %v2605_v37, %v1415_v49  ;;  %v3168_v29 = vld [vmem:[#allocation37_spill] sm:$0xff]  ;;  %v3174_v2 = vld [vmem:[#allocation39_spill] sm:$0xff] }
 0x122   : > { %v1428_v58 = vmul.f32 %v2605_v37, %v1416_v38  ;;  %v1447_v61 = vmul.f32 %v2626_v14, %v1435_v5  ;;  %v1535_v4 = vld [vmem:[#allocation2 + $0x65] sm:$0xf]  ;;  %v1411_v10 = vadd.f32 %v1407_v52, %v1371_v24  ;;  %v1412_v53 = vadd.f32 %v1408_v22, %v1372_v62  ;;  %v3177_v38 = vld [vmem:[#allocation40_spill] sm:$0xff]  ;;  %v3179_v21 = vld [vmem:[#allocation45_spill] sm:$0xff] }
 0x123   : > { %v1467_v45 = vmul.f32 %v2643_v27, %v1455_v7  ;;  %v1487_v60 = vmul.f32 %v2648_v42, %v1475_v20  ;;  %v1431_v36 = vadd.f32 %v1427_v63, %v1391_v28  ;;  %v1507_v39 = vmul.f32 %v2653_v16, %v1495_v30  ;;  %v3169_v16 = vld [vmem:[#allocation32_spill] sm:$0xff]  ;;  %v3178_v24 = vld [vmem:[#allocation43_spill] sm:$0xff]  ;;  %v3180_v7 = vld [vmem:[#allocation41_spill] sm:$0xff] }
 0x124   : > { %v1432_v3 = vadd.f32 %v1428_v58, %v1392_v12  ;;  %v1527_v54 = vmul.f32 %v2658_v18, %v1515_v23  ;;  %v1451_v43 = vadd.f32 %v1447_v61, %v1411_v10  ;;  %v1452_v31 = vadd.f32 %v2686_v40, %v1412_v53  ;;  %v3170_v18 = vld [vmem:[#allocation34_spill] sm:$0xff]  ;;  %v3182_v52 = vld [vmem:[#allocation48_spill] sm:$0xff]  ;;  %v3183_v19 = vld [vmem:[#allocation47_spill] sm:$0xff] }
 0x125   : > { %v1547_v37 = vmul.f32 %v2675_v44, %v1535_v4  ;;  %v1567_v14 = vmul.f32 %v2680_v55, %v1555_v15  ;;  %v1471_v57 = vadd.f32 %v1467_v45, %v1431_v36  ;;  %v1394_v27 = vadd.f32 %v3166_v33, %v1354_v48  ;;  %v3171_v40 = vld [vmem:[#allocation38_spill] sm:$0xff]  ;;  %v3172_v44 = vld [vmem:[#allocation33_spill] sm:$0xff]  ;;  %v3173_v55 = vld [vmem:[#allocation35_spill] sm:$0xff] }
 0x126   : > { %v1472_v6 = vadd.f32 %v3165_v34, %v1432_v3  ;;  %v1414_v42 = vadd.f32 %v3167_v0, %v1374_v32  ;;  %v1491_v8 = vadd.f32 %v1487_v60, %v1451_v43  ;;  %v1492_v47 = vadd.f32 %v3168_v29, %v1452_v31  ;;  %v3175_v48 = vld [vmem:[#allocation42_spill] sm:$0xff]  ;;  %v3176_v32 = vld [vmem:[#allocation44_spill] sm:$0xff]  ;;  %v3184_v30 = vld [vmem:[#allocation49_spill] sm:$0xff] }
 0x127   : > { %v1433_v59 = vadd.f32 %v3169_v16, %v1393_v26  ;;  %v1453_v17 = vadd.f32 %v3170_v18, %v1413_v46  ;;  %v1511_v1 = vadd.f32 %v1507_v39, %v1471_v57  ;;  %v1434_v11 = vadd.f32 %v3172_v44, %v1394_v27  ;;  %v3181_v28 = vld [vmem:[#allocation46_spill] sm:$0xff]  ;;  %v3186_v4 = vld [vmem:[#allocation52_spill] sm:$0xff]  ;;  %v3187_v10 = vld [vmem:[#allocation51_spill] sm:$0xff] }
 0x128   : > { %v1512_v50 = vadd.f32 %v3171_v40, %v1472_v6  ;;  %v1454_v25 = vadd.f32 %v3173_v55, %v1414_v42  ;;  %v1531_v13 = vadd.f32 %v1527_v54, %v1491_v8  ;;  %v1532_v9 = vadd.f32 %v3174_v2, %v1492_v47  ;;  %v3185_v58 = vld [vmem:[#allocation50_spill] sm:$0xff]  ;;  %v3188_v45 = vld [vmem:[#allocation53_spill] sm:$0xff] }
 0x129   : > { %v1473_v41 = vadd.f32 %v3175_v48, %v1433_v59  ;;  %v1493_v35 = vadd.f32 %v3176_v32, %v1453_v17  ;;  %v1551_v49 = vadd.f32 %v1547_v37, %v1511_v1  ;;  %v1474_v62 = vadd.f32 %v3178_v24, %v1434_v11  ;;  %v2071_v39 = vld [vmem:[%s3062_s4] ss:$0 sm:$0xff]  ;;  %v2170_v59 = vld [vmem:[%s3065_s7 + $0x8] sm:$0xff]   ;;  %v2172_v24 = vld [vmem:[%s3067_s9 + $0x38] sm:$0xff]  }
 0x12a   : > { %v1552_v5 = vadd.f32 %v3177_v38, %v1512_v50  ;;  %v1494_v56 = vadd.f32 %v3179_v21, %v1454_v25  ;;  %v1571_v26 = vadd.f32 %v1567_v14, %v1531_v13  ;;  %v1572_v20 = vadd.f32 %v3180_v7, %v1532_v9  ;;  %2128 = vmatpush3.bf16.msra.mxu0 %v2170_v59  ;;  %v2171_v18 = vld [vmem:[%s3065_s7] sm:$0xff]   ;;  %v2174_v21 = vld [vmem:[%s3067_s9 + $0x28] sm:$0xff]   ;;  %v2177_v7 = vld [vmem:[%s3067_s9 + $0x10] sm:$0xff]  }
 0x12b   : > { %v1513_v51 = vadd.f32 %v3181_v28, %v1473_v41  ;;  %v1533_v22 = vadd.f32 %v3182_v52, %v1493_v35  ;;  %v1514_v46 = vadd.f32 %v3183_v19, %v1474_v62  ;;  %v3189_v17 = vmov 0.0   ;;  %v2072_v2 = vld [vmem:[%s3063_s5] ss:$0 sm:$0xff]  ;;  %2136 = vmatpush3.bf16.msra.mxu1 %v2172_v24  ;;  %v2173_v62 = vld [vmem:[%s3067_s9 + $0x30] sm:$0xff]  }
 0x12c   : > { %v1534_v23 = vadd.f32 %v3184_v30, %v1494_v56  ;;  %v1575_v12 = vadd.f32 %v1571_v26, %v1551_v49  ;;  %v1576_v63 = vadd.f32 %v1572_v20, %v1552_v5  ;;  %2129 = vmatprep.subr.bf16.mxu0 %v3189_v17  ;;  %v2073_v32 = vld [vmem:[%s3064_s6] ss:$0 sm:$0xff]  ;;  %2137 = vmatprep.subr.bf16.mxu1 %v3189_v17  ;;  %v2176_v26 = vld [vmem:[%s3067_s9 + $0x18] sm:$0xff]   ;;  %v2178_v20 = vld [vmem:[%s3067_s9 + $0x8] sm:$0xff]  }
 0x12d   : > { %v1553_v61 = vadd.f32 %v3185_v58, %v1513_v51  ;;  %v1573_v15 = vadd.f32 %v3186_v4, %v1533_v22  ;;  %v1554_v53 = vadd.f32 %v3187_v10, %v1514_v46  ;;  %v2175_v56 = vld [vmem:[%s3067_s9 + $0x20] sm:$0xff]  }
 0x12e   : > { %v1574_v60 = vadd.f32 %v3188_v45, %v1534_v23  ;;  %1579 = vst.msk [vmem:[#allocation3] sm:$0xf] %vm585_vm5, %v1575_v12  ;;  %1580 = vst.msk [vmem:[#allocation3 + $0x4] sm:$0xf] %vm585_vm5, %v1576_v63  ;;  %2130 = vmatpush3.bf16.msra.mxu0 %v2171_v18  ;;  %v2179_v28 = vld [vmem:[%s3067_s9] sm:$0xff]  }
 0x12f   : > { %v1577_v36 = vadd.f32 %v1573_v15, %v1553_v61  ;;  %2138 = vmatpush3.bf16.msra.mxu1 %v2173_v62  ;;  %v2074_v51 = vld [vmem:[%s3066_s8] ss:$0 sm:$0xff] }
 0x130   : > { %v1578_v3 = vadd.f32 %v1574_v60, %v1554_v53  ;;  %2139 = vmatprep.subr.bf16.mxu1 %v3189_v17 }
 0x131   : > { %1581 = vst.msk [vmem:[#allocation3 + $0x8] sm:$0xf] %vm585_vm5, %v1577_v36 }
 0x132   : > { %1582 = vst.msk [vmem:[#allocation3 + $0xc] sm:$0xf] %vm585_vm5, %v1578_v3 }
 0x133   : > { %2140 = vmatpush3.bf16.msra.mxu1 %v2174_v21 }
 0x134   : > { %2141 = vmatprep.subr.bf16.mxu1 %v3189_v17 }
 0x135   : > { %v1583_v54 = vld [vmem:[#allocation3] sm:$0xff] }
 0x136   : > { %v1592_v43 = vadd.f32 %v2071_v39, %v1583_v54 }
 0x137   : > { %2142 = vmatpush3.bf16.msra.mxu1 %v2175_v56  ;;  %v2088_v56 = vld [vmem:[%s3070_s12] ss:$0 sm:$0xff] }
 0x138   : > { %v1596_v31 = vsel %vm560_vm2, %v1592_v43, 0.0  ;;  %2143 = vmatprep.subr.bf16.mxu1 %v3189_v17 }
 0x139   : > { %v1584_v37 = vld [vmem:[#allocation3 + $0x8] sm:$0xff]  ;;  %1597 = vadd.xlane.f32.xlu0 %v1596_v31 }
 0x13a   : > { %v1593_v14 = vadd.f32 %v2071_v39, %v1584_v37 }
 0x13b   : > { %2144 = vmatpush3.bf16.msra.mxu1 %v2176_v26 }
 0x13c   : > { %v1599_v57 = vsel %vm560_vm2, %v1593_v14, 0.0  ;;  %2145 = vmatprep.subr.bf16.mxu1 %v3189_v17 }
 0x13d   : > { %1600 = vadd.xlane.f32.xlu0 %v1599_v57 }
 0x13f   : > { %2146 = vmatpush3.bf16.msra.mxu1 %v2177_v7  ;;  %v2089_v7 = vld [vmem:[%s3071_s13] ss:$0 sm:$0xff] }
 0x140   : > { %2147 = vmatprep.subr.bf16.mxu1 %v3189_v17 }
 0x143   : > { %2148 = vmatpush3.bf16.msra.mxu1 %v2178_v20 }
 0x144   : > { %2149 = vmatprep.subr.bf16.mxu1 %v3189_v17 }
 0x147   : > { %2150 = vmatpush3.bf16.msra.mxu1 %v2179_v28 }
 0x1c2   : > { %v1598_v34 = vpop.xlane.xlu0 %1597 }
 0x1c3   : > { %v1603_v6 = vmul.f32 0.03125, %v1598_v34  ;;  %v2078_v34 = vld [vmem:[%s3068_s10] ss:$0 sm:$0xff] }
 0x1c5   : > { %v1605_v33 = vsub.f32 %v1592_v43, %v1603_v6 }
 0x1c6   : > { %v1601_v27 = vpop.xlane.xlu0 %1600 }
 0x1c7   : > { %v1607_v0 = vmul.f32 %v1605_v33, %v1605_v33  ;;  %v1604_v42 = vmul.f32 0.03125, %v1601_v27 }
 0x1c9   : > { %v1609_v8 = vsel %vm560_vm2, %v1607_v0, 0.0  ;;  %v1606_v29 = vsub.f32 %v1593_v14, %v1604_v42 }
 0x1ca   : > { %1610 = vadd.xlane.f32.xlu1 %v1609_v8 }
 0x1cb   : > { %v1608_v47 = vmul.f32 %v1606_v29, %v1606_v29 }
 0x1cd   : > { %v1612_v16 = vsel %vm560_vm2, %v1608_v47, 0.0  ;;  %v3190_v47 = vld [vmem:[#allocation10_spill] sm:$0xff] }
 0x1ce   : > { %1613 = vadd.xlane.f32.xlu1 %v1612_v16 }
 0x253   : > { %v1611_v1 = vpop.xlane.xlu1 %1610 }
 0x254   : > { %v1615_v40 = vmul.f32 0.03125, %v1611_v1  ;;  %v3191_v1 = vld [vmem:[#allocation29_spill] sm:$0xff] }
 0x256   : > { %v1617_v50 = vadd.f32 1e-06, %v1615_v40 }
 0x257   : > { %v1614_v44 = vpop.xlane.xlu1 %1613 }
 0x258   : > { %2180 = vrsqrt.f32 %v1617_v50  ;;  %v1616_v11 = vmul.f32 0.03125, %v1614_v44 }
 0x25a   : > { %v1618_v55 = vadd.f32 1e-06, %v1616_v11 }
 0x25c   : > { %2182 = vrsqrt.f32 %v1618_v55 }
 0x265   : > { %v2181_v25 = vpop.eup %2180 }
 0x266   : > { %v1621_v13 = vmul.f32 %v2181_v25, %v1605_v33  ;;  %v2087_v33 = vld [vmem:[%s3069_s11] ss:$0 sm:$0xff] }
 0x268   : > { %v1629_v41 = vmul.f32 %v2072_v2, %v1621_v13 }
 0x269   : > { %v2183_v9 = vpop.eup %2182 }
 0x26a   : > { %v1622_v48 = vmul.f32 %v2183_v9, %v1606_v29  ;;  %v1637_v49 = vadd.f32 %v2073_v32, %v1629_v41 }
 0x26c   : > { %v1630_v35 = vmul.f32 %v2072_v2, %v1622_v48 }
 0x26e   : > { %v1638_v38 = vadd.f32 %v2073_v32, %v1630_v35 }
 0x270   : > { %v1639_v5 = vpack.c.bf16 %v1638_v38, %v1637_v49 }
 0x272   : > { %2132 = vmatmul.mubr.msk.bf16.vlgmr.msra.gmra.mxu0 %vm560_vm2, %v1639_v5 }
 0x332   : > { %v1700_v52 = vpop.f32.mrf.mxu0 }
 0x333   : > { %v1701_v22 = vadd.f32 %v2074_v51, %v1700_v52 }
 0x334   : > { %v2133_v19 = vpop.f32.mrf.mxu0 }
 0x335   : > { %v1709_v46 = vmul.f32 0.044715, %v1701_v22  ;;  %v1707_v54 = vmul.f32 0.5, %v1701_v22 }
 0x336   : > { %v1703_v30 = vpop.f32.mrf.mxu0 }
 0x337   : > { %v1711_v23 = vmul.f32 %v1709_v46, %v1701_v22  ;;  %v1704_v12 = vadd.f32 %v2074_v51, %v1703_v30 }
 0x338   : > { %v2134_v63 = vpop.f32.mrf.mxu0 }
 0x339   : > { %v1713_v58 = vmul.f32 %v1711_v23, %v1701_v22  ;;  %v1710_v61 = vmul.f32 0.044715, %v1704_v12  ;;  %v1708_v43 = vmul.f32 0.5, %v1704_v12 }
 0x33b   : > { %v1712_v4 = vmul.f32 %v1710_v61, %v1704_v12  ;;  %v1715_v15 = vadd.f32 %v1713_v58, %v1701_v22 }
 0x33d   : > { %v1714_v10 = vmul.f32 %v1712_v4, %v1704_v12  ;;  %v1717_v53 = vmul.f32 0.7978846, %v1715_v15 }
 0x33f   : > { %v1716_v45 = vadd.f32 %v1714_v10, %v1704_v12  ;;  %2184 = vtanh.f32 %v1717_v53 }
 0x341   : > { %v1718_v60 = vmul.f32 0.7978846, %v1716_v45 }
 0x343   : > { %2186 = vtanh.f32 %v1718_v60 }
 0x34c   : > { %v2185_v36 = vpop.eup %2184 }
 0x34d   : > { %v1721_v3 = vadd.f32 1.0, %v2185_v36 }
 0x34f   : > { %v1723_v37 = vmul.f32 %v1721_v3, %v1707_v54 }
 0x350   : > { %v2187_v39 = vpop.eup %2186 }
 0x351   : > { %v1722_v31 = vadd.f32 1.0, %v2187_v39 }
 0x353   : > { %v1724_v14 = vmul.f32 %v1722_v31, %v1708_v43 }
 0x355   : > { %v1725_v57 = vpack.c.bf16 %v1724_v14, %v1723_v37 }
 0x357   : > { %2152 = vmatmul.mubr.bf16.vlgmr.msra.gmra.mxu1 %v1725_v57 }
 0x417   : > { %v1831_v6 = vpop.f32.mrf.mxu1 }
 0x418   : > { %v1832_v27 = vadd.f32 %v2078_v34, %v1831_v6 }
 0x419   : > { %v2153_v0 = vpop.f32.mrf.mxu1 }
 0x41a   : > { %v1845_v42 = vmul.f32 %v2087_v33, %v1832_v27 }
 0x41b   : > { %v1834_v8 = vpop.f32.mrf.mxu1 }
 0x41c   : > { %v1835_v29 = vadd.f32 %v2078_v34, %v1834_v8  ;;  %v1847_v16 = vadd.f32 %v1845_v42, %v3190_v47 }
 0x41d   : > { %v2154_v59 = vpop.f32.mrf.mxu1 }
 0x41e   : > { %v1846_v18 = vmul.f32 %v2087_v33, %v1835_v29  ;;  %v1851_v17 = vsel %vm560_vm2, %v1847_v16, 0.0 }
 0x41f   : > { %1852 = vadd.xlane.f32.xlu0 %v1851_v17 }
 0x420   : > { %v1848_v40 = vadd.f32 %v1846_v18, %v3191_v1 }
 0x422   : > { %v1854_v50 = vsel %vm560_vm2, %v1848_v40, 0.0 }
 0x423   : > { %1855 = vadd.xlane.f32.xlu1 %v1854_v50 }
 0x4a8   : > { %v1853_v44 = vpop.xlane.xlu0 %1852 }
 0x4a9   : > { %v1857_v11 = vmul.f32 0.03125, %v1853_v44 }
 0x4ab   : > { %v1859_v55 = vsub.f32 %v1847_v16, %v1857_v11 }
 0x4ac   : > { %v1856_v25 = vpop.xlane.xlu1 %1855 }
 0x4ad   : > { %v1858_v13 = vmul.f32 0.03125, %v1856_v25  ;;  %v1861_v2 = vmul.f32 %v1859_v55, %v1859_v55 }
 0x4af   : > { %v1860_v9 = vsub.f32 %v1848_v40, %v1858_v13  ;;  %v1863_v48 = vsel %vm560_vm2, %v1861_v2, 0.0 }
 0x4b0   : > { %1864 = vadd.xlane.f32.xlu0 %v1863_v48 }
 0x4b1   : > { %v1862_v41 = vmul.f32 %v1860_v9, %v1860_v9 }
 0x4b3   : > { %v1866_v32 = vsel %vm560_vm2, %v1862_v41, 0.0 }
 0x4b4   : > { %1867 = vadd.xlane.f32.xlu1 %v1866_v32 }
 0x539   : > { %v1865_v35 = vpop.xlane.xlu0 %1864 }
 0x53a   : > { %v1869_v49 = vmul.f32 0.03125, %v1865_v35 }
 0x53c   : > { %v1871_v38 = vadd.f32 1e-06, %v1869_v49 }
 0x53d   : > { %v1868_v5 = vpop.xlane.xlu1 %1867 }
 0x53e   : > { %2188 = vrsqrt.f32 %v1871_v38  ;;  %v1870_v24 = vmul.f32 0.03125, %v1868_v5 }
 0x540   : > { %v1872_v62 = vadd.f32 1e-06, %v1870_v24 }
 0x542   : > { %2190 = vrsqrt.f32 %v1872_v62 }
 0x54b   : > { %v2189_v21 = vpop.eup %2188 }
 0x54c   : > { %v1875_v26 = vmul.f32 %v2189_v21, %v1859_v55 }
 0x54e   : > { %v1883_v20 = vmul.f32 %v2088_v56, %v1875_v26 }
 0x54f   : > { %v2191_v28 = vpop.eup %2190 }
 0x550   : > { %v1891_v51 = vadd.f32 %v2089_v7, %v1883_v20  ;;  %v1876_v52 = vmul.f32 %v2191_v28, %v1860_v9 }
 0x552   : > { %v2096_v22 = vpack.c.bf16 %v1891_v51, %v1891_v51  ;;  %v1884_v19 = vmul.f32 %v2088_v56, %v1876_v52 }
 0x554   : > { %1901 = vst.msk [vmem:[%s467_s22] sm:$0xf] %vm585_vm5, %v2096_v22  ;;  %v1892_v46 = vadd.f32 %v2089_v7, %v1884_v19 }
 0x556   : > { %v2097_v30 = vpack.c.bf16 %v1892_v46, %v1892_v46 }
 0x558   : > { %1902 = vst.msk [vmem:[%s467_s22 + $0x4] sm:$0xf] %vm585_vm5, %v2097_v30 }
 0x559 PF: > { %s24_s29 = sadd.s32 1, %s2198_s29  }
 0x55a   : > { %p21_p4 = scmp.ge.s32.totalorder %s24_s29, 4  }
 0x55c   :  { %23 = sbr.rel (!%p21_p4) target bundleno = 1 (0x1), region = 161 }

// kernel: forward.4
= control target key start
LH: loop header
LB: loop body
LE: loop exit
PB: predicated region body
PF: predicated region fallthrough
CT: control target
= control target key end

     0   :  { %s3574_s21 = smov 0   ;;  %s5582_s0 = inlined_call_operand.vmem [shape: bf16[2,64,48], index: 0, kind: input, shape index: {}]   ;;  %s5583_s1 = inlined_call_operand.vmem [shape: bf16[48,16], index: 1, kind: input, shape index: {}]   ;;  %s5584_s2 = inlined_call_operand.vmem [shape: f32[1,16], index: 2, kind: input, shape index: {}]   ;;  %s5585_s3 = inlined_call_operand.vmem [shape: f32[1,16], index: 3, kind: input, shape index: {}]   ;;  %s5586_s4 = inlined_call_operand.vmem [shape: f32[1,16], index: 4, kind: input, shape index: {}]   ;;  %s5587_s5 = inlined_call_operand.vmem [shape: f32[49,1,1,16], index: 5, kind: input, shape index: {}]   ;;  %s5588_s6 = inlined_call_operand.vmem [shape: f32[1,16], index: 6, kind: input, shape index: {}]   ;;  %s5589_s7 = inlined_call_operand.vmem [shape: f32[1,16], index: 7, kind: input, shape index: {}]   ;;  %s5590_s8 = inlined_call_operand.vmem [shape: f32[1,16], index: 8, kind: input, shape index: {}]   ;;  %s5591_s9 = inlined_call_operand.vmem [shape: bf16[16,64], index: 9, kind: input, shape index: {}]   ;;  %s5592_s10 = inlined_call_operand.vmem [shape: f32[1,64], index: 10, kind: input, shape index: {}]   ;;  %s5593_s11 = inlined_call_operand.vmem [shape: bf16[64,16], index: 11, kind: input, shape index: {}]   ;;  %s5594_s12 = inlined_call_operand.vmem [shape: f32[1,16], index: 12, kind: input, shape index: {}]   ;;  %s5595_s13 = inlined_call_operand.vmem [shape: f32[1,16], index: 13, kind: input, shape index: {}]   ;;  %s5596_s14 = inlined_call_operand.vmem [shape: f32[1,16], index: 14, kind: input, shape index: {}]   ;;  %s5597_s15 = inlined_call_operand.vmem [shape: f32[1,16], index: 15, kind: input, shape index: {}]   ;;  %s5598_s16 = inlined_call_operand.vmem [shape: bf16[2,64,16], index: 16, kind: output, shape index: {}]  }
   0x1   :  { %5795 = sst [smem:[#allocation94_spill]] %s5582_s0 }
   0x2 LB: > { %s3127_s22 = sadd.s32 4294967295, %s3486_s21   ;;  %p3131_p0 = scmp.ge.s32.totalorder %s3486_s21, 1  ;;  %s3486_s21 = sphi %s3574_s21, %s26_s21  }
   0x3   : > { %p462_p1 = scmp.lt.s32.totalorder %s3486_s21, 3 }
   0x5   : > { %p463_p2 = pnand %p3131_p0, %p462_p1 }
   0x7   : > { %466 = sbr.rel (%p463_p2) target bundleno = 1822 (0x71e), region = 84 }
   0xc   : > { %v3357_v0 = vld [vmem:[%s5583_s1 + $0x10] sm:$0xff]   ;;  %p512_p3 = scmp.lt.s32.totalorder %s3127_s22, 1  ;;  %v3358_v1 = vld [vmem:[%s5583_s1 + $0x8] sm:$0xff]   ;;  %vm582_vm0 = vcmask 392192   ;;  %v3359_v2 = vld [vmem:[%s5583_s1] sm:$0xff]   ;;  %s5796_s17 = sld [smem:[#allocation94_spill]] }
   0xd   : > { %3308 = vmatprep.subr.bf16.mxu0 %v3357_v0  ;;  %v3136_v7 = vld [vmem:[%s5584_s2] ss:$0 sm:$0xff]  ;;  %vm662_vm1 = vcmask 130048   ;;  %vm797_vm2 = vcmask 128000   ;;  %v3488_v32 = vmov 0.0   ;;  %vm811_vm3 = vcmask 124928  }
   0xe   : > { %s6146_s22 = smov (!%p512_p3, %s3127_s22), 1  ;;  %3309 = vmatpush3.bf16.msra.mxu0 %v3357_v0  ;;  %796 = vst.msk [vmem:[#allocation2] sm:$0xff] %vm662_vm1, %v3488_v32  ;;  %799 = vst.msk [vmem:[#allocation2 + $0x10] sm:$0xff] %vm662_vm1, %v3488_v32  ;;  %vm2796_vm4 = vcmask 523264   ;;  %vm3063_vm5 = vcmask 125952  }
   0xf   : > { %3310 = vmatprep.subr.bf16.mxu0 %v3358_v1  ;;  %s3278_s29 = sshll.u32 %s6146_s22, 5  ;;  %798 = vst.msk [vmem:[#allocation2 + $0x8] sm:$0x3f] %vm797_vm2, %v3488_v32  ;;  %800 = vst.msk [vmem:[#allocation2 + $0x18] sm:$0x3f] %vm797_vm2, %v3488_v32 }
  0x10   : > { %801 = vst.msk [vmem:[#allocation2 + $0x20] sm:$0xff] %vm662_vm1, %v3488_v32  ;;  %804 = vst.msk [vmem:[#allocation2 + $0xb0] sm:$0xff] %vm662_vm1, %v3488_v32 }
  0x11   : > { %802 = vst.msk [vmem:[#allocation2 + $0x28] sm:$0x3f] %vm797_vm2, %v3488_v32  ;;  %805 = vst.msk [vmem:[#allocation2 + $0xb8] sm:$0x3f] %vm797_vm2, %v3488_v32 }
  0x12   : > { %s516_s18 = scalar_lea.vmem %s5796_s17, %s3278_s29  ;;  %3311 = vmatpush3.bf16.msra.mxu0 %v3358_v1  ;;  %806 = vst.msk [vmem:[#allocation2 + $0xc0] sm:$0xff] %vm662_vm1, %v3488_v32  ;;  %808 = vst.msk [vmem:[#allocation2 + $0xd0] sm:$0xff] %vm662_vm1, %v3488_v32  ;;  %s5555_s17 = scalar_lea.vmem %s5598_s16, %s3278_s29 }
  0x13   : > { %v3360_v3 = vld [vmem:[%s516_s18] sm:$0xff]   ;;  %3312 = vmatprep.subr.bf16.mxu0 %v3359_v2  ;;  %v3361_v4 = vld [vmem:[%s516_s18 + $0x8] sm:$0xff]   ;;  %v3362_v5 = vld [vmem:[%s516_s18 + $0x10] sm:$0xff]   ;;  %807 = vst.msk [vmem:[#allocation2 + $0xc8] sm:$0x3f] %vm797_vm2, %v3488_v32 }
  0x14   : > { %3314 = vmatprep.mubr.msk.bf16.mxu0 %vm582_vm0, %v3360_v3  ;;  %v3363_v6 = vld [vmem:[%s516_s18 + $0x18] sm:$0xff]   ;;  %809 = vst.msk [vmem:[#allocation2 + $0xd8] sm:$0x3f] %vm797_vm2, %v3488_v32 }
  0x15   : > { %812 = vst.msk [vmem:[#allocation2 + $0x30] sm:$0x7] %vm811_vm3, %v3488_v32  ;;  %813 = vst.msk [vmem:[#allocation2 + $0x40] sm:$0x7] %vm811_vm3, %v3488_v32 }
  0x16   : > { %3313 = vmatpush3.bf16.msra.mxu0 %v3359_v2  ;;  %814 = vst.msk [vmem:[#allocation2 + $0x50] sm:$0x7] %vm811_vm3, %v3488_v32  ;;  %820 = vst.msk [vmem:[#allocation2 + $0x3b] sm:$0x7] %vm811_vm3, %v3488_v32 }
  0x17   : > { %821 = vst.msk [vmem:[#allocation2 + $0x4b] sm:$0x7] %vm811_vm3, %v3488_v32  ;;  %822 = vst.msk [vmem:[#allocation2 + $0x5b] sm:$0x7] %vm811_vm3, %v3488_v32 }
  0x18   : > { %815 = vst.msk [vmem:[#allocation2 + $0x60] sm:$0x7] %vm811_vm3, %v3488_v32  ;;  %816 = vst.msk [vmem:[#allocation2 + $0x70] sm:$0x7] %vm811_vm3, %v3488_v32 }
  0x19   : > { %3315 = vmatmul.mubr.msk.bf16.vlgmr.msra.gmra.mxu0 %vm582_vm0, %v3361_v4  ;;  %817 = vst.msk [vmem:[#allocation2 + $0x80] sm:$0x7] %vm811_vm3, %v3488_v32  ;;  %818 = vst.msk [vmem:[#allocation2 + $0x90] sm:$0x7] %vm811_vm3, %v3488_v32 }
  0x1a   : > { %3318 = vmatprep.mubr.msk.bf16.mxu0 %vm582_vm0, %v3362_v5  ;;  %819 = vst.msk [vmem:[#allocation2 + $0xa0] sm:$0x7] %vm811_vm3, %v3488_v32  ;;  %823 = vst.msk [vmem:[#allocation2 + $0x6b] sm:$0x7] %vm811_vm3, %v3488_v32 }
  0x1b   : > { %824 = vst.msk [vmem:[#allocation2 + $0x7b] sm:$0x7] %vm811_vm3, %v3488_v32  ;;  %825 = vst.msk [vmem:[#allocation2 + $0x8b] sm:$0x7] %vm811_vm3, %v3488_v32 }
  0x1c   : > { %826 = vst.msk [vmem:[#allocation2 + $0x9b] sm:$0x7] %vm811_vm3, %v3488_v32  ;;  %827 = vst.msk [vmem:[#allocation2 + $0xab] sm:$0x7] %vm811_vm3, %v3488_v32 }
  0x21   : > { %3319 = vmatmul.mubr.msk.bf16.gmra.mxu0 %vm582_vm0, %v3363_v6 }
  0xd9   : > { %v3316_v8 = vpop.f32.mrf.mxu0 }
  0xda   : > { %v3606_v9 = vadd.f32 %v3316_v8, %v3136_v7 }
  0xdb   : > { %v629_v10 = vpop.f32.mrf.mxu0 }
  0xdc   : > { %v3608_v11 = vadd.f32 %v3136_v7, %v629_v10  ;;  %v669_v12 = vsel %vm662_vm1, %v3606_v9, 0.0  ;;  %v843_v10 = vld [vmem:[#allocation2] sm:$0xff] }
  0xdd   : > { %670 = vadd.xlane.f32.xlu1 %v669_v12  ;;  %v3317_v13 = vpop.f32.mrf.mxu0  ;;  %v3716_v12 = vld [vmem:[%s5587_s5 + $0x2] ss:$0 sm:$0xff] }
  0xde   : > { %v3612_v14 = vadd.f32 %v3317_v13, %v3136_v7  ;;  %v663_v15 = vsel %vm662_vm1, %v3608_v11, 0.0  ;;  %v3721_v13 = vld [vmem:[%s5587_s5 + $0x1] ss:$0 sm:$0xff] }
  0xdf   : > { %v632_v16 = vpop.f32.mrf.mxu0  ;;  %664 = vadd.xlane.f32.xlu0 %v663_v15  ;;  %v874_v15 = vld [vmem:[#allocation2 + $0x1] sm:$0xff] }
  0xe0   : > { %v3616_v17 = vadd.f32 %v3136_v7, %v632_v16  ;;  %v672_v18 = vsel %vm662_vm1, %v3612_v14, 0.0 }
  0xe1   : > { %673 = vadd.xlane.f32.xlu1 %v672_v18  ;;  %v3320_v19 = vpop.f32.mrf.mxu0  ;;  %v3728_v18 = vld [vmem:[%s5587_s5 + $0x3] ss:$0 sm:$0xff] }
  0xe2   : > { %v666_v20 = vsel %vm662_vm1, %v3616_v17, 0.0  ;;  %v3624_v24 = vadd.f32 %v3320_v19, %v3136_v7  ;;  %v970_v19 = vld [vmem:[#allocation2 + $0x4] sm:$0xff] }
  0xe3   : > { %v645_v21 = vpop.f32.mrf.mxu0  ;;  %667 = vadd.xlane.f32.xlu0 %v666_v20  ;;  %v3733_v20 = vld [vmem:[%s5587_s5 + $0x4] ss:$0 sm:$0xff] }
  0xe4   : > { %v3622_v22 = vadd.f32 %v3136_v7, %v645_v21  ;;  %v681_v30 = vsel %vm662_vm1, %v3624_v24, 0.0  ;;  %v890_v21 = vmul.f32 %v3721_v13, %v874_v15  ;;  %v3787_v15 = vld [vmem:[%s5587_s5 + $0xc] ss:$0 sm:$0xff] }
  0xe5   : > { %v3321_v23 = vpop.f32.mrf.mxu0  ;;  %5799 = vst [vmem:[#allocation6_spill] sm:$0xff] %v3787_v15 }
  0xe6   : > { %v675_v25 = vsel %vm662_vm1, %v3622_v22, 0.0  ;;  %v3630_v28 = vadd.f32 %v3321_v23, %v3136_v7 }
  0xe7   : > { %v648_v26 = vpop.f32.mrf.mxu0  ;;  %676 = vadd.xlane.f32.xlu0 %v675_v25  ;;  %v1002_v25 = vld [vmem:[#allocation2 + $0x5] sm:$0xff] }
  0xe8   : > { %v3628_v27 = vadd.f32 %v3136_v7, %v648_v26  ;;  %v684_v31 = vsel %vm662_vm1, %v3630_v28, 0.0  ;;  %v3741_v26 = vld [vmem:[%s5587_s5 + $0x5] ss:$0 sm:$0xff] }
  0xea   : > { %v678_v29 = vsel %vm662_vm1, %v3628_v27, 0.0 }
  0xeb   : > { %679 = vadd.xlane.f32.xlu1 %v678_v29  ;;  %682 = vadd.xlane.f32.xlu0 %v681_v30  ;;  %v1018_v30 = vmul.f32 %v3741_v26, %v1002_v25 }
  0xef   : > { %685 = vadd.xlane.f32.xlu1 %v684_v31  ;;  %v844_v31 = vld [vmem:[#allocation2 + $0x10] sm:$0xff] }
 0x166   : > { %v671_v33 = vpop.xlane.xlu1 %670 }
 0x167   : > { %v690_v34 = vmul.f32 0.0625, %v671_v33 }
 0x168   : > { %v665_v35 = vpop.xlane.xlu0 %664 }
 0x169   : > { %v688_v36 = vmul.f32 0.0625, %v665_v35  ;;  %v3661_v38 = vsub.f32 %v3606_v9, %v690_v34  ;;  %v3711_v9 = vld [vmem:[%s5587_s5] ss:$0 sm:$0xff]  ;;  %v3753_v34 = vld [vmem:[%s5587_s5 + $0x7] ss:$0 sm:$0xff]  ;;  %v875_v35 = vld [vmem:[#allocation2 + $0x11] sm:$0xff] }
 0x16a   : > { %v674_v37 = vpop.xlane.xlu1 %673 }
 0x16b   : > { %v3664_v39 = vsub.f32 %v3608_v11, %v688_v36  ;;  %v691_v40 = vmul.f32 0.0625, %v674_v37  ;;  %v706_v47 = vmul.f32 %v3661_v38, %v3661_v38  ;;  %v906_v11 = vld [vmem:[#allocation2 + $0x2] sm:$0xff] }
 0x16c   : > { %v668_v41 = vpop.xlane.xlu0 %667  ;;  %v922_v16 = vmul.f32 %v3716_v12, %v906_v11  ;;  %v3758_v36 = vld [vmem:[%s5587_s5 + $0x8] ss:$0 sm:$0xff] }
 0x16d   : > { %v689_v42 = vmul.f32 0.0625, %v668_v41  ;;  %v704_v43 = vmul.f32 %v3664_v39, %v3664_v39  ;;  %v3669_v44 = vsub.f32 %v3612_v14, %v691_v40  ;;  %v718_v52 = vsel %vm662_vm1, %v706_v47, 0.0  ;;  %v907_v40 = vld [vmem:[#allocation2 + $0x12] sm:$0xff] }
 0x16e   : > { %v858_v14 = vmul.f32 %v3711_v9, %v843_v10  ;;  %v939_v41 = vld [vmem:[#allocation2 + $0x13] sm:$0xff] }
 0x16f   : > { %v3672_v45 = vsub.f32 %v3616_v17, %v689_v42  ;;  %v712_v46 = vsel %vm662_vm1, %v704_v43, 0.0  ;;  %v707_v54 = vmul.f32 %v3669_v44, %v3669_v44  ;;  %v938_v17 = vld [vmem:[#allocation2 + $0x3] sm:$0xff] }
 0x170   : > { %713 = vadd.xlane.f32.xlu0 %v712_v46  ;;  %v677_v48 = vpop.xlane.xlu0 %676  ;;  %v930_v23 = vadd.f32 %v922_v16, %v858_v14  ;;  %v1083_v46 = vmul.f32 %v3753_v34, %v844_v31 }
 0x171   : > { %v692_v49 = vmul.f32 0.0625, %v677_v48  ;;  %v705_v50 = vmul.f32 %v3672_v45, %v3672_v45  ;;  %v721_v62 = vsel %vm662_vm1, %v707_v54, 0.0  ;;  %v1115_v48 = vmul.f32 %v3758_v36, %v875_v35 }
 0x172   : > { %v923_v54 = vmul.f32 %v3716_v12, %v907_v40 }
 0x173   : > { %v3680_v51 = vsub.f32 %v3622_v22, %v692_v49  ;;  %v715_v53 = vsel %vm662_vm1, %v705_v50, 0.0  ;;  %v954_v22 = vmul.f32 %v3728_v18, %v938_v17  ;;  %v3765_v49 = vld [vmem:[%s5587_s5 + $0x9] ss:$0 sm:$0xff] }
 0x174   : > { %v680_v55 = vpop.xlane.xlu1 %679  ;;  %719 = vadd.xlane.f32.xlu0 %v718_v52  ;;  %716 = vadd.xlane.f32.xlu1 %v715_v53  ;;  %v683_v56 = vpop.xlane.xlu0 %682  ;;  %v859_v52 = vmul.f32 %v3711_v9, %v844_v31  ;;  %v891_v53 = vmul.f32 %v3721_v13, %v875_v35  ;;  %v3795_v31 = vld [vmem:[%s5587_s5 + $0xd] ss:$0 sm:$0xff] }
 0x175   : > { %v693_v57 = vmul.f32 0.0625, %v680_v55  ;;  %v694_v58 = vmul.f32 0.0625, %v683_v56  ;;  %v708_v59 = vmul.f32 %v3680_v51, %v3680_v51  ;;  %v962_v29 = vadd.f32 %v954_v22, %v890_v21  ;;  %v3774_v56 = vld [vmem:[%s5587_s5 + $0xa] ss:$0 sm:$0xff]  ;;  %v1035_v22 = vld [vmem:[#allocation2 + $0x16] sm:$0xff]  ;;  %5800 = vst [vmem:[#allocation7_spill] sm:$0xff] %v3795_v31 }
 0x176   : > { %v955_v55 = vmul.f32 %v3728_v18, %v939_v41  ;;  %v931_v10 = vadd.f32 %v923_v54, %v859_v52  ;;  %v1275_v54 = vmul.f32 %v3795_v31, %v1035_v22 }
 0x177   : > { %v3689_v60 = vsub.f32 %v3628_v27, %v693_v57  ;;  %v3692_v61 = vsub.f32 %v3624_v24, %v694_v58  ;;  %v724_v63 = vsel %vm662_vm1, %v708_v59, 0.0  ;;  %v986_v24 = vmul.f32 %v3733_v20, %v970_v19  ;;  %v1034_v27 = vld [vmem:[#allocation2 + $0x6] sm:$0xff]  ;;  %v971_v59 = vld [vmem:[#allocation2 + $0x14] sm:$0xff] }
 0x178   : > { %v686_v0 = vpop.xlane.xlu1 %685  ;;  %722 = vadd.xlane.f32.xlu1 %v721_v62  ;;  %725 = vadd.xlane.f32.xlu0 %v724_v63  ;;  %v1026_v43 = vadd.f32 %v1018_v30, %v962_v29  ;;  %v963_v11 = vadd.f32 %v955_v55, %v891_v53  ;;  %v987_v14 = vmul.f32 %v3733_v20, %v971_v59  ;;  %v845_v19 = vld [vmem:[#allocation2 + $0x20] sm:$0xff]  ;;  %v3808_v55 = vld [vmem:[%s5587_s5 + $0xf] ss:$0 sm:$0xff] }
 0x179   : > { %v695_v1 = vmul.f32 0.0625, %v686_v0  ;;  %v709_v2 = vmul.f32 %v3689_v60, %v3689_v60  ;;  %v710_v3 = vmul.f32 %v3692_v61, %v3692_v61  ;;  %v994_v32 = vadd.f32 %v986_v24, %v930_v23  ;;  %v1003_v0 = vld [vmem:[#allocation2 + $0x15] sm:$0xff] }
 0x17a   : > { %v1019_v21 = vmul.f32 %v3741_v26, %v1003_v0  ;;  %v1243_v30 = vmul.f32 %v3787_v15, %v1003_v0  ;;  %v995_v35 = vadd.f32 %v987_v14, %v931_v10  ;;  %v860_v0 = vmul.f32 %v3711_v9, %v845_v19  ;;  %v3823_v14 = vld [vmem:[%s5585_s3] ss:$0 sm:$0xff] }
 0x17b   : > { %v3701_v4 = vsub.f32 %v3630_v28, %v695_v1  ;;  %v727_v5 = vsel %vm662_vm1, %v709_v2, 0.0  ;;  %v730_v6 = vsel %vm662_vm1, %v710_v3, 0.0  ;;  %v3746_v28 = vld [vmem:[%s5587_s5 + $0x6] ss:$0 sm:$0xff]  ;;  %v1091_v1 = vadd.f32 %v1083_v46, %v1026_v43 }
 0x17c   : > { %728 = vadd.xlane.f32.xlu1 %v727_v5  ;;  %731 = vadd.xlane.f32.xlu0 %v730_v6  ;;  %5798 = vst [vmem:[#allocation5_spill] sm:$0xff] %v3746_v28  ;;  %v1050_v33 = vmul.f32 %v3746_v28, %v1034_v27  ;;  %v1147_v2 = vmul.f32 %v3765_v49, %v907_v40  ;;  %v3781_v6 = vld [vmem:[%s5587_s5 + $0xb] ss:$0 sm:$0xff]  ;;  %v876_v46 = vld [vmem:[#allocation2 + $0x21] sm:$0xff] }
 0x17d   : > { %5797 = vst [vmem:[#allocation4_spill] sm:$0xff] %v3701_v4  ;;  %v711_v7 = vmul.f32 %v3701_v4, %v3701_v4  ;;  %v1179_v5 = vmul.f32 %v3774_v56, %v939_v41  ;;  %v1211_v27 = vmul.f32 %v3781_v6, %v971_v59  ;;  %v1084_v40 = vmul.f32 %v3753_v34, %v845_v19  ;;  %v3802_v41 = vld [vmem:[%s5587_s5 + $0xe] ss:$0 sm:$0xff] }
 0x17e   : > { %v1058_v47 = vadd.f32 %v1050_v33, %v994_v32  ;;  %v1155_v25 = vadd.f32 %v1147_v2, %v1091_v1  ;;  %v1308_v59 = vmul.f32 %v3802_v41, %v845_v19  ;;  %v1340_v19 = vmul.f32 %v3808_v55, %v876_v46 }
 0x17f   : > { %v733_v8 = vsel %vm662_vm1, %v711_v7, 0.0 }
 0x180   : > { %734 = vadd.xlane.f32.xlu1 %v733_v8  ;;  %v1123_v3 = vadd.f32 %v1115_v48, %v1058_v47  ;;  %v908_v47 = vld [vmem:[#allocation2 + $0x22] sm:$0xff]  ;;  %v1027_v48 = vadd.f32 %v1019_v21, %v963_v11  ;;  %v1219_v53 = vadd.f32 %v1211_v27, %v1155_v25  ;;  %v3832_v25 = vld [vmem:[%s5587_s5 + $0x11] ss:$0 sm:$0xff]  ;;  %v3837_v27 = vld [vmem:[%s5587_s5 + $0x12] ss:$0 sm:$0xff] }
 0x181   : > { %v924_v1 = vmul.f32 %v3716_v12, %v908_v47  ;;  %v1148_v10 = vmul.f32 %v3765_v49, %v908_v47  ;;  %v1004_v21 = vld [vmem:[#allocation2 + $0x25] sm:$0xff] }
 0x182   : > { %v1187_v29 = vadd.f32 %v1179_v5, %v1123_v3  ;;  %v1116_v3 = vmul.f32 %v3758_v36, %v876_v46  ;;  %v3817_v5 = vld [vmem:[%s5587_s5 + $0x10] ss:$0 sm:$0xff] }
 0x1f9   : > { %v714_v37 = vpop.xlane.xlu0 %713 }
 0x1fa   : > { %v736_v42 = vmul.f32 0.0625, %v714_v37  ;;  %v1051_v37 = vmul.f32 %v3746_v28, %v1035_v22  ;;  %v1283_v22 = vadd.f32 %v1275_v54, %v1219_v53 }
 0x1fc   : > { %v744_v50 = vadd.f32 1e-06, %v736_v42  ;;  %v1059_v2 = vadd.f32 %v1051_v37, %v995_v35  ;;  %v1036_v37 = vld [vmem:[#allocation2 + $0x26] sm:$0xff] }
 0x1fd   : > { %v717_v57 = vpop.xlane.xlu1 %716  ;;  %v720_v58 = vpop.xlane.xlu0 %719 }
 0x1fe   : > { %3369 = vrsqrt.f32 %v744_v50  ;;  %v737_v62 = vmul.f32 0.0625, %v717_v57  ;;  %v738_v63 = vmul.f32 0.0625, %v720_v58  ;;  %v940_v57 = vld [vmem:[#allocation2 + $0x23] sm:$0xff]  ;;  %v1251_v58 = vadd.f32 %v1243_v30, %v1187_v29  ;;  %v3843_v30 = vld [vmem:[%s5586_s4] ss:$0 sm:$0xff] }
 0x1ff   : > { %v1124_v35 = vadd.f32 %v1116_v3, %v1059_v2  ;;  %v1052_v2 = vmul.f32 %v3746_v28, %v1036_v37 }
 0x200   : > { %v745_v7 = vadd.f32 1e-06, %v737_v62  ;;  %v746_v8 = vadd.f32 1e-06, %v738_v63 }
 0x201   : > { %v723_v16 = vpop.xlane.xlu1 %722  ;;  %v726_v17 = vpop.xlane.xlu0 %725 }
 0x202   : > { %3371 = vrsqrt.f32 %v745_v7  ;;  %v739_v23 = vmul.f32 0.0625, %v723_v16  ;;  %v740_v24 = vmul.f32 0.0625, %v726_v17  ;;  %v972_v7 = vld [vmem:[#allocation2 + $0x24] sm:$0xff]  ;;  %v892_v16 = vmul.f32 %v3721_v13, %v876_v46 }
 0x203   : > { %3373 = vrsqrt.f32 %v746_v8  ;;  %v1092_v8 = vadd.f32 %v1084_v40, %v1027_v48  ;;  %v956_v17 = vmul.f32 %v3728_v18, %v940_v57  ;;  %v1436_v53 = vmul.f32 %v3837_v27, %v972_v7 }
 0x204   : > { %v747_v32 = vadd.f32 1e-06, %v739_v23  ;;  %v748_v33 = vadd.f32 1e-06, %v740_v24  ;;  %v1316_v23 = vadd.f32 %v1308_v59, %v1251_v58  ;;  %v1372_v24 = vmul.f32 %v3817_v5, %v908_v47 }
 0x205   : > { %v729_v42 = vpop.xlane.xlu1 %728  ;;  %v732_v43 = vpop.xlane.xlu0 %731  ;;  %v1156_v40 = vadd.f32 %v1148_v10, %v1092_v8  ;;  %v1348_v58 = vadd.f32 %v1340_v19, %v1283_v22  ;;  %v1276_v19 = vmul.f32 %v3795_v31, %v1036_v37 }
 0x206   : > { %3375 = vrsqrt.f32 %v747_v32  ;;  %v741_v50 = vmul.f32 0.0625, %v729_v42  ;;  %v742_v52 = vmul.f32 0.0625, %v732_v43  ;;  %v932_v32 = vadd.f32 %v924_v1, %v860_v0 }
 0x207   : > { %3377 = vrsqrt.f32 %v748_v33  ;;  %v988_v33 = vmul.f32 %v3733_v20, %v972_v7  ;;  %v1180_v42 = vmul.f32 %v3774_v56, %v940_v57  ;;  %v1212_v43 = vmul.f32 %v3781_v6, %v972_v7 }
 0x208   : > { %v749_v62 = vadd.f32 1e-06, %v741_v50  ;;  %v750_v63 = vadd.f32 1e-06, %v742_v52  ;;  %v1020_v50 = vmul.f32 %v3741_v26, %v1004_v21  ;;  %v1404_v52 = vmul.f32 %v3832_v25, %v940_v57 }
 0x209   : > { %v735_v47 = vpop.xlane.xlu1 %734  ;;  %v1380_v59 = vadd.f32 %v1372_v24, %v1316_v23  ;;  %v996_v1 = vadd.f32 %v988_v33, %v932_v32  ;;  %v1188_v8 = vadd.f32 %v1180_v42, %v1124_v35  ;;  %v1220_v10 = vadd.f32 %v1212_v43, %v1156_v40  ;;  %v1747_v42 = vld [vmem:[#allocation2 + $0xb0] sm:$0xff] }
 0x20a   : > { %3379 = vrsqrt.f32 %v749_v62  ;;  %v3855_v62 = vld [vmem:[%s5587_s5 + $0x13] ss:$0 sm:$0xff]  ;;  %v743_v7 = vmul.f32 0.0625, %v735_v47  ;;  %v1412_v24 = vadd.f32 %v1404_v52, %v1348_v58 }
 0x20b   : > { %v3370_v11 = vpop.eup %3369  ;;  %3381 = vrsqrt.f32 %v750_v63  ;;  %5801 = vst [vmem:[#allocation8_spill] sm:$0xff] %v3855_v62  ;;  %v3860_v63 = vld [vmem:[%s5587_s5 + $0x14] ss:$0 sm:$0xff]  ;;  %v1060_v47 = vadd.f32 %v1052_v2, %v996_v1  ;;  %v1284_v52 = vadd.f32 %v1276_v19, %v1220_v10 }
 0x20c   : > { %v760_v29 = vmul.f32 %v3370_v11, %v3664_v39  ;;  %v964_v39 = vadd.f32 %v956_v17, %v892_v16  ;;  %5802 = vst [vmem:[#allocation9_spill] sm:$0xff] %v3860_v63  ;;  %v1244_v11 = vmul.f32 %v3787_v15, %v1004_v21  ;;  %v1500_v22 = vmul.f32 %v3860_v63, %v1036_v37 }
 0x20d   : > { %v751_v43 = vadd.f32 1e-06, %v743_v7 }
 0x20e   : > { %v774_v46 = vmul.f32 %v3823_v14, %v760_v29  ;;  %v1444_v29 = vadd.f32 %v1436_v53, %v1380_v59 }
 0x20f   : > { %v3372_v48 = vpop.eup %3371  ;;  %3383 = vrsqrt.f32 %v751_v43 }
 0x210   : > { %v3374_v54 = vpop.eup %3373  ;;  %v3863_v0 = vadd.f32 %v3843_v30, %v774_v46  ;;  %v761_v57 = vmul.f32 %v3372_v48, %v3672_v45  ;;  %v1468_v45 = vmul.f32 %v3855_v62, %v1004_v21  ;;  %v1028_v21 = vadd.f32 %v1020_v50, %v964_v39 }
 0x211   : > { %v762_v3 = vmul.f32 %v3374_v54, %v3661_v38  ;;  %v1252_v48 = vadd.f32 %v1244_v11, %v1188_v8  ;;  %v3897_v53 = vadd.f32 %v1500_v22, %v1444_v29 }
 0x212   : > { %5803 = vst [vmem:[#allocation10_spill] sm:$0xff] %v3863_v0  ;;  %828 = vst.msk [vmem:[#allocation2 + $0x33] sm:$0xff] %vm662_vm1, %v3863_v0  ;;  %v775_v16 = vmul.f32 %v3823_v14, %v761_v57  ;;  %v3895_v50 = vadd.f32 %v1468_v45, %v1412_v24 }
 0x213   : > { %v3376_v17 = vpop.eup %3375  ;;  %v776_v23 = vmul.f32 %v3823_v14, %v762_v3 }
 0x214   : > { %v3378_v38 = vpop.eup %3377  ;;  %v3877_v32 = vadd.f32 %v3843_v30, %v775_v16  ;;  %v763_v33 = vmul.f32 %v3376_v17, %v3669_v44  ;;  %v3890_v44 = vld [vmem:[%s5587_s5 + $0x1c] ss:$0 sm:$0xff] }
 0x215   : > { %v3881_v35 = vadd.f32 %v3843_v30, %v776_v23  ;;  %v764_v40 = vmul.f32 %v3378_v38, %v3680_v51  ;;  %v3903_v58 = vmul.f32 %v3890_v44, %v1747_v42 }
 0x216   : > { %5804 = vst [vmem:[#allocation11_spill] sm:$0xff] %v3877_v32  ;;  %830 = vst.msk [vmem:[#allocation2 + $0x43] sm:$0xff] %vm662_vm1, %v3877_v32  ;;  %v777_v37 = vmul.f32 %v3823_v14, %v763_v33 }
 0x217   : > { %5805 = vst [vmem:[#allocation12_spill] sm:$0xff] %v3881_v35  ;;  %v3380_v46 = vpop.eup %3379  ;;  %832 = vst.msk [vmem:[#allocation2 + $0x53] sm:$0xff] %vm662_vm1, %v3881_v35  ;;  %v778_v51 = vmul.f32 %v3823_v14, %v764_v40 }
 0x218   : > { %v3382_v39 = vpop.eup %3381  ;;  %v3900_v54 = vadd.f32 %v3843_v30, %v777_v37  ;;  %5807 = vst [vmem:[#allocation14_spill] sm:$0xff] %v3903_v58  ;;  %v3909_v3 = vmul.f32 %v3380_v46, %v3689_v60 }
 0x219   : > { %v846_v59 = vld [vmem:[#allocation2 + $0x30] sm:$0xff]  ;;  %v3906_v2 = vadd.f32 %v3843_v30, %v778_v51  ;;  %v3912_v7 = vmul.f32 %v3382_v39, %v3692_v61 }
 0x21a   : > { %5806 = vst [vmem:[#allocation13_spill] sm:$0xff] %v3900_v54  ;;  %v877_v57 = vld [vmem:[#allocation2 + $0x31] sm:$0xff]  ;;  %v861_v8 = vmul.f32 %v3711_v9, %v846_v59  ;;  %v1085_v45 = vmul.f32 %v3753_v34, %v846_v59  ;;  %834 = vst.msk [vmem:[#allocation2 + $0x63] sm:$0xff] %vm662_vm1, %v3900_v54 }
 0x21b   : > { %v909_v1 = vld [vmem:[#allocation2 + $0x32] sm:$0xff]  ;;  %5808 = vst [vmem:[#allocation15_spill] sm:$0xff] %v3906_v2  ;;  %v893_v10 = vmul.f32 %v3721_v13, %v877_v57  ;;  %v1117_v38 = vmul.f32 %v3758_v36, %v877_v57  ;;  %836 = vst.msk [vmem:[#allocation2 + $0x73] sm:$0xff] %vm662_vm1, %v3906_v2 }
 0x21c   : > { %v925_v11 = vmul.f32 %v3716_v12, %v909_v1  ;;  %v941_v16 = vld [vmem:[#allocation2 + $0x33] sm:$0xff]  ;;  %v1093_v33 = vadd.f32 %v1085_v45, %v1028_v21  ;;  %v1149_v40 = vmul.f32 %v3765_v49, %v909_v1 }
 0x21d   : > { %v973_v17 = vld [vmem:[#allocation2 + $0x34] sm:$0xff]  ;;  %v957_v60 = vmul.f32 %v3728_v18, %v941_v16  ;;  %v1125_v43 = vadd.f32 %v1117_v38, %v1060_v47  ;;  %v1181_v37 = vmul.f32 %v3774_v56, %v941_v16  ;;  %v1309_v47 = vmul.f32 %v3802_v41, %v846_v59 }
 0x21e   : > { %v1005_v19 = vld [vmem:[#allocation2 + $0x35] sm:$0xff]  ;;  %v989_v61 = vmul.f32 %v3733_v20, %v973_v17  ;;  %v933_v24 = vadd.f32 %v925_v11, %v861_v8  ;;  %v1213_v46 = vmul.f32 %v3781_v6, %v973_v17  ;;  %v1157_v39 = vadd.f32 %v1149_v40, %v1093_v33 }
 0x21f   : > { %v1021_v22 = vmul.f32 %v3741_v26, %v1005_v19  ;;  %v1037_v23 = vld [vmem:[#allocation2 + $0x36] sm:$0xff]  ;;  %v965_v42 = vadd.f32 %v957_v60, %v893_v10  ;;  %v1245_v32 = vmul.f32 %v3787_v15, %v1005_v19  ;;  %v3935_v8 = vld [vmem:[%s5587_s5 + $0x15] ss:$0 sm:$0xff]  ;;  %v1189_v11 = vadd.f32 %v1181_v37, %v1125_v43 }
 0x220   : > { %v1053_v29 = vmul.f32 %v3746_v28, %v1037_v23  ;;  %v997_v51 = vadd.f32 %v989_v61, %v933_v24  ;;  %v1277_v54 = vmul.f32 %v3795_v31, %v1037_v23  ;;  %5809 = vst [vmem:[#allocation16_spill] sm:$0xff] %v3935_v8  ;;  %v1341_v10 = vmul.f32 %v3808_v55, %v877_v57  ;;  %v3944_v45 = vld [vmem:[%s5587_s5 + $0x16] ss:$0 sm:$0xff]  ;;  %v3949_v60 = vld [vmem:[%s5587_s5 + $0x17] ss:$0 sm:$0xff]  ;;  %v3991_v28 = vld [vmem:[#allocation2 + $0x41] sm:$0xff] }
 0x221   : > { %v3937_v21 = vadd.f32 %v1021_v22, %v965_v42  ;;  %5810 = vst [vmem:[#allocation17_spill] sm:$0xff] %v3944_v45  ;;  %5811 = vst [vmem:[#allocation18_spill] sm:$0xff] %v3949_v60  ;;  %v1221_v38 = vadd.f32 %v1213_v46, %v1157_v39  ;;  %v1373_v22 = vmul.f32 %v3817_v5, %v909_v1  ;;  %v3958_v33 = vld [vmem:[%s5587_s5 + $0x18] ss:$0 sm:$0xff]  ;;  %v3963_v40 = vld [vmem:[%s5587_s5 + $0x19] ss:$0 sm:$0xff] }
 0x222   : > { %v3951_v61 = vadd.f32 %v1053_v29, %v997_v51  ;;  %v1405_v24 = vmul.f32 %v3832_v25, %v941_v16  ;;  %5812 = vst [vmem:[#allocation19_spill] sm:$0xff] %v3958_v33  ;;  %5813 = vst [vmem:[#allocation20_spill] sm:$0xff] %v3963_v40  ;;  %v3968_v29 = vld [vmem:[%s5587_s5 + $0x1a] ss:$0 sm:$0xff]  ;;  %v3970_v42 = vadd.f32 %v1245_v32, %v1189_v11  ;;  %v3976_v51 = vld [vmem:[%s5587_s5 + $0x1b] ss:$0 sm:$0xff] }
 0x223   : > { %5814 = vst [vmem:[#allocation21_spill] sm:$0xff] %v3968_v29  ;;  %v1317_v43 = vadd.f32 %v1309_v47, %v1252_v48  ;;  %v1349_v37 = vadd.f32 %v1341_v10, %v1284_v52  ;;  %v1437_v46 = vmul.f32 %v3837_v27, %v973_v17  ;;  %5815 = vst [vmem:[#allocation22_spill] sm:$0xff] %v3976_v51  ;;  %v847_v11 = vld [vmem:[#allocation2 + $0x40] sm:$0xff] }
 0x224   : > { %v3978_v39 = vadd.f32 %v1277_v54, %v1221_v38  ;;  %v1469_v2 = vmul.f32 %v3855_v62, %v1005_v19  ;;  %v1501_v0 = vmul.f32 %v3860_v63, %v1037_v23  ;;  %v1532_v35 = vmul.f32 %v3935_v8, %v846_v59  ;;  %v3985_v47 = vld [vmem:[#allocation2 + $0x42] sm:$0xff]  ;;  %5817 = vst [vmem:[#allocation24_spill] sm:$0xff] %v3991_v28 }
 0x225   : > { %v1381_v58 = vadd.f32 %v1373_v22, %v1317_v43  ;;  %v1413_v32 = vadd.f32 %v1405_v24, %v1349_v37  ;;  %v1564_v48 = vmul.f32 %v3944_v45, %v877_v57  ;;  %v1596_v52 = vmul.f32 %v3949_v60, %v909_v1  ;;  %5816 = vst [vmem:[#allocation23_spill] sm:$0xff] %v3985_v47  ;;  %v3995_v1 = vld [vmem:[#allocation2 + $0x43] sm:$0xff] }
 0x226   : > { %v1540_v10 = vadd.f32 %v1532_v35, %v3895_v50  ;;  %v1628_v54 = vmul.f32 %v3958_v33, %v941_v16  ;;  %v1660_v38 = vmul.f32 %v3963_v40, %v973_v17  ;;  %v1692_v4 = vmul.f32 %v3968_v29, %v1005_v19  ;;  %5818 = vst [vmem:[#allocation25_spill] sm:$0xff] %v3995_v1  ;;  %v3997_v43 = vld [vmem:[#allocation2 + $0x44] sm:$0xff]  ;;  %v4001_v35 = vpop.eup %3383  ;;  %v4049_v40 = vld [vmem:[#allocation2 + $0x53] sm:$0xff] }
 0x227   : > { %v1445_v59 = vadd.f32 %v1437_v46, %v1381_v58  ;;  %v1477_v22 = vadd.f32 %v1469_v2, %v1413_v32  ;;  %v1572_v24 = vadd.f32 %v1564_v48, %v3897_v53  ;;  %v1724_v57 = vmul.f32 %v3976_v51, %v1037_v23  ;;  %5819 = vst [vmem:[#allocation26_spill] sm:$0xff] %v3997_v43  ;;  %v3999_v37 = vld [vmem:[#allocation2 + $0x45] sm:$0xff]  ;;  %v4040_v51 = vld [vmem:[#allocation2 + $0x51] sm:$0xff] }
 0x228   : > { %5820 = vst [vmem:[#allocation27_spill] sm:$0xff] %v3999_v37  ;;  %v1604_v50 = vadd.f32 %v1596_v52, %v1540_v10  ;;  %v4003_v16 = vld [vmem:[#allocation2 + $0x46] sm:$0xff]  ;;  %v4006_v17 = vmul.f32 %v3711_v9, %v847_v11  ;;  %v4010_v58 = vmul.f32 %v3716_v12, %v3985_v47  ;;  %v1086_v53 = vmul.f32 %v3753_v34, %v847_v11 }
 0x229   : > { %5821 = vst [vmem:[#allocation28_spill] sm:$0xff] %v4003_v16  ;;  %v1509_v2 = vadd.f32 %v1501_v0, %v1445_v59  ;;  %v1636_v19 = vadd.f32 %v1628_v54, %v1572_v24  ;;  %v1118_v23 = vmul.f32 %v3758_v36, %v3991_v28  ;;  %v1150_v46 = vmul.f32 %v3765_v49, %v3985_v47  ;;  %v4032_v24 = vld [vmem:[#allocation2 + $0x52] sm:$0xff] }
 0x22a   : > { %5822 = vst [vmem:[#allocation29_spill] sm:$0xff] %v4006_v17  ;;  %5823 = vst [vmem:[#allocation30_spill] sm:$0xff] %v4010_v58  ;;  %v1668_v32 = vadd.f32 %v1660_v38, %v1604_v50  ;;  %v1182_v48 = vmul.f32 %v3774_v56, %v3995_v1  ;;  %v1214_v52 = vmul.f32 %v3781_v6, %v3997_v43  ;;  %v4023_v17 = vld [vmem:[#allocation2 + $0x50] sm:$0xff] }
 0x22b   : > { %v1246_v10 = vmul.f32 %v3787_v15, %v3999_v37  ;;  %v1700_v58 = vadd.f32 %v1692_v4, %v1636_v19  ;;  %v1278_v0 = vmul.f32 %v3795_v31, %v4003_v16  ;;  %v1310_v54 = vmul.f32 %v3802_v41, %v847_v11  ;;  %5825 = vst [vmem:[#allocation32_spill] sm:$0xff] %v4032_v24  ;;  %v4051_v31 = vld [vmem:[#allocation2 + $0x54] sm:$0xff] }
 0x22c   : > { %v1342_v38 = vmul.f32 %v3808_v55, %v3991_v28  ;;  %v4030_v59 = vadd.f32 %v1724_v57, %v1668_v32  ;;  %v1374_v50 = vmul.f32 %v3817_v5, %v3985_v47  ;;  %v1406_v4 = vmul.f32 %v3832_v25, %v3995_v1  ;;  %5826 = vst [vmem:[#allocation33_spill] sm:$0xff] %v4040_v51 }
 0x22d   : > { %v1438_v19 = vmul.f32 %v3837_v27, %v3997_v43  ;;  %v1470_v29 = vmul.f32 %v3855_v62, %v3999_v37  ;;  %v1502_v57 = vmul.f32 %v3860_v63, %v4003_v16  ;;  %v1533_v32 = vmul.f32 %v3935_v8, %v847_v11  ;;  %5827 = vst [vmem:[#allocation34_spill] sm:$0xff] %v4049_v40 }
 0x22e   : > { %5824 = vst [vmem:[#allocation31_spill] sm:$0xff] %v4030_v59  ;;  %v1565_v59 = vmul.f32 %v3944_v45, %v3991_v28  ;;  %5828 = vst [vmem:[#allocation35_spill] sm:$0xff] %v4051_v31  ;;  %v1597_v43 = vmul.f32 %v3949_v60, %v3985_v47  ;;  %v1629_v15 = vmul.f32 %v3958_v33, %v3995_v1 }
 0x22f   : > { %v1756_v37 = vmul.f32 %v3890_v44, %v847_v11  ;;  %v4060_v16 = vmul.f32 %v3711_v9, %v4023_v17  ;;  %v4064_v63 = vmul.f32 %v3716_v12, %v4032_v24  ;;  %v1094_v28 = vadd.f32 %v1086_v53, %v3937_v21 }
 0x230   : > { %v1126_v45 = vadd.f32 %v1118_v23, %v3951_v61  ;;  %v1311_v47 = vmul.f32 %v3802_v41, %v4023_v17  ;;  %v1318_v60 = vadd.f32 %v1310_v54, %v3970_v42  ;;  %v4073_v11 = vmul.f32 %v3808_v55, %v4040_v51 }
 0x231   : > { %5829 = vst [vmem:[#allocation36_spill] sm:$0xff] %v4060_v16  ;;  %5830 = vst [vmem:[#allocation37_spill] sm:$0xff] %v4064_v63  ;;  %v1350_v1 = vadd.f32 %v1342_v38, %v3978_v39  ;;  %v4078_v16 = vmul.f32 %v3817_v5, %v4032_v24  ;;  %v4082_v21 = vmul.f32 %v3832_v25, %v4049_v40  ;;  %v4092_v63 = vld [vmem:[#allocation2 + $0x60] sm:$0xff] }
 0x232   : > { %v4086_v61 = vmul.f32 %v3837_v27, %v4051_v31  ;;  %v1534_v42 = vmul.f32 %v3935_v8, %v4023_v17  ;;  %v1541_v53 = vadd.f32 %v1533_v32, %v1477_v22  ;;  %v1573_v23 = vadd.f32 %v1565_v59, %v1509_v2  ;;  %v4098_v31 = vld [vmem:[#allocation2 + $0x61] sm:$0xff] }
 0x233   : > { %5831 = vst [vmem:[#allocation38_spill] sm:$0xff] %v4078_v16  ;;  %5832 = vst [vmem:[#allocation39_spill] sm:$0xff] %v4082_v21  ;;  %v4090_v54 = vadd.f32 %v1756_v37, %v1700_v58  ;;  %v1158_v39 = vadd.f32 %v1150_v46, %v1094_v28  ;;  %v1190_v38 = vadd.f32 %v1182_v48, %v1126_v45  ;;  %v4104_v28 = vld [vmem:[#allocation2 + $0x62] sm:$0xff] }
 0x234   : > { %5833 = vst [vmem:[#allocation40_spill] sm:$0xff] %v4086_v61  ;;  %v1382_v24 = vadd.f32 %v1374_v50, %v1318_v60  ;;  %v1414_v51 = vadd.f32 %v1406_v4, %v1350_v1  ;;  %v4094_v16 = vadd.f32 %v1597_v43, %v1541_v53  ;;  %v779_v21 = vmul.f32 %v3823_v14, %v3909_v3  ;;  %v4106_v45 = vld [vmem:[#allocation2 + $0x63] sm:$0xff]  ;;  %v4146_v50 = vld [vmem:[#allocation2 + $0x74] sm:$0xff] }
 0x235   : > { %v4100_v61 = vadd.f32 %v1629_v15, %v1573_v23  ;;  %v1222_v40 = vadd.f32 %v1214_v52, %v1158_v39  ;;  %v1254_v22 = vadd.f32 %v1246_v10, %v1190_v38  ;;  %v780_v37 = vmul.f32 %v3823_v14, %v3912_v7  ;;  %v4113_v58 = vld [vmem:[#allocation2 + $0x64] sm:$0xff]  ;;  %5843 = vst [vmem:[#allocation50_spill] sm:$0xff] %v4146_v50  ;;  %v4158_v53 = vld [vmem:[#allocation2 + $0x75] sm:$0xff] }
 0x236   : > { %v4109_v60 = vadd.f32 %v3843_v30, %v779_v21  ;;  %v1446_v1 = vadd.f32 %v1438_v19, %v1382_v24  ;;  %v1478_v43 = vadd.f32 %v1470_v29, %v1414_v51  ;;  %v864_v3 = vmul.f32 %v3711_v9, %v4092_v63  ;;  %v4115_v15 = vld [vmem:[#allocation2 + $0x65] sm:$0xff]  ;;  %v4128_v29 = vld [vmem:[#allocation2 + $0x70] sm:$0xff] }
 0x237   : > { %5834 = vst [vmem:[#allocation41_spill] sm:$0xff] %v4100_v61  ;;  %v4117_v2 = vld [vmem:[#allocation2 + $0x66] sm:$0xff]  ;;  %v4120_v7 = vadd.f32 %v3843_v30, %v780_v37  ;;  %v4122_v46 = vadd.f32 %v1278_v0, %v1222_v40  ;;  %v4124_v48 = vadd.f32 %v1311_v47, %v1254_v22  ;;  %v896_v52 = vmul.f32 %v3721_v13, %v4098_v31  ;;  %v4130_v51 = vld [vmem:[#allocation2 + $0x71] sm:$0xff] }
 0x238   : > { %5835 = vst [vmem:[#allocation42_spill] sm:$0xff] %v4109_v60  ;;  %5837 = vst [vmem:[#allocation44_spill] sm:$0xff] %v4128_v29  ;;  %v4134_v10 = vadd.f32 %v1502_v57, %v1446_v1  ;;  %v4136_v59 = vadd.f32 %v1534_v42, %v1478_v43  ;;  %v928_v40 = vmul.f32 %v3716_v12, %v4104_v28  ;;  %v4142_v0 = vld [vmem:[#allocation2 + $0x72] sm:$0xff]  ;;  %v5844_v57 = vld [vmem:[#allocation5_spill] sm:$0xff] }
 0x239   : > { %5836 = vst [vmem:[#allocation43_spill] sm:$0xff] %v4120_v7  ;;  %5838 = vst [vmem:[#allocation45_spill] sm:$0xff] %v4130_v51  ;;  %v960_v47 = vmul.f32 %v3728_v18, %v4106_v45  ;;  %v4144_v24 = vld [vmem:[#allocation2 + $0x73] sm:$0xff]  ;;  %v992_v4 = vmul.f32 %v3733_v20, %v4113_v58  ;;  %v1024_v19 = vmul.f32 %v3741_v26, %v4115_v15  ;;  %v5845_v21 = vld [vmem:[#allocation4_spill] sm:$0xff] }
 0x23a   : > { %838 = vst.msk [vmem:[#allocation2 + $0x83] sm:$0xff] %vm662_vm1, %v4109_v60  ;;  %5839 = vst [vmem:[#allocation46_spill] sm:$0xff] %v4134_v10  ;;  %v1056_v32 = vmul.f32 %v5844_v57, %v4117_v2  ;;  %v767_v42 = vmul.f32 %v4001_v35, %v5845_v21  ;;  %v4160_v23 = vld [vmem:[#allocation2 + $0x76] sm:$0xff]  ;;  %v936_v39 = vadd.f32 %v928_v40, %v864_v3 }
 0x23b   : > { %5840 = vst [vmem:[#allocation47_spill] sm:$0xff] %v4136_v59  ;;  %5841 = vst [vmem:[#allocation48_spill] sm:$0xff] %v4142_v0  ;;  %v968_v38 = vadd.f32 %v960_v47, %v896_v52  ;;  %v865_v22 = vmul.f32 %v3711_v9, %v4128_v29  ;;  %v897_v37 = vmul.f32 %v3721_v13, %v4130_v51 }
 0x23c   : > { %5842 = vst [vmem:[#allocation49_spill] sm:$0xff] %v4144_v24  ;;  %840 = vst.msk [vmem:[#allocation2 + $0x93] sm:$0xff] %vm662_vm1, %v4120_v7  ;;  %v781_v1 = vmul.f32 %v3823_v14, %v767_v42  ;;  %v929_v43 = vmul.f32 %v3716_v12, %v4142_v0  ;;  %v961_v35 = vmul.f32 %v3728_v18, %v4144_v24 }
 0x23d   : > { %5846 = vst [vmem:[#allocation5_spill] sm:$0xff] %v4158_v53  ;;  %5847 = vst [vmem:[#allocation4_spill] sm:$0xff] %v4160_v23  ;;  %v993_v21 = vmul.f32 %v3733_v20, %v4146_v50  ;;  %v1000_v60 = vadd.f32 %v992_v4, %v936_v39  ;;  %v1032_v3 = vadd.f32 %v1024_v19, %v968_v38 }
 0x23e   : > { %v1025_v52 = vmul.f32 %v3741_v26, %v4158_v53  ;;  %v1057_v9 = vmul.f32 %v5844_v57, %v4160_v23  ;;  %v4178_v13 = vadd.f32 %v3843_v30, %v781_v1  ;;  %v937_v14 = vadd.f32 %v929_v43, %v865_v22 }
 0x23f   : > { %v969_v40 = vadd.f32 %v961_v35, %v897_v37  ;;  %v1089_v12 = vmul.f32 %v3753_v34, %v4128_v29  ;;  %v1064_v18 = vadd.f32 %v1056_v32, %v1000_v60  ;;  %v1121_v20 = vmul.f32 %v3758_v36, %v4130_v51 }
 0x240   : > { %5848 = vst [vmem:[#allocation51_spill] sm:$0xff] %v4178_v13  ;;  %v1153_v47 = vmul.f32 %v3765_v49, %v4142_v0  ;;  %v1185_v26 = vmul.f32 %v3774_v56, %v4144_v24  ;;  %842 = vst.msk [vmem:[#allocation2 + $0xa3] sm:$0xff] %vm662_vm1, %v4178_v13  ;;  %v1001_v57 = vadd.f32 %v993_v21, %v937_v14  ;;  %v5857_v14 = vld [vmem:[#allocation7_spill] sm:$0xff] }
 0x241   : > { %v4188_v4 = vld [vmem:[#allocation2 + $0x80] sm:$0xff]  ;;  %v1033_v60 = vadd.f32 %v1025_v52, %v969_v40  ;;  %v1097_v32 = vadd.f32 %v1089_v12, %v1032_v3  ;;  %v1217_v42 = vmul.f32 %v3781_v6, %v4146_v50  ;;  %v1281_v51 = vmul.f32 %v5857_v14, %v4160_v23 }
 0x242   : > { %5849 = vst [vmem:[#allocation52_spill] sm:$0xff] %v4188_v4  ;;  %v4190_v19 = vld [vmem:[#allocation2 + $0x81] sm:$0xff]  ;;  %v1090_v39 = vmul.f32 %v3753_v34, %v4188_v4  ;;  %v1314_v35 = vmul.f32 %v3802_v41, %v4188_v4  ;;  %v1065_v10 = vadd.f32 %v1057_v9, %v1001_v57 }
 0x243   : > { %5850 = vst [vmem:[#allocation53_spill] sm:$0xff] %v4190_v19  ;;  %v4192_v30 = vld [vmem:[#allocation2 + $0x82] sm:$0xff]  ;;  %v1122_v38 = vmul.f32 %v3758_v36, %v4190_v19  ;;  %v5855_v36 = vld [vmem:[#allocation6_spill] sm:$0xff]  ;;  %v1161_v0 = vadd.f32 %v1153_v47, %v1097_v32 }
 0x244   : > { %5851 = vst [vmem:[#allocation54_spill] sm:$0xff] %v4192_v30  ;;  %v1154_v22 = vmul.f32 %v3765_v49, %v4192_v30  ;;  %v4204_v37 = vld [vmem:[#allocation2 + $0x83] sm:$0xff]  ;;  %v1346_v49 = vmul.f32 %v3808_v55, %v4190_v19  ;;  %v1378_v12 = vmul.f32 %v3817_v5, %v4192_v30  ;;  %v4230_v13 = vld [vmem:[#allocation2 + $0x90] sm:$0xff]  ;;  %v1098_v50 = vadd.f32 %v1090_v39, %v1033_v60 }
 0x245   : > { %5852 = vst [vmem:[#allocation55_spill] sm:$0xff] %v4204_v37  ;;  %v4206_v1 = vld [vmem:[#allocation2 + $0x84] sm:$0xff]  ;;  %v1186_v21 = vmul.f32 %v3774_v56, %v4204_v37  ;;  %v1410_v56 = vmul.f32 %v3832_v25, %v4204_v37  ;;  %5858 = vst [vmem:[#allocation7_spill] sm:$0xff] %v4230_v13  ;;  %v4232_v7 = vld [vmem:[#allocation2 + $0x91] sm:$0xff]  ;;  %v1129_v37 = vadd.f32 %v1121_v20, %v1064_v18 }
 0x246   : > { %5853 = vst [vmem:[#allocation56_spill] sm:$0xff] %v4206_v1  ;;  %v4208_v43 = vld [vmem:[#allocation2 + $0x85] sm:$0xff]  ;;  %v1218_v34 = vmul.f32 %v3781_v6, %v4206_v1  ;;  %v1442_v6 = vmul.f32 %v3837_v27, %v4206_v1  ;;  %5859 = vst [vmem:[#allocation58_spill] sm:$0xff] %v4232_v7  ;;  %v4240_v30 = vld [vmem:[#allocation2 + $0x92] sm:$0xff]  ;;  %v1249_v1 = vmul.f32 %v5855_v36, %v4158_v53 }
 0x247   : > { %5854 = vst [vmem:[#allocation57_spill] sm:$0xff] %v4208_v43  ;;  %v1250_v3 = vmul.f32 %v5855_v36, %v4208_v43  ;;  %v4218_v52 = vld [vmem:[#allocation2 + $0x86] sm:$0xff]  ;;  %v1474_v4 = vmul.f32 %v3855_v62, %v4208_v43  ;;  %5861 = vst [vmem:[#allocation59_spill] sm:$0xff] %v4240_v30  ;;  %v4242_v24 = vld [vmem:[#allocation2 + $0x93] sm:$0xff]  ;;  %v1162_v61 = vadd.f32 %v1154_v22, %v1098_v50 }
 0x248   : > { %5856 = vst [vmem:[#allocation6_spill] sm:$0xff] %v4218_v52  ;;  %v1282_v40 = vmul.f32 %v5857_v14, %v4218_v52  ;;  %v5860_v19 = vld [vmem:[#allocation9_spill] sm:$0xff]  ;;  %5862 = vst [vmem:[#allocation60_spill] sm:$0xff] %v4242_v24  ;;  %v4248_v29 = vld [vmem:[#allocation2 + $0x94] sm:$0xff]  ;;  %v1315_v9 = vmul.f32 %v3802_v41, %v4230_v13  ;;  %v1347_v57 = vmul.f32 %v3808_v55, %v4232_v7 }
 0x249   : > { %v4238_v59 = vmul.f32 %v5860_v19, %v4218_v52  ;;  %5863 = vst [vmem:[#allocation61_spill] sm:$0xff] %v4248_v29  ;;  %v4250_v43 = vld [vmem:[#allocation2 + $0x95] sm:$0xff]  ;;  %v1130_v52 = vadd.f32 %v1122_v38, %v1065_v10  ;;  %v1193_v20 = vadd.f32 %v1185_v26, %v1129_v37  ;;  %v1225_v47 = vadd.f32 %v1217_v42, %v1161_v0  ;;  %v4262_v39 = vld [vmem:[#allocation2 + $0xa0] sm:$0xff] }
 0x24a   : > { %5864 = vst [vmem:[#allocation62_spill] sm:$0xff] %v4250_v43  ;;  %v4256_v18 = vld [vmem:[#allocation2 + $0x96] sm:$0xff]  ;;  %v1379_v60 = vmul.f32 %v3817_v5, %v4240_v30  ;;  %v1411_v32 = vmul.f32 %v3832_v25, %v4242_v24  ;;  %5866 = vst [vmem:[#allocation64_spill] sm:$0xff] %v4262_v39  ;;  %v1226_v50 = vadd.f32 %v1218_v34, %v1162_v61  ;;  %v4268_v38 = vld [vmem:[#allocation2 + $0xa1] sm:$0xff] }
 0x24b   : > { %5865 = vst [vmem:[#allocation63_spill] sm:$0xff] %v4256_v18  ;;  %v1194_v10 = vadd.f32 %v1186_v21, %v1130_v52  ;;  %v1443_v41 = vmul.f32 %v3837_v27, %v4248_v29  ;;  %v1475_v55 = vmul.f32 %v3855_v62, %v4250_v43  ;;  %5867 = vst [vmem:[#allocation65_spill] sm:$0xff] %v4268_v38  ;;  %v1587_v42 = vld [vmem:[#allocation2 + $0xa2] sm:$0xff] }
 0x24c   : > { %v1257_v26 = vadd.f32 %v1249_v1, %v1193_v20  ;;  %v1289_v0 = vadd.f32 %v1281_v51, %v1225_v47  ;;  %v1507_v5 = vmul.f32 %v5860_v19, %v4256_v18  ;;  %v1538_v25 = vmul.f32 %v3935_v8, %v4230_v13  ;;  %v5868_v27 = vld [vmem:[#allocation17_spill] sm:$0xff]  ;;  %v5869_v1 = vld [vmem:[#allocation18_spill] sm:$0xff]  ;;  %v5920_v23 = vld [vmem:[#allocation40_spill] sm:$0xff] }
 0x24d   : > { %v1258_v22 = vadd.f32 %v1250_v3, %v1194_v10  ;;  %v1290_v37 = vadd.f32 %v1282_v40, %v1226_v50  ;;  %v1539_v61 = vmul.f32 %v3935_v8, %v4262_v39  ;;  %v1570_v21 = vmul.f32 %v5868_v27, %v4232_v7  ;;  %v1619_v34 = vld [vmem:[#allocation2 + $0xa3] sm:$0xff] }
 0x24e   : > { %v1322_v36 = vadd.f32 %v1314_v35, %v1257_v26  ;;  %v1354_v52 = vadd.f32 %v1346_v49, %v1289_v0  ;;  %v1571_v51 = vmul.f32 %v5868_v27, %v4268_v38  ;;  %v1602_v14 = vmul.f32 %v5869_v1, %v4240_v30  ;;  %v1651_v20 = vld [vmem:[#allocation2 + $0xa4] sm:$0xff] }
 0x24f   : > { %v1323_v47 = vadd.f32 %v1315_v9, %v1258_v22  ;;  %v1355_v13 = vadd.f32 %v1347_v57, %v1290_v37  ;;  %v1603_v3 = vmul.f32 %v5869_v1, %v1587_v42  ;;  %v1634_v40 = vmul.f32 %v3958_v33, %v4242_v24  ;;  %v4285_v10 = vld [vmem:[#allocation2 + $0xa5] sm:$0xff] }
 0x250   : > { %5870 = vst [vmem:[#allocation66_spill] sm:$0xff] %v4285_v10  ;;  %v1386_v50 = vadd.f32 %v1378_v12, %v1322_v36  ;;  %v1418_v7 = vadd.f32 %v1410_v56, %v1354_v52  ;;  %v1635_v35 = vmul.f32 %v3958_v33, %v1619_v34  ;;  %v5871_v49 = vld [vmem:[#allocation20_spill] sm:$0xff]  ;;  %v5873_v57 = vld [vmem:[#allocation21_spill] sm:$0xff]  ;;  %v5874_v56 = vld [vmem:[#allocation22_spill] sm:$0xff] }
 0x251   : > { %v1666_v26 = vmul.f32 %v5871_v49, %v4248_v29  ;;  %v4290_v0 = vld [vmem:[#allocation2 + $0xa6] sm:$0xff]  ;;  %v1387_v30 = vadd.f32 %v1379_v60, %v1323_v47  ;;  %v1419_v8 = vadd.f32 %v1411_v32, %v1355_v13  ;;  %v1667_v9 = vmul.f32 %v5871_v49, %v1651_v20  ;;  %v4302_v52 = vld [vmem:[%s5587_s5 + $0x1d] ss:$0 sm:$0xff]  ;;  %v4307_v13 = vld [vmem:[%s5587_s5 + $0x1e] ss:$0 sm:$0xff] }
 0x252   : > { %5872 = vst [vmem:[#allocation20_spill] sm:$0xff] %v4290_v0  ;;  %v1698_v22 = vmul.f32 %v5873_v57, %v4250_v43  ;;  %v1450_v37 = vadd.f32 %v1442_v6, %v1386_v50  ;;  %v1482_v24 = vadd.f32 %v1474_v4, %v1418_v7  ;;  %v1699_v12 = vmul.f32 %v5873_v57, %v4285_v10  ;;  %v4316_v6 = vld [vmem:[%s5587_s5 + $0x1f] ss:$0 sm:$0xff]  ;;  %v4321_v47 = vld [vmem:[%s5587_s5 + $0x20] ss:$0 sm:$0xff] }
 0x253   : > { %v1730_v36 = vmul.f32 %v5874_v56, %v4256_v18  ;;  %5875 = vst [vmem:[#allocation21_spill] sm:$0xff] %v4302_v52  ;;  %5876 = vst [vmem:[#allocation22_spill] sm:$0xff] %v4307_v13  ;;  %v1451_v60 = vadd.f32 %v1443_v41, %v1387_v30  ;;  %v1483_v32 = vadd.f32 %v1475_v55, %v1419_v8  ;;  %v4330_v55 = vld [vmem:[%s5587_s5 + $0x21] ss:$0 sm:$0xff] }
 0x254   : > { %v1731_v7 = vmul.f32 %v5874_v56, %v4290_v0  ;;  %v1762_v4 = vmul.f32 %v3890_v44, %v4262_v39  ;;  %5877 = vst [vmem:[#allocation67_spill] sm:$0xff] %v4316_v6  ;;  %5878 = vst [vmem:[#allocation68_spill] sm:$0xff] %v4321_v47  ;;  %v1514_v50 = vadd.f32 %v4238_v59, %v1450_v37  ;;  %v4335_v39 = vld [vmem:[%s5587_s5 + $0x22] ss:$0 sm:$0xff] }
 0x255   : > { %v1546_v30 = vadd.f32 %v1538_v25, %v1482_v24  ;;  %v1794_v8 = vmul.f32 %v4302_v52, %v4268_v38  ;;  %v1826_v41 = vmul.f32 %v4307_v13, %v1587_v42  ;;  %5879 = vst [vmem:[#allocation69_spill] sm:$0xff] %v4330_v55  ;;  %5880 = vst [vmem:[#allocation70_spill] sm:$0xff] %v4335_v39 }
 0x256   : > { %v1515_v18 = vadd.f32 %v1507_v5, %v1451_v60  ;;  %v1547_v43 = vadd.f32 %v1539_v61, %v1483_v32  ;;  %v4338_v59 = vmul.f32 %v4316_v6, %v1619_v34  ;;  %v4341_v24 = vmul.f32 %v4321_v47, %v1651_v20  ;;  %v5885_v61 = vld [vmem:[#allocation38_spill] sm:$0xff]  ;;  %v5887_v32 = vld [vmem:[#allocation23_spill] sm:$0xff] }
 0x257   : > { %v1578_v25 = vadd.f32 %v1570_v21, %v1514_v50  ;;  %v1610_v42 = vadd.f32 %v1602_v14, %v1546_v30  ;;  %v4345_v37 = vmul.f32 %v4330_v55, %v4285_v10  ;;  %v4349_v38 = vmul.f32 %v4335_v39, %v4290_v0  ;;  %v5886_v21 = vld [vmem:[#allocation24_spill] sm:$0xff] }
 0x258   : > { %5881 = vst [vmem:[#allocation71_spill] sm:$0xff] %v4338_v59  ;;  %5882 = vst [vmem:[#allocation72_spill] sm:$0xff] %v4341_v24  ;;  %v1579_v29 = vadd.f32 %v1571_v51, %v1515_v18  ;;  %v1611_v19 = vadd.f32 %v1603_v3, %v1547_v43  ;;  %v1351_v5 = vadd.f32 %v4073_v11, %v4122_v46  ;;  %v5888_v24 = vld [vmem:[#allocation25_spill] sm:$0xff]  ;;  %v5889_v43 = vld [vmem:[#allocation26_spill] sm:$0xff] }
 0x259   : > { %5883 = vst [vmem:[#allocation73_spill] sm:$0xff] %v4345_v37  ;;  %5884 = vst [vmem:[#allocation74_spill] sm:$0xff] %v4349_v38  ;;  %v1383_v34 = vadd.f32 %v5885_v61, %v4124_v48  ;;  %v1642_v20 = vadd.f32 %v1634_v40, %v1578_v25  ;;  %v1674_v60 = vadd.f32 %v1666_v26, %v1610_v42  ;;  %v4366_v11 = vld [vmem:[%s5587_s5 + $0x23] ss:$0 sm:$0xff]  ;;  %v5891_v3 = vld [vmem:[#allocation31_spill] sm:$0xff] }
 0x25a   : > { %v1788_v14 = vmul.f32 %v4302_v52, %v5886_v21  ;;  %v1820_v50 = vmul.f32 %v4307_v13, %v5887_v32  ;;  %v1643_v30 = vadd.f32 %v1635_v35, %v1579_v29  ;;  %v1675_v37 = vadd.f32 %v1667_v9, %v1611_v19  ;;  %5890 = vst [vmem:[#allocation38_spill] sm:$0xff] %v4366_v11  ;;  %v4373_v29 = vld [vmem:[%s5587_s5 + $0x24] ss:$0 sm:$0xff]  ;;  %v4378_v19 = vld [vmem:[%s5587_s5 + $0x25] ss:$0 sm:$0xff]  ;;  %v4408_v21 = vld [vmem:[#allocation2 + $0x55] sm:$0xff] }
 0x25b   : > { %v1852_v18 = vmul.f32 %v4316_v6, %v5888_v24  ;;  %v1884_v51 = vmul.f32 %v4321_v47, %v5889_v43  ;;  %v1706_v46 = vadd.f32 %v1698_v22, %v1642_v20  ;;  %v1738_v48 = vadd.f32 %v1730_v36, %v1674_v60  ;;  %5892 = vst [vmem:[#allocation24_spill] sm:$0xff] %v4373_v29  ;;  %v4383_v35 = vld [vmem:[%s5587_s5 + $0x26] ss:$0 sm:$0xff]  ;;  %v5896_v36 = vld [vmem:[#allocation27_spill] sm:$0xff]  ;;  %v4394_v42 = vld [vmem:[%s5587_s5 + $0x27] ss:$0 sm:$0xff] }
 0x25c   : > { %v1796_v40 = vadd.f32 %v1788_v14, %v5891_v3  ;;  %v1828_v26 = vadd.f32 %v1820_v50, %v4090_v54  ;;  %5893 = vst [vmem:[#allocation23_spill] sm:$0xff] %v4378_v19  ;;  %5894 = vst [vmem:[#allocation25_spill] sm:$0xff] %v4383_v35  ;;  %v1707_v9 = vadd.f32 %v1699_v12, %v1643_v30  ;;  %v5897_v24 = vld [vmem:[#allocation28_spill] sm:$0xff]  ;;  %v4399_v61 = vld [vmem:[%s5587_s5 + $0x28] ss:$0 sm:$0xff] }
 0x25d   : > { %v4385_v22 = vadd.f32 %v1731_v7, %v1675_v37  ;;  %v1916_v54 = vmul.f32 %v4330_v55, %v5896_v36  ;;  %v1948_v25 = vmul.f32 %v4335_v39, %v5897_v24  ;;  %5898 = vst [vmem:[#allocation31_spill] sm:$0xff] %v4394_v42  ;;  %5899 = vst [vmem:[#allocation27_spill] sm:$0xff] %v4399_v61  ;;  %v4404_v12 = vld [vmem:[%s5587_s5 + $0x29] ss:$0 sm:$0xff]  ;;  %v4410_v14 = vld [vmem:[#allocation2 + $0x56] sm:$0xff] }
 0x25e   : > { %5900 = vst [vmem:[#allocation28_spill] sm:$0xff] %v4404_v12  ;;  %v1770_v7 = vadd.f32 %v1762_v4, %v1706_v46  ;;  %v4406_v37 = vadd.f32 %v1794_v8, %v1738_v48  ;;  %v1860_v20 = vadd.f32 %v1852_v18, %v1796_v40  ;;  %v1892_v60 = vadd.f32 %v1884_v51, %v1828_v26  ;;  %v4415_v32 = vld [vmem:[%s5587_s5 + $0x2a] ss:$0 sm:$0xff]  ;;  %v5905_v50 = vld [vmem:[#allocation14_spill] sm:$0xff]  ;;  %v5908_v18 = vld [vmem:[#allocation32_spill] sm:$0xff] }
 0x25f   : > { %5895 = vst [vmem:[#allocation26_spill] sm:$0xff] %v4385_v22  ;;  %5902 = vst [vmem:[#allocation76_spill] sm:$0xff] %v4408_v21  ;;  %v4418_v30 = vadd.f32 %v5905_v50, %v1707_v9  ;;  %v1980_v3 = vmul.f32 %v4366_v11, %v4023_v17  ;;  %v5907_v4 = vld [vmem:[#allocation33_spill] sm:$0xff]  ;;  %v2044_v51 = vmul.f32 %v4378_v19, %v5908_v18 }
 0x260   : > { %5901 = vst [vmem:[#allocation75_spill] sm:$0xff] %v4406_v37  ;;  %5903 = vst [vmem:[#allocation77_spill] sm:$0xff] %v4410_v14  ;;  %v2012_v8 = vmul.f32 %v4373_v29, %v5907_v4  ;;  %v4429_v46 = vld [vmem:[%s5587_s5 + $0x2b] ss:$0 sm:$0xff]  ;;  %v4434_v48 = vld [vmem:[%s5587_s5 + $0x2c] ss:$0 sm:$0xff]  ;;  %v4441_v26 = vadd.f32 %v1826_v41, %v1770_v7  ;;  %v1924_v9 = vadd.f32 %v1916_v54, %v1860_v20 }
 0x261   : > { %5904 = vst [vmem:[#allocation78_spill] sm:$0xff] %v4415_v32  ;;  %5906 = vst [vmem:[#allocation14_spill] sm:$0xff] %v4418_v30  ;;  %v4439_v40 = vld [vmem:[%s5587_s5 + $0x2d] ss:$0 sm:$0xff]  ;;  %v1956_v50 = vadd.f32 %v1948_v25, %v1892_v60  ;;  %v5913_v30 = vld [vmem:[#allocation34_spill] sm:$0xff]  ;;  %v2140_v7 = vmul.f32 %v4399_v61, %v4408_v21  ;;  %v2172_v20 = vmul.f32 %v4404_v12, %v4410_v14 }
 0x262   : > { %5909 = vst [vmem:[#allocation33_spill] sm:$0xff] %v4429_v46  ;;  %5910 = vst [vmem:[#allocation32_spill] sm:$0xff] %v4434_v48  ;;  %v2076_v22 = vmul.f32 %v4383_v35, %v5913_v30  ;;  %v4448_v38 = vld [vmem:[%s5587_s5 + $0x2e] ss:$0 sm:$0xff]  ;;  %v4453_v59 = vld [vmem:[%s5587_s5 + $0x2f] ss:$0 sm:$0xff]  ;;  %v2204_v60 = vmul.f32 %v4415_v32, %v4092_v63  ;;  %v2236_v0 = vmul.f32 %v4429_v46, %v4098_v31 }
 0x263   : > { %5911 = vst [vmem:[#allocation79_spill] sm:$0xff] %v4439_v40  ;;  %5912 = vst [vmem:[#allocation80_spill] sm:$0xff] %v4441_v26  ;;  %v4458_v41 = vld [vmem:[%s5587_s5 + $0x30] ss:$0 sm:$0xff]  ;;  %v5917_v54 = vld [vmem:[#allocation35_spill] sm:$0xff]  ;;  %v1988_v26 = vadd.f32 %v1980_v3, %v1924_v9  ;;  %v2020_v37 = vadd.f32 %v2012_v8, %v1956_v50  ;;  %v2268_v10 = vmul.f32 %v4434_v48, %v4104_v28 }
 0x264   : > { %5914 = vst [vmem:[#allocation34_spill] sm:$0xff] %v4448_v38  ;;  %5915 = vst [vmem:[#allocation81_spill] sm:$0xff] %v4453_v59  ;;  %v2108_v25 = vmul.f32 %v4394_v42, %v5917_v54  ;;  %v2300_v62 = vmul.f32 %v4439_v40, %v4106_v45  ;;  %v2332_v33 = vmul.f32 %v4448_v38, %v4113_v58  ;;  %v5918_v9 = vld [vmem:[#allocation39_spill] sm:$0xff] }
 0x265   : > { %5916 = vst [vmem:[#allocation82_spill] sm:$0xff] %v4458_v41  ;;  %v2364_v1 = vmul.f32 %v4453_v59, %v4115_v15  ;;  %v2396_v27 = vmul.f32 %v4458_v41, %v4117_v2  ;;  %v2052_v3 = vadd.f32 %v2044_v51, %v1988_v26  ;;  %v2084_v8 = vadd.f32 %v2076_v22, %v2020_v37 }
 0x266   : > { %v4481_v50 = vadd.f32 %v5918_v9, %v1351_v5  ;;  %v4484_v53 = vadd.f32 %v5920_v23, %v1383_v34  ;;  %v1661_v40 = vmul.f32 %v5871_v49, %v5889_v43  ;;  %v1693_v38 = vmul.f32 %v5873_v57, %v5896_v36  ;;  %v5922_v43 = vld [vmem:[#allocation41_spill] sm:$0xff] }
 0x267   : > { %v1725_v59 = vmul.f32 %v5874_v56, %v5897_v24  ;;  %v1757_v41 = vmul.f32 %v3890_v44, %v4023_v17  ;;  %v2116_v51 = vadd.f32 %v2108_v25, %v2052_v3  ;;  %v2148_v22 = vadd.f32 %v2140_v7, %v2084_v8 }
 0x268   : > { %5919 = vst [vmem:[#allocation35_spill] sm:$0xff] %v4481_v50  ;;  %5921 = vst [vmem:[#allocation39_spill] sm:$0xff] %v4484_v53  ;;  %v1789_v5 = vmul.f32 %v4302_v52, %v5907_v4  ;;  %v1821_v23 = vmul.f32 %v4307_v13, %v5908_v18  ;;  %v1669_v34 = vadd.f32 %v1661_v40, %v4094_v16  ;;  %v5924_v53 = vld [vmem:[#allocation45_spill] sm:$0xff] }
 0x269   : > { %v1701_v37 = vadd.f32 %v1693_v38, %v5922_v43  ;;  %v1853_v36 = vmul.f32 %v4316_v6, %v5913_v30  ;;  %v1885_v24 = vmul.f32 %v4321_v47, %v5917_v54  ;;  %v2180_v26 = vadd.f32 %v2172_v20, %v2116_v51 }
 0x26a   : > { %v2212_v17 = vadd.f32 %v2204_v60, %v2148_v22  ;;  %v1917_v25 = vmul.f32 %v4330_v55, %v4408_v21  ;;  %v1949_v7 = vmul.f32 %v4335_v39, %v4410_v14  ;;  %v1733_v3 = vadd.f32 %v1725_v59, %v1669_v34 }
 0x26b   : > { %v1765_v8 = vadd.f32 %v1757_v41, %v1701_v37  ;;  %v1981_v16 = vmul.f32 %v4366_v11, %v4092_v63  ;;  %v2013_v38 = vmul.f32 %v4373_v29, %v4098_v31  ;;  %v2244_v40 = vadd.f32 %v2236_v0, %v2180_v26  ;;  %v5934_v29 = vld [vmem:[#allocation17_spill] sm:$0xff] }
 0x26c   : > { %v2276_v9 = vadd.f32 %v2268_v10, %v2212_v17  ;;  %v2045_v20 = vmul.f32 %v4378_v19, %v4104_v28  ;;  %v2077_v60 = vmul.f32 %v4383_v35, %v4106_v45  ;;  %v1797_v51 = vadd.f32 %v1789_v5, %v1733_v3  ;;  %v5923_v10 = vld [vmem:[#allocation44_spill] sm:$0xff]  ;;  %v5930_v19 = vld [vmem:[#allocation5_spill] sm:$0xff] }
 0x26d   : > { %v1829_v22 = vadd.f32 %v1821_v23, %v1765_v8  ;;  %v2109_v59 = vmul.f32 %v4394_v42, %v4113_v58  ;;  %v2141_v41 = vmul.f32 %v4399_v61, %v4115_v15  ;;  %v2308_v34 = vadd.f32 %v2300_v62, %v2244_v40  ;;  %v5925_v23 = vld [vmem:[#allocation48_spill] sm:$0xff]  ;;  %v5926_v42 = vld [vmem:[#allocation49_spill] sm:$0xff]  ;;  %v5927_v61 = vld [vmem:[#allocation79_spill] sm:$0xff] }
 0x26e   : > { %v2340_v43 = vadd.f32 %v2332_v33, %v2276_v9  ;;  %v2173_v0 = vmul.f32 %v4404_v12, %v4117_v2  ;;  %v2205_v37 = vmul.f32 %v4415_v32, %v5923_v10  ;;  %v1861_v26 = vadd.f32 %v1853_v36, %v1797_v51  ;;  %v5928_v33 = vld [vmem:[#allocation50_spill] sm:$0xff]  ;;  %v5931_v32 = vld [vmem:[#allocation81_spill] sm:$0xff] }
 0x26f   : > { %v1893_v17 = vadd.f32 %v1885_v24, %v1829_v22  ;;  %v2237_v5 = vmul.f32 %v4429_v46, %v5924_v53  ;;  %v2269_v3 = vmul.f32 %v4434_v48, %v5925_v23  ;;  %v2372_v8 = vadd.f32 %v2364_v1, %v2308_v34  ;;  %v5929_v40 = vld [vmem:[#allocation34_spill] sm:$0xff]  ;;  %v5932_v24 = vld [vmem:[#allocation4_spill] sm:$0xff]  ;;  %v5936_v34 = vld [vmem:[#allocation19_spill] sm:$0xff] }
 0x270   : > { %v2404_v50 = vadd.f32 %v2396_v27, %v2340_v43  ;;  %v2301_v62 = vmul.f32 %v5927_v61, %v5926_v42  ;;  %v2333_v9 = vmul.f32 %v5929_v40, %v5928_v33  ;;  %v1925_v12 = vadd.f32 %v1917_v25, %v1861_v26  ;;  %v5933_v51 = vld [vmem:[#allocation82_spill] sm:$0xff] }
 0x271   : > { %v1957_v35 = vadd.f32 %v1949_v7, %v1893_v17  ;;  %v2365_v36 = vmul.f32 %v5931_v32, %v5930_v19  ;;  %v2397_v22 = vmul.f32 %v5933_v51, %v5932_v24  ;;  %v1566_v48 = vmul.f32 %v5934_v29, %v5907_v4  ;;  %v5935_v27 = vld [vmem:[#allocation18_spill] sm:$0xff]  ;;  %v5938_v17 = vld [vmem:[#allocation47_spill] sm:$0xff] }
 0x272   : > { %v2412_v46 = vadd.f32 %v2404_v50, %v2372_v8  ;;  %v1598_v1 = vmul.f32 %v5935_v27, %v5908_v18  ;;  %v1630_v43 = vmul.f32 %v5936_v34, %v5913_v30  ;;  %v1989_v61 = vadd.f32 %v1981_v16, %v1925_v12  ;;  %v5937_v50 = vld [vmem:[#allocation46_spill] sm:$0xff] }
 0x273   : > { %v2021_v40 = vadd.f32 %v2013_v38, %v1957_v35  ;;  %v1662_v25 = vmul.f32 %v5871_v49, %v5917_v54  ;;  %v1694_v7 = vmul.f32 %v5873_v57, %v4408_v21  ;;  %v1574_v26 = vadd.f32 %v1566_v48, %v5937_v50 }
 0x274   : > { %2420 = vst.msk [vmem:[#allocation3] sm:$0xff] %vm662_vm1, %v2412_v46  ;;  %v1606_v4 = vadd.f32 %v1598_v1, %v5938_v17  ;;  %v1726_v18 = vmul.f32 %v5874_v56, %v4410_v14  ;;  %v1758_v30 = vmul.f32 %v3890_v44, %v4092_v63  ;;  %v2053_v12 = vadd.f32 %v2045_v20, %v1989_v61  ;;  %v4572_v17 = vld [vmem:[%s5588_s6] ss:$0 sm:$0xff] }
 0x275   : > { %v2085_v35 = vadd.f32 %v2077_v60, %v2021_v40  ;;  %v1790_v54 = vmul.f32 %v4302_v52, %v4098_v31  ;;  %v1822_v16 = vmul.f32 %v4307_v13, %v4104_v28  ;;  %v1638_v38 = vadd.f32 %v1630_v43, %v1574_v26  ;;  %5940 = vst [vmem:[#allocation40_spill] sm:$0xff] %v4572_v17 }
 0x276   : > { %v1670_v46 = vadd.f32 %v1662_v25, %v1606_v4  ;;  %v1854_v48 = vmul.f32 %v4316_v6, %v4106_v45  ;;  %v1886_v8 = vmul.f32 %v4321_v47, %v4113_v58  ;;  %v2117_v1 = vadd.f32 %v2109_v59, %v2053_v12  ;;  %v5939_v25 = vld [vmem:[#allocation24_spill] sm:$0xff]  ;;  %v5941_v4 = vld [vmem:[#allocation23_spill] sm:$0xff] }
 0x277   : > { %v2149_v50 = vadd.f32 %v2141_v41, %v2085_v35  ;;  %v1918_v61 = vmul.f32 %v4330_v55, %v4115_v15  ;;  %v1950_v20 = vmul.f32 %v4335_v39, %v4117_v2  ;;  %v1702_v60 = vadd.f32 %v1694_v7, %v1638_v38  ;;  %v5942_v35 = vld [vmem:[#allocation25_spill] sm:$0xff] }
 0x278   : > { %v1734_v40 = vadd.f32 %v1726_v18, %v1670_v46  ;;  %v1982_v43 = vmul.f32 %v4366_v11, %v5923_v10  ;;  %v2014_v26 = vmul.f32 %v5939_v25, %v5924_v53  ;;  %v2181_v59 = vadd.f32 %v2173_v0, %v2117_v1  ;;  %v5943_v46 = vld [vmem:[#allocation31_spill] sm:$0xff]  ;;  %v5945_v0 = vld [vmem:[#allocation28_spill] sm:$0xff] }
 0x279   : > { %v2213_v41 = vadd.f32 %v2205_v37, %v2149_v50  ;;  %v2046_v12 = vmul.f32 %v5941_v4, %v5925_v23  ;;  %v2078_v7 = vmul.f32 %v5942_v35, %v5926_v42  ;;  %v1766_v18 = vadd.f32 %v1758_v30, %v1702_v60  ;;  %v5944_v25 = vld [vmem:[#allocation27_spill] sm:$0xff]  ;;  %v5946_v1 = vld [vmem:[#allocation52_spill] sm:$0xff]  ;;  %v5947_v50 = vld [vmem:[#allocation78_spill] sm:$0xff] }
 0x27a   : > { %v1798_v38 = vadd.f32 %v1790_v54, %v1734_v40  ;;  %v2110_v11 = vmul.f32 %v5943_v46, %v5928_v33  ;;  %v2142_v39 = vmul.f32 %v5944_v25, %v5930_v19  ;;  %v2245_v47 = vadd.f32 %v2237_v5, %v2181_v59  ;;  %v5949_v60 = vld [vmem:[#allocation53_spill] sm:$0xff]  ;;  %v5951_v25 = vld [vmem:[#allocation54_spill] sm:$0xff]  ;;  %v5952_v19 = vld [vmem:[#allocation32_spill] sm:$0xff] }
 0x27b   : > { %v2428_v55 = vld [vmem:[#allocation3] sm:$0xff]  ;;  %v2277_v6 = vadd.f32 %v2269_v3, %v2213_v41  ;;  %v2174_v37 = vmul.f32 %v5945_v0, %v5932_v24  ;;  %v2206_v4 = vmul.f32 %v5947_v50, %v5946_v1  ;;  %v1830_v30 = vadd.f32 %v1822_v16, %v1766_v18  ;;  %v5950_v40 = vld [vmem:[#allocation33_spill] sm:$0xff]  ;;  %v5953_v3 = vld [vmem:[#allocation55_spill] sm:$0xff] }
 0x27c   : > { %v4587_v13 = vadd.f32 %v4572_v17, %v2428_v55  ;;  %v1862_v54 = vadd.f32 %v1854_v48, %v1798_v38  ;;  %v2238_v46 = vmul.f32 %v5950_v40, %v5949_v60  ;;  %v2309_v35 = vadd.f32 %v2301_v62, %v2245_v47  ;;  %v5954_v59 = vld [vmem:[#allocation79_spill] sm:$0xff]  ;;  %v5955_v55 = vld [vmem:[#allocation56_spill] sm:$0xff]  ;;  %v5956_v17 = vld [vmem:[#allocation34_spill] sm:$0xff] }
 0x27d   : > { %v2341_v33 = vadd.f32 %v2333_v9, %v2277_v6  ;;  %v2270_v5 = vmul.f32 %v5952_v19, %v5951_v25  ;;  %v2302_v41 = vmul.f32 %v5954_v59, %v5953_v3  ;;  %v1894_v50 = vadd.f32 %v1886_v8, %v1830_v30  ;;  %v5957_v38 = vld [vmem:[#allocation57_spill] sm:$0xff]  ;;  %v5958_v47 = vld [vmem:[#allocation6_spill] sm:$0xff]  ;;  %v5959_v19 = vld [vmem:[#allocation8_spill] sm:$0xff] }
 0x27e   : > { %5948 = vst [vmem:[#allocation41_spill] sm:$0xff] %v4587_v13  ;;  %v2453_v0 = vsel %vm662_vm1, %v4587_v13, 0.0  ;;  %v1926_v1 = vadd.f32 %v1918_v61, %v1862_v54  ;;  %v2334_v16 = vmul.f32 %v5956_v17, %v5955_v55  ;;  %v2373_v48 = vadd.f32 %v2365_v36, %v2309_v35  ;;  %v5960_v8 = vld [vmem:[#allocation9_spill] sm:$0xff] }
 0x27f   : > { %2454 = vadd.xlane.f32.xlu0 %v2453_v0  ;;  %v2405_v18 = vadd.f32 %v2397_v22, %v2341_v33  ;;  %v2366_v6 = vmul.f32 %v5931_v32, %v5957_v38  ;;  %v4603_v62 = vmul.f32 %v5933_v51, %v5958_v47  ;;  %v1958_v9 = vadd.f32 %v1950_v20, %v1894_v50  ;;  %v5961_v0 = vld [vmem:[#allocation16_spill] sm:$0xff]  ;;  %v5962_v20 = vld [vmem:[#allocation35_spill] sm:$0xff] }
 0x280   : > { %v1990_v59 = vadd.f32 %v1982_v43, %v1926_v1  ;;  %v1471_v13 = vmul.f32 %v5959_v19, %v4408_v21  ;;  %v1503_v61 = vmul.f32 %v5960_v8, %v4410_v14  ;;  %v1535_v36 = vmul.f32 %v5961_v0, %v4092_v63  ;;  %v5963_v1 = vld [vmem:[#allocation39_spill] sm:$0xff] }
 0x281   : > { %v2413_v30 = vadd.f32 %v2405_v18, %v2373_v48  ;;  %v1567_v33 = vmul.f32 %v5934_v29, %v4098_v31  ;;  %v1599_v22 = vmul.f32 %v5935_v27, %v4104_v28  ;;  %v2022_v35 = vadd.f32 %v2014_v26, %v1958_v9  ;;  %v5968_v18 = vld [vmem:[#allocation5_spill] sm:$0xff] }
 0x282   : > { %v2054_v54 = vadd.f32 %v2046_v12, %v1990_v59  ;;  %v1479_v43 = vadd.f32 %v1471_v13, %v5962_v20  ;;  %v1511_v50 = vadd.f32 %v1503_v61, %v5963_v1  ;;  %v1631_v19 = vmul.f32 %v5936_v34, %v4106_v45  ;;  %v5964_v45 = vld [vmem:[#allocation22_spill] sm:$0xff]  ;;  %v5969_v9 = vld [vmem:[#allocation69_spill] sm:$0xff] }
 0x283   : > { %2421 = vst.msk [vmem:[#allocation3 + $0x8] sm:$0xff] %vm662_vm1, %v2413_v30  ;;  %v1663_v63 = vmul.f32 %v5871_v49, %v4113_v58  ;;  %v1695_v31 = vmul.f32 %v5873_v57, %v4115_v15  ;;  %v1727_v28 = vmul.f32 %v5874_v56, %v4117_v2  ;;  %v2086_v29 = vadd.f32 %v2078_v7, %v2022_v35  ;;  %v5965_v58 = vld [vmem:[#allocation67_spill] sm:$0xff]  ;;  %v5966_v56 = vld [vmem:[#allocation50_spill] sm:$0xff]  ;;  %v5975_v35 = vld [vmem:[#allocation25_spill] sm:$0xff] }
 0x284   : > { %v2118_v27 = vadd.f32 %v2110_v11, %v2054_v54  ;;  %v1543_v26 = vadd.f32 %v1535_v36, %v1479_v43  ;;  %v1575_v13 = vadd.f32 %v1567_v33, %v1511_v50  ;;  %v1759_v12 = vmul.f32 %v3890_v44, %v5923_v10  ;;  %v5967_v11 = vld [vmem:[#allocation68_spill] sm:$0xff]  ;;  %v5970_v44 = vld [vmem:[#allocation70_spill] sm:$0xff]  ;;  %v5974_v33 = vld [vmem:[#allocation23_spill] sm:$0xff] }
 0x285   : > { %v1791_v59 = vmul.f32 %v4302_v52, %v5924_v53  ;;  %v1823_v34 = vmul.f32 %v5964_v45, %v5925_v23  ;;  %v1855_v49 = vmul.f32 %v5965_v58, %v5926_v42  ;;  %v2150_v15 = vadd.f32 %v2142_v39, %v2086_v29  ;;  %v5971_v53 = vld [vmem:[#allocation52_spill] sm:$0xff]  ;;  %v5972_v61 = vld [vmem:[#allocation38_spill] sm:$0xff]  ;;  %v5981_v29 = vld [vmem:[#allocation7_spill] sm:$0xff] }
 0x286   : > { %v2182_v57 = vadd.f32 %v2174_v37, %v2118_v27  ;;  %v1607_v48 = vadd.f32 %v1599_v22, %v1543_v26  ;;  %v1639_v2 = vadd.f32 %v1631_v19, %v1575_v13  ;;  %v1887_v7 = vmul.f32 %v5967_v11, %v5966_v56  ;;  %v5973_v39 = vld [vmem:[#allocation24_spill] sm:$0xff]  ;;  %v5982_v27 = vld [vmem:[#allocation78_spill] sm:$0xff]  ;;  %v5987_v56 = vld [vmem:[#allocation79_spill] sm:$0xff] }
 0x287   : > { %v1919_v8 = vmul.f32 %v5969_v9, %v5968_v18  ;;  %v1951_v10 = vmul.f32 %v5970_v44, %v5932_v24  ;;  %v1983_v30 = vmul.f32 %v5972_v61, %v5971_v53  ;;  %v2214_v23 = vadd.f32 %v2206_v4, %v2150_v15  ;;  %v5976_v24 = vld [vmem:[#allocation31_spill] sm:$0xff]  ;;  %v5977_v19 = vld [vmem:[#allocation40_spill] sm:$0xff]  ;;  %v5983_v15 = vld [vmem:[#allocation58_spill] sm:$0xff] }
 0x288   : > { %v2246_v0 = vadd.f32 %v2238_v46, %v2182_v57  ;;  %v1671_v36 = vadd.f32 %v1663_v63, %v1607_v48  ;;  %v1703_v42 = vadd.f32 %v1695_v31, %v1639_v2  ;;  %v2015_v37 = vmul.f32 %v5973_v39, %v5949_v60  ;;  %v5979_v60 = vld [vmem:[#allocation27_spill] sm:$0xff]  ;;  %v5980_v31 = vld [vmem:[#allocation28_spill] sm:$0xff] }
 0x289   : > { %v4646_v22 = vmul.f32 %v5974_v33, %v5951_v25  ;;  %v4650_v54 = vmul.f32 %v5975_v35, %v5953_v3  ;;  %v4654_v20 = vmul.f32 %v5976_v24, %v5955_v55  ;;  %v2278_v4 = vadd.f32 %v2270_v5, %v2214_v23  ;;  %v878_v13 = vld [vmem:[#allocation2 + $0x41] sm:$0xff]  ;;  %v5984_v57 = vld [vmem:[#allocation59_spill] sm:$0xff] }
 0x28a   : > { %v2429_v43 = vld [vmem:[#allocation3 + $0x8] sm:$0xff]  ;;  %v2310_v46 = vadd.f32 %v2302_v41, %v2246_v0  ;;  %v1735_v1 = vadd.f32 %v1727_v28, %v1671_v36  ;;  %v1767_v50 = vadd.f32 %v1759_v12, %v1703_v42  ;;  %v4661_v25 = vmul.f32 %v5979_v60, %v5957_v38  ;;  %v5985_v48 = vld [vmem:[#allocation32_spill] sm:$0xff] }
 0x28b   : > { %v4657_v63 = vadd.f32 %v5977_v19, %v2429_v43  ;;  %v4665_v3 = vmul.f32 %v5980_v31, %v5958_v47  ;;  %v4669_v55 = vmul.f32 %v5982_v27, %v5981_v29  ;;  %v2342_v26 = vadd.f32 %v2334_v16, %v2278_v4  ;;  %v5986_v2 = vld [vmem:[#allocation60_spill] sm:$0xff]  ;;  %v5988_v23 = vld [vmem:[#allocation61_spill] sm:$0xff]  ;;  %v1071_v43 = vld [vmem:[#allocation2 + $0x50] sm:$0xff] }
 0x28c   : > { %v2374_v5 = vadd.f32 %v2366_v6, %v2310_v46  ;;  %v1799_v41 = vadd.f32 %v1791_v59, %v1735_v1  ;;  %v1831_v28 = vadd.f32 %v1823_v34, %v1767_v50  ;;  %v4675_v38 = vmul.f32 %v5950_v40, %v5983_v15  ;;  %v942_v16 = vld [vmem:[#allocation2 + $0x43] sm:$0xff]  ;;  %v5989_v4 = vld [vmem:[#allocation62_spill] sm:$0xff]  ;;  %v5990_v1 = vld [vmem:[#allocation63_spill] sm:$0xff] }
 0x28d   : > { %5978 = vst [vmem:[#allocation44_spill] sm:$0xff] %v4657_v63  ;;  %v2456_v12 = vsel %vm662_vm1, %v4657_v63, 0.0  ;;  %v4679_v47 = vmul.f32 %v5985_v48, %v5984_v57  ;;  %v4683_v18 = vmul.f32 %v5987_v56, %v5986_v2  ;;  %v974_v6 = vld [vmem:[#allocation2 + $0x44] sm:$0xff]  ;;  %v2406_v59 = vadd.f32 %v4603_v62, %v2342_v26  ;;  %v4701_v62 = vld [vmem:[%s5587_s5 + $0x1] ss:$0 sm:$0xff]  ;;  %v5992_v29 = vld [vmem:[#allocation30_spill] sm:$0xff] }
 0x28e   : > { %2457 = vadd.xlane.f32.xlu1 %v2456_v12  ;;  %v1863_v34 = vadd.f32 %v1855_v49, %v1799_v41  ;;  %v1895_v53 = vadd.f32 %v1887_v7, %v1831_v28  ;;  %v4688_v0 = vmul.f32 %v5956_v17, %v5988_v23  ;;  %v1006_v36 = vld [vmem:[#allocation2 + $0x45] sm:$0xff]  ;;  %v4692_v46 = vmul.f32 %v5931_v32, %v5989_v4  ;;  %v4706_v41 = vld [vmem:[#allocation2 + $0x51] sm:$0xff]  ;;  %v4711_v57 = vld [vmem:[%s5587_s5 + $0x3] ss:$0 sm:$0xff] }
 0x28f   : > { %v1038_v42 = vld [vmem:[#allocation2 + $0x46] sm:$0xff]  ;;  %v4696_v50 = vmul.f32 %v5933_v51, %v5990_v1  ;;  %v894_v49 = vmul.f32 %v4701_v62, %v878_v13  ;;  %v2414_v28 = vadd.f32 %v2406_v59, %v2374_v5  ;;  %v958_v2 = vmul.f32 %v4711_v57, %v942_v16  ;;  %v1135_v23 = vld [vmem:[#allocation2 + $0x52] sm:$0xff]  ;;  %v4721_v13 = vld [vmem:[%s5587_s5 + $0x4] ss:$0 sm:$0xff] }
 0x290   : > { %v5991_v7 = vld [vmem:[#allocation29_spill] sm:$0xff]  ;;  %v1927_v12 = vadd.f32 %v1919_v8, %v1863_v34  ;;  %v1959_v15 = vadd.f32 %v1951_v10, %v1895_v53  ;;  %v4714_v4 = vld [vmem:[#allocation2 + $0x53] sm:$0xff]  ;;  %v990_v8 = vmul.f32 %v4721_v13, %v974_v6  ;;  %v4727_v10 = vld [vmem:[%s5587_s5 + $0x5] ss:$0 sm:$0xff] }
 0x291   : > { %v934_v26 = vadd.f32 %v5992_v29, %v5991_v7  ;;  %v4716_v1 = vld [vmem:[#allocation2 + $0x54] sm:$0xff]  ;;  %5993 = vst [vmem:[#allocation45_spill] sm:$0xff] %v4727_v10  ;;  %v1022_v5 = vmul.f32 %v4727_v10, %v1006_v36  ;;  %v4733_v16 = vld [vmem:[%s5587_s5 + $0x6] ss:$0 sm:$0xff]  ;;  %v4739_v34 = vld [vmem:[%s5587_s5 + $0x7] ss:$0 sm:$0xff]  ;;  %v966_v29 = vadd.f32 %v958_v2, %v894_v49 }
 0x292   : > { %5994 = vst [vmem:[#allocation48_spill] sm:$0xff] %v4733_v16  ;;  %v1054_v59 = vmul.f32 %v4733_v16, %v1038_v42  ;;  %5995 = vst [vmem:[#allocation49_spill] sm:$0xff] %v4739_v34  ;;  %v1087_v6 = vmul.f32 %v4739_v34, %v1071_v43  ;;  %v1991_v53 = vadd.f32 %v1983_v30, %v1927_v12  ;;  %v4746_v36 = vld [vmem:[%s5587_s5 + $0x8] ss:$0 sm:$0xff]  ;;  %v4750_v63 = vld [vmem:[#allocation2 + $0x60] sm:$0xff] }
 0x293   : > { %2422 = vst.msk [vmem:[#allocation3 + $0x10] sm:$0xff] %vm662_vm1, %v2414_v28  ;;  %v2023_v7 = vadd.f32 %v2015_v37, %v1959_v15  ;;  %5996 = vst [vmem:[#allocation4_spill] sm:$0xff] %v4746_v36  ;;  %v1119_v42 = vmul.f32 %v4746_v36, %v4706_v41  ;;  %v4752_v16 = vld [vmem:[#allocation2 + $0x61] sm:$0xff]  ;;  %v998_v10 = vadd.f32 %v990_v8, %v934_v26  ;;  %v4757_v43 = vld [vmem:[%s5587_s5 + $0x9] ss:$0 sm:$0xff] }
 0x294   : > { %5997 = vst [vmem:[#allocation17_spill] sm:$0xff] %v4750_v63  ;;  %5998 = vst [vmem:[#allocation18_spill] sm:$0xff] %v4752_v16  ;;  %v1151_v30 = vmul.f32 %v4757_v43, %v1135_v23  ;;  %v4763_v37 = vld [vmem:[%s5587_s5 + $0xa] ss:$0 sm:$0xff]  ;;  %v4770_v28 = vld [vmem:[%s5587_s5 + $0xb] ss:$0 sm:$0xff]  ;;  %v2055_v15 = vadd.f32 %v4646_v22, %v1991_v53  ;;  %v1030_v23 = vadd.f32 %v1022_v5, %v966_v29 }
 0x295   : > { %5999 = vst [vmem:[#allocation19_spill] sm:$0xff] %v4757_v43  ;;  %6000 = vst [vmem:[#allocation46_spill] sm:$0xff] %v4763_v37  ;;  %v1183_v49 = vmul.f32 %v4763_v37, %v4714_v4  ;;  %v1215_v26 = vmul.f32 %v4770_v28, %v4716_v1  ;;  %v4774_v12 = vld [vmem:[#allocation2 + $0x62] sm:$0xff]  ;;  %v2087_v2 = vadd.f32 %v4650_v54, %v2023_v7  ;;  %v4781_v8 = vld [vmem:[%s5587_s5 + $0xc] ss:$0 sm:$0xff] }
 0x296   : > { %6001 = vst [vmem:[#allocation47_spill] sm:$0xff] %v4770_v28  ;;  %6002 = vst [vmem:[#allocation53_spill] sm:$0xff] %v4774_v12  ;;  %v1247_v37 = vmul.f32 %v4781_v8, %v4408_v21  ;;  %v4785_v43 = vld [vmem:[#allocation2 + $0x63] sm:$0xff]  ;;  %v1062_v34 = vadd.f32 %v1054_v59, %v998_v10  ;;  %v4794_v22 = vld [vmem:[%s5587_s5 + $0xd] ss:$0 sm:$0xff]  ;;  %v2119_v29 = vadd.f32 %v4654_v20, %v2055_v15 }
 0x297   : > { %6003 = vst [vmem:[#allocation54_spill] sm:$0xff] %v4781_v8  ;;  %6004 = vst [vmem:[#allocation55_spill] sm:$0xff] %v4785_v43  ;;  %v4787_v36 = vld [vmem:[#allocation2 + $0x64] sm:$0xff]  ;;  %v1279_v54 = vmul.f32 %v4794_v22, %v4410_v14  ;;  %v4801_v5 = vld [vmem:[%s5587_s5 + $0xe] ss:$0 sm:$0xff]  ;;  %v1095_v8 = vadd.f32 %v1087_v6, %v1030_v23 }
 0x298   : > { %6005 = vst [vmem:[#allocation56_spill] sm:$0xff] %v4787_v36  ;;  %v4789_v28 = vld [vmem:[#allocation2 + $0x65] sm:$0xff]  ;;  %6007 = vst [vmem:[#allocation6_spill] sm:$0xff] %v4794_v22  ;;  %v1312_v53 = vmul.f32 %v4801_v5, %v4750_v63  ;;  %v4808_v10 = vld [vmem:[%s5587_s5 + $0xf] ss:$0 sm:$0xff]  ;;  %v2151_v22 = vadd.f32 %v4661_v25, %v2087_v2  ;;  %v1127_v21 = vadd.f32 %v1119_v42, %v1062_v34 }
 0x299   : > { %6006 = vst [vmem:[#allocation57_spill] sm:$0xff] %v4789_v28  ;;  %6008 = vst [vmem:[#allocation8_spill] sm:$0xff] %v4801_v5  ;;  %v4812_v59 = vmul.f32 %v4808_v10, %v4752_v16  ;;  %v4814_v7 = vld [vmem:[#allocation2 + $0x66] sm:$0xff]  ;;  %v4821_v5 = vld [vmem:[%s5587_s5 + $0x10] ss:$0 sm:$0xff]  ;;  %v2183_v2 = vadd.f32 %v4665_v3, %v2119_v29 }
 0x29a   : > { %6009 = vst [vmem:[#allocation9_spill] sm:$0xff] %v4808_v10  ;;  %6010 = vst [vmem:[#allocation16_spill] sm:$0xff] %v4814_v7  ;;  %v4825_v63 = vmul.f32 %v4821_v5, %v4774_v12  ;;  %v4827_v14 = vld [vmem:[#allocation2 + $0x70] sm:$0xff]  ;;  %v2215_v23 = vadd.f32 %v4669_v55, %v2151_v22  ;;  %v1191_v3 = vadd.f32 %v1183_v49, %v1127_v21 }
 0x29b   : > { %6011 = vst [vmem:[#allocation35_spill] sm:$0xff] %v4821_v5  ;;  %6012 = vst [vmem:[#allocation39_spill] sm:$0xff] %v4827_v14  ;;  %v4829_v10 = vld [vmem:[#allocation2 + $0x71] sm:$0xff] }
 0x29c   : > { %6013 = vst [vmem:[#allocation50_spill] sm:$0xff] %v4829_v10  ;;  %v4831_v16 = vld [vmem:[#allocation2 + $0x72] sm:$0xff]  ;;  %v4836_v20 = vld [vmem:[%s5587_s5 + $0x11] ss:$0 sm:$0xff]  ;;  %v1255_v12 = vadd.f32 %v1247_v37, %v1191_v3  ;;  %v4936_v37 = vld [vmem:[%s5587_s5 + $0x1a] ss:$0 sm:$0xff] }
 0x29d   : > { %6014 = vst [vmem:[#allocation5_spill] sm:$0xff] %v4831_v16  ;;  %6015 = vst [vmem:[#allocation70_spill] sm:$0xff] %v4836_v20  ;;  %v4840_v25 = vmul.f32 %v4836_v20, %v4785_v43  ;;  %v4845_v6 = vld [vmem:[%s5587_s5 + $0x12] ss:$0 sm:$0xff]  ;;  %v4854_v34 = vld [vmem:[%s5587_s5 + $0x13] ss:$0 sm:$0xff]  ;;  %v1159_v20 = vadd.f32 %v1151_v30, %v1095_v8 }
 0x29e   : > { %6016 = vst [vmem:[#allocation52_spill] sm:$0xff] %v4845_v6  ;;  %v4849_v15 = vmul.f32 %v4845_v6, %v4787_v36  ;;  %6017 = vst [vmem:[#allocation31_spill] sm:$0xff] %v4854_v34  ;;  %v4858_v42 = vmul.f32 %v4854_v34, %v4789_v28  ;;  %v4865_v5 = vld [vmem:[%s5587_s5 + $0x14] ss:$0 sm:$0xff]  ;;  %v4875_v34 = vld [vmem:[#allocation2 + $0x75] sm:$0xff] }
 0x29f   : > { %6018 = vst [vmem:[#allocation40_spill] sm:$0xff] %v4865_v5  ;;  %v4869_v6 = vmul.f32 %v4865_v5, %v4814_v7  ;;  %v4871_v36 = vld [vmem:[#allocation2 + $0x73] sm:$0xff]  ;;  %v2279_v5 = vadd.f32 %v4679_v47, %v2215_v23  ;;  %6029 = vst [vmem:[#allocation84_spill] sm:$0xff] %v4936_v37 }
 0x2a0   : > { %6019 = vst [vmem:[#allocation7_spill] sm:$0xff] %v4871_v36  ;;  %v4873_v43 = vld [vmem:[#allocation2 + $0x74] sm:$0xff] }
 0x2a1   : > { %6020 = vst [vmem:[#allocation58_spill] sm:$0xff] %v4873_v43  ;;  %v2430_v28 = vld [vmem:[#allocation3 + $0x10] sm:$0xff]  ;;  %v2343_v3 = vadd.f32 %v4688_v0, %v2279_v5 }
 0x2a2   : > { %v4880_v55 = vld [vmem:[%s5587_s5 + $0x15] ss:$0 sm:$0xff]  ;;  %v4889_v8 = vld [vmem:[%s5587_s5 + $0x16] ss:$0 sm:$0xff]  ;;  %v4898_v21 = vld [vmem:[%s5587_s5 + $0x17] ss:$0 sm:$0xff]  ;;  %v4905_v29 = vadd.f32 %v5977_v19, %v2430_v28 }
 0x2a3   : > { %6021 = vst [vmem:[#allocation59_spill] sm:$0xff] %v4880_v55  ;;  %v4884_v30 = vmul.f32 %v4880_v55, %v4827_v14  ;;  %6022 = vst [vmem:[#allocation60_spill] sm:$0xff] %v4889_v8  ;;  %v4893_v22 = vmul.f32 %v4889_v8, %v4829_v10  ;;  %v4902_v49 = vmul.f32 %v4898_v21, %v4831_v16  ;;  %v4909_v7 = vld [vmem:[#allocation2 + $0x76] sm:$0xff]  ;;  %v4911_v8 = vld [vmem:[#allocation2 + $0x80] sm:$0xff] }
 0x2a4   : > { %6023 = vst [vmem:[#allocation61_spill] sm:$0xff] %v4898_v21  ;;  %6024 = vst [vmem:[#allocation62_spill] sm:$0xff] %v4905_v29  ;;  %v2247_v55 = vadd.f32 %v4675_v38, %v2183_v2  ;;  %v1223_v14 = vadd.f32 %v1215_v26, %v1159_v20  ;;  %v4913_v10 = vld [vmem:[#allocation2 + $0x81] sm:$0xff]  ;;  %v4918_v21 = vld [vmem:[%s5587_s5 + $0x18] ss:$0 sm:$0xff]  ;;  %v4940_v26 = vmul.f32 %v4936_v37, %v4875_v34  ;;  %v2459_v2 = vsel %vm662_vm1, %v4905_v29, 0.0 }
 0x2a5   : > { %6025 = vst [vmem:[#allocation63_spill] sm:$0xff] %v4911_v8  ;;  %6026 = vst [vmem:[#allocation29_spill] sm:$0xff] %v4913_v10  ;;  %v4922_v28 = vmul.f32 %v4918_v21, %v4871_v36  ;;  %v4927_v38 = vld [vmem:[%s5587_s5 + $0x19] ss:$0 sm:$0xff]  ;;  %v4942_v20 = vld [vmem:[#allocation2 + $0x82] sm:$0xff]  ;;  %2460 = vadd.xlane.f32.xlu0 %v2459_v2  ;;  %v1320_v16 = vadd.f32 %v1312_v53, %v1255_v12  ;;  %v4974_v0 = vmul.f32 %v4302_v52, %v4913_v10 }
 0x2a6   : > { %6027 = vst [vmem:[#allocation30_spill] sm:$0xff] %v4918_v21  ;;  %6028 = vst [vmem:[#allocation83_spill] sm:$0xff] %v4927_v38  ;;  %v4931_v47 = vmul.f32 %v4927_v38, %v4873_v43  ;;  %v2311_v23 = vadd.f32 %v4683_v18, %v2247_v55  ;;  %v1287_v38 = vadd.f32 %v1279_v54, %v1223_v14  ;;  %v4948_v21 = vld [vmem:[#allocation2 + $0x83] sm:$0xff]  ;;  %v4957_v37 = vld [vmem:[%s5587_s5 + $0x1b] ss:$0 sm:$0xff] }
 0x2a7   : > { %v4950_v43 = vld [vmem:[#allocation2 + $0x84] sm:$0xff]  ;;  %6032 = vst [vmem:[#allocation87_spill] sm:$0xff] %v4957_v37  ;;  %v4961_v29 = vmul.f32 %v4957_v37, %v4909_v7  ;;  %v4966_v14 = vld [vmem:[%s5587_s5 + $0x1c] ss:$0 sm:$0xff]  ;;  %v4978_v54 = vld [vmem:[#allocation2 + $0x90] sm:$0xff]  ;;  %v2407_v53 = vadd.f32 %v4696_v50, %v2343_v3  ;;  %v4985_v2 = vmul.f32 %v5964_v45, %v4942_v20  ;;  %v1384_v10 = vadd.f32 %v4825_v63, %v1320_v16 }
 0x2a8   : > { %6030 = vst [vmem:[#allocation85_spill] sm:$0xff] %v4950_v43  ;;  %v4952_v36 = vld [vmem:[#allocation2 + $0x85] sm:$0xff]  ;;  %6033 = vst [vmem:[#allocation88_spill] sm:$0xff] %v4966_v14  ;;  %v4970_v18 = vmul.f32 %v4966_v14, %v4911_v8  ;;  %v2375_v5 = vadd.f32 %v4692_v46, %v2311_v23  ;;  %v1352_v55 = vadd.f32 %v4812_v59, %v1287_v38  ;;  %v4987_v14 = vld [vmem:[#allocation2 + $0x91] sm:$0xff] }
 0x2a9   : > { %6031 = vst [vmem:[#allocation86_spill] sm:$0xff] %v4952_v36  ;;  %v4976_v12 = vld [vmem:[#allocation2 + $0x86] sm:$0xff]  ;;  %v4989_v37 = vld [vmem:[#allocation2 + $0x92] sm:$0xff]  ;;  %v4996_v8 = vmul.f32 %v5965_v58, %v4948_v21  ;;  %v5000_v46 = vmul.f32 %v5967_v11, %v4950_v43  ;;  %v5004_v50 = vmul.f32 %v5969_v9, %v4952_v36  ;;  %v5019_v11 = vmul.f32 %v5972_v61, %v4978_v54 }
 0x2aa   : > { %v4991_v52 = vld [vmem:[#allocation2 + $0x93] sm:$0xff]  ;;  %v2415_v3 = vadd.f32 %v2407_v53, %v2375_v5  ;;  %v1416_v63 = vadd.f32 %v4840_v25, %v1352_v55  ;;  %v5015_v16 = vmul.f32 %v5970_v44, %v4976_v12  ;;  %v2192_v58 = vld [vmem:[#allocation2 + $0xa0] sm:$0xff]  ;;  %v1448_v36 = vadd.f32 %v4849_v15, %v1384_v10 }
 0x2ab   : > { %v5006_v59 = vld [vmem:[#allocation2 + $0x94] sm:$0xff]  ;;  %v2224_v9 = vld [vmem:[#allocation2 + $0xa1] sm:$0xff]  ;;  %v5026_v43 = vmul.f32 %v5973_v39, %v4987_v14  ;;  %v5030_v25 = vmul.f32 %v5974_v33, %v4989_v37  ;;  %v5034_v5 = vmul.f32 %v5975_v35, %v4991_v52  ;;  %v5056_v61 = vmul.f32 %v5982_v27, %v2192_v58 }
 0x2ac   : > { %v5008_v38 = vld [vmem:[#allocation2 + $0x95] sm:$0xff]  ;;  %v5021_v45 = vld [vmem:[#allocation2 + $0xa2] sm:$0xff]  ;;  %2423 = vst.msk [vmem:[#allocation3 + $0x18] sm:$0xff] %vm662_vm1, %v2415_v3  ;;  %v1480_v10 = vadd.f32 %v4858_v42, %v1416_v63  ;;  %v5044_v15 = vmul.f32 %v5976_v24, %v5006_v59  ;;  %v1512_v39 = vadd.f32 %v4869_v6, %v1448_v36  ;;  %v5059_v3 = vmul.f32 %v5950_v40, %v2224_v9 }
 0x2ad   : > { %v5010_v23 = vld [vmem:[#allocation2 + $0x96] sm:$0xff]  ;;  %v5036_v53 = vld [vmem:[#allocation2 + $0xa3] sm:$0xff]  ;;  %v5048_v33 = vmul.f32 %v5979_v60, %v5008_v38  ;;  %6034 = vst [vmem:[#allocation89_spill] sm:$0xff] %v5056_v61  ;;  %v5063_v42 = vmul.f32 %v5985_v48, %v5021_v45 }
 0x2ae   : > { %v5038_v55 = vld [vmem:[#allocation2 + $0xa4] sm:$0xff]  ;;  %v5052_v35 = vmul.f32 %v5980_v31, %v5010_v23  ;;  %6035 = vst [vmem:[#allocation90_spill] sm:$0xff] %v5059_v3  ;;  %v1544_v63 = vadd.f32 %v4884_v30, %v1480_v10  ;;  %v5068_v60 = vmul.f32 %v5987_v56, %v5036_v53  ;;  %v6039_v36 = vld [vmem:[#allocation66_spill] sm:$0xff]  ;;  %v1576_v9 = vadd.f32 %v4893_v22, %v1512_v39 }
 0x2af   : > { %6036 = vst [vmem:[#allocation91_spill] sm:$0xff] %v5063_v42  ;;  %v5072_v31 = vmul.f32 %v5956_v17, %v5038_v55  ;;  %v5076_v58 = vmul.f32 %v5931_v32, %v6039_v36  ;;  %v6041_v6 = vld [vmem:[#allocation20_spill] sm:$0xff]  ;;  %v895_v30 = vmul.f32 %v4701_v62, %v4706_v41  ;;  %v6044_v56 = vld [vmem:[#allocation37_spill] sm:$0xff]  ;;  %v991_v36 = vmul.f32 %v4721_v13, %v4716_v1  ;;  %v6054_v1 = vld [vmem:[#allocation19_spill] sm:$0xff] }
 0x2b0   : > { %6037 = vst [vmem:[#allocation92_spill] sm:$0xff] %v5068_v60  ;;  %v5081_v48 = vmul.f32 %v5933_v51, %v6041_v6  ;;  %v6043_v10 = vld [vmem:[#allocation36_spill] sm:$0xff]  ;;  %v1608_v42 = vadd.f32 %v4902_v49, %v1544_v63  ;;  %v6046_v39 = vld [vmem:[#allocation45_spill] sm:$0xff]  ;;  %v1640_v6 = vadd.f32 %v4922_v28, %v1576_v9  ;;  %v6055_v28 = vld [vmem:[#allocation55_spill] sm:$0xff] }
 0x2b1   : > { %6038 = vst [vmem:[#allocation93_spill] sm:$0xff] %v5072_v31  ;;  %6040 = vst [vmem:[#allocation66_spill] sm:$0xff] %v5076_v58  ;;  %v935_v60 = vadd.f32 %v6044_v56, %v6043_v10  ;;  %v959_v31 = vmul.f32 %v4711_v57, %v4714_v4  ;;  %v6045_v58 = vld [vmem:[#allocation76_spill] sm:$0xff]  ;;  %v6049_v62 = vld [vmem:[#allocation17_spill] sm:$0xff] }
 0x2b2   : > { %6042 = vst [vmem:[#allocation20_spill] sm:$0xff] %v5081_v48  ;;  %v1023_v22 = vmul.f32 %v6046_v39, %v6045_v58  ;;  %v6047_v48 = vld [vmem:[#allocation77_spill] sm:$0xff]  ;;  %v6048_v51 = vld [vmem:[#allocation48_spill] sm:$0xff]  ;;  %v6051_v56 = vld [vmem:[#allocation18_spill] sm:$0xff]  ;;  %v1672_v63 = vadd.f32 %v4931_v47, %v1608_v42  ;;  %v1704_v58 = vadd.f32 %v4940_v26, %v1640_v6 }
 0x2b3   : > { %v1055_v32 = vmul.f32 %v6048_v51, %v6047_v48  ;;  %v6050_v41 = vld [vmem:[#allocation49_spill] sm:$0xff]  ;;  %v6052_v10 = vld [vmem:[#allocation4_spill] sm:$0xff]  ;;  %v967_v57 = vadd.f32 %v959_v31, %v895_v30  ;;  %v999_v4 = vadd.f32 %v991_v36, %v935_v60  ;;  %v2431_v3 = vld [vmem:[#allocation3 + $0x18] sm:$0xff] }
 0x2b4   : > { %v1088_v17 = vmul.f32 %v6050_v41, %v6049_v62  ;;  %v1120_v49 = vmul.f32 %v6052_v10, %v6051_v56  ;;  %v6053_v40 = vld [vmem:[#allocation53_spill] sm:$0xff]  ;;  %v6056_v9 = vld [vmem:[#allocation46_spill] sm:$0xff]  ;;  %v6057_v51 = vld [vmem:[#allocation56_spill] sm:$0xff]  ;;  %v5112_v56 = vadd.f32 %v5977_v19, %v2431_v3  ;;  %v1736_v60 = vadd.f32 %v4961_v29, %v1672_v63 }
 0x2b5   : > { %v1152_v13 = vmul.f32 %v6054_v1, %v6053_v40  ;;  %v1184_v39 = vmul.f32 %v6056_v9, %v6055_v28  ;;  %v6058_v48 = vld [vmem:[#allocation47_spill] sm:$0xff]  ;;  %v6059_v62 = vld [vmem:[#allocation57_spill] sm:$0xff]  ;;  %v6060_v41 = vld [vmem:[#allocation54_spill] sm:$0xff]  ;;  %v1031_v31 = vadd.f32 %v1023_v22, %v967_v57  ;;  %v1063_v47 = vadd.f32 %v1055_v32, %v999_v4 }
 0x2b6   : > { %v1216_v27 = vmul.f32 %v6058_v48, %v6057_v51  ;;  %v1248_v61 = vmul.f32 %v6060_v41, %v6059_v62  ;;  %6061 = vst [vmem:[#allocation36_spill] sm:$0xff] %v5112_v56  ;;  %v1768_v40 = vadd.f32 %v4970_v18, %v1704_v58  ;;  %v6062_v42 = vld [vmem:[#allocation16_spill] sm:$0xff]  ;;  %v6063_v26 = vld [vmem:[#allocation6_spill] sm:$0xff]  ;;  %v6064_v36 = vld [vmem:[#allocation39_spill] sm:$0xff]  ;;  %v2462_v51 = vsel %vm662_vm1, %v5112_v56, 0.0 }
 0x2b7   : > { %v1280_v30 = vmul.f32 %v6063_v26, %v6062_v42  ;;  %v6065_v6 = vld [vmem:[#allocation8_spill] sm:$0xff]  ;;  %v6066_v1 = vld [vmem:[#allocation50_spill] sm:$0xff]  ;;  %v6067_v28 = vld [vmem:[#allocation9_spill] sm:$0xff]  ;;  %v1800_v3 = vadd.f32 %v4974_v0, %v1736_v60  ;;  %v1096_v48 = vadd.f32 %v1088_v17, %v1031_v31  ;;  %v1128_v29 = vadd.f32 %v1120_v49, %v1063_v47  ;;  %2463 = vadd.xlane.f32.xlu1 %v2462_v51 }
 0x2b8   : > { %v1313_v10 = vmul.f32 %v6065_v6, %v6064_v36  ;;  %v1345_v9 = vmul.f32 %v6067_v28, %v6066_v1  ;;  %v1832_v32 = vadd.f32 %v4985_v2, %v1768_v40  ;;  %v6068_v18 = vld [vmem:[#allocation5_spill] sm:$0xff]  ;;  %v6069_v22 = vld [vmem:[#allocation35_spill] sm:$0xff]  ;;  %v6071_v4 = vld [vmem:[#allocation70_spill] sm:$0xff] }
 0x2b9   : > { %v1377_v63 = vmul.f32 %v6069_v22, %v6068_v18  ;;  %v6070_v57 = vld [vmem:[#allocation7_spill] sm:$0xff]  ;;  %v6072_v62 = vld [vmem:[#allocation58_spill] sm:$0xff]  ;;  %v6073_v41 = vld [vmem:[#allocation52_spill] sm:$0xff]  ;;  %v1864_v26 = vadd.f32 %v4996_v8, %v1800_v3  ;;  %v1160_v36 = vadd.f32 %v1152_v13, %v1096_v48  ;;  %v1192_v6 = vadd.f32 %v1184_v39, %v1128_v29 }
 0x2ba   : > { %v1409_v58 = vmul.f32 %v6071_v4, %v6070_v57  ;;  %v1441_v42 = vmul.f32 %v6073_v41, %v6072_v62  ;;  %v6074_v0 = vld [vmem:[#allocation31_spill] sm:$0xff]  ;;  %v1896_v49 = vadd.f32 %v5000_v46, %v1832_v32  ;;  %v6075_v2 = vld [vmem:[#allocation40_spill] sm:$0xff]  ;;  %v6078_v1 = vld [vmem:[#allocation29_spill] sm:$0xff] }
 0x2bb   : > { %v1473_v17 = vmul.f32 %v6074_v0, %v4875_v34  ;;  %v1505_v60 = vmul.f32 %v6075_v2, %v4909_v7  ;;  %v6076_v31 = vld [vmem:[#allocation63_spill] sm:$0xff]  ;;  %v6079_v28 = vld [vmem:[#allocation60_spill] sm:$0xff]  ;;  %v1928_v18 = vadd.f32 %v5004_v50, %v1864_v26  ;;  %v1224_v22 = vadd.f32 %v1216_v27, %v1160_v36  ;;  %v6080_v13 = vld [vmem:[#allocation61_spill] sm:$0xff] }
 0x2bc   : > { %v6077_v47 = vld [vmem:[#allocation59_spill] sm:$0xff]  ;;  %v1569_v51 = vmul.f32 %v6079_v28, %v6078_v1  ;;  %v1256_v8 = vadd.f32 %v1248_v61, %v1192_v6  ;;  %v1601_v39 = vmul.f32 %v6080_v13, %v4942_v20  ;;  %v1960_v34 = vadd.f32 %v5015_v16, %v1896_v49  ;;  %v6081_v46 = vld [vmem:[#allocation30_spill] sm:$0xff]  ;;  %v6082_v48 = vld [vmem:[#allocation85_spill] sm:$0xff] }
 0x2bd   : > { %v1537_v40 = vmul.f32 %v6077_v47, %v6076_v31  ;;  %v1633_v3 = vmul.f32 %v6081_v46, %v4948_v21  ;;  %v6083_v7 = vld [vmem:[#allocation83_spill] sm:$0xff]  ;;  %v6084_v32 = vld [vmem:[#allocation86_spill] sm:$0xff]  ;;  %v6085_v57 = vld [vmem:[#allocation84_spill] sm:$0xff]  ;;  %v1992_v62 = vadd.f32 %v5019_v11, %v1928_v18  ;;  %v1288_v41 = vadd.f32 %v1280_v30, %v1224_v22 }
 0x2be   : > { %v1665_v29 = vmul.f32 %v6083_v7, %v6082_v48  ;;  %v1697_v4 = vmul.f32 %v6085_v57, %v6084_v32  ;;  %v1321_v50 = vadd.f32 %v1313_v10, %v1256_v8  ;;  %v6086_v61 = vld [vmem:[#allocation87_spill] sm:$0xff]  ;;  %v2024_v20 = vadd.f32 %v5026_v43, %v1960_v34  ;;  %v6087_v16 = vld [vmem:[#allocation88_spill] sm:$0xff]  ;;  %v6088_v21 = vld [vmem:[#allocation21_spill] sm:$0xff] }
 0x2bf   : > { %v1729_v27 = vmul.f32 %v6086_v61, %v4976_v12  ;;  %v1761_v26 = vmul.f32 %v6087_v16, %v4978_v54  ;;  %v5160_v36 = vmul.f32 %v6088_v21, %v4987_v14  ;;  %v6089_v6 = vld [vmem:[#allocation22_spill] sm:$0xff]  ;;  %v2056_v11 = vadd.f32 %v5030_v25, %v1992_v62  ;;  %v6090_v49 = vld [vmem:[#allocation67_spill] sm:$0xff]  ;;  %v6091_v54 = vld [vmem:[#allocation68_spill] sm:$0xff] }
 0x2c0   : > { %v5164_v0 = vmul.f32 %v6089_v6, %v4989_v37  ;;  %v1353_v30 = vadd.f32 %v1345_v9, %v1288_v41  ;;  %v1385_v10 = vadd.f32 %v1377_v63, %v1321_v50  ;;  %v5169_v12 = vmul.f32 %v6090_v49, %v4991_v52  ;;  %v6092_v14 = vld [vmem:[#allocation69_spill] sm:$0xff]  ;;  %v6093_v52 = vld [vmem:[#allocation64_spill] sm:$0xff]  ;;  %v6094_v47 = vld [vmem:[#allocation38_spill] sm:$0xff] }
 0x2c1   : > { %v2088_v43 = vadd.f32 %v5034_v5, %v2024_v20  ;;  %v5174_v2 = vmul.f32 %v6091_v54, %v5006_v59  ;;  %v5178_v31 = vmul.f32 %v6092_v14, %v5008_v38  ;;  %v5182_v37 = vmul.f32 %v5970_v44, %v5010_v23  ;;  %v2129_v5 = vld [vmem:[#allocation2 + $0xa5] sm:$0xff]  ;;  %v6097_v8 = vld [vmem:[#allocation23_spill] sm:$0xff]  ;;  %v6102_v62 = vld [vmem:[#allocation78_spill] sm:$0xff] }
 0x2c2   : > { %v2120_v25 = vadd.f32 %v5044_v15, %v2056_v11  ;;  %v1417_v9 = vadd.f32 %v1409_v58, %v1353_v30  ;;  %v1449_v63 = vadd.f32 %v1441_v42, %v1385_v10  ;;  %v5187_v1 = vmul.f32 %v6094_v47, %v6093_v52  ;;  %v2161_v28 = vld [vmem:[#allocation2 + $0xa6] sm:$0xff]  ;;  %v6100_v7 = vld [vmem:[#allocation27_spill] sm:$0xff] }
 0x2c3   : > { %v2152_v59 = vadd.f32 %v5048_v33, %v2088_v43  ;;  %v6095_v18 = vld [vmem:[#allocation65_spill] sm:$0xff]  ;;  %v6096_v22 = vld [vmem:[#allocation24_spill] sm:$0xff]  ;;  %v5196_v44 = vmul.f32 %v6097_v8, %v5021_v45  ;;  %v5205_v34 = vmul.f32 %v5976_v24, %v5038_v55  ;;  %v2193_v33 = vld [vmem:[#allocation2 + $0xb0] sm:$0xff]  ;;  %v5209_v32 = vmul.f32 %v6100_v7, %v2129_v5 }
 0x2c4   : > { %v5192_v38 = vmul.f32 %v6096_v22, %v6095_v18  ;;  %v6098_v23 = vld [vmem:[#allocation25_spill] sm:$0xff]  ;;  %v2184_v58 = vadd.f32 %v5052_v35, %v2120_v25  ;;  %v1481_v42 = vadd.f32 %v1473_v17, %v1417_v9  ;;  %v1513_v13 = vadd.f32 %v1505_v60, %v1449_v63  ;;  %v6101_v45 = vld [vmem:[#allocation28_spill] sm:$0xff]  ;;  %v5217_v41 = vld [vmem:[#allocation2 + $0xb1] sm:$0xff] }
 0x2c5   : > { %v5200_v15 = vmul.f32 %v6098_v23, %v5036_v53  ;;  %v6099_v46 = vld [vmem:[#allocation89_spill] sm:$0xff]  ;;  %v5212_v57 = vmul.f32 %v6101_v45, %v2161_v28  ;;  %v5215_v53 = vmul.f32 %v6102_v62, %v2193_v33  ;;  %v6103_v35 = vld [vmem:[#allocation90_spill] sm:$0xff]  ;;  %v6105_v6 = vld [vmem:[#allocation91_spill] sm:$0xff] }
 0x2c6   : > { %v2216_v48 = vadd.f32 %v6099_v46, %v2152_v59  ;;  %v2248_v17 = vadd.f32 %v6103_v35, %v2184_v58  ;;  %v1545_v60 = vadd.f32 %v1537_v40, %v1481_v42  ;;  %v1577_v50 = vadd.f32 %v1569_v51, %v1513_v13  ;;  %v6104_v55 = vld [vmem:[#allocation33_spill] sm:$0xff]  ;;  %v5224_v20 = vld [vmem:[#allocation2 + $0xb2] sm:$0xff]  ;;  %v6106_v30 = vld [vmem:[#allocation32_spill] sm:$0xff] }
 0x2c7   : > { %v5222_v61 = vmul.f32 %v6104_v55, %v5217_v41  ;;  %v5226_v16 = vld [vmem:[#allocation2 + $0xb3] sm:$0xff]  ;;  %v5233_v10 = vmul.f32 %v6106_v30, %v5224_v20  ;;  %v6112_v14 = vld [vmem:[#allocation92_spill] sm:$0xff]  ;;  %v6113_v52 = vld [vmem:[#allocation81_spill] sm:$0xff] }
 0x2c8   : > { %v5228_v21 = vld [vmem:[#allocation2 + $0xb4] sm:$0xff]  ;;  %v2280_v11 = vadd.f32 %v6105_v6, %v2216_v48  ;;  %v2312_v25 = vadd.f32 %v6112_v14, %v2248_v17  ;;  %v1609_v9 = vadd.f32 %v1601_v39, %v1545_v60  ;;  %v1641_v63 = vadd.f32 %v1633_v3, %v1577_v50  ;;  %v6115_v59 = vld [vmem:[#allocation93_spill] sm:$0xff]  ;;  %v6120_v35 = vld [vmem:[#allocation80_spill] sm:$0xff] }
 0x2c9   : > { %6107 = vst [vmem:[#allocation37_spill] sm:$0xff] %v5233_v10  ;;  %v6108_v49 = vld [vmem:[#allocation79_spill] sm:$0xff]  ;;  %v6110_v51 = vld [vmem:[#allocation34_spill] sm:$0xff]  ;;  %v6121_v6 = vld [vmem:[#allocation72_spill] sm:$0xff]  ;;  %v1986_v14 = vmul.f32 %v6094_v47, %v2193_v33 }
 0x2ca   : > { %v5237_v40 = vmul.f32 %v6108_v49, %v5226_v16  ;;  %v5241_v43 = vmul.f32 %v6110_v51, %v5228_v21  ;;  %v5243_v54 = vld [vmem:[#allocation2 + $0xb5] sm:$0xff]  ;;  %v2344_v18 = vadd.f32 %v6115_v59, %v2280_v11  ;;  %v1898_v17 = vadd.f32 %v6121_v6, %v6120_v35  ;;  %v6123_v56 = vld [vmem:[#allocation20_spill] sm:$0xff] }
 0x2cb   : > { %v5248_v5 = vmul.f32 %v6113_v52, %v5243_v54  ;;  %v5250_v28 = vld [vmem:[#allocation2 + $0xb6] sm:$0xff]  ;;  %v1673_v60 = vadd.f32 %v1665_v29, %v1609_v9  ;;  %v1705_v50 = vadd.f32 %v1697_v4, %v1641_v63  ;;  %v2082_v29 = vmul.f32 %v6098_v23, %v5226_v16  ;;  %v5295_v35 = vld [vmem:[#allocation2 + $0xc6] sm:$0xff] }
 0x2cc   : > { %6109 = vst [vmem:[#allocation76_spill] sm:$0xff] %v5237_v40  ;;  %6111 = vst [vmem:[#allocation45_spill] sm:$0xff] %v5241_v43  ;;  %v6116_v58 = vld [vmem:[#allocation82_spill] sm:$0xff]  ;;  %v6118_v13 = vld [vmem:[#allocation75_spill] sm:$0xff] }
 0x2cd   : > { %6114 = vst [vmem:[#allocation77_spill] sm:$0xff] %v5248_v5  ;;  %v5255_v42 = vmul.f32 %v6116_v58, %v5250_v28  ;;  %v6119_v46 = vld [vmem:[#allocation71_spill] sm:$0xff]  ;;  %v6122_v39 = vld [vmem:[#allocation66_spill] sm:$0xff]  ;;  %v2408_v5 = vadd.f32 %v6123_v56, %v2344_v18  ;;  %v6124_v43 = vld [vmem:[#allocation73_spill] sm:$0xff]  ;;  %v1737_v10 = vadd.f32 %v1729_v27, %v1673_v60  ;;  %v2114_v56 = vmul.f32 %v5976_v24, %v5228_v21 }
 0x2ce   : > { %v1866_v48 = vadd.f32 %v6119_v46, %v6118_v13  ;;  %v2376_v3 = vadd.f32 %v6122_v39, %v2312_v25  ;;  %v6125_v59 = vld [vmem:[#allocation74_spill] sm:$0xff]  ;;  %v1769_v13 = vadd.f32 %v1761_v26, %v1705_v50  ;;  %v2050_v46 = vmul.f32 %v6097_v8, %v5224_v20  ;;  %v5280_v8 = vld [vmem:[#allocation2 + $0xc1] sm:$0xff]  ;;  %v3463_v50 = vld [vmem:[%s5587_s5 + $0x20] ss:$0 sm:$0xff] }
 0x2cf   : > { %6117 = vst [vmem:[#allocation48_spill] sm:$0xff] %v5255_v42  ;;  %v1962_v40 = vadd.f32 %v6125_v59, %v1898_v17  ;;  %v2018_v42 = vmul.f32 %v6096_v22, %v5217_v41  ;;  %v1801_v33 = vadd.f32 %v5160_v36, %v1737_v10  ;;  %v2146_v27 = vmul.f32 %v6100_v7, %v5243_v54  ;;  %v2194_v22 = vld [vmem:[#allocation2 + $0xc0] sm:$0xff]  ;;  %v6126_v60 = vld [vmem:[#allocation26_spill] sm:$0xff] }
 0x2d0   : > { %v1930_v11 = vadd.f32 %v6124_v43, %v1866_v48  ;;  %v2416_v4 = vadd.f32 %v2408_v5, %v2376_v3  ;;  %v1833_v43 = vadd.f32 %v5164_v0, %v1769_v13  ;;  %v2178_v26 = vmul.f32 %v6101_v45, %v5250_v28  ;;  %v2258_v36 = vld [vmem:[#allocation2 + $0xc2] sm:$0xff]  ;;  %v6127_v59 = vld [vmem:[#allocation14_spill] sm:$0xff] }
 0x2d1   : > { %v2026_v47 = vadd.f32 %v2018_v42, %v1962_v40  ;;  %v2210_v9 = vmul.f32 %v6102_v62, %v2194_v22  ;;  %v2242_v24 = vmul.f32 %v6104_v55, %v5280_v8  ;;  %v2290_v0 = vld [vmem:[#allocation2 + $0xc3] sm:$0xff]  ;;  %v1865_v10 = vadd.f32 %v5169_v12, %v1801_v33 }
 0x2d2   : > { %v1994_v25 = vadd.f32 %v1986_v14, %v1930_v11  ;;  %2424 = vst.msk [vmem:[#allocation3 + $0x20] sm:$0xff] %vm662_vm1, %v2416_v4  ;;  %v1897_v7 = vadd.f32 %v5174_v2, %v1833_v43  ;;  %v2274_v45 = vmul.f32 %v6106_v30, %v2258_v36  ;;  %v2306_v63 = vmul.f32 %v6108_v49, %v2290_v0  ;;  %v2322_v5 = vld [vmem:[#allocation2 + $0xc4] sm:$0xff]  ;;  %v3460_v49 = vld [vmem:[%s5587_s5 + $0x1d] ss:$0 sm:$0xff] }
 0x2d3   : > { %v2090_v40 = vadd.f32 %v2082_v29, %v2026_v47  ;;  %v5290_v18 = vld [vmem:[#allocation2 + $0xc5] sm:$0xff]  ;;  %v2338_v62 = vmul.f32 %v6110_v51, %v2322_v5  ;;  %v1929_v12 = vadd.f32 %v5178_v31, %v1865_v10  ;;  %v2402_v30 = vmul.f32 %v6116_v58, %v5295_v35  ;;  %v3462_v31 = vld [vmem:[%s5587_s5 + $0x1f] ss:$0 sm:$0xff] }
 0x2d4   : > { %v2058_v23 = vadd.f32 %v2050_v46, %v1994_v25  ;;  %v2370_v55 = vmul.f32 %v6113_v52, %v5290_v18  ;;  %v1961_v2 = vadd.f32 %v5182_v37, %v1897_v7  ;;  %v1795_v6 = vmul.f32 %v3460_v49, %v5217_v41  ;;  %v3461_v52 = vld [vmem:[%s5587_s5 + $0x1e] ss:$0 sm:$0xff]  ;;  %v2227_v49 = vld [vmem:[#allocation2 + $0xd1] sm:$0xff] }
 0x2d5   : > { %v2154_v48 = vadd.f32 %v2146_v27, %v2090_v40  ;;  %v1827_v39 = vmul.f32 %v3461_v52, %v5224_v20  ;;  %v1859_v37 = vmul.f32 %v3462_v31, %v5226_v16  ;;  %v1993_v58 = vadd.f32 %v5187_v1, %v1929_v12  ;;  %v3464_v16 = vld [vmem:[%s5587_s5 + $0x21] ss:$0 sm:$0xff]  ;;  %v6130_v52 = vld [vmem:[#allocation45_spill] sm:$0xff] }
 0x2d6   : > { %v2122_v42 = vadd.f32 %v2114_v56, %v2058_v23  ;;  %v2025_v3 = vadd.f32 %v5192_v38, %v1961_v2  ;;  %v1803_v41 = vadd.f32 %v1795_v6, %v6126_v60  ;;  %v1891_v14 = vmul.f32 %v3463_v50, %v5228_v21  ;;  %v3465_v21 = vld [vmem:[%s5587_s5 + $0x22] ss:$0 sm:$0xff]  ;;  %v3474_v60 = vld [vmem:[%s5587_s5 + $0x2b] ss:$0 sm:$0xff]  ;;  %v2323_v50 = vld [vmem:[#allocation2 + $0xd4] sm:$0xff] }
 0x2d7   : > { %v2218_v51 = vadd.f32 %v2210_v9, %v2154_v48  ;;  %v1835_v13 = vadd.f32 %v1827_v39, %v6127_v59  ;;  %v1923_v1 = vmul.f32 %v3464_v16, %v5243_v54  ;;  %v2057_v38 = vadd.f32 %v5196_v44, %v1993_v58  ;;  %v2291_v58 = vld [vmem:[#allocation2 + $0xd3] sm:$0xff] }
 0x2d8   : > { %v2186_v17 = vadd.f32 %v2178_v26, %v2122_v42  ;;  %v2089_v29 = vadd.f32 %v5200_v15, %v2025_v3  ;;  %v1867_v4 = vadd.f32 %v1859_v37, %v1803_v41  ;;  %v1955_v25 = vmul.f32 %v3465_v21, %v5250_v28  ;;  %v3466_v15 = vld [vmem:[%s5587_s5 + $0x23] ss:$0 sm:$0xff]  ;;  %v3469_v42 = vld [vmem:[%s5587_s5 + $0x26] ss:$0 sm:$0xff] }
 0x2d9   : > { %v2282_v20 = vadd.f32 %v2274_v45, %v2218_v51  ;;  %v2432_v46 = vld [vmem:[#allocation3 + $0x20] sm:$0xff]  ;;  %v1899_v43 = vadd.f32 %v1891_v14, %v1835_v13  ;;  %v2121_v54 = vadd.f32 %v5205_v34, %v2057_v38  ;;  %v1987_v26 = vmul.f32 %v3466_v15, %v2194_v22  ;;  %v3475_v13 = vld [vmem:[%s5587_s5 + $0x2c] ss:$0 sm:$0xff] }
 0x2da   : > { %v2250_v11 = vadd.f32 %v2242_v24, %v2186_v17  ;;  %v5332_v47 = vadd.f32 %v5977_v19, %v2432_v46  ;;  %v2153_v27 = vadd.f32 %v5209_v32, %v2089_v29  ;;  %v1931_v44 = vadd.f32 %v1923_v1, %v1867_v4  ;;  %v3467_v32 = vld [vmem:[%s5587_s5 + $0x24] ss:$0 sm:$0xff]  ;;  %v3468_v22 = vld [vmem:[%s5587_s5 + $0x25] ss:$0 sm:$0xff]  ;;  %v3476_v46 = vld [vmem:[%s5587_s5 + $0x2d] ss:$0 sm:$0xff] }
 0x2db   : > { %v2346_v33 = vadd.f32 %v2338_v62, %v2282_v20  ;;  %v1963_v9 = vadd.f32 %v1955_v25, %v1899_v43  ;;  %v2185_v24 = vadd.f32 %v5212_v57, %v2121_v54  ;;  %v2019_v7 = vmul.f32 %v3467_v32, %v5280_v8  ;;  %v2195_v62 = vld [vmem:[#allocation2 + $0xd0] sm:$0xff]  ;;  %v6128_v8 = vld [vmem:[#allocation37_spill] sm:$0xff]  ;;  %v6129_v17 = vld [vmem:[#allocation76_spill] sm:$0xff] }
 0x2dc   : > { %v2314_v56 = vadd.f32 %v2306_v63, %v2250_v11  ;;  %v2465_v23 = vsel %vm662_vm1, %v5332_v47, 0.0  ;;  %v2217_v10 = vadd.f32 %v5215_v53, %v2153_v27  ;;  %v1995_v34 = vadd.f32 %v1987_v26, %v1931_v44  ;;  %v3470_v53 = vld [vmem:[%s5587_s5 + $0x27] ss:$0 sm:$0xff]  ;;  %v2355_v29 = vld [vmem:[#allocation2 + $0xd5] sm:$0xff]  ;;  %v3478_v44 = vld [vmem:[%s5587_s5 + $0x2f] ss:$0 sm:$0xff] }
 0x2dd   : > { %v2410_v40 = vadd.f32 %v2402_v30, %v2346_v33  ;;  %2466 = vadd.xlane.f32.xlu0 %v2465_v23  ;;  %v2051_v63 = vmul.f32 %v3468_v22, %v2258_v36  ;;  %v2083_v57 = vmul.f32 %v3469_v42, %v2290_v0  ;;  %v2115_v48 = vmul.f32 %v3470_v53, %v2322_v5  ;;  %v3471_v36 = vld [vmem:[%s5587_s5 + $0x28] ss:$0 sm:$0xff]  ;;  %v3472_v5 = vld [vmem:[%s5587_s5 + $0x29] ss:$0 sm:$0xff]  ;;  %v6132_v11 = vld [vmem:[#allocation48_spill] sm:$0xff] }
 0x2de   : > { %v2378_v28 = vadd.f32 %v2370_v55, %v2314_v56  ;;  %v2249_v55 = vadd.f32 %v5222_v61, %v2185_v24  ;;  %v2281_v12 = vadd.f32 %v6128_v8, %v2217_v10  ;;  %v2027_v2 = vadd.f32 %v2019_v7, %v1963_v9  ;;  %v2259_v61 = vld [vmem:[#allocation2 + $0xd2] sm:$0xff]  ;;  %v3477_v56 = vld [vmem:[%s5587_s5 + $0x2e] ss:$0 sm:$0xff]  ;;  %v3479_v26 = vld [vmem:[%s5587_s5 + $0x30] ss:$0 sm:$0xff] }
 0x2df   : > { %v2147_v30 = vmul.f32 %v3471_v36, %v5290_v18  ;;  %v2059_v0 = vadd.f32 %v2051_v63, %v1995_v34  ;;  %v2179_v6 = vmul.f32 %v3472_v5, %v5295_v35  ;;  %v3473_v18 = vld [vmem:[%s5587_s5 + $0x2a] ss:$0 sm:$0xff]  ;;  %v2243_v41 = vmul.f32 %v3474_v60, %v2227_v49  ;;  %v2387_v4 = vld [vmem:[#allocation2 + $0xd6] sm:$0xff] }
 0x2e0   : > { %v2418_v45 = vadd.f32 %v2410_v40, %v2378_v28  ;;  %v2313_v51 = vadd.f32 %v6129_v17, %v2249_v55  ;;  %v2345_v39 = vadd.f32 %v6130_v52, %v2281_v12  ;;  %v2091_v31 = vadd.f32 %v2083_v57, %v2027_v2  ;;  %v6131_v35 = vld [vmem:[#allocation77_spill] sm:$0xff] }
 0x2e1   : > { %v2211_v37 = vmul.f32 %v3473_v18, %v2195_v62  ;;  %v2123_v3 = vadd.f32 %v2115_v48, %v2059_v0  ;;  %v2275_v16 = vmul.f32 %v3475_v13, %v2259_v61  ;;  %v2307_v38 = vmul.f32 %v3476_v46, %v2291_v58  ;;  %v6133_v62 = vld [vmem:[#allocation41_spill] sm:$0xff]  ;;  %v6135_v61 = vld [vmem:[#allocation62_spill] sm:$0xff]  ;;  %v6136_v18 = vld [vmem:[#allocation36_spill] sm:$0xff] }
 0x2e2   : > { %2426 = vst.msk [vmem:[#allocation3 + $0x30] sm:$0xff] %vm662_vm1, %v2418_v45  ;;  %v2377_v14 = vadd.f32 %v6131_v35, %v2313_v51  ;;  %v2409_v20 = vadd.f32 %v6132_v11, %v2345_v39  ;;  %v2155_v59 = vadd.f32 %v2147_v30, %v2091_v31  ;;  %v2339_v33 = vmul.f32 %v3477_v56, %v2323_v50  ;;  %v6134_v30 = vld [vmem:[#allocation44_spill] sm:$0xff] }
 0x2e3   : > { %v2187_v1 = vadd.f32 %v2179_v6, %v2123_v3  ;;  %v2371_v15 = vmul.f32 %v3478_v44, %v2355_v29  ;;  %v2403_v23 = vmul.f32 %v3479_v26, %v2387_v4 }
 0x2e4   : > { %v2417_v21 = vadd.f32 %v2409_v20, %v2377_v14  ;;  %v2219_v25 = vadd.f32 %v2211_v37, %v2155_v59 }
 0x2e5   : > { %v2251_v43 = vadd.f32 %v2243_v41, %v2187_v1 }
 0x2e6   : > { %2425 = vst.msk [vmem:[#allocation3 + $0x28] sm:$0xff] %vm662_vm1, %v2417_v21  ;;  %v2283_v27 = vadd.f32 %v2275_v16, %v2219_v25 }
 0x2e7   : > { %v2315_v40 = vadd.f32 %v2307_v38, %v2251_v43  ;;  %v3364_v43 = vld [vmem:[%s5591_s9] sm:$0xff]  }
 0x2e8   : > { %v2347_v9 = vadd.f32 %v2339_v33, %v2283_v27  ;;  %3322 = vmatprep.subr.bf16.mxu1 %v3364_v43 }
 0x2e9   : > { %v2434_v54 = vld [vmem:[#allocation3 + $0x30] sm:$0xff]  ;;  %v2379_v10 = vadd.f32 %v2371_v15, %v2315_v40  ;;  %3323 = vmatpush3.bf16.msra.mxu1 %v3364_v43 }
 0x2ea   : > { %v2449_v28 = vadd.f32 %v5977_v19, %v2434_v54  ;;  %v2411_v34 = vadd.f32 %v2403_v23, %v2347_v9  ;;  %v3248_v9 = vld [vmem:[%s5589_s7] ss:$0 sm:$0xff] }
 0x2ec   : > { %v2471_v24 = vsel %vm662_vm1, %v2449_v28, 0.0  ;;  %v2419_v32 = vadd.f32 %v2411_v34, %v2379_v10 }
 0x2ed   : > { %2472 = vadd.xlane.f32.xlu0 %v2471_v24  ;;  %v2433_v7 = vld [vmem:[#allocation3 + $0x28] sm:$0xff] }
 0x2ee   : > { %v2448_v45 = vadd.f32 %v5977_v19, %v2433_v7  ;;  %2427 = vst.msk [vmem:[#allocation3 + $0x38] sm:$0xff] %vm662_vm1, %v2419_v32  ;;  %v3249_v7 = vld [vmem:[%s5590_s8] ss:$0 sm:$0xff] }
 0x2f0   : > { %v2468_v22 = vsel %vm662_vm1, %v2448_v45, 0.0 }
 0x2f1   : > { %2469 = vadd.xlane.f32.xlu1 %v2468_v22 }
 0x2f5   : > { %v2435_v63 = vld [vmem:[#allocation3 + $0x38] sm:$0xff] }
 0x2f6   : > { %v2450_v42 = vadd.f32 %v5977_v19, %v2435_v63 }
 0x2f8   : > { %v2474_v57 = vsel %vm662_vm1, %v2450_v42, 0.0 }
 0x2f9   : > { %2475 = vadd.xlane.f32.xlu1 %v2474_v57 }
 0x308   : > { %v2455_v53 = vpop.xlane.xlu0 %2454 }
 0x309   : > { %v2477_v48 = vmul.f32 0.0625, %v2455_v53 }
 0x30b   : > { %v2485_v55 = vsub.f32 %v6133_v62, %v2477_v48 }
 0x30d   : > { %v2493_v8 = vmul.f32 %v2485_v55, %v2485_v55 }
 0x30f   : > { %v2501_v12 = vsel %vm662_vm1, %v2493_v8, 0.0 }
 0x310   : > { %2502 = vadd.xlane.f32.xlu0 %v2501_v12 }
 0x317   : > { %v2458_v2 = vpop.xlane.xlu1 %2457 }
 0x318   : > { %v2478_v36 = vmul.f32 0.0625, %v2458_v2 }
 0x31a   : > { %v2486_v49 = vsub.f32 %v6134_v30, %v2478_v36 }
 0x31c   : > { %v2494_v0 = vmul.f32 %v2486_v49, %v2486_v49 }
 0x31e   : > { %v2504_v5 = vsel %vm662_vm1, %v2494_v0, 0.0 }
 0x31f   : > { %2505 = vadd.xlane.f32.xlu1 %v2504_v5 }
 0x32e   : > { %v2461_v19 = vpop.xlane.xlu0 %2460 }
 0x32f   : > { %v2479_v6 = vmul.f32 0.0625, %v2461_v19 }
 0x331   : > { %v5405_v17 = vsub.f32 %v6135_v61, %v2479_v6 }
 0x333   : > { %v2495_v51 = vmul.f32 %v5405_v17, %v5405_v17 }
 0x335   : > { %v2507_v52 = vsel %vm662_vm1, %v2495_v51, 0.0 }
 0x336   : > { %2508 = vadd.xlane.f32.xlu0 %v2507_v52 }
 0x340   : > { %v2464_v39 = vpop.xlane.xlu1 %2463 }
 0x341   : > { %v2480_v31 = vmul.f32 0.0625, %v2464_v39 }
 0x343   : > { %v2488_v37 = vsub.f32 %v6136_v18, %v2480_v31 }
 0x345   : > { %v2496_v58 = vmul.f32 %v2488_v37, %v2488_v37 }
 0x347   : > { %v2510_v3 = vsel %vm662_vm1, %v2496_v58, 0.0 }
 0x348   : > { %2511 = vadd.xlane.f32.xlu1 %v2510_v3 }
 0x366   : > { %v2467_v60 = vpop.xlane.xlu0 %2466 }
 0x367   : > { %v2481_v41 = vmul.f32 0.0625, %v2467_v60 }
 0x369   : > { %v5413_v50 = vsub.f32 %v5332_v47, %v2481_v41 }
 0x36b   : > { %v2497_v35 = vmul.f32 %v5413_v50, %v5413_v50 }
 0x36d   : > { %v2513_v14 = vsel %vm662_vm1, %v2497_v35, 0.0 }
 0x36e   : > { %2514 = vadd.xlane.f32.xlu0 %v2513_v14 }
 0x376   : > { %v2473_v11 = vpop.xlane.xlu0 %2472 }
 0x377   : > { %v2483_v20 = vmul.f32 0.0625, %v2473_v11 }
 0x379   : > { %v5418_v59 = vsub.f32 %v2449_v28, %v2483_v20 }
 0x37a   : > { %v2470_v16 = vpop.xlane.xlu1 %2469 }
 0x37b   : > { %v2499_v13 = vmul.f32 %v5418_v59, %v5418_v59  ;;  %v2482_v46 = vmul.f32 0.0625, %v2470_v16 }
 0x37d   : > { %v2519_v1 = vsel %vm662_vm1, %v2499_v13, 0.0  ;;  %v5423_v47 = vsub.f32 %v2448_v45, %v2482_v46 }
 0x37e   : > { %2520 = vadd.xlane.f32.xlu0 %v2519_v1 }
 0x37f   : > { %v2498_v38 = vmul.f32 %v5423_v47, %v5423_v47 }
 0x381   : > { %v2516_v29 = vsel %vm662_vm1, %v2498_v38, 0.0 }
 0x382   : > { %v2476_v4 = vpop.xlane.xlu1 %2475  ;;  %2517 = vadd.xlane.f32.xlu1 %v2516_v29 }
 0x383   : > { %v2484_v21 = vmul.f32 0.0625, %v2476_v4 }
 0x385   : > { %v5428_v25 = vsub.f32 %v2450_v42, %v2484_v21 }
 0x387   : > { %v2500_v56 = vmul.f32 %v5428_v25, %v5428_v25 }
 0x389   : > { %v2522_v33 = vsel %vm662_vm1, %v2500_v56, 0.0 }
 0x38a   : > { %2523 = vadd.xlane.f32.xlu1 %v2522_v33 }
 0x399   : > { %v2503_v54 = vpop.xlane.xlu0 %2502 }
 0x39a   : > { %v2525_v27 = vmul.f32 0.0625, %v2503_v54 }
 0x39c   : > { %v2533_v44 = vadd.f32 1e-06, %v2525_v27  ;;  %v3368_v27 = vld [vmem:[%s5593_s11] sm:$0xff]  }
 0x39e   : > { %3385 = vrsqrt.f32 %v2533_v44  ;;  %v5466_v44 = vld [vmem:[%s5592_s10] ss:$0 sm:$0xff] }
 0x3a8   : > { %v2506_v15 = vpop.xlane.xlu1 %2505 }
 0x3a9   : > { %v2526_v26 = vmul.f32 0.0625, %v2506_v15 }
 0x3ab   : > { %v2534_v23 = vadd.f32 1e-06, %v2526_v26  ;;  %v3386_v28 = vpop.eup %3385 }
 0x3ac   : > { %v2549_v40 = vmul.f32 %v3386_v28, %v2485_v55 }
 0x3ad   : > { %3387 = vrsqrt.f32 %v2534_v23 }
 0x3ae   : > { %v2563_v32 = vmul.f32 %v3248_v9, %v2549_v40 }
 0x3b0   : > { %v2577_v63 = vadd.f32 %v3249_v7, %v2563_v32 }
 0x3ba   : > { %v3388_v24 = vpop.eup %3387 }
 0x3bb   : > { %v2550_v34 = vmul.f32 %v3388_v24, %v2486_v49 }
 0x3bd   : > { %v2564_v45 = vmul.f32 %v3248_v9, %v2550_v34 }
 0x3bf   : > { %v2509_v10 = vpop.xlane.xlu0 %2508  ;;  %v2578_v42 = vadd.f32 %v3249_v7, %v2564_v45 }
 0x3c0   : > { %v2527_v22 = vmul.f32 0.0625, %v2509_v10 }
 0x3c1   : > { %v2585_v57 = vpack.c.bf16 %v2578_v42, %v2577_v63 }
 0x3c2   : > { %v2535_v53 = vadd.f32 1e-06, %v2527_v22 }
 0x3c3   : > { %3324 = vmatprep.mubr.msk.bf16.mxu1 %vm662_vm1, %v2585_v57 }
 0x3c4   : > { %3389 = vrsqrt.f32 %v2535_v53 }
 0x3d1   : > { %v2512_v48 = vpop.xlane.xlu1 %2511  ;;  %v3390_v8 = vpop.eup %3389 }
 0x3d2   : > { %v2528_v62 = vmul.f32 0.0625, %v2512_v48  ;;  %v2551_v12 = vmul.f32 %v3390_v8, %v5405_v17 }
 0x3d4   : > { %v2536_v55 = vadd.f32 1e-06, %v2528_v62  ;;  %v2565_v30 = vmul.f32 %v3248_v9, %v2551_v12 }
 0x3d6   : > { %3391 = vrsqrt.f32 %v2536_v55  ;;  %v2579_v0 = vadd.f32 %v3249_v7, %v2565_v30 }
 0x3e3   : > { %v3392_v2 = vpop.eup %3391 }
 0x3e4   : > { %v2552_v36 = vmul.f32 %v3392_v2, %v2488_v37 }
 0x3e6   : > { %v2566_v49 = vmul.f32 %v3248_v9, %v2552_v36 }
 0x3e8   : > { %v2580_v5 = vadd.f32 %v3249_v7, %v2566_v49 }
 0x3ea   : > { %v2586_v19 = vpack.c.bf16 %v2580_v5, %v2579_v0 }
 0x3ec   : > { %3325 = vmatmul.mubr.msk.bf16.vlgmr.msra.gmra.mxu1 %vm662_vm1, %v2586_v19 }
 0x3f7   : > { %v2515_v6 = vpop.xlane.xlu0 %2514 }
 0x3f8   : > { %v2529_v61 = vmul.f32 0.0625, %v2515_v6 }
 0x3fa   : > { %v2537_v51 = vadd.f32 1e-06, %v2529_v61 }
 0x3fc   : > { %3393 = vrsqrt.f32 %v2537_v51 }
 0x407   : > { %v2521_v52 = vpop.xlane.xlu0 %2520 }
 0x408   : > { %v2531_v39 = vmul.f32 0.0625, %v2521_v52 }
 0x409   : > { %v3394_v60 = vpop.eup %3393 }
 0x40a   : > { %v2539_v18 = vadd.f32 1e-06, %v2531_v39  ;;  %v2553_v35 = vmul.f32 %v3394_v60, %v5413_v50 }
 0x40b   : > { %v2518_v31 = vpop.xlane.xlu1 %2517 }
 0x40c   : > { %v2530_v58 = vmul.f32 0.0625, %v2518_v31  ;;  %3395 = vrsqrt.f32 %v2539_v18  ;;  %v2567_v11 = vmul.f32 %v3248_v9, %v2553_v35 }
 0x40e   : > { %v2538_v3 = vadd.f32 1e-06, %v2530_v58  ;;  %v2581_v1 = vadd.f32 %v3249_v7, %v2567_v11 }
 0x410   : > { %3397 = vrsqrt.f32 %v2538_v3 }
 0x413   : > { %v2524_v17 = vpop.xlane.xlu1 %2523 }
 0x414   : > { %v2532_v37 = vmul.f32 0.0625, %v2524_v17 }
 0x416   : > { %v2540_v41 = vadd.f32 1e-06, %v2532_v37 }
 0x418   : > { %3399 = vrsqrt.f32 %v2540_v41 }
 0x419   : > { %v3396_v14 = vpop.eup %3395 }
 0x41a   : > { %v2555_v46 = vmul.f32 %v3396_v14, %v5418_v59  ;;  %v3366_v59 = vld [vmem:[%s5593_s11 + $0x10] sm:$0xff]  }
 0x41c   : > { %v2569_v4 = vmul.f32 %v3248_v9, %v2555_v46 }
 0x41d   : > { %v3398_v20 = vpop.eup %3397 }
 0x41e   : > { %v2554_v13 = vmul.f32 %v3398_v20, %v5423_v47  ;;  %v2583_v43 = vadd.f32 %v3249_v7, %v2569_v4  ;;  %v3365_v47 = vld [vmem:[%s5593_s11 + $0x18] sm:$0xff]  }
 0x41f   : > { %3332 = vmatprep.subr.bf16.mxu1 %v3365_v47 }
 0x420   : > { %v2568_v16 = vmul.f32 %v3248_v9, %v2554_v13  ;;  %3333 = vmatpush3.bf16.msra.mxu1 %v3365_v47 }
 0x421   : > { %3334 = vmatprep.subr.bf16.mxu1 %v3366_v59 }
 0x422   : > { %v2582_v38 = vadd.f32 %v3249_v7, %v2568_v16 }
 0x424   : > { %v2587_v29 = vpack.c.bf16 %v2582_v38, %v2581_v1  ;;  %3335 = vmatpush3.bf16.msra.mxu1 %v3366_v59 }
 0x425   : > { %v3400_v21 = vpop.eup %3399 }
 0x426   : > { %3328 = vmatprep.mubr.msk.bf16.mxu1 %vm662_vm1, %v2587_v29  ;;  %v2556_v56 = vmul.f32 %v3400_v21, %v5428_v25  ;;  %v3367_v25 = vld [vmem:[%s5593_s11 + $0x8] sm:$0xff]  }
 0x427   : > { %3336 = vmatprep.subr.bf16.mxu1 %v3367_v25 }
 0x428   : > { %v2570_v33 = vmul.f32 %v3248_v9, %v2556_v56  ;;  %3337 = vmatpush3.bf16.msra.mxu1 %v3367_v25 }
 0x429   : > { %3338 = vmatprep.subr.bf16.mxu1 %v3368_v27 }
 0x42a   : > { %v2584_v50 = vadd.f32 %v3249_v7, %v2570_v33 }
 0x42c   : > { %v2588_v54 = vpack.c.bf16 %v2584_v50, %v2583_v43  ;;  %3339 = vmatpush3.bf16.msra.mxu1 %v3368_v27 }
 0x42e   : > { %3329 = vmatmul.mubr.msk.bf16.gmra.mxu1 %vm662_vm1, %v2588_v54 }
 0x4ac   : > { %v3326_v15 = vpop.f32.mrf.mxu1 }
 0x4ad   : > { %v2659_v26 = vadd.f32 %v3326_v15, %v5466_v44 }
 0x4ae   : > { %v2650_v23 = vpop.f32.mrf.mxu1 }
 0x4af   : > { %v2691_v28 = vmul.f32 0.044715, %v2659_v26  ;;  %v2651_v40 = vadd.f32 %v5466_v44, %v2650_v23  ;;  %v2683_v37 = vmul.f32 0.5, %v2659_v26 }
 0x4b0   : > { %v3327_v9 = vpop.f32.mrf.mxu1 }
 0x4b1   : > { %v2699_v24 = vmul.f32 %v2691_v28, %v2659_v26  ;;  %v2689_v10 = vmul.f32 0.044715, %v2651_v40  ;;  %v2662_v34 = vadd.f32 %v3327_v9, %v5466_v44  ;;  %v2681_v58 = vmul.f32 0.5, %v2651_v40 }
 0x4b2   : > { %v2653_v32 = vpop.f32.mrf.mxu1 }
 0x4b3   : > { %v2707_v7 = vmul.f32 %v2699_v24, %v2659_v26  ;;  %v2697_v45 = vmul.f32 %v2689_v10, %v2651_v40  ;;  %v2692_v22 = vmul.f32 0.044715, %v2662_v34  ;;  %v2654_v63 = vadd.f32 %v5466_v44, %v2653_v32 }
 0x4b4   : > { %v2684_v18 = vmul.f32 0.5, %v2662_v34 }
 0x4b5   : > { %v2715_v42 = vadd.f32 %v2707_v7, %v2659_v26  ;;  %v2705_v57 = vmul.f32 %v2697_v45, %v2651_v40  ;;  %v2700_v53 = vmul.f32 %v2692_v22, %v2662_v34  ;;  %v2690_v48 = vmul.f32 0.044715, %v2654_v63 }
 0x4b6   : > { %v2682_v3 = vmul.f32 0.5, %v2654_v63 }
 0x4b7   : > { %v2723_v62 = vmul.f32 0.7978846, %v2715_v42  ;;  %v2713_v55 = vadd.f32 %v2705_v57, %v2651_v40  ;;  %v2708_v8 = vmul.f32 %v2700_v53, %v2662_v34  ;;  %v2698_v12 = vmul.f32 %v2690_v48, %v2654_v63 }
 0x4b9   : > { %v2721_v2 = vmul.f32 0.7978846, %v2713_v55  ;;  %v2716_v36 = vadd.f32 %v2708_v8, %v2662_v34  ;;  %v2706_v30 = vmul.f32 %v2698_v12, %v2654_v63  ;;  %3401 = vtanh.f32 %v2723_v62 }
 0x4bb   : > { %v2724_v49 = vmul.f32 0.7978846, %v2716_v36  ;;  %3403 = vtanh.f32 %v2721_v2  ;;  %v2714_v0 = vadd.f32 %v2706_v30, %v2654_v63 }
 0x4bd   : > { %3405 = vtanh.f32 %v2724_v49  ;;  %v2722_v5 = vmul.f32 0.7978846, %v2714_v0 }
 0x4bf   : > { %3407 = vtanh.f32 %v2722_v5 }
 0x4c6   : > { %v3402_v19 = vpop.eup %3401 }
 0x4c7   : > { %v2739_v31 = vadd.f32 1.0, %v3402_v19  ;;  %v3256_v19 = vld [vmem:[%s5594_s12] ss:$0 sm:$0xff] }
 0x4c8   : > { %v3404_v6 = vpop.eup %3403 }
 0x4c9   : > { %v2737_v52 = vadd.f32 1.0, %v3404_v6  ;;  %v2747_v14 = vmul.f32 %v2739_v31, %v2683_v37 }
 0x4ca   : > { %v3406_v61 = vpop.eup %3405 }
 0x4cb   : > { %v2740_v51 = vadd.f32 1.0, %v3406_v61  ;;  %v2745_v41 = vmul.f32 %v2737_v52, %v2681_v58  ;;  %v3265_v61 = vld [vmem:[%s5595_s13] ss:$0 sm:$0xff] }
 0x4cc   : > { %v3408_v39 = vpop.eup %3407 }
 0x4cd   : > { %v2738_v17 = vadd.f32 1.0, %v3408_v39  ;;  %v2748_v60 = vmul.f32 %v2740_v51, %v2684_v18 }
 0x4cf   : > { %v2746_v35 = vmul.f32 %v2738_v17, %v2682_v3  ;;  %v2754_v20 = vpack.c.bf16 %v2748_v60, %v2747_v14  ;;  %v6137_v17 = vld [vmem:[#allocation12_spill] sm:$0xff] }
 0x4d1   : > { %v2753_v11 = vpack.c.bf16 %v2746_v35, %v2745_v41 }
 0x4d3   : > { %3340 = vmatprep.mubr.msk.bf16.mxu1 %vm2796_vm4, %v2753_v11  ;;  %v6138_v11 = vld [vmem:[#allocation10_spill] sm:$0xff] }
 0x4d4   : > { %3341 = vmatmul.mubr.msk.bf16.vlgmr.msra.gmra.mxu1 %vm2796_vm4, %v2754_v20 }
 0x4ee   : > { %v3330_v13 = vpop.f32.mrf.mxu1 }
 0x4ef   : > { %v2675_v16 = vadd.f32 %v3330_v13, %v5466_v44 }
 0x4f0   : > { %v2666_v1 = vpop.f32.mrf.mxu1 }
 0x4f1   : > { %v2695_v46 = vmul.f32 0.044715, %v2675_v16  ;;  %v2667_v38 = vadd.f32 %v5466_v44, %v2666_v1  ;;  %v2687_v12 = vmul.f32 0.5, %v2675_v16 }
 0x4f2   : > { %v3331_v29 = vpop.f32.mrf.mxu1 }
 0x4f3   : > { %v2703_v4 = vmul.f32 %v2695_v46, %v2675_v16  ;;  %v2693_v21 = vmul.f32 0.044715, %v2667_v38  ;;  %v2678_v56 = vadd.f32 %v3331_v29, %v5466_v44  ;;  %v2685_v62 = vmul.f32 0.5, %v2667_v38  ;;  %v6140_v29 = vld [vmem:[#allocation11_spill] sm:$0xff] }
 0x4f4   : > { %v2669_v33 = vpop.f32.mrf.mxu1 }
 0x4f5   : > { %v2711_v43 = vmul.f32 %v2703_v4, %v2675_v16  ;;  %v2701_v50 = vmul.f32 %v2693_v21, %v2667_v38  ;;  %v2696_v54 = vmul.f32 0.044715, %v2678_v56  ;;  %v2670_v47 = vadd.f32 %v5466_v44, %v2669_v33 }
 0x4f6   : > { %v2688_v53 = vmul.f32 0.5, %v2678_v56 }
 0x4f7   : > { %v2719_v59 = vadd.f32 %v2711_v43, %v2675_v16  ;;  %v2709_v25 = vmul.f32 %v2701_v50, %v2667_v38  ;;  %v2704_v27 = vmul.f32 %v2696_v54, %v2678_v56  ;;  %v2694_v15 = vmul.f32 0.044715, %v2670_v47  ;;  %v6139_v16 = vld [vmem:[#allocation13_spill] sm:$0xff] }
 0x4f8   : > { %v2686_v55 = vmul.f32 0.5, %v2670_v47 }
 0x4f9   : > { %v2717_v26 = vadd.f32 %v2709_v25, %v2667_v38  ;;  %v2712_v23 = vmul.f32 %v2704_v27, %v2678_v56  ;;  %v2702_v28 = vmul.f32 %v2694_v15, %v2670_v47  ;;  %v2727_v40 = vmul.f32 0.7978846, %v2719_v59 }
 0x4fb   : > { %v2725_v9 = vmul.f32 0.7978846, %v2717_v26  ;;  %v2720_v24 = vadd.f32 %v2712_v23, %v2678_v56  ;;  %v2710_v10 = vmul.f32 %v2702_v28, %v2670_v47  ;;  %v6141_v26 = vld [vmem:[#allocation15_spill] sm:$0xff] }
 0x4fd   : > { %3409 = vtanh.f32 %v2725_v9  ;;  %v2728_v34 = vmul.f32 0.7978846, %v2720_v24  ;;  %v2718_v32 = vadd.f32 %v2710_v10, %v2670_v47  ;;  %v6142_v24 = vld [vmem:[#allocation43_spill] sm:$0xff] }
 0x4fe   : > { %3411 = vtanh.f32 %v2727_v40 }
 0x4ff   : > { %3413 = vtanh.f32 %v2728_v34  ;;  %v2726_v7 = vmul.f32 0.7978846, %v2718_v32  ;;  %v6143_v34 = vld [vmem:[#allocation42_spill] sm:$0xff] }
 0x501   : > { %3415 = vtanh.f32 %v2726_v7 }
 0x50a   : > { %v3410_v45 = vpop.eup %3409 }
 0x50b   : > { %v3412_v44 = vpop.eup %3411  ;;  %v2741_v63 = vadd.f32 1.0, %v3410_v45 }
 0x50c   : > { %v3414_v22 = vpop.eup %3413  ;;  %v2743_v48 = vadd.f32 1.0, %v3412_v44  ;;  %v6144_v44 = vld [vmem:[#allocation51_spill] sm:$0xff] }
 0x50d   : > { %v2744_v42 = vadd.f32 1.0, %v3414_v22  ;;  %v2749_v36 = vmul.f32 %v2741_v63, %v2685_v62 }
 0x50e   : > { %v3416_v57 = vpop.eup %3415  ;;  %v2751_v49 = vmul.f32 %v2743_v48, %v2687_v12 }
 0x50f   : > { %v2742_v8 = vadd.f32 1.0, %v3416_v57  ;;  %v2752_v2 = vmul.f32 %v2744_v42, %v2688_v53 }
 0x511   : > { %v2750_v30 = vmul.f32 %v2742_v8, %v2686_v55  ;;  %v2756_v5 = vpack.c.bf16 %v2752_v2, %v2751_v49 }
 0x513   : > { %v2755_v0 = vpack.c.bf16 %v2750_v30, %v2749_v36 }
 0x515   : > { %3344 = vmatprep.mubr.msk.bf16.mxu1 %vm2796_vm4, %v2755_v0 }
 0x516   : > { %3345 = vmatmul.mubr.msk.bf16.gmra.mxu1 %vm2796_vm4, %v2756_v5 }
 0x594   : > { %v3342_v6 = vpop.f32.mrf.mxu1 }
 0x595   : > { %v2852_v51 = vadd.f32 %v3342_v6, %v3256_v19 }
 0x596   : > { %v2843_v52 = vpop.f32.mrf.mxu1 }
 0x597   : > { %v2883_v39 = vmul.f32 %v3265_v61, %v2852_v51  ;;  %v2844_v31 = vadd.f32 %v3256_v19, %v2843_v52 }
 0x598   : > { %v3343_v18 = vpop.f32.mrf.mxu1 }
 0x599   : > { %v2881_v58 = vmul.f32 %v3265_v61, %v2844_v31  ;;  %v2855_v3 = vadd.f32 %v3343_v18, %v3256_v19  ;;  %v2891_v37 = vadd.f32 %v2883_v39, %v6137_v17 }
 0x59a   : > { %v2846_v60 = vpop.f32.mrf.mxu1 }
 0x59b   : > { %v2884_v41 = vmul.f32 %v3265_v61, %v2855_v3  ;;  %v2847_v35 = vadd.f32 %v3256_v19, %v2846_v60  ;;  %v2905_v14 = vsel %vm662_vm1, %v2891_v37, 0.0  ;;  %v2889_v20 = vadd.f32 %v2881_v58, %v6138_v11 }
 0x59c   : > { %2906 = vadd.xlane.f32.xlu0 %v2905_v14 }
 0x59d   : > { %v2882_v13 = vmul.f32 %v3265_v61, %v2847_v35  ;;  %v2892_v1 = vadd.f32 %v2884_v41, %v6139_v16  ;;  %v2899_v38 = vsel %vm662_vm1, %v2889_v20, 0.0 }
 0x59f   : > { %v2908_v46 = vsel %vm662_vm1, %v2892_v1, 0.0  ;;  %v2890_v4 = vadd.f32 %v2882_v13, %v6140_v29 }
 0x5a0   : > { %2909 = vadd.xlane.f32.xlu1 %v2908_v46  ;;  %2900 = vadd.xlane.f32.xlu0 %v2899_v38 }
 0x5a1   : > { %v2902_v21 = vsel %vm662_vm1, %v2890_v4, 0.0 }
 0x5a4   : > { %2903 = vadd.xlane.f32.xlu1 %v2902_v21 }
 0x5d6   : > { %v3346_v56 = vpop.f32.mrf.mxu1 }
 0x5d7   : > { %v2868_v33 = vadd.f32 %v3346_v56, %v3256_v19 }
 0x5d8   : > { %v2859_v43 = vpop.f32.mrf.mxu1 }
 0x5d9   : > { %v2860_v50 = vadd.f32 %v3256_v19, %v2859_v43  ;;  %v2887_v47 = vmul.f32 %v3265_v61, %v2868_v33 }
 0x5da   : > { %v3347_v54 = vpop.f32.mrf.mxu1 }
 0x5db   : > { %v2885_v59 = vmul.f32 %v3265_v61, %v2860_v50  ;;  %v2871_v25 = vadd.f32 %v3347_v54, %v3256_v19  ;;  %v2895_v10 = vadd.f32 %v2887_v47, %v6142_v24  ;;  %v3267_v24 = vld [vmem:[%s5597_s15] ss:$0 sm:$0xff] }
 0x5dc   : > { %v2862_v27 = vpop.f32.mrf.mxu1 }
 0x5dd   : > { %v2863_v15 = vadd.f32 %v3256_v19, %v2862_v27  ;;  %v2893_v23 = vadd.f32 %v2885_v59, %v6141_v26  ;;  %v2888_v28 = vmul.f32 %v3265_v61, %v2871_v25  ;;  %v2917_v45 = vsel %vm662_vm1, %v2895_v10, 0.0 }
 0x5df   : > { %v2886_v40 = vmul.f32 %v3265_v61, %v2863_v15  ;;  %v2911_v9 = vsel %vm662_vm1, %v2893_v23, 0.0  ;;  %v2896_v22 = vadd.f32 %v2888_v28, %v6144_v44 }
 0x5e0   : > { %2912 = vadd.xlane.f32.xlu0 %v2911_v9 }
 0x5e1   : > { %v2894_v32 = vadd.f32 %v2886_v40, %v6143_v34  ;;  %v2920_v63 = vsel %vm662_vm1, %v2896_v22, 0.0  ;;  %v3266_v40 = vld [vmem:[%s5596_s14] ss:$0 sm:$0xff] }
 0x5e3   : > { %v2914_v7 = vsel %vm662_vm1, %v2894_v32, 0.0 }
 0x5e4   : > { %2915 = vadd.xlane.f32.xlu1 %v2914_v7  ;;  %2918 = vadd.xlane.f32.xlu0 %v2917_v45 }
 0x5e8   : > { %2921 = vadd.xlane.f32.xlu1 %v2920_v63 }
 0x625   : > { %v2907_v42 = vpop.xlane.xlu0 %2906 }
 0x626   : > { %v2925_v57 = vmul.f32 0.0625, %v2907_v42 }
 0x628   : > { %v5502_v53 = vsub.f32 %v2891_v37, %v2925_v57 }
 0x629   : > { %v2910_v48 = vpop.xlane.xlu1 %2909  ;;  %v2901_v62 = vpop.xlane.xlu0 %2900 }
 0x62a   : > { %v2926_v55 = vmul.f32 0.0625, %v2910_v48  ;;  %v2923_v8 = vmul.f32 0.0625, %v2901_v62  ;;  %v2941_v12 = vmul.f32 %v5502_v53, %v5502_v53 }
 0x62c   : > { %v5506_v2 = vsub.f32 %v2892_v1, %v2926_v55  ;;  %v5508_v36 = vsub.f32 %v2889_v20, %v2923_v8  ;;  %v2953_v30 = vsel %vm662_vm1, %v2941_v12, 0.0 }
 0x62d   : > { %v2904_v49 = vpop.xlane.xlu1 %2903  ;;  %2954 = vadd.xlane.f32.xlu0 %v2953_v30 }
 0x62e   : > { %v2924_v0 = vmul.f32 0.0625, %v2904_v49  ;;  %v2942_v5 = vmul.f32 %v5506_v2, %v5506_v2  ;;  %v2939_v19 = vmul.f32 %v5508_v36, %v5508_v36 }
 0x630   : > { %v5515_v6 = vsub.f32 %v2890_v4, %v2924_v0  ;;  %v2956_v61 = vsel %vm662_vm1, %v2942_v5, 0.0  ;;  %v2947_v51 = vsel %vm662_vm1, %v2939_v19, 0.0 }
 0x631   : > { %2957 = vadd.xlane.f32.xlu1 %v2956_v61  ;;  %2948 = vadd.xlane.f32.xlu0 %v2947_v51 }
 0x632   : > { %v2940_v52 = vmul.f32 %v5515_v6, %v5515_v6 }
 0x634   : > { %v2950_v39 = vsel %vm662_vm1, %v2940_v52, 0.0 }
 0x635   : > { %2951 = vadd.xlane.f32.xlu1 %v2950_v39 }
 0x669   : > { %v2913_v31 = vpop.xlane.xlu0 %2912 }
 0x66a   : > { %v2927_v18 = vmul.f32 0.0625, %v2913_v31 }
 0x66c   : > { %v5522_v58 = vsub.f32 %v2893_v23, %v2927_v18 }
 0x66d   : > { %v2916_v3 = vpop.xlane.xlu1 %2915  ;;  %v2919_v17 = vpop.xlane.xlu0 %2918 }
 0x66e   : > { %v2928_v37 = vmul.f32 0.0625, %v2916_v3  ;;  %v2929_v60 = vmul.f32 0.0625, %v2919_v17  ;;  %v2943_v41 = vmul.f32 %v5522_v58, %v5522_v58 }
 0x670   : > { %v5526_v35 = vsub.f32 %v2894_v32, %v2928_v37  ;;  %v5528_v14 = vsub.f32 %v2895_v10, %v2929_v60  ;;  %v2959_v11 = vsel %vm662_vm1, %v2943_v41, 0.0 }
 0x671   : > { %v2922_v20 = vpop.xlane.xlu1 %2921  ;;  %2960 = vadd.xlane.f32.xlu0 %v2959_v11 }
 0x672   : > { %v2930_v13 = vmul.f32 0.0625, %v2922_v20  ;;  %v2944_v16 = vmul.f32 %v5526_v35, %v5526_v35  ;;  %v2945_v1 = vmul.f32 %v5528_v14, %v5528_v14 }
 0x674   : > { %v5535_v46 = vsub.f32 %v2896_v22, %v2930_v13  ;;  %v2962_v38 = vsel %vm662_vm1, %v2944_v16, 0.0  ;;  %v2965_v29 = vsel %vm662_vm1, %v2945_v1, 0.0 }
 0x675   : > { %2963 = vadd.xlane.f32.xlu1 %v2962_v38  ;;  %2966 = vadd.xlane.f32.xlu0 %v2965_v29 }
 0x676   : > { %v2946_v4 = vmul.f32 %v5535_v46, %v5535_v46 }
 0x678   : > { %v2968_v21 = vsel %vm662_vm1, %v2946_v4, 0.0 }
 0x679   : > { %2969 = vadd.xlane.f32.xlu1 %v2968_v21 }
 0x6b6   : > { %v2955_v56 = vpop.xlane.xlu0 %2954 }
 0x6b7   : > { %v2973_v33 = vmul.f32 0.0625, %v2955_v56 }
 0x6b9   : > { %v2981_v43 = vadd.f32 1e-06, %v2973_v33 }
 0x6ba   : > { %v2958_v50 = vpop.xlane.xlu1 %2957  ;;  %v2949_v54 = vpop.xlane.xlu0 %2948 }
 0x6bb   : > { %3417 = vrsqrt.f32 %v2981_v43  ;;  %v2974_v47 = vmul.f32 0.0625, %v2958_v50  ;;  %v2971_v59 = vmul.f32 0.0625, %v2949_v54 }
 0x6bd   : > { %v2982_v25 = vadd.f32 1e-06, %v2974_v47  ;;  %v2979_v27 = vadd.f32 1e-06, %v2971_v59 }
 0x6be   : > { %v2952_v15 = vpop.xlane.xlu1 %2951 }
 0x6bf   : > { %3419 = vrsqrt.f32 %v2982_v25  ;;  %v2972_v26 = vmul.f32 0.0625, %v2952_v15 }
 0x6c0   : > { %3421 = vrsqrt.f32 %v2979_v27 }
 0x6c1   : > { %v2980_v23 = vadd.f32 1e-06, %v2972_v26 }
 0x6c3   : > { %3423 = vrsqrt.f32 %v2980_v23 }
 0x6c8   : > { %v3418_v28 = vpop.eup %3417 }
 0x6c9   : > { %v2997_v9 = vmul.f32 %v3418_v28, %v5502_v53 }
 0x6cb   : > { %v3011_v10 = vmul.f32 %v3266_v40, %v2997_v9 }
 0x6cc   : > { %v3420_v34 = vpop.eup %3419 }
 0x6cd   : > { %v3422_v32 = vpop.eup %3421  ;;  %v3025_v7 = vadd.f32 %v3267_v24, %v3011_v10  ;;  %v2998_v45 = vmul.f32 %v3420_v34, %v5506_v2 }
 0x6ce   : > { %v2995_v44 = vmul.f32 %v3422_v32, %v5508_v36 }
 0x6cf   : > { %v3282_v22 = vpack.c.bf16 %v3025_v7, %v3025_v7  ;;  %v3012_v63 = vmul.f32 %v3266_v40, %v2998_v45 }
 0x6d0   : > { %v3424_v42 = vpop.eup %3423  ;;  %v3009_v57 = vmul.f32 %v3266_v40, %v2995_v44 }
 0x6d1   : > { %3066 = vst.msk [vmem:[%s5555_s17 + $0x8] sm:$0xf] %vm3063_vm5, %v3282_v22  ;;  %v3026_v53 = vadd.f32 %v3267_v24, %v3012_v63  ;;  %v2996_v48 = vmul.f32 %v3424_v42, %v5515_v6 }
 0x6d2   : > { %v3023_v62 = vadd.f32 %v3267_v24, %v3009_v57 }
 0x6d3   : > { %v3283_v55 = vpack.c.bf16 %v3026_v53, %v3026_v53  ;;  %v3010_v8 = vmul.f32 %v3266_v40, %v2996_v48 }
 0x6d4   : > { %v3280_v12 = vpack.c.bf16 %v3023_v62, %v3023_v62 }
 0x6d5   : > { %3067 = vst.msk [vmem:[%s5555_s17 + $0xc] sm:$0xf] %vm3063_vm5, %v3283_v55  ;;  %v3024_v2 = vadd.f32 %v3267_v24, %v3010_v8 }
 0x6d6   : > { %3064 = vst.msk [vmem:[%s5555_s17] sm:$0xf] %vm3063_vm5, %v3280_v12 }
 0x6d7   : > { %v3281_v36 = vpack.c.bf16 %v3024_v2, %v3024_v2 }
 0x6d9   : > { %3065 = vst.msk [vmem:[%s5555_s17 + $0x4] sm:$0xf] %vm3063_vm5, %v3281_v36 }
 0x6fa   : > { %v2961_v30 = vpop.xlane.xlu0 %2960 }
 0x6fb   : > { %v2975_v49 = vmul.f32 0.0625, %v2961_v30 }
 0x6fd   : > { %v2983_v0 = vadd.f32 1e-06, %v2975_v49 }
 0x6fe   : > { %v2964_v5 = vpop.xlane.xlu1 %2963  ;;  %v2967_v19 = vpop.xlane.xlu0 %2966 }
 0x6ff   : > { %3425 = vrsqrt.f32 %v2983_v0  ;;  %v2976_v61 = vmul.f32 0.0625, %v2964_v5  ;;  %v2977_v6 = vmul.f32 0.0625, %v2967_v19 }
 0x701   : > { %v2984_v51 = vadd.f32 1e-06, %v2976_v61  ;;  %v2985_v52 = vadd.f32 1e-06, %v2977_v6 }
 0x702   : > { %v2970_v39 = vpop.xlane.xlu1 %2969 }
 0x703   : > { %3427 = vrsqrt.f32 %v2984_v51  ;;  %v2978_v31 = vmul.f32 0.0625, %v2970_v39 }
 0x704   : > { %3429 = vrsqrt.f32 %v2985_v52 }
 0x705   : > { %v2986_v18 = vadd.f32 1e-06, %v2978_v31 }
 0x707   : > { %3431 = vrsqrt.f32 %v2986_v18 }
 0x70c   : > { %v3426_v3 = vpop.eup %3425 }
 0x70d   : > { %v2999_v17 = vmul.f32 %v3426_v3, %v5522_v58 }
 0x70f   : > { %v3013_v37 = vmul.f32 %v3266_v40, %v2999_v17 }
 0x710   : > { %v3428_v60 = vpop.eup %3427 }
 0x711   : > { %v3430_v41 = vpop.eup %3429  ;;  %v3027_v11 = vadd.f32 %v3267_v24, %v3013_v37  ;;  %v3000_v20 = vmul.f32 %v3428_v60, %v5526_v35 }
 0x712   : > { %v3001_v13 = vmul.f32 %v3430_v41, %v5528_v14 }
 0x713   : > { %v3284_v16 = vpack.c.bf16 %v3027_v11, %v3027_v11  ;;  %v3014_v1 = vmul.f32 %v3266_v40, %v3000_v20 }
 0x714   : > { %v3432_v38 = vpop.eup %3431  ;;  %v3015_v29 = vmul.f32 %v3266_v40, %v3001_v13 }
 0x715   : > { %3068 = vst.msk [vmem:[%s5555_s17 + $0x10] sm:$0xf] %vm3063_vm5, %v3284_v16  ;;  %v3028_v4 = vadd.f32 %v3267_v24, %v3014_v1  ;;  %v3002_v58 = vmul.f32 %v3432_v38, %v5535_v46 }
 0x716   : > { %v3029_v21 = vadd.f32 %v3267_v24, %v3015_v29 }
 0x717   : > { %v3285_v56 = vpack.c.bf16 %v3028_v4, %v3028_v4  ;;  %v3016_v33 = vmul.f32 %v3266_v40, %v3002_v58 }
 0x718   : > { %v3286_v43 = vpack.c.bf16 %v3029_v21, %v3029_v21 }
 0x719   : > { %3069 = vst.msk [vmem:[%s5555_s17 + $0x14] sm:$0xf] %vm3063_vm5, %v3285_v56  ;;  %v3030_v50 = vadd.f32 %v3267_v24, %v3016_v33 }
 0x71a   : > { %3070 = vst.msk [vmem:[%s5555_s17 + $0x18] sm:$0xf] %vm3063_vm5, %v3286_v43 }
 0x71b   : > { %v3287_v35 = vpack.c.bf16 %v3030_v50, %v3030_v50 }
 0x71d   : > { %3071 = vst.msk [vmem:[%s5555_s17 + $0x1c] sm:$0xf] %vm3063_vm5, %v3287_v35 }
 0x71e PF: > { %s26_s21 = sadd.s32 1, %s3486_s21  }
 0x71f   : > { %p23_p4 = scmp.ge.s32.totalorder %s26_s21, 4  }
 0x721   :  { %25 = sbr.rel (!%p23_p4) target bundleno = 2 (0x2), region = 173 }

// kernel: forward.7
= control target key start
LH: loop header
LB: loop body
LE: loop exit
PB: predicated region body
PF: predicated region fallthrough
CT: control target
= control target key end

     0   :  { %s2536_s0 = inlined_call_operand.vmem [shape: bf16[2,1,256], index: 0, kind: input, shape index: {}]   ;;  %s2537_s1 = inlined_call_operand.vmem [shape: bf16[256,128], index: 1, kind: input, shape index: {}]   ;;  %s2538_s2 = inlined_call_operand.vmem [shape: f32[1,128], index: 2, kind: input, shape index: {}]   ;;  %s2539_s3 = inlined_call_operand.vmem [shape: f32[1,1,1,128], index: 3, kind: input, shape index: {}]   ;;  %s2540_s4 = inlined_call_operand.vmem [shape: f32[1,128], index: 4, kind: input, shape index: {}]   ;;  %s2541_s5 = inlined_call_operand.vmem [shape: f32[1,128], index: 5, kind: input, shape index: {}]   ;;  %s2542_s6 = inlined_call_operand.vmem [shape: f32[1,128], index: 6, kind: input, shape index: {}]   ;;  %s2543_s7 = inlined_call_operand.vmem [shape: bf16[128,512], index: 7, kind: input, shape index: {}]   ;;  %s2544_s8 = inlined_call_operand.vmem [shape: f32[1,512], index: 8, kind: input, shape index: {}]   ;;  %s2545_s9 = inlined_call_operand.vmem [shape: bf16[512,128], index: 9, kind: input, shape index: {}]   ;;  %s2546_s10 = inlined_call_operand.vmem [shape: f32[1,128], index: 10, kind: input, shape index: {}]   ;;  %s2547_s11 = inlined_call_operand.vmem [shape: f32[1,128], index: 11, kind: input, shape index: {}]   ;;  %s2548_s12 = inlined_call_operand.vmem [shape: f32[1,128], index: 12, kind: input, shape index: {}]   ;;  %s2549_s13 = inlined_call_operand.vmem [shape: f32[1,128], index: 13, kind: input, shape index: {}]   ;;  %s2550_s14 = inlined_call_operand.vmem [shape: bf16[128,10], index: 14, kind: input, shape index: {}]   ;;  %s2551_s15 = inlined_call_operand.vmem [shape: f32[1,10], index: 15, kind: input, shape index: {}]   ;;  %s2552_s16 = inlined_call_operand.hbm [shape: f32[2,1,10], index: 16, kind: output, shape index: {}]  }
   0x1   :  { %2562 = sst [smem:[#allocation14_spill]] %s2536_s0 }
   0x2   :  { %2563 = sst [smem:[#allocation15_spill]] %s2552_s16 }
   0x3   :  { %21 = vsyncpa [#allocation5], 0 }
   0x4   :  { %23 = vsyncpa [#allocation5 + $0x1], 0  ;;  %s2125_s21 = smov 0   ;;  %s2127_s22 = smov 0  }
   0x5   :  { %s2129_s23 = smov 0   ;;  %s2131_s24 = smov 0  }
   0x6 LB: > { %2564 = sst [smem:[#allocation7_spill]] %s2021_s21  ;;  %s2146_s25 = sadd.s32 4294967295, %s2033_s24   ;;  %s2033_s24 = sphi %s2131_s24, %s2580_s24   ;;  %s2029_s23 = sphi %s2129_s23, %s2582_s23   ;;  %s2025_s22 = sphi %s2127_s22, %s2584_s22   ;;  %s2021_s21 = sphi %s2125_s21, %s2583_s21  }
   0x7   : > { %2565 = sst [smem:[#allocation8_spill]] %s2029_s23  ;;  %s1622_s26 = sadd.s32 4294967294, %s2033_s24  }
   0x8   : > { %2566 = sst [smem:[#allocation9_spill]] %s2033_s24  ;;  %s2150_s27 = sadd.s32 1, %s2033_s24  }
   0x9   : > { %2567 = sst [smem:[#allocation10_spill]] %s2150_s27  ;;  %s377_s28 = sadd.s32 1, %s2029_s23 }
   0xa   : > { %s374_s29 = ssub.s32 %s2033_s24, %s2150_s27  ;;  %p387_p0 = scmp.ne.s32.totalorder %s2029_s23, %s2025_s22 }
   0xb   : > { %p375_p1 = scmp.eq.s32.totalorder %s374_s29, 0  ;;  %p388_p2 = scmp.eq.s32.totalorder %s2146_s25, 1 }
   0xc   : > { %p393_p3 = scmp.ne.s32.totalorder %s2025_s22, %s2021_s21  ;;  %p394_p4 = scmp.eq.s32.totalorder %s1622_s26, 1 }
   0xd   : > { %s2161_s30 = scalar_select %p375_p1, %s2029_s23, %s377_s28  }
   0xe   : > { %p2163_p5 = por %p388_p2, %p387_p0  ;;  %p2167_p6 = por %p394_p4, %p393_p3 }
   0xf   : > { %2568 = sst [smem:[#allocation11_spill]] %s2161_s30  ;;  %p1625_p7 = scmp.ge.s32.totalorder %s2033_s24, 1 }
  0x10   : > { %s2569_s0 = scalar_select %p2163_p5, 1, 0 }
  0x11   : > { %s2571_s17 = scalar_select %p2167_p6, 1, 0 }
  0x12   : > { %2570 = sst [smem:[#allocation12_spill]] %s2569_s0  ;;  %p464_p8 = scmp.lt.s32.totalorder %s2033_s24, 3 }
  0x13   : > { %2572 = sst [smem:[#allocation13_spill]] %s2571_s17 }
  0x14   : > { %p465_p9 = pnand %p1625_p7, %p464_p8 }
  0x15   : > { %p512_p10 = scmp.lt.s32.totalorder (!%p465_p9), %s2146_s25, 1  ;;  %s2573_s20 = sld [smem:[#allocation14_spill]] (!%p465_p9) }
  0x16   : > { %468 = sbr.rel (%p465_p9) target bundleno = 1541 (0x605), region = 84  ;;  %s2575_s23 = sld [smem:[#allocation15_spill]] (!%p465_p9) }
  0x17   : > { %s2039_s0 = smov (!%p465_p9), [#allocation4]  }
  0x18   : > { %s1977_s30 = sshll.u32 (!%p465_p9), %s2039_s0, 4  ;;  %s1978_s30 = int_to_ptr.vmem [resolvable:$false] %s1977_s30 }
  0x19   : > { %s1979_s18 = scalar_lea.vmem (!%p465_p9), %s1978_s30, 32 }
  0x1b   : > { %v1857_v0 = vld [vmem:[%s2537_s1 + $0x78] sm:$0xff]   ;;  %v1859_v2 = vld [vmem:[%s2537_s1 + $0x70] sm:$0xff]   ;;  %v1861_v4 = vld [vmem:[%s2537_s1 + $0x68] sm:$0xff]   ;;  %s513_s27 = scalar_select %p512_p10, %s2146_s25, 1  ;;  %v563_v9 = vlaneseq  ;;  %v2035_v14 = vmov 1966171168  }
  0x1c   : > { %v1858_v1 = vld [vmem:[%s2537_s1 + $0x38] sm:$0xff]   ;;  %1719 = vmatprep.subr.bf16.mxu0 %v1857_v0  ;;  %v1860_v3 = vld [vmem:[%s2537_s1 + $0x30] sm:$0xff]   ;;  %v1862_v5 = vld [vmem:[%s2537_s1 + $0x28] sm:$0xff]   ;;  %v561_v15 = vunpack.c.l.s4 %v2035_v14  ;;  %vm734_vm0 = vcmask 1040384   ;;  %vm2038_vm1 = vmmov 0   ;;  %vm1552_vm2 = vcmask 73728   ;;  %s2576_s16 = smov %s2575_s23 }
  0x1d   : > { %1720 = vmatpush3.bf16.msra.mxu0 %v1858_v1  ;;  %v1863_v6 = vld [vmem:[%s2537_s1 + $0x60] sm:$0xff]   ;;  %s1626_s17 = sshll.u32 %s513_s27, 1  ;;  %v1865_v8 = vld [vmem:[%s2537_s1 + $0x58] sm:$0xff]   ;;  %v1867_v11 = vld [vmem:[%s2537_s1 + $0x50] sm:$0xff]   ;;  %v2214_v16 = vshrl.u32 %v563_v9, 7 }
  0x1e   : > { %1721 = vmatprep.subr.bf16.mxu0 %v1859_v2  ;;  %v1864_v7 = vld [vmem:[%s2537_s1 + $0x20] sm:$0xff]   ;;  %s515_s26 = scalar_lea.vmem %s2573_s20, %s1626_s17  ;;  %v1866_v10 = vld [vmem:[%s2537_s1 + $0x18] sm:$0xff]   ;;  %v1868_v13 = vld [vmem:[%s2537_s1 + $0x10] sm:$0xff]   ;;  %v562_v19 = vunpack.c.0.s8 %v561_v15  ;;  %s510_s17 = sand.u32 1, %s2025_s22  }
  0x1f   : > { %v1627_v12 = vld.sshfl [vmem:[%s515_s26] sm:$0x11 pattern:$0x75316420]  ;;  %v1869_v17 = vld [vmem:[%s2537_s1 + $0x48] sm:$0xff]   ;;  %s1716_s20 = sshll.u32 %s2146_s25, 4 }
  0x20   : > { %v559_v18 = vcombine.high %v1627_v12, %v1627_v12  ;;  %v1870_v20 = vld [vmem:[%s2537_s1 + $0x8] sm:$0xff]   ;;  %v565_v21 = vsub.s32 %v562_v19, %v2214_v16  ;;  %v1871_v22 = vld [vmem:[%s2537_s1 + $0x40] sm:$0xff]   ;;  %s511_s26 = scalar_lea.vmem [#allocation4], %s510_s17  ;;  %s2495_s21 = scalar_lea.hbm %s2575_s23, %s1716_s20 }
  0x21   : > { %1722 = vmatpush3.bf16.msra.mxu0 %v1860_v3  ;;  %v1872_v24 = vld [vmem:[%s2537_s1] sm:$0xff]   ;;  %v1875_v41 = vld [vmem:[%s2543_s7 + $0xe8] ss:$16 sps:$4 sm:$0xff]   ;;  %v1877_v42 = vld [vmem:[%s2543_s7 + $0xec] ss:$16 sps:$4 sm:$0xff]   ;;  %s1567_s27 = sshll.u32 %s511_s26, 4  ;;  %s2497_s27 = int_to_ptr.vmem [resolvable:$true] %s1567_s27 }
  0x22   : > { %1723 = vmatprep.subr.bf16.mxu0 %v1861_v4  ;;  %v573_v23 = vrot.slane %v559_v18, %v565_v21  ;;  %v566_v25 = vrot.slane %v1627_v12, %v565_v21  ;;  %v550_v27 = vld [vmem:[%s2538_s2] sm:$0x1]  ;;  %v1873_v40 = vld [vmem:[%s2543_s7 + $0xe4] ss:$16 sps:$4 sm:$0xff]   ;;  %v1883_v45 = vld [vmem:[%s2543_s7 + $0xcc] ss:$16 sps:$4 sm:$0xff]   ;;  %p1980_p0 = scmp.lt.s32.totalorder %s2497_s27, %s1978_s30 }
  0x23   : > { %v724_v33 = vld [vmem:[%s2539_s3] sm:$0x1]  ;;  %v1879_v44 = vld [vmem:[%s2543_s7 + $0xc4] ss:$16 sps:$4 sm:$0xff]   ;;  %966 = vmatprep.subr.bf16.mxu1 %v1873_v40  ;;  %v1881_v46 = vld [vmem:[%s2543_s7 + $0xc8] ss:$16 sps:$4 sm:$0xff]  }
  0x24   : > { %704 = vmatprep.mubr.bf16.mxu0 %v573_v23  ;;  %v730_v36 = vld [vmem:[%s2540_s4] sm:$0x1]  ;;  %v1885_v53 = vld [vmem:[%s2543_s7 + $0xa4] ss:$16 sps:$4 sm:$0xff]   ;;  %v1889_v54 = vld [vmem:[%s2543_s7 + $0xac] ss:$16 sps:$4 sm:$0xff]  }
  0x25   : > { %1724 = vmatpush3.bf16.msra.mxu0 %v1862_v5  ;;  %v1878_v43 = vld [vmem:[%s2543_s7 + $0xe0] ss:$16 sps:$4 sm:$0xff]   ;;  %v1887_v55 = vld [vmem:[%s2543_s7 + $0xa8] ss:$16 sps:$4 sm:$0xff]   ;;  %v1891_v57 = vld [vmem:[%s2543_s7 + $0x84] ss:$16 sps:$4 sm:$0xff]  }
  0x26   : > { %1725 = vmatprep.subr.bf16.mxu0 %v1863_v6  ;;  %967 = vmatpush1.bf16.msra.mxu1 %v1878_v43  ;;  %v1884_v47 = vld [vmem:[%s2543_s7 + $0xc0] ss:$16 sps:$4 sm:$0xff]   ;;  %v1893_v58 = vld [vmem:[%s2543_s7 + $0x88] ss:$16 sps:$4 sm:$0xff]   ;;  %v1895_v59 = vld [vmem:[%s2543_s7 + $0x8c] ss:$16 sps:$4 sm:$0xff]  }
  0x27   : > { %968 = vmatprep.subr.bf16.mxu1 %v1879_v44  ;;  %v1890_v56 = vld [vmem:[%s2543_s7 + $0xa0] ss:$16 sps:$4 sm:$0xff]   ;;  %v1897_v61 = vld [vmem:[%s2543_s7 + $0x64] ss:$16 sps:$4 sm:$0xff]   ;;  %v1901_v62 = vld [vmem:[%s2543_s7 + $0x6c] ss:$16 sps:$4 sm:$0xff]  }
  0x28   : > { %v1896_v60 = vld [vmem:[%s2543_s7 + $0x80] ss:$16 sps:$4 sm:$0xff]   ;;  %v1899_v63 = vld [vmem:[%s2543_s7 + $0x68] ss:$16 sps:$4 sm:$0xff]   ;;  %v1903_v1 = vld [vmem:[%s2543_s7 + $0x44] ss:$16 sps:$4 sm:$0xff]  }
  0x29   : > { %1726 = vmatpush3.bf16.msra.mxu0 %v1864_v7  ;;  %v1902_v0 = vld [vmem:[%s2543_s7 + $0x60] ss:$16 sps:$4 sm:$0xff]   ;;  %v1907_v2 = vld [vmem:[%s2543_s7 + $0x4c] ss:$16 sps:$4 sm:$0xff]   ;;  %v1905_v3 = vld [vmem:[%s2543_s7 + $0x48] ss:$16 sps:$4 sm:$0xff]  }
  0x2a   : > { %1727 = vmatprep.subr.bf16.mxu0 %v1865_v8  ;;  %969 = vmatpush1.bf16.msra.mxu1 %v1884_v47  ;;  %v1908_v4 = vld [vmem:[%s2543_s7 + $0x40] ss:$16 sps:$4 sm:$0xff]   ;;  %v1909_v5 = vld [vmem:[%s2543_s7 + $0x24] ss:$16 sps:$4 sm:$0xff]   ;;  %v1913_v6 = vld [vmem:[%s2543_s7 + $0x2c] ss:$16 sps:$4 sm:$0xff]  }
  0x2b   : > { %970 = vmatprep.subr.bf16.mxu1 %v1885_v53  ;;  %v2036_v7 = vmov 0   ;;  %v1911_v8 = vld [vmem:[%s2543_s7 + $0x28] ss:$16 sps:$4 sm:$0xff]   ;;  %v1914_v9 = vld [vmem:[%s2543_s7 + $0x20] ss:$16 sps:$4 sm:$0xff]   ;;  %s1555_s24 = scalar_lea.sflag [#allocation5], %s510_s17 }
  0x2c   : > { %998 = vmatprep.mubr.bf16.mxu1 %v2036_v7  ;;  %v1917_v12 = vld [vmem:[%s2543_s7 + $0x8] ss:$16 sps:$4 sm:$0xff]   ;;  %v732_v19 = vld [vmem:[%s2541_s5] sm:$0x1]  ;;  %v1942_v47 = vld [vmem:[%s2545_s9 + $0xd0] sm:$0xff]   ;;  %s1973_s25 = scalar_lea.vmem %s2497_s27, 16 }
  0x2d   : > { %1728 = vmatpush3.bf16.msra.mxu0 %v1866_v10  ;;  %v1915_v10 = vld [vmem:[%s2543_s7 + $0x4] ss:$16 sps:$4 sm:$0xff]   ;;  %v733_v21 = vld [vmem:[%s2542_s6] sm:$0x1]  ;;  %v1938_v43 = vld [vmem:[%s2545_s9 + $0xd8] sm:$0xff]   ;;  %p1974_p11 = scmp.ne.s32.totalorder %s2497_s27, %s1973_s25  ;;  %p1981_p1 = scmp.lt.s32.totalorder %s1979_s18, %s1973_s25 }
  0x2e   : > { %1729 = vmatprep.subr.bf16.mxu0 %v1867_v11  ;;  %971 = vmatpush1.bf16.msra.mxu1 %v1890_v56  ;;  %v1919_v11 = vld [vmem:[%s2543_s7 + $0xc] ss:$16 sps:$4 sm:$0xff]   ;;  %v1935_v40 = vld [vmem:[%s2545_s9 + $0x20] sm:$0xff]  }
  0x2f   : > { %972 = vmatprep.subr.bf16.mxu1 %v1891_v57  ;;  %v1939_v44 = vld [vmem:[%s2545_s9 + $0x18] sm:$0xff]   ;;  %v1948_v53 = vld [vmem:[%s2545_s9 + $0x88] sm:$0xff]   ;;  %v1951_v56 = vld [vmem:[%s2545_s9] sm:$0xff]   ;;  %p1975_p12 = pnand %p1974_p11, %p2163_p5  ;;  %p1982_p2 = por %p1981_p1, %p1980_p0 }
  0x30   : > { %v1952_v57 = vld [vmem:[%s2545_s9 + $0x80] sm:$0xff]  }
  0x31   : > { %1730 = vmatpush3.bf16.msra.mxu0 %v1868_v13  ;;  %v1920_v13 = vld [vmem:[%s2543_s7] ss:$16 sps:$4 sm:$0xff]   ;;  %p1976_p13 = pneg %p1975_p12 }
  0x32   : > { %1731 = vmatprep.subr.bf16.mxu0 %v1869_v17  ;;  %973 = vmatpush1.bf16.msra.mxu1 %v1896_v60  ;;  %v784_v60 = vld [vmem:[%s2544_s8] sm:$0xf] }
  0x33   : > { %974 = vmatprep.subr.bf16.mxu1 %v1897_v61  ;;  %v952_v61 = vsub.s32 1, %v2214_v16  ;;  %p1983_p3 = pnand %p1982_p2, %p1976_p13 }
  0x35   : > { %1732 = vmatpush3.bf16.msra.mxu0 %v1870_v20 }
  0x36   : > { %1733 = vmatprep.subr.bf16.mxu0 %v1871_v22  ;;  %975 = vmatpush1.bf16.msra.mxu1 %v1902_v0 }
  0x37   : > { %976 = vmatprep.subr.bf16.mxu1 %v1903_v1  ;;  %v953_v1 = vrot.slane %v784_v60, %v952_v61 }
  0x39   : > { %1734 = vmatpush3.bf16.msra.mxu0 %v1872_v24 }
  0x3a   : > { %1007 = vmatprep.subr.bf16.mxu0 %v1877_v42  ;;  %977 = vmatpush1.bf16.msra.mxu1 %v1908_v4  ;;  %v1937_v42 = vld [vmem:[%s2545_s9 + $0x58] sm:$0xff]  }
  0x3b   : > { %978 = vmatprep.subr.bf16.mxu1 %v1909_v5 }
  0x3c   : > { %705 = vmatmul.mubr.bf16.vlgmr.msra.gmra.mxu0 %v566_v25  ;;  %v1921_v25 = vld [vmem:[%s2545_s9 + $0x78] sm:$0xff]  }
  0x3d   : > { %1008 = vmatpush1.bf16.msra.mxu0 %v1875_v41  ;;  %1039 = vmatprep.mubr.bf16.mxu0 %v2036_v7  ;;  %v1936_v41 = vld [vmem:[%s2545_s9 + $0xa0] sm:$0xff]  }
  0x3e   : > { %1009 = vmatprep.subr.bf16.mxu0 %v1883_v45  ;;  %979 = vmatpush1.bf16.msra.mxu1 %v1914_v9  ;;  %v1940_v45 = vld [vmem:[%s2545_s9 + $0x98] sm:$0xff]  }
  0x3f   : > { %980 = vmatprep.subr.bf16.mxu1 %v1915_v10 }
  0x41   : > { %1010 = vmatpush1.bf16.msra.mxu0 %v1881_v46  ;;  %v1941_v46 = vld [vmem:[%s2545_s9 + $0x50] sm:$0xff]  }
  0x42   : > { %1011 = vmatprep.subr.bf16.mxu0 %v1889_v54  ;;  %981 = vmatpush1.bf16.msra.mxu1 %v1920_v13  ;;  %v1949_v54 = vld [vmem:[%s2545_s9 + $0x40] sm:$0xff]  }
  0x43   : > { %1741 = vmatprep.subr.bf16.mxu1 %v1921_v25 }
  0x45   : > { %1012 = vmatpush1.bf16.msra.mxu0 %v1887_v55  ;;  %v1950_v55 = vld [vmem:[%s2545_s9 + $0xc0] sm:$0xff]  }
  0x46   : > { %1013 = vmatprep.subr.bf16.mxu0 %v1895_v59  ;;  %v956_v59 = vsub.s32 2, %v2214_v16 }
  0x48   : > { %v957_v0 = vrot.slane %v784_v60, %v956_v59 }
  0x49   : > { %1014 = vmatpush1.bf16.msra.mxu0 %v1893_v58  ;;  %v948_v58 = vsub.s32 0, %v2214_v16 }
  0x4a   : > { %1015 = vmatprep.subr.bf16.mxu0 %v1901_v62  ;;  %v960_v62 = vsub.s32 3, %v2214_v16 }
  0x4d   : > { %1016 = vmatpush1.bf16.msra.mxu0 %v1899_v63  ;;  %v949_v63 = vrot.slane %v784_v60, %v948_v58  ;;  %v1152_v58 = vld [vmem:[%s2546_s10] sm:$0x1] }
  0x4e   : > { %1017 = vmatprep.subr.bf16.mxu0 %v1907_v2  ;;  %v961_v2 = vrot.slane %v784_v60, %v960_v62 }
  0x51   : > { %1018 = vmatpush1.bf16.msra.mxu0 %v1905_v3 }
  0x52   : > { %1019 = vmatprep.subr.bf16.mxu0 %v1913_v6 }
  0x55   : > { %1020 = vmatpush1.bf16.msra.mxu0 %v1911_v8 }
  0x56   : > { %1021 = vmatprep.subr.bf16.mxu0 %v1919_v11 }
  0x59   : > { %1022 = vmatpush1.bf16.msra.mxu0 %v1917_v12 }
  0xfc   : > { %v1735_v26 = vpop.f32.mrf.mxu0 }
  0xfe   : > { %v1736_v28 = vpop.f32.mrf.mxu0 }
  0xff   : > { %v1737_v29 = vadd.f32 %v1736_v28, %v1735_v26  ;;  %v1922_v26 = vld [vmem:[%s2545_s9 + $0xf8] sm:$0xff]  }
 0x100   : > { %v1738_v30 = vpop.f32.mrf.mxu0  ;;  %v1924_v28 = vld [vmem:[%s2545_s9 + $0xb8] sm:$0xff]   ;;  %1763 = vmatprep.subr.bf16.mxu0 %v1922_v26 }
 0x101   : > { %v2232_v31 = vadd.f32 %v1737_v29, %v550_v27  ;;  %v1923_v27 = vld [vmem:[%s2545_s9 + $0x38] sm:$0xff]   ;;  %v1925_v29 = vld [vmem:[%s2545_s9 + $0x70] sm:$0xff]  }
 0x102   : > { %v1739_v32 = vpop.f32.mrf.mxu0  ;;  %v1926_v30 = vld [vmem:[%s2545_s9 + $0xf0] sm:$0xff]  }
 0x103   : > { %722 = vst [vmem:[#allocation2 + $0x1b] sm:$0x1] %v2232_v31  ;;  %v1927_v32 = vld [vmem:[%s2545_s9 + $0x30] sm:$0xff]  }
 0x10a   : > { %v723_v34 = vld [vmem:[#allocation2 + $0x1b] sm:$0x1] }
 0x10b   : > { %v725_v35 = vmul.f32 %v724_v33, %v723_v34  ;;  %v1928_v33 = vld [vmem:[%s2545_s9 + $0xb0] sm:$0xff]   ;;  %v1929_v34 = vld [vmem:[%s2545_s9 + $0x68] sm:$0xff]  }
 0x10d   : > { %728 = vst [vmem:[#allocation3] sm:$0x1] %v725_v35  ;;  %v1930_v35 = vld [vmem:[%s2545_s9 + $0xe8] sm:$0xff]  }
 0x114   : > { %v729_v37 = vld [vmem:[#allocation3] sm:$0x1] }
 0x115   : > { %v731_v38 = vadd.f32 %v730_v36, %v729_v37  ;;  %v1931_v36 = vld [vmem:[%s2545_s9 + $0x28] sm:$0xff]  }
 0x116   : > { %v1932_v37 = vld [vmem:[%s2545_s9 + $0xa8] sm:$0xff]  }
 0x117   : > { %v735_v39 = vsel %vm734_vm0, %v731_v38, 0.0 }
 0x118   : > { %736 = vadd.xlane.f32.xlu0 %v735_v39  ;;  %v1934_v39 = vld [vmem:[%s2545_s9 + $0xe0] sm:$0xff]  }
 0x1a1   : > { %v737_v48 = vpop.xlane.xlu0 %736 }
 0x1a2   : > { %v739_v49 = vmul.f32 0.0078125, %v737_v48  ;;  %v1943_v48 = vld [vmem:[%s2545_s9 + $0x10] sm:$0xff]  }
 0x1a4   : > { %v740_v50 = vsub.f32 %v731_v38, %v739_v49  ;;  %v1933_v38 = vld [vmem:[%s2545_s9 + $0x60] sm:$0xff]   ;;  %v1944_v49 = vld [vmem:[%s2545_s9 + $0x90] sm:$0xff]  }
 0x1a6   : > { %v741_v51 = vmul.f32 %v740_v50, %v740_v50 }
 0x1a8   : > { %v742_v52 = vsel %vm734_vm0, %v741_v51, 0.0  ;;  %v1946_v51 = vld [vmem:[%s2545_s9 + $0xc8] sm:$0xff]  }
 0x1a9   : > { %743 = vadd.xlane.f32.xlu0 %v742_v52  ;;  %v1947_v52 = vld [vmem:[%s2545_s9 + $0x8] sm:$0xff]  }
 0x232   : > { %v744_v14 = vpop.xlane.xlu0 %743 }
 0x233   : > { %v745_v15 = vmul.f32 0.0078125, %v744_v14 }
 0x235   : > { %v746_v17 = vadd.f32 1e-06, %v745_v15 }
 0x237   : > { %1961 = vrsqrt.f32 %v746_v17 }
 0x244   : > { %v1962_v18 = vpop.eup %1961 }
 0x245   : > { %v748_v20 = vmul.f32 %v1962_v18, %v740_v50  ;;  %v1945_v50 = vld [vmem:[%s2545_s9 + $0x48] sm:$0xff]  }
 0x247   : > { %v749_v22 = vmul.f32 %v748_v20, %v732_v19 }
 0x249   : > { %v750_v23 = vadd.f32 %v749_v22, %v733_v21 }
 0x24b   : > { %v751_v24 = vpack.c.bf16 %v750_v23, %v750_v23 }
 0x24d   : > { %999 = vmatmul.mubr.bf16.vlgmr.msra.gmra.mxu1 %v751_v24  ;;  %1040 = vmatmul.mubr.bf16.vlgmr.msra.gmra.mxu0 %v751_v24 }
 0x24e   : > { %1742 = vmatpush3.bf16.msra.mxu1 %v1923_v27  ;;  %1764 = vmatpush3.bf16.msra.mxu0 %v1924_v28 }
 0x24f   : > { %1743 = vmatprep.subr.bf16.mxu1 %v1925_v29  ;;  %1765 = vmatprep.subr.bf16.mxu0 %v1926_v30 }
 0x252   : > { %1744 = vmatpush3.bf16.msra.mxu1 %v1927_v32  ;;  %1766 = vmatpush3.bf16.msra.mxu0 %v1928_v33 }
 0x253   : > { %1745 = vmatprep.subr.bf16.mxu1 %v1929_v34  ;;  %1767 = vmatprep.subr.bf16.mxu0 %v1930_v35 }
 0x256   : > { %1746 = vmatpush3.bf16.msra.mxu1 %v1931_v36  ;;  %1768 = vmatpush3.bf16.msra.mxu0 %v1932_v37 }
 0x257   : > { %1747 = vmatprep.subr.bf16.mxu1 %v1933_v38  ;;  %1769 = vmatprep.subr.bf16.mxu0 %v1934_v39 }
 0x25a   : > { %1748 = vmatpush3.bf16.msra.mxu1 %v1935_v40  ;;  %1770 = vmatpush3.bf16.msra.mxu0 %v1936_v41 }
 0x25b   : > { %1749 = vmatprep.subr.bf16.mxu1 %v1937_v42  ;;  %1771 = vmatprep.subr.bf16.mxu0 %v1938_v43 }
 0x25e   : > { %1750 = vmatpush3.bf16.msra.mxu1 %v1939_v44  ;;  %1772 = vmatpush3.bf16.msra.mxu0 %v1940_v45 }
 0x25f   : > { %1751 = vmatprep.subr.bf16.mxu1 %v1941_v46  ;;  %1773 = vmatprep.subr.bf16.mxu0 %v1942_v47 }
 0x262   : > { %1752 = vmatpush3.bf16.msra.mxu1 %v1943_v48  ;;  %1774 = vmatpush3.bf16.msra.mxu0 %v1944_v49 }
 0x263   : > { %1753 = vmatprep.subr.bf16.mxu1 %v1945_v50  ;;  %1775 = vmatprep.subr.bf16.mxu0 %v1946_v51 }
 0x266   : > { %1754 = vmatpush3.bf16.msra.mxu1 %v1947_v52  ;;  %1776 = vmatpush3.bf16.msra.mxu0 %v1948_v53 }
 0x267   : > { %1755 = vmatprep.subr.bf16.mxu1 %v1949_v54  ;;  %1777 = vmatprep.subr.bf16.mxu0 %v1950_v55 }
 0x26a   : > { %1756 = vmatpush3.bf16.msra.mxu1 %v1951_v56  ;;  %1778 = vmatpush3.bf16.msra.mxu0 %v1952_v57 }
 0x30d   : > { %v1000_v3 = vpop.f32.mrf.mxu1  ;;  %v1041_v4 = vpop.f32.mrf.mxu0 }
 0x30e   : > { %v1001_v5 = vadd.f32 %v1000_v3, %v949_v63  ;;  %v1042_v6 = vadd.f32 %v1041_v4, %v957_v0  ;;  %v1425_v3 = vld [vmem:[%s2547_s11] sm:$0x1] }
 0x30f   : > { %v1002_v7 = vpop.f32.mrf.mxu1  ;;  %v1043_v8 = vpop.f32.mrf.mxu0 }
 0x310   : > { %v1052_v9 = vmul.f32 0.044715, %v1001_v5  ;;  %v1054_v10 = vmul.f32 0.044715, %v1042_v6  ;;  %v1003_v11 = vadd.f32 %v1002_v7, %v953_v1  ;;  %v1044_v12 = vadd.f32 %v1043_v8, %v961_v2 }
 0x311   : > { %v1004_v13 = vpop.f32.mrf.mxu1  ;;  %v1045_v14 = vpop.f32.mrf.mxu0  ;;  %v1048_v40 = vmul.f32 0.5, %v1001_v5  ;;  %v1050_v45 = vmul.f32 0.5, %v1042_v6 }
 0x312   : > { %v1056_v15 = vmul.f32 %v1052_v9, %v1001_v5  ;;  %v1058_v17 = vmul.f32 %v1054_v10, %v1042_v6  ;;  %v1053_v18 = vmul.f32 0.044715, %v1003_v11  ;;  %v1055_v16 = vmul.f32 0.044715, %v1044_v12  ;;  %v1953_v9 = vld [vmem:[%s2550_s14 + $0x38] sm:$0xff]  }
 0x313   : > { %v1005_v19 = vpop.f32.mrf.mxu1  ;;  %v1046_v20 = vpop.f32.mrf.mxu0  ;;  %v1049_v43 = vmul.f32 0.5, %v1003_v11  ;;  %v1051_v46 = vmul.f32 0.5, %v1044_v12  ;;  %v2037_v10 = vmov 0.0  }
 0x314   : > { %v1060_v21 = vmul.f32 %v1056_v15, %v1001_v5  ;;  %v1062_v22 = vmul.f32 %v1058_v17, %v1042_v6  ;;  %v1057_v23 = vmul.f32 %v1053_v18, %v1003_v11  ;;  %v1059_v24 = vmul.f32 %v1055_v16, %v1044_v12  ;;  %1794 = vmatprep.subr.bf16.mxu1 %v2037_v10  ;;  %v1955_v17 = vld [vmem:[%s2550_s14 + $0x28] sm:$0xff]   ;;  %v1956_v18 = vld [vmem:[%s2550_s14 + $0x20] sm:$0xff]   ;;  %v1957_v16 = vld [vmem:[%s2550_s14 + $0x18] sm:$0xff]  }
 0x315   : > { %v1958_v19 = vld [vmem:[%s2550_s14 + $0x10] sm:$0xff]   ;;  %v1959_v20 = vld [vmem:[%s2550_s14 + $0x8] sm:$0xff]  }
 0x316   : > { %v1064_v25 = vadd.f32 %v1060_v21, %v1001_v5  ;;  %v1066_v26 = vadd.f32 %v1062_v22, %v1042_v6  ;;  %v1061_v27 = vmul.f32 %v1057_v23, %v1003_v11  ;;  %v1063_v28 = vmul.f32 %v1059_v24, %v1044_v12  ;;  %v1960_v21 = vld [vmem:[%s2550_s14] sm:$0xff]  }
 0x318   : > { %v1068_v29 = vmul.f32 0.7978846, %v1064_v25  ;;  %v1070_v30 = vmul.f32 0.7978846, %v1066_v26  ;;  %v1065_v32 = vadd.f32 %v1061_v27, %v1003_v11  ;;  %v1067_v33 = vadd.f32 %v1063_v28, %v1044_v12  ;;  %v1954_v11 = vld [vmem:[%s2550_s14 + $0x30] sm:$0xff]  }
 0x319   : > { %v1429_v26 = vld [vmem:[%s2548_s12] sm:$0x1] }
 0x31a   : > { %v1069_v34 = vmul.f32 0.7978846, %v1065_v32  ;;  %v1071_v35 = vmul.f32 0.7978846, %v1067_v33  ;;  %1963 = vtanh.f32 %v1068_v29  ;;  %v1430_v28 = vld [vmem:[%s2549_s13] sm:$0x1] }
 0x31b   : > { %1965 = vtanh.f32 %v1070_v30  ;;  %v1463_v33 = vld [vmem:[%s2551_s15] sm:$0x1] }
 0x31c   : > { %1967 = vtanh.f32 %v1069_v34 }
 0x31d   : > { %1969 = vtanh.f32 %v1071_v35 }
 0x327   : > { %v1964_v36 = vpop.eup %1963 }
 0x328   : > { %v1966_v37 = vpop.eup %1965  ;;  %v1076_v38 = vadd.f32 1.0, %v1964_v36 }
 0x329   : > { %v1968_v39 = vpop.eup %1967  ;;  %v1078_v41 = vadd.f32 1.0, %v1966_v37 }
 0x32a   : > { %v1970_v42 = vpop.eup %1969  ;;  %v1077_v44 = vadd.f32 1.0, %v1968_v39  ;;  %v1080_v48 = vmul.f32 %v1076_v38, %v1048_v40 }
 0x32b   : > { %v1079_v47 = vadd.f32 1.0, %v1970_v42  ;;  %v1082_v50 = vmul.f32 %v1078_v41, %v1050_v45 }
 0x32c   : > { %v1081_v49 = vmul.f32 %v1077_v44, %v1049_v43  ;;  %v1084_v54 = vpack.c.bf16 %v1080_v48, %v1080_v48 }
 0x32d   : > { %v1083_v51 = vmul.f32 %v1079_v47, %v1051_v46  ;;  %v1086_v55 = vpack.c.bf16 %v1082_v50, %v1082_v50 }
 0x32e   : > { %v1085_v52 = vpack.c.bf16 %v1081_v49, %v1081_v49 }
 0x32f   : > { %v1087_v53 = vpack.c.bf16 %v1083_v51, %v1083_v51 }
 0x330   : > { %1377 = vmatprep.mubr.bf16.mxu1 %v1085_v52 }
 0x331   : > { %1417 = vmatprep.mubr.bf16.mxu0 %v1087_v53  ;;  %1378 = vmatmul.mubr.bf16.vlgmr.msra.gmra.mxu1 %v1084_v54 }
 0x332   : > { %1418 = vmatmul.mubr.bf16.vlgmr.msra.gmra.mxu0 %v1086_v55  ;;  %1795 = vmatpush3.bf16.msra.mxu1 %v1953_v9 }
 0x333   : > { %1796 = vmatprep.subr.bf16.mxu1 %v2037_v10  ;;  %1810 = vmatprep.mubr.msk.bf16.mxu1 %vm2038_vm1, %v2037_v10 }
 0x336   : > { %1797 = vmatpush3.bf16.msra.mxu1 %v1954_v11 }
 0x337   : > { %1798 = vmatprep.subr.bf16.mxu1 %v2037_v10 }
 0x33a   : > { %1799 = vmatpush3.bf16.msra.mxu1 %v1955_v17 }
 0x33b   : > { %1800 = vmatprep.subr.bf16.mxu1 %v2037_v10 }
 0x33e   : > { %1801 = vmatpush3.bf16.msra.mxu1 %v1956_v18 }
 0x33f   : > { %1802 = vmatprep.subr.bf16.mxu1 %v2037_v10 }
 0x342   : > { %1803 = vmatpush3.bf16.msra.mxu1 %v1957_v16 }
 0x343   : > { %1804 = vmatprep.subr.bf16.mxu1 %v2037_v10 }
 0x346   : > { %1805 = vmatpush3.bf16.msra.mxu1 %v1958_v19 }
 0x347   : > { %1806 = vmatprep.subr.bf16.mxu1 %v2037_v10 }
 0x34a   : > { %1807 = vmatpush3.bf16.msra.mxu1 %v1959_v20 }
 0x34b   : > { %1808 = vmatprep.subr.bf16.mxu1 %v2037_v10 }
 0x34e   : > { %1809 = vmatpush3.bf16.msra.mxu1 %v1960_v21 }
 0x3f1   : > { %v1757_v56 = vpop.f32.mrf.mxu1 }
 0x3f2   : > { %v1779_v57 = vpop.f32.mrf.mxu0 }
 0x3f3   : > { %v1758_v59 = vpop.f32.mrf.mxu1 }
 0x3f4   : > { %v1759_v60 = vadd.f32 %v1758_v59, %v1757_v56  ;;  %v1780_v61 = vpop.f32.mrf.mxu0 }
 0x3f5   : > { %v1760_v62 = vpop.f32.mrf.mxu1  ;;  %v1781_v0 = vadd.f32 %v1780_v61, %v1779_v57 }
 0x3f6   : > { %v1380_v63 = vadd.f32 %v1759_v60, %v1152_v58  ;;  %v1782_v1 = vpop.f32.mrf.mxu0 }
 0x3f7   : > { %v1761_v2 = vpop.f32.mrf.mxu1 }
 0x3f8   : > { %v1420_v4 = vadd.f32 %v1781_v0, %v1380_v63  ;;  %v1783_v5 = vpop.f32.mrf.mxu0 }
 0x3fa   : > { %v1426_v6 = vmul.f32 %v1425_v3, %v1420_v4 }
 0x3fc   : > { %v1427_v7 = vadd.f32 %v1426_v6, %v2232_v31 }
 0x3fe   : > { %v1431_v8 = vsel %vm734_vm0, %v1427_v7, 0.0 }
 0x3ff   : > { %1432 = vadd.xlane.f32.xlu1 %v1431_v8 }
 0x488   : > { %v1433_v12 = vpop.xlane.xlu1 %1432 }
 0x489   : > { %v1434_v13 = vmul.f32 0.0078125, %v1433_v12 }
 0x48b   : > { %v1435_v31 = vsub.f32 %v1427_v7, %v1434_v13 }
 0x48d   : > { %v1436_v14 = vmul.f32 %v1435_v31, %v1435_v31 }
 0x48f   : > { %v1437_v15 = vsel %vm734_vm0, %v1436_v14, 0.0 }
 0x490   : > { %1438 = vadd.xlane.f32.xlu1 %v1437_v15 }
 0x519   : > { %v1439_v22 = vpop.xlane.xlu1 %1438 }
 0x51a   : > { %v1440_v23 = vmul.f32 0.0078125, %v1439_v22 }
 0x51c   : > { %v1441_v24 = vadd.f32 1e-06, %v1440_v23 }
 0x51e   : > { %1971 = vrsqrt.f32 %v1441_v24 }
 0x52b   : > { %v1972_v25 = vpop.eup %1971 }
 0x52c   : > { %v1443_v27 = vmul.f32 %v1972_v25, %v1435_v31 }
 0x52e   : > { %v1444_v29 = vmul.f32 %v1443_v27, %v1429_v26 }
 0x530   : > { %v1445_v30 = vadd.f32 %v1444_v29, %v1430_v28 }
 0x532   : > { %v1446_v32 = vpack.c.bf16 %v1445_v30, %v1445_v30 }
 0x534   : > { %1811 = vmatmul.mubr.bf16.vlgmr.msra.gmra.mxu1 %v1446_v32 }
 0x5f4   : > { %v1546_v34 = vpop.f32.mrf.mxu1 }
 0x5f5   : > { %v1547_v35 = vadd.f32 %v1546_v34, %v1463_v33 }
 0x5f6   : > { %v1812_v36 = vpop.f32.mrf.mxu1 }
 0x5f7   : > { %1553 = vst.msk [vmem:[%s511_s26] sm:$0x1] %vm1552_vm2, %v1547_v35 }
 0x5f8   : > { %v1549_v37 = vpop.f32.mrf.mxu1 }
 0x5f9   : > { %1986 = shalt.err (!%p1983_p3)
}
 0x5fa   : > { %s1987_s20 = scalar_lea.hbm %s2495_s21, 16  ;;  %s1991_s28 = scalar_lea.hbm %s2576_s16, 32 }
 0x5fb   : > { %p1988_p4 = scmp.ne.s32.totalorder %s2495_s21, %s1987_s20  ;;  %p1992_p9 = scmp.lt.s32.totalorder %s2495_s21, %s2576_s16 }
 0x5fc   : > { %p1993_p10 = scmp.lt.s32.totalorder %s1991_s28, %s1987_s20 }
 0x5fd   : > { %p1989_p7 = pnand %p1988_p4, %p2163_p5 }
 0x5fe   : > { %p1994_p11 = por %p1993_p10, %p1992_p9 }
 0x5ff   : > { %p1990_p8 = pneg %p1989_p7 }
 0x601   : > { %p1995_p12 = pnand %p1994_p11, %p1990_p8 }
 0x603   : > { %1998 = shalt.err (!%p1995_p12)
}
 0x604   : > { %1814 = dma.vmem_to_hbm [thread:$0]  (%p2163_p5), %s2497_s27, 16, %s2495_s21, %s1555_s24   ;;  %v1813_v38 = vpop.f32.mrf.mxu1 }
 0x605 PF: > { %s2577_s25 = sld [smem:[#allocation9_spill]] }
 0x606   : > { %s2578_s0 = sld [smem:[#allocation7_spill]] }
 0x60b   : > { %p1820_p13 = scmp.ge.s32.totalorder %s2577_s25, 2 }
 0x60c   : > { %s1579_s18 = sand.u32 1, %s2578_s0  }
 0x60d   : > { %p1817_p0 = pnand %p1820_p13, %p2167_p6  ;;  %s1580_s17 = scalar_lea.sflag [#allocation5], %s1579_s18 }
 0x60f   : > { %p1818_p1 = pneg %p1817_p0 }
 0x611   : > { %2016 = dma.done.wait (%p1818_p1), %s1580_s17, 16  }
 0x612   : > { %2018 = vsyncadd (%p1818_p1), %s1580_s17, 4294967280  ;;  %s2580_s24 = sld [smem:[#allocation10_spill]]  ;;  %s2583_s21 = smov %s2025_s22 }
 0x613   : > { %s2581_s20 = sld [smem:[#allocation8_spill]] }
 0x614   : > { %s2582_s23 = sld [smem:[#allocation11_spill]] }
 0x618   : > { %p26_p2 = scmp.ge.s32.totalorder %s2580_s24, 4  }
 0x619   : > { %s2584_s22 = smov %s2581_s20 }
 0x61a   :  { %28 = sbr.rel (!%p26_p2) target bundleno = 6 (0x6), region = 121 }
 0x61f   :  { %1584 = vsyncpa [#allocation5], 1 }
 0x620   :  { %1586 = vsyncpa [#allocation5 + $0x1], 1 }

</bundles_post_ra>
